<compile_context>
chip_gen: v7x
topology: tpu7x:2x2x1
jax: 0.10.0
libtpu: 0.0.40
codegen_flags: <defaults>
</compile_context>

<pallas_src>
import functools

import jax
import jax.numpy as jnp
from jax import lax
from jax.experimental import pallas as pl
from jax.experimental.pallas import tpu as pltpu

EPS = 1e-5      # nn.GroupNorm default eps
LANE = 128      # TPU lane width: channel dims padded to multiples of this


def _round_up(n, m):
    return ((n + m - 1) // m) * m


def _gn_affine(h, gamma, beta, cnt, relu):
    """GroupNorm(num_groups=1) over a flat (H*W, C) block + affine (+ ReLU).

    One-pass moments (sum and sum-of-squares), reduced over the sublane
    (spatial) axis first and the lane (channel) axis last, all in f32.
    `cnt` is the *real* element count: padded channels are exactly zero (their
    weights / gamma / beta are zero-padded), so they do not perturb the sums;
    only the divisor must exclude them.
    """
    s = jnp.sum(h, axis=0, keepdims=True)                   # (1, C)
    ss = jnp.sum(h * h, axis=0, keepdims=True)              # (1, C)
    mean = jnp.sum(s, axis=1, keepdims=True) / cnt          # (1, 1)
    ex2 = jnp.sum(ss, axis=1, keepdims=True) / cnt          # (1, 1)
    var = jnp.maximum(ex2 - mean * mean, 0.0)
    inv = lax.rsqrt(var + EPS)                               # EUP slot (cheap)
    scale = inv * gamma                                      # (1, C)
    shift = beta - mean * scale                              # (1, C)
    y = h * scale + shift                                    # one FMA per elem
    if relu:
        y = jnp.maximum(y, 0.0)
    return y


def bottleneck_kernel(x_ref, w1_ref, g1_ref, b1_ref,
                      w2_ref, g2_ref, b2_ref,
                      w3_ref, g3_ref, b3_ref,
                      o_ref, *, H, W, p_real, c4_real):
    HW = H * W
    Pp = w1_ref.shape[1]

    x = x_ref[0]                                             # (HW, Cp) f32

    # ---- conv1: 1x1 == channel matmul (bf16 operands, f32 accumulation) ----
    h = jnp.dot(x.astype(jnp.bfloat16), w1_ref[...],
                preferred_element_type=jnp.float32)          # (HW, Pp)
    h = _gn_affine(h, g1_ref[...], b1_ref[...],
                   cnt=float(HW * p_real), relu=True)

    # ---- conv2: 3x3, stride 1, pad 1, as 9 tap-accumulated matmuls ---------
    # Horizontal (+-1) shifts cross sublane boundaries, so they are built only
    # once (2 copies + a column-boundary mask).  Vertical shifts are whole-row
    # (sublane-aligned) concats built per tap and consumed immediately, so at
    # most one (HW, Pp) staging buffer is live at a time.  No (HW, 9*Pp)
    # im2col is ever materialised.
    col = lax.broadcasted_iota(jnp.int32, (HW, 1), 0) % W
    zrow = jnp.zeros((1, Pp), jnp.float32)
    h_m1 = jnp.where(col == 0, 0.0,
                     jnp.concatenate([zrow, h[:HW - 1]], axis=0))   # h[y, x-1]
    h_p1 = jnp.where(col == W - 1, 0.0,
                     jnp.concatenate([h[1:], zrow], axis=0))        # h[y, x+1]
    # bf16 staging: these are exactly the matmul LHS operands for conv2.
    hx = (h_m1.astype(jnp.bfloat16),
          h.astype(jnp.bfloat16),
          h_p1.astype(jnp.bfloat16))
    zrows = jnp.zeros((W, Pp), jnp.bfloat16)

    acc = jnp.zeros((HW, Pp), jnp.float32)
    for ky in range(3):                        # dy = ky - 1
        for kx in range(3):                    # dx = kx - 1
            hb = hx[kx]
            if ky == 0:                        # tap[y, x] = hb[y-1, x]
                tap = jnp.concatenate([zrows, hb[:HW - W]], axis=0)
            elif ky == 2:                      # tap[y, x] = hb[y+1, x]
                tap = jnp.concatenate([hb[W:], zrows], axis=0)
            else:
                tap = hb
            # K = Pp per tap: optimal for v5e's 128-deep MXU and the smallest
            # staging footprint.  TODO(synk): on v6e/v7x (256-deep MXU),
            # grouping a kernel row's 3 taps into one K=3*Pp matmul is a
            # further MXU-efficiency tuning option.
            acc = acc + jnp.dot(tap, w2_ref[ky * 3 + kx],
                                preferred_element_type=jnp.float32)
    h = _gn_affine(acc, g2_ref[...], b2_ref[...],
                   cnt=float(HW * p_real), relu=True)

    # ---- conv3: 1x1 (4x expansion) ------------------------------------------
    h = jnp.dot(h.astype(jnp.bfloat16), w3_ref[...],
                preferred_element_type=jnp.float32)          # (HW, Cp)
    h = _gn_affine(h, g3_ref[...], b3_ref[...],
                   cnt=float(HW * c4_real), relu=False)

    # ---- residual add + ReLU (residual kept exact in f32) -------------------
    o_ref[0] = jnp.maximum(h + x, 0.0).astype(o_ref.dtype)


def _vmem_capacity_bytes():
    """Physical VMEM per core; conservative 64 MiB (v7x) if the query fails."""
    try:
        info = pltpu.get_tpu_info()
        for name in ("vmem_capacity_bytes", "vmem_size_bytes", "vmem_bytes"):
            v = getattr(info, name, None)
            if v:
                return int(v)
    except Exception:
        pass
    return 64 * 1024 * 1024


def _vmem_limit_bytes(HW, Cp, Pp, single_buffer):
    wbuf = 1 if single_buffer else 2
    weights = wbuf * 2 * (Cp * Pp + 9 * Pp * Pp + Pp * Cp)   # bf16 weights
    act_io = 2 * 2 * HW * Cp * 4                             # x + out, 2-buffered
    interm = 6 * HW * max(Cp, Pp) * 4                        # f32 intermediates
    est = weights + act_io + interm
    cap = _vmem_capacity_bytes()
    return int(min(max(2 * est, 32 * 1024 * 1024), (3 * cap) // 4))


def _bottleneck_forward(x_nchw, params, *, single_buffer=True):
    (w1, g1, b1, w2, g2, b2, w3, g3, b3) = params
    Cin, P = w1.shape
    C4 = w3.shape[1]
    assert Cin == C4, ("identity residual requires inplanes == planes * 4 "
                       "(stride=1, downsample=None path only)")
    N, _, H, W = x_nchw.shape
    HW = H * W
    Cp = _round_up(Cin, LANE)        # == padded C4 as well
    Pp = _round_up(P, LANE)

    # NCHW -> flat, lane-padded NHWC (N, H*W, Cp).
    x = jnp.transpose(x_nchw, (0, 2, 3, 1)).astype(jnp.float32)
    x = jnp.pad(x, ((0, 0), (0, 0), (0, 0), (0, Cp - Cin))).reshape(N, HW, Cp)

    # Weights: zero-pad channel dims, cast to bf16 (MXU operands only).
    w1p = jnp.pad(w1, ((0, Cp - Cin), (0, Pp - P))).astype(jnp.bfloat16)
    w2p = jnp.pad(w2, ((0, 0), (0, 0), (0, Pp - P), (0, Pp - P)))
    w2p = w2p.reshape(9, Pp, Pp).astype(jnp.bfloat16)        # tap-major (ky*3+kx)
    w3p = jnp.pad(w3, ((0, Pp - P), (0, Cp - C4))).astype(jnp.bfloat16)

    def pad_vec(v, cp):
        v = jnp.reshape(v, (1, -1)).astype(jnp.float32)
        return jnp.pad(v, ((0, 0), (0, cp - v.shape[1])))

    g1p, b1p = pad_vec(g1, Pp), pad_vec(b1, Pp)
    g2p, b2p = pad_vec(g2, Pp), pad_vec(b2, Pp)
    g3p, b3p = pad_vec(g3, Cp), pad_vec(b3, Cp)

    kernel = functools.partial(bottleneck_kernel,
                               H=H, W=W, p_real=P, c4_real=C4)

    def wspec(shape):
        # Grid-invariant (never re-fetched) weights / GN params: single buffer.
        if single_buffer:
            return pl.BlockSpec(shape, lambda n: (0,) * len(shape),
                                pipeline_mode=pl.Buffered(1))
        return pl.BlockSpec(shape, lambda n: (0,) * len(shape))

    out = pl.pallas_call(
        kernel,
        out_shape=jax.ShapeDtypeStruct((N, HW, Cp), jnp.float32),
        grid_spec=pltpu.PrefetchScalarGridSpec(
            num_scalar_prefetch=0,
            grid=(N,),
            in_specs=[
                pl.BlockSpec((1, HW, Cp), lambda n: (n, 0, 0)),   # x
                wspec((Cp, Pp)),                                  # w1
                wspec((1, Pp)), wspec((1, Pp)),                   # gn1
                wspec((9, Pp, Pp)),                               # w2 (9 taps)
                wspec((1, Pp)), wspec((1, Pp)),                   # gn2
                wspec((Pp, Cp)),                                  # w3
                wspec((1, Cp)), wspec((1, Cp)),                   # gn3
            ],
            out_specs=pl.BlockSpec((1, HW, Cp), lambda n: (n, 0, 0)),
        ),
        compiler_params=pltpu.CompilerParams(
            dimension_semantics=("parallel",),      # megacore-shard over batch
            vmem_limit_bytes=_vmem_limit_bytes(HW, Cp, Pp, single_buffer),
        ),
        input_output_aliases={0: 0},                # reuse x's HBM buffer
    )(x, w1p, g1p, b1p, w2p, g2p, b2p, w3p, g3p, b3p)

    out = out[..., :C4].reshape(N, H, W, C4)        # drop channel padding
    return jnp.transpose(out, (0, 3, 1, 2))         # NHWC -> NCHW


_forward_single_buf = jax.jit(
    functools.partial(_bottleneck_forward, single_buffer=True))
_forward_double_buf = jax.jit(
    functools.partial(_bottleneck_forward, single_buffer=False))


def bottleneck_forward(x_nchw, params):
    try:
        return _forward_single_buf(x_nchw, params)
    except Exception:
        # pl.Buffered(1) (single-buffered resident weights) unsupported on this
        # JAX build -> fall back to default double-buffered weight specs.
        return _forward_double_buf(x_nchw, params)


def bottleneck_reference(x_nchw, params):
    """Pure-JAX reference.  Matmul operands are cast to bf16 (accumulating in
    f32) to mirror the kernel's MXU numerics; GroupNorm stays in f32."""
    (w1, g1, b1, w2, g2, b2, w3, g3, b3) = params
    x = jnp.transpose(x_nchw, (0, 2, 3, 1)).astype(jnp.float32)
    bf = jnp.bfloat16

    def gn(h, g, b):
        mean = h.mean(axis=(1, 2, 3), keepdims=True)
        var = ((h - mean) ** 2).mean(axis=(1, 2, 3), keepdims=True)
        return ((h - mean) * lax.rsqrt(var + EPS) * g.reshape(1, 1, 1, -1)
                + b.reshape(1, 1, 1, -1))

    h = jnp.einsum('nhwc,cp->nhwp', x.astype(bf), w1.astype(bf),
                   preferred_element_type=jnp.float32)
    h = jax.nn.relu(gn(h, g1, b1))
    h = lax.conv_general_dilated(h.astype(bf), w2.astype(bf),
                                 window_strides=(1, 1), padding='SAME',
                                 dimension_numbers=('NHWC', 'HWIO', 'NHWC'),
                                 preferred_element_type=jnp.float32)
    h = jax.nn.relu(gn(h, g2, b2))
    h = jnp.einsum('nhwc,cp->nhwp', h.astype(bf), w3.astype(bf),
                   preferred_element_type=jnp.float32)
    h = gn(h, g3, b3)
    return jnp.transpose(jax.nn.relu(h + x), (0, 3, 1, 2))


def make_params(key, inplanes, planes):
    c4 = planes * 4
    ks = jax.random.split(key, 9)
    w1 = 0.1 * jax.random.normal(ks[0], (inplanes, planes), jnp.float32)
    w2 = 0.1 * jax.random.normal(ks[1], (3, 3, planes, planes), jnp.float32)
    w3 = 0.1 * jax.random.normal(ks[2], (planes, c4), jnp.float32)
    g1 = 1.0 + 0.1 * jax.random.normal(ks[3], (planes,), jnp.float32)
    b1 = 0.1 * jax.random.normal(ks[4], (planes,), jnp.float32)
    g2 = 1.0 + 0.1 * jax.random.normal(ks[5], (planes,), jnp.float32)
    b2 = 0.1 * jax.random.normal(ks[6], (planes,), jnp.float32)
    g3 = 1.0 + 0.1 * jax.random.normal(ks[7], (c4,), jnp.float32)
    b3 = 0.1 * jax.random.normal(ks[8], (c4,), jnp.float32)
    return (w1, g1, b1, w2, g2, b2, w3, g3, b3)


if __name__ == "__main__":
    # Small shapes consistent with the module: inplanes = planes * expansion
    # so the identity residual path is valid (stride=1, downsample=None).
    N, planes, H, W = 2, 8, 16, 16
    inplanes = planes * 4                                    # 32

    key = jax.random.PRNGKey(0)
    kx, kp = jax.random.split(key)
    x = jax.random.normal(kx, (N, inplanes, H, W), jnp.float32)   # NCHW
    params = make_params(kp, inplanes, planes)

    out = jax.block_until_ready(bottleneck_forward(x, params))
    ref = jax.block_until_ready(bottleneck_reference(x, params))

    assert out.shape == (N, inplanes, H, W)
    err = float(jnp.max(jnp.abs(out - ref)))
    assert jnp.allclose(out, ref, rtol=1e-2, atol=1e-2), f"max abs err = {err}"

    print("KERNEL_OK")
</pallas_src>

<mosaic_0001>
module attributes {stable_mosaic.version = 11 : i64} {
  func.func @bottleneck_kernel(%arg0: i32, %arg1: memref<1x256x128xf32, #tpu.memory_space<vmem>>, %arg2: memref<128x128xbf16, #tpu.memory_space<vmem>>, %arg3: memref<1x128xf32, #tpu.memory_space<vmem>>, %arg4: memref<1x128xf32, #tpu.memory_space<vmem>>, %arg5: memref<9x128x128xbf16, #tpu.memory_space<vmem>>, %arg6: memref<1x128xf32, #tpu.memory_space<vmem>>, %arg7: memref<1x128xf32, #tpu.memory_space<vmem>>, %arg8: memref<128x128xbf16, #tpu.memory_space<vmem>>, %arg9: memref<1x128xf32, #tpu.memory_space<vmem>>, %arg10: memref<1x128xf32, #tpu.memory_space<vmem>>, %arg11: memref<1x256x128xf32, #tpu.memory_space<vmem>>) attributes {dimension_semantics = [#tpu.dimension_semantics<parallel>], iteration_bounds = array<i64: 2>, scalar_prefetch = 0 : i64, scratch_operands = 0 : i64, tpu.core_type = #tpu.core_type<tc>, window_params = [{transform_indices = @transform_0, window_bounds = array<i64: 1, 256, 128>}, {pipeline_mode = #tpu.pipeline_mode<synchronous>, transform_indices = @transform_1, window_bounds = array<i64: 128, 128>}, {pipeline_mode = #tpu.pipeline_mode<synchronous>, transform_indices = @transform_2, window_bounds = array<i64: 1, 128>}, {pipeline_mode = #tpu.pipeline_mode<synchronous>, transform_indices = @transform_3, window_bounds = array<i64: 1, 128>}, {pipeline_mode = #tpu.pipeline_mode<synchronous>, transform_indices = @transform_4, window_bounds = array<i64: 9, 128, 128>}, {pipeline_mode = #tpu.pipeline_mode<synchronous>, transform_indices = @transform_5, window_bounds = array<i64: 1, 128>}, {pipeline_mode = #tpu.pipeline_mode<synchronous>, transform_indices = @transform_6, window_bounds = array<i64: 1, 128>}, {pipeline_mode = #tpu.pipeline_mode<synchronous>, transform_indices = @transform_7, window_bounds = array<i64: 128, 128>}, {pipeline_mode = #tpu.pipeline_mode<synchronous>, transform_indices = @transform_8, window_bounds = array<i64: 1, 128>}, {pipeline_mode = #tpu.pipeline_mode<synchronous>, transform_indices = @transform_9, window_bounds = array<i64: 1, 128>}, {transform_indices = @transform_10, window_bounds = array<i64: 1, 256, 128>}]} {
    %c0 = arith.constant 0 : index
    %c0_0 = arith.constant 0 : index
    %c0_1 = arith.constant 0 : index
    %0 = vector.load %arg1[%c0, %c0_0, %c0_1] : memref<1x256x128xf32, #tpu.memory_space<vmem>>, vector<1x256x128xf32>
    %1 = vector.shape_cast %0 : vector<1x256x128xf32> to vector<256x128xf32>
    %2 = arith.truncf %1 : vector<256x128xf32> to vector<256x128xbf16>
    %c0_2 = arith.constant 0 : index
    %c0_3 = arith.constant 0 : index
    %3 = vector.load %arg2[%c0_2, %c0_3] : memref<128x128xbf16, #tpu.memory_space<vmem>>, vector<128x128xbf16>
    %cst = arith.constant dense<0.000000e+00> : vector<256x128xf32>
    %4 = tpu.matmul %2, %3, %cst {dimension_numbers = #tpu.dot_dimension_numbers<[1], [0], [0], [1], [0, 0, 1, 1], [], []>} : vector<256x128xbf16>, vector<128x128xbf16>, vector<256x128xf32> -> vector<256x128xf32>
    %c0_4 = arith.constant 0 : index
    %c0_5 = arith.constant 0 : index
    %5 = vector.load %arg3[%c0_4, %c0_5] : memref<1x128xf32, #tpu.memory_space<vmem>>, vector<1x128xf32>
    %c0_6 = arith.constant 0 : index
    %c0_7 = arith.constant 0 : index
    %6 = vector.load %arg4[%c0_6, %c0_7] : memref<1x128xf32, #tpu.memory_space<vmem>>, vector<1x128xf32>
    %cst_8 = arith.constant dense<0.000000e+00> : vector<128xf32>
    %7 = vector.multi_reduction <add>, %4, %cst_8 [0] : vector<256x128xf32> to vector<128xf32>
    %8 = vector.shape_cast %7 : vector<128xf32> to vector<1x128xf32>
    %9 = arith.mulf %4, %4 : vector<256x128xf32>
    %cst_9 = arith.constant dense<0.000000e+00> : vector<128xf32>
    %10 = vector.multi_reduction <add>, %9, %cst_9 [0] : vector<256x128xf32> to vector<128xf32>
    %11 = vector.shape_cast %10 : vector<128xf32> to vector<1x128xf32>
    %cst_10 = arith.constant dense<0.000000e+00> : vector<1xf32>
    %12 = vector.multi_reduction <add>, %8, %cst_10 [1] : vector<1x128xf32> to vector<1xf32>
    %13 = vector.shape_cast %12 : vector<1xf32> to vector<1x1xf32>
    %cst_11 = arith.constant 2.048000e+03 : f32
    %14 = vector.broadcast %cst_11 : f32 to vector<1x1xf32>
    %15 = arith.divf %13, %14 : vector<1x1xf32>
    %cst_12 = arith.constant dense<0.000000e+00> : vector<1xf32>
    %16 = vector.multi_reduction <add>, %11, %cst_12 [1] : vector<1x128xf32> to vector<1xf32>
    %17 = vector.shape_cast %16 : vector<1xf32> to vector<1x1xf32>
    %cst_13 = arith.constant 2.048000e+03 : f32
    %18 = vector.broadcast %cst_13 : f32 to vector<1x1xf32>
    %19 = arith.divf %17, %18 : vector<1x1xf32>
    %20 = arith.mulf %15, %15 : vector<1x1xf32>
    %21 = arith.subf %19, %20 : vector<1x1xf32>
    %cst_14 = arith.constant 0.000000e+00 : f32
    %22 = vector.broadcast %cst_14 : f32 to vector<1x1xf32>
    %23 = arith.maximumf %21, %22 : vector<1x1xf32>
    %cst_15 = arith.constant 9.99999974E-6 : f32
    %24 = vector.broadcast %cst_15 : f32 to vector<1x1xf32>
    %25 = arith.addf %23, %24 : vector<1x1xf32>
    %26 = math.rsqrt %25 : vector<1x1xf32>
    %27 = vector.broadcast %26 : vector<1x1xf32> to vector<1x128xf32>
    %28 = arith.mulf %27, %5 : vector<1x128xf32>
    %29 = vector.broadcast %15 : vector<1x1xf32> to vector<1x128xf32>
    %30 = arith.mulf %29, %28 : vector<1x128xf32>
    %31 = arith.subf %6, %30 : vector<1x128xf32>
    %32 = vector.broadcast %28 : vector<1x128xf32> to vector<256x128xf32>
    %33 = arith.mulf %4, %32 : vector<256x128xf32>
    %34 = vector.broadcast %31 : vector<1x128xf32> to vector<256x128xf32>
    %35 = arith.addf %33, %34 : vector<256x128xf32>
    %cst_16 = arith.constant 0.000000e+00 : f32
    %36 = vector.broadcast %cst_16 : f32 to vector<256x128xf32>
    %37 = arith.maximumf %35, %36 : vector<256x128xf32>
    %38 = tpu.iota {dimensions = array<i32: 0>} : vector<256x1xi32>
    %c16_i32 = arith.constant 16 : i32
    %c0_i32 = arith.constant 0 : i32
    %39 = arith.cmpi eq, %c16_i32, %c0_i32 : i32
    %c1_i32 = arith.constant 1 : i32
    %40 = arith.select %39, %c1_i32, %c16_i32 : i32
    %41 = vector.broadcast %40 : i32 to vector<256x1xi32>
    %42 = arith.remsi %38, %41 : vector<256x1xi32>
    %c0_i32_17 = arith.constant 0 : i32
    %43 = vector.broadcast %c0_i32_17 : i32 to vector<256x1xi32>
    %44 = arith.cmpi ne, %42, %43 : vector<256x1xi32>
    %c0_i32_18 = arith.constant 0 : i32
    %45 = vector.broadcast %c0_i32_18 : i32 to vector<256x1xi32>
    %46 = arith.cmpi slt, %42, %45 : vector<256x1xi32>
    %c0_i32_19 = arith.constant 0 : i32
    %47 = arith.cmpi slt, %40, %c0_i32_19 : i32
    %48 = vector.broadcast %47 : i1 to vector<256x1xi1>
    %49 = vector.broadcast %48 : vector<256x1xi1> to vector<256x1xi1>
    %50 = arith.xori %46, %49 : vector<256x1xi1>
    %51 = arith.andi %50, %44 : vector<256x1xi1>
    %52 = vector.broadcast %40 : i32 to vector<256x1xi32>
    %53 = arith.addi %42, %52 : vector<256x1xi32>
    %54 = arith.select %51, %53, %42 : vector<256x1xi1>, vector<256x1xi32>
    %cst_20 = arith.constant 0.000000e+00 : f32
    %55 = vector.broadcast %cst_20 : f32 to vector<1x128xf32>
    %c0_i32_21 = arith.constant 0 : i32
    %56 = vector.broadcast %c0_i32_21 : i32 to vector<256x1xi32>
    %57 = arith.cmpi eq, %54, %56 : vector<256x1xi32>
    %58 = vector.extract_strided_slice %37 {offsets = [0, 0], sizes = [255, 128], strides = [1, 1]} : vector<256x128xf32> to vector<255x128xf32>
    %59 = tpu.concatenate %55, %58 in 0 : vector<1x128xf32>, vector<255x128xf32> -> vector<256x128xf32>
    %cst_22 = arith.constant 0.000000e+00 : f32
    %60 = vector.shape_cast %57 : vector<256x1xi1> to vector<256x1xi1>
    %61 = vector.broadcast %60 : vector<256x1xi1> to vector<256x128xi1>
    %62 = vector.broadcast %cst_22 : f32 to vector<256x128xf32>
    %63 = arith.select %61, %62, %59 : vector<256x128xi1>, vector<256x128xf32>
    %c15_i32 = arith.constant 15 : i32
    %64 = vector.broadcast %c15_i32 : i32 to vector<256x1xi32>
    %65 = arith.cmpi eq, %54, %64 : vector<256x1xi32>
    %66 = vector.extract_strided_slice %37 {offsets = [1, 0], sizes = [255, 128], strides = [1, 1]} : vector<256x128xf32> to vector<255x128xf32>
    %67 = tpu.concatenate %66, %55 in 0 : vector<255x128xf32>, vector<1x128xf32> -> vector<256x128xf32>
    %cst_23 = arith.constant 0.000000e+00 : f32
    %68 = vector.shape_cast %65 : vector<256x1xi1> to vector<256x1xi1>
    %69 = vector.broadcast %68 : vector<256x1xi1> to vector<256x128xi1>
    %70 = vector.broadcast %cst_23 : f32 to vector<256x128xf32>
    %71 = arith.select %69, %70, %67 : vector<256x128xi1>, vector<256x128xf32>
    %72 = arith.truncf %63 : vector<256x128xf32> to vector<256x128xbf16>
    %73 = arith.truncf %37 : vector<256x128xf32> to vector<256x128xbf16>
    %74 = arith.truncf %71 : vector<256x128xf32> to vector<256x128xbf16>
    %cst_24 = arith.constant 0.000000e+00 : bf16
    %75 = vector.broadcast %cst_24 : bf16 to vector<16x128xbf16>
    %cst_25 = arith.constant 0.000000e+00 : f32
    %76 = vector.broadcast %cst_25 : f32 to vector<256x128xf32>
    %77 = vector.extract_strided_slice %72 {offsets = [0, 0], sizes = [240, 128], strides = [1, 1]} : vector<256x128xbf16> to vector<240x128xbf16>
    %78 = tpu.concatenate %75, %77 in 0 : vector<16x128xbf16>, vector<240x128xbf16> -> vector<256x128xbf16>
    %c0_26 = arith.constant 0 : index
    %c0_27 = arith.constant 0 : index
    %c0_28 = arith.constant 0 : index
    %79 = vector.load %arg5[%c0_26, %c0_27, %c0_28] : memref<9x128x128xbf16, #tpu.memory_space<vmem>>, vector<1x128x128xbf16>
    %80 = vector.shape_cast %79 : vector<1x128x128xbf16> to vector<128x128xbf16>
    %cst_29 = arith.constant dense<0.000000e+00> : vector<256x128xf32>
    %81 = tpu.matmul %78, %80, %cst_29 {dimension_numbers = #tpu.dot_dimension_numbers<[1], [0], [0], [1], [0, 0, 1, 1], [], []>} : vector<256x128xbf16>, vector<128x128xbf16>, vector<256x128xf32> -> vector<256x128xf32>
    %82 = arith.addf %76, %81 : vector<256x128xf32>
    %83 = vector.extract_strided_slice %73 {offsets = [0, 0], sizes = [240, 128], strides = [1, 1]} : vector<256x128xbf16> to vector<240x128xbf16>
    %84 = tpu.concatenate %75, %83 in 0 : vector<16x128xbf16>, vector<240x128xbf16> -> vector<256x128xbf16>
    %c1 = arith.constant 1 : index
    %c0_30 = arith.constant 0 : index
    %c0_31 = arith.constant 0 : index
    %85 = vector.load %arg5[%c1, %c0_30, %c0_31] : memref<9x128x128xbf16, #tpu.memory_space<vmem>>, vector<1x128x128xbf16>
    %86 = vector.shape_cast %85 : vector<1x128x128xbf16> to vector<128x128xbf16>
    %cst_32 = arith.constant dense<0.000000e+00> : vector<256x128xf32>
    %87 = tpu.matmul %84, %86, %cst_32 {dimension_numbers = #tpu.dot_dimension_numbers<[1], [0], [0], [1], [0, 0, 1, 1], [], []>} : vector<256x128xbf16>, vector<128x128xbf16>, vector<256x128xf32> -> vector<256x128xf32>
    %88 = arith.addf %82, %87 : vector<256x128xf32>
    %89 = vector.extract_strided_slice %74 {offsets = [0, 0], sizes = [240, 128], strides = [1, 1]} : vector<256x128xbf16> to vector<240x128xbf16>
    %90 = tpu.concatenate %75, %89 in 0 : vector<16x128xbf16>, vector<240x128xbf16> -> vector<256x128xbf16>
    %c2 = arith.constant 2 : index
    %c0_33 = arith.constant 0 : index
    %c0_34 = arith.constant 0 : index
    %91 = vector.load %arg5[%c2, %c0_33, %c0_34] : memref<9x128x128xbf16, #tpu.memory_space<vmem>>, vector<1x128x128xbf16>
    %92 = vector.shape_cast %91 : vector<1x128x128xbf16> to vector<128x128xbf16>
    %cst_35 = arith.constant dense<0.000000e+00> : vector<256x128xf32>
    %93 = tpu.matmul %90, %92, %cst_35 {dimension_numbers = #tpu.dot_dimension_numbers<[1], [0], [0], [1], [0, 0, 1, 1], [], []>} : vector<256x128xbf16>, vector<128x128xbf16>, vector<256x128xf32> -> vector<256x128xf32>
    %94 = arith.addf %88, %93 : vector<256x128xf32>
    %c3 = arith.constant 3 : index
    %c0_36 = arith.constant 0 : index
    %c0_37 = arith.constant 0 : index
    %95 = vector.load %arg5[%c3, %c0_36, %c0_37] : memref<9x128x128xbf16, #tpu.memory_space<vmem>>, vector<1x128x128xbf16>
    %96 = vector.shape_cast %95 : vector<1x128x128xbf16> to vector<128x128xbf16>
    %cst_38 = arith.constant dense<0.000000e+00> : vector<256x128xf32>
    %97 = tpu.matmul %72, %96, %cst_38 {dimension_numbers = #tpu.dot_dimension_numbers<[1], [0], [0], [1], [0, 0, 1, 1], [], []>} : vector<256x128xbf16>, vector<128x128xbf16>, vector<256x128xf32> -> vector<256x128xf32>
    %98 = arith.addf %94, %97 : vector<256x128xf32>
    %c4 = arith.constant 4 : index
    %c0_39 = arith.constant 0 : index
    %c0_40 = arith.constant 0 : index
    %99 = vector.load %arg5[%c4, %c0_39, %c0_40] : memref<9x128x128xbf16, #tpu.memory_space<vmem>>, vector<1x128x128xbf16>
    %100 = vector.shape_cast %99 : vector<1x128x128xbf16> to vector<128x128xbf16>
    %cst_41 = arith.constant dense<0.000000e+00> : vector<256x128xf32>
    %101 = tpu.matmul %73, %100, %cst_41 {dimension_numbers = #tpu.dot_dimension_numbers<[1], [0], [0], [1], [0, 0, 1, 1], [], []>} : vector<256x128xbf16>, vector<128x128xbf16>, vector<256x128xf32> -> vector<256x128xf32>
    %102 = arith.addf %98, %101 : vector<256x128xf32>
    %c5 = arith.constant 5 : index
    %c0_42 = arith.constant 0 : index
    %c0_43 = arith.constant 0 : index
    %103 = vector.load %arg5[%c5, %c0_42, %c0_43] : memref<9x128x128xbf16, #tpu.memory_space<vmem>>, vector<1x128x128xbf16>
    %104 = vector.shape_cast %103 : vector<1x128x128xbf16> to vector<128x128xbf16>
    %cst_44 = arith.constant dense<0.000000e+00> : vector<256x128xf32>
    %105 = tpu.matmul %74, %104, %cst_44 {dimension_numbers = #tpu.dot_dimension_numbers<[1], [0], [0], [1], [0, 0, 1, 1], [], []>} : vector<256x128xbf16>, vector<128x128xbf16>, vector<256x128xf32> -> vector<256x128xf32>
    %106 = arith.addf %102, %105 : vector<256x128xf32>
    %107 = vector.extract_strided_slice %72 {offsets = [16, 0], sizes = [240, 128], strides = [1, 1]} : vector<256x128xbf16> to vector<240x128xbf16>
    %108 = tpu.concatenate %107, %75 in 0 : vector<240x128xbf16>, vector<16x128xbf16> -> vector<256x128xbf16>
    %c6 = arith.constant 6 : index
    %c0_45 = arith.constant 0 : index
    %c0_46 = arith.constant 0 : index
    %109 = vector.load %arg5[%c6, %c0_45, %c0_46] : memref<9x128x128xbf16, #tpu.memory_space<vmem>>, vector<1x128x128xbf16>
    %110 = vector.shape_cast %109 : vector<1x128x128xbf16> to vector<128x128xbf16>
    %cst_47 = arith.constant dense<0.000000e+00> : vector<256x128xf32>
    %111 = tpu.matmul %108, %110, %cst_47 {dimension_numbers = #tpu.dot_dimension_numbers<[1], [0], [0], [1], [0, 0, 1, 1], [], []>} : vector<256x128xbf16>, vector<128x128xbf16>, vector<256x128xf32> -> vector<256x128xf32>
    %112 = arith.addf %106, %111 : vector<256x128xf32>
    %113 = vector.extract_strided_slice %73 {offsets = [16, 0], sizes = [240, 128], strides = [1, 1]} : vector<256x128xbf16> to vector<240x128xbf16>
    %114 = tpu.concatenate %113, %75 in 0 : vector<240x128xbf16>, vector<16x128xbf16> -> vector<256x128xbf16>
    %c7 = arith.constant 7 : index
    %c0_48 = arith.constant 0 : index
    %c0_49 = arith.constant 0 : index
    %115 = vector.load %arg5[%c7, %c0_48, %c0_49] : memref<9x128x128xbf16, #tpu.memory_space<vmem>>, vector<1x128x128xbf16>
    %116 = vector.shape_cast %115 : vector<1x128x128xbf16> to vector<128x128xbf16>
    %cst_50 = arith.constant dense<0.000000e+00> : vector<256x128xf32>
    %117 = tpu.matmul %114, %116, %cst_50 {dimension_numbers = #tpu.dot_dimension_numbers<[1], [0], [0], [1], [0, 0, 1, 1], [], []>} : vector<256x128xbf16>, vector<128x128xbf16>, vector<256x128xf32> -> vector<256x128xf32>
    %118 = arith.addf %112, %117 : vector<256x128xf32>
    %119 = vector.extract_strided_slice %74 {offsets = [16, 0], sizes = [240, 128], strides = [1, 1]} : vector<256x128xbf16> to vector<240x128xbf16>
    %120 = tpu.concatenate %119, %75 in 0 : vector<240x128xbf16>, vector<16x128xbf16> -> vector<256x128xbf16>
    %c8 = arith.constant 8 : index
    %c0_51 = arith.constant 0 : index
    %c0_52 = arith.constant 0 : index
    %121 = vector.load %arg5[%c8, %c0_51, %c0_52] : memref<9x128x128xbf16, #tpu.memory_space<vmem>>, vector<1x128x128xbf16>
    %122 = vector.shape_cast %121 : vector<1x128x128xbf16> to vector<128x128xbf16>
    %cst_53 = arith.constant dense<0.000000e+00> : vector<256x128xf32>
    %123 = tpu.matmul %120, %122, %cst_53 {dimension_numbers = #tpu.dot_dimension_numbers<[1], [0], [0], [1], [0, 0, 1, 1], [], []>} : vector<256x128xbf16>, vector<128x128xbf16>, vector<256x128xf32> -> vector<256x128xf32>
    %124 = arith.addf %118, %123 : vector<256x128xf32>
    %c0_54 = arith.constant 0 : index
    %c0_55 = arith.constant 0 : index
    %125 = vector.load %arg6[%c0_54, %c0_55] : memref<1x128xf32, #tpu.memory_space<vmem>>, vector<1x128xf32>
    %c0_56 = arith.constant 0 : index
    %c0_57 = arith.constant 0 : index
    %126 = vector.load %arg7[%c0_56, %c0_57] : memref<1x128xf32, #tpu.memory_space<vmem>>, vector<1x128xf32>
    %cst_58 = arith.constant dense<0.000000e+00> : vector<128xf32>
    %127 = vector.multi_reduction <add>, %124, %cst_58 [0] : vector<256x128xf32> to vector<128xf32>
    %128 = vector.shape_cast %127 : vector<128xf32> to vector<1x128xf32>
    %129 = arith.mulf %124, %124 : vector<256x128xf32>
    %cst_59 = arith.constant dense<0.000000e+00> : vector<128xf32>
    %130 = vector.multi_reduction <add>, %129, %cst_59 [0] : vector<256x128xf32> to vector<128xf32>
    %131 = vector.shape_cast %130 : vector<128xf32> to vector<1x128xf32>
    %cst_60 = arith.constant dense<0.000000e+00> : vector<1xf32>
    %132 = vector.multi_reduction <add>, %128, %cst_60 [1] : vector<1x128xf32> to vector<1xf32>
    %133 = vector.shape_cast %132 : vector<1xf32> to vector<1x1xf32>
    %cst_61 = arith.constant 2.048000e+03 : f32
    %134 = vector.broadcast %cst_61 : f32 to vector<1x1xf32>
    %135 = arith.divf %133, %134 : vector<1x1xf32>
    %cst_62 = arith.constant dense<0.000000e+00> : vector<1xf32>
    %136 = vector.multi_reduction <add>, %131, %cst_62 [1] : vector<1x128xf32> to vector<1xf32>
    %137 = vector.shape_cast %136 : vector<1xf32> to vector<1x1xf32>
    %cst_63 = arith.constant 2.048000e+03 : f32
    %138 = vector.broadcast %cst_63 : f32 to vector<1x1xf32>
    %139 = arith.divf %137, %138 : vector<1x1xf32>
    %140 = arith.mulf %135, %135 : vector<1x1xf32>
    %141 = arith.subf %139, %140 : vector<1x1xf32>
    %cst_64 = arith.constant 0.000000e+00 : f32
    %142 = vector.broadcast %cst_64 : f32 to vector<1x1xf32>
    %143 = arith.maximumf %141, %142 : vector<1x1xf32>
    %cst_65 = arith.constant 9.99999974E-6 : f32
    %144 = vector.broadcast %cst_65 : f32 to vector<1x1xf32>
    %145 = arith.addf %143, %144 : vector<1x1xf32>
    %146 = math.rsqrt %145 : vector<1x1xf32>
    %147 = vector.broadcast %146 : vector<1x1xf32> to vector<1x128xf32>
    %148 = arith.mulf %147, %125 : vector<1x128xf32>
    %149 = vector.broadcast %135 : vector<1x1xf32> to vector<1x128xf32>
    %150 = arith.mulf %149, %148 : vector<1x128xf32>
    %151 = arith.subf %126, %150 : vector<1x128xf32>
    %152 = vector.broadcast %148 : vector<1x128xf32> to vector<256x128xf32>
    %153 = arith.mulf %124, %152 : vector<256x128xf32>
    %154 = vector.broadcast %151 : vector<1x128xf32> to vector<256x128xf32>
    %155 = arith.addf %153, %154 : vector<256x128xf32>
    %cst_66 = arith.constant 0.000000e+00 : f32
    %156 = vector.broadcast %cst_66 : f32 to vector<256x128xf32>
    %157 = arith.maximumf %155, %156 : vector<256x128xf32>
    %158 = arith.truncf %157 : vector<256x128xf32> to vector<256x128xbf16>
    %c0_67 = arith.constant 0 : index
    %c0_68 = arith.constant 0 : index
    %159 = vector.load %arg8[%c0_67, %c0_68] : memref<128x128xbf16, #tpu.memory_space<vmem>>, vector<128x128xbf16>
    %cst_69 = arith.constant dense<0.000000e+00> : vector<256x128xf32>
    %160 = tpu.matmul %158, %159, %cst_69 {dimension_numbers = #tpu.dot_dimension_numbers<[1], [0], [0], [1], [0, 0, 1, 1], [], []>} : vector<256x128xbf16>, vector<128x128xbf16>, vector<256x128xf32> -> vector<256x128xf32>
    %c0_70 = arith.constant 0 : index
    %c0_71 = arith.constant 0 : index
    %161 = vector.load %arg9[%c0_70, %c0_71] : memref<1x128xf32, #tpu.memory_space<vmem>>, vector<1x128xf32>
    %c0_72 = arith.constant 0 : index
    %c0_73 = arith.constant 0 : index
    %162 = vector.load %arg10[%c0_72, %c0_73] : memref<1x128xf32, #tpu.memory_space<vmem>>, vector<1x128xf32>
    %cst_74 = arith.constant dense<0.000000e+00> : vector<128xf32>
    %163 = vector.multi_reduction <add>, %160, %cst_74 [0] : vector<256x128xf32> to vector<128xf32>
    %164 = vector.shape_cast %163 : vector<128xf32> to vector<1x128xf32>
    %165 = arith.mulf %160, %160 : vector<256x128xf32>
    %cst_75 = arith.constant dense<0.000000e+00> : vector<128xf32>
    %166 = vector.multi_reduction <add>, %165, %cst_75 [0] : vector<256x128xf32> to vector<128xf32>
    %167 = vector.shape_cast %166 : vector<128xf32> to vector<1x128xf32>
    %cst_76 = arith.constant dense<0.000000e+00> : vector<1xf32>
    %168 = vector.multi_reduction <add>, %164, %cst_76 [1] : vector<1x128xf32> to vector<1xf32>
    %169 = vector.shape_cast %168 : vector<1xf32> to vector<1x1xf32>
    %cst_77 = arith.constant 8.192000e+03 : f32
    %170 = vector.broadcast %cst_77 : f32 to vector<1x1xf32>
    %171 = arith.divf %169, %170 : vector<1x1xf32>
    %cst_78 = arith.constant dense<0.000000e+00> : vector<1xf32>
    %172 = vector.multi_reduction <add>, %167, %cst_78 [1] : vector<1x128xf32> to vector<1xf32>
    %173 = vector.shape_cast %172 : vector<1xf32> to vector<1x1xf32>
    %cst_79 = arith.constant 8.192000e+03 : f32
    %174 = vector.broadcast %cst_79 : f32 to vector<1x1xf32>
    %175 = arith.divf %173, %174 : vector<1x1xf32>
    %176 = arith.mulf %171, %171 : vector<1x1xf32>
    %177 = arith.subf %175, %176 : vector<1x1xf32>
    %cst_80 = arith.constant 0.000000e+00 : f32
    %178 = vector.broadcast %cst_80 : f32 to vector<1x1xf32>
    %179 = arith.maximumf %177, %178 : vector<1x1xf32>
    %cst_81 = arith.constant 9.99999974E-6 : f32
    %180 = vector.broadcast %cst_81 : f32 to vector<1x1xf32>
    %181 = arith.addf %179, %180 : vector<1x1xf32>
    %182 = math.rsqrt %181 : vector<1x1xf32>
    %183 = vector.broadcast %182 : vector<1x1xf32> to vector<1x128xf32>
    %184 = arith.mulf %183, %161 : vector<1x128xf32>
    %185 = vector.broadcast %171 : vector<1x1xf32> to vector<1x128xf32>
    %186 = arith.mulf %185, %184 : vector<1x128xf32>
    %187 = arith.subf %162, %186 : vector<1x128xf32>
    %188 = vector.broadcast %184 : vector<1x128xf32> to vector<256x128xf32>
    %189 = arith.mulf %160, %188 : vector<256x128xf32>
    %190 = vector.broadcast %187 : vector<1x128xf32> to vector<256x128xf32>
    %191 = arith.addf %189, %190 : vector<256x128xf32>
    %192 = arith.addf %191, %1 : vector<256x128xf32>
    %cst_82 = arith.constant 0.000000e+00 : f32
    %193 = vector.broadcast %cst_82 : f32 to vector<256x128xf32>
    %194 = arith.maximumf %192, %193 : vector<256x128xf32>
    %c0_83 = arith.constant 0 : index
    %c0_84 = arith.constant 0 : index
    %c0_85 = arith.constant 0 : index
    %195 = vector.load %arg11[%c0_83, %c0_84, %c0_85] : memref<1x256x128xf32, #tpu.memory_space<vmem>>, vector<1x256x128xf32>
    %196 = vector.shape_cast %195 : vector<1x256x128xf32> to vector<256x128xf32>
    %197 = vector.shape_cast %194 : vector<256x128xf32> to vector<1x256x128xf32>
    tpu.vector_store %arg11[%c0_83, %c0_84, %c0_85], %197 {strides = array<i32>} : memref<1x256x128xf32, #tpu.memory_space<vmem>>, vector<1x256x128xf32>,
    return
  }
  func.func @transform_0(%arg0: i32) -> (i32, i32, i32) {
    %c0_i32 = arith.constant 0 : i32
    %c0_i32_0 = arith.constant 0 : i32
    %c0_i32_1 = arith.constant 0 : i32
    return %arg0, %c0_i32, %c0_i32_0 : i32, i32, i32
  }
  func.func @transform_1(%arg0: i32) -> (i32, i32) {
    %c0_i32 = arith.constant 0 : i32
    %c0_i32_0 = arith.constant 0 : i32
    %c0_i32_1 = arith.constant 0 : i32
    return %c0_i32, %c0_i32_0 : i32, i32
  }
  func.func @transform_2(%arg0: i32) -> (i32, i32) {
    %c0_i32 = arith.constant 0 : i32
    %c0_i32_0 = arith.constant 0 : i32
    %c0_i32_1 = arith.constant 0 : i32
    return %c0_i32, %c0_i32_0 : i32, i32
  }
  func.func @transform_3(%arg0: i32) -> (i32, i32) {
    %c0_i32 = arith.constant 0 : i32
    %c0_i32_0 = arith.constant 0 : i32
    %c0_i32_1 = arith.constant 0 : i32
    return %c0_i32, %c0_i32_0 : i32, i32
  }
  func.func @transform_4(%arg0: i32) -> (i32, i32, i32) {
    %c0_i32 = arith.constant 0 : i32
    %c0_i32_0 = arith.constant 0 : i32
    %c0_i32_1 = arith.constant 0 : i32
    %c0_i32_2 = arith.constant 0 : i32
    return %c0_i32, %c0_i32_0, %c0_i32_1 : i32, i32, i32
  }
  func.func @transform_5(%arg0: i32) -> (i32, i32) {
    %c0_i32 = arith.constant 0 : i32
    %c0_i32_0 = arith.constant 0 : i32
    %c0_i32_1 = arith.constant 0 : i32
    return %c0_i32, %c0_i32_0 : i32, i32
  }
  func.func @transform_6(%arg0: i32) -> (i32, i32) {
    %c0_i32 = arith.constant 0 : i32
    %c0_i32_0 = arith.constant 0 : i32
    %c0_i32_1 = arith.constant 0 : i32
    return %c0_i32, %c0_i32_0 : i32, i32
  }
  func.func @transform_7(%arg0: i32) -> (i32, i32) {
    %c0_i32 = arith.constant 0 : i32
    %c0_i32_0 = arith.constant 0 : i32
    %c0_i32_1 = arith.constant 0 : i32
    return %c0_i32, %c0_i32_0 : i32, i32
  }
  func.func @transform_8(%arg0: i32) -> (i32, i32) {
    %c0_i32 = arith.constant 0 : i32
    %c0_i32_0 = arith.constant 0 : i32
    %c0_i32_1 = arith.constant 0 : i32
    return %c0_i32, %c0_i32_0 : i32, i32
  }
  func.func @transform_9(%arg0: i32) -> (i32, i32) {
    %c0_i32 = arith.constant 0 : i32
    %c0_i32_0 = arith.constant 0 : i32
    %c0_i32_1 = arith.constant 0 : i32
    return %c0_i32, %c0_i32_0 : i32, i32
  }
  func.func @transform_10(%arg0: i32) -> (i32, i32, i32) {
    %c0_i32 = arith.constant 0 : i32
    %c0_i32_0 = arith.constant 0 : i32
    %c0_i32_1 = arith.constant 0 : i32
    return %arg0, %c0_i32, %c0_i32_0 : i32, i32, i32
  }
}

module attributes {stable_mosaic.version = 11 : i64} {
  func.func @bottleneck_kernel(%arg0: i32, %arg1: memref<1x256x128xf32, #tpu.memory_space<vmem>>, %arg2: memref<128x128xbf16, #tpu.memory_space<vmem>>, %arg3: memref<1x128xf32, #tpu.memory_space<vmem>>, %arg4: memref<1x128xf32, #tpu.memory_space<vmem>>, %arg5: memref<9x128x128xbf16, #tpu.memory_space<vmem>>, %arg6: memref<1x128xf32, #tpu.memory_space<vmem>>, %arg7: memref<1x128xf32, #tpu.memory_space<vmem>>, %arg8: memref<128x128xbf16, #tpu.memory_space<vmem>>, %arg9: memref<1x128xf32, #tpu.memory_space<vmem>>, %arg10: memref<1x128xf32, #tpu.memory_space<vmem>>, %arg11: memref<1x256x128xf32, #tpu.memory_space<vmem>>) attributes {dimension_semantics = [#tpu.dimension_semantics<parallel>], iteration_bounds = array<i64: 2>, scalar_prefetch = 0 : i64, scratch_operands = 0 : i64, tpu.core_type = #tpu.core_type<tc>, window_params = [{transform_indices = @transform_0, window_bounds = array<i64: 1, 256, 128>}, {pipeline_mode = #tpu.pipeline_mode<synchronous>, transform_indices = @transform_1, window_bounds = array<i64: 128, 128>}, {pipeline_mode = #tpu.pipeline_mode<synchronous>, transform_indices = @transform_2, window_bounds = array<i64: 1, 128>}, {pipeline_mode = #tpu.pipeline_mode<synchronous>, transform_indices = @transform_3, window_bounds = array<i64: 1, 128>}, {pipeline_mode = #tpu.pipeline_mode<synchronous>, transform_indices = @transform_4, window_bounds = array<i64: 9, 128, 128>}, {pipeline_mode = #tpu.pipeline_mode<synchronous>, transform_indices = @transform_5, window_bounds = array<i64: 1, 128>}, {pipeline_mode = #tpu.pipeline_mode<synchronous>, transform_indices = @transform_6, window_bounds = array<i64: 1, 128>}, {pipeline_mode = #tpu.pipeline_mode<synchronous>, transform_indices = @transform_7, window_bounds = array<i64: 128, 128>}, {pipeline_mode = #tpu.pipeline_mode<synchronous>, transform_indices = @transform_8, window_bounds = array<i64: 1, 128>}, {pipeline_mode = #tpu.pipeline_mode<synchronous>, transform_indices = @transform_9, window_bounds = array<i64: 1, 128>}, {transform_indices = @transform_10, window_bounds = array<i64: 1, 256, 128>}]} {
    %c0 = arith.constant 0 : index
    %c0_0 = arith.constant 0 : index
    %c0_1 = arith.constant 0 : index
    %0 = vector.load %arg1[%c0, %c0_0, %c0_1] : memref<1x256x128xf32, #tpu.memory_space<vmem>>, vector<1x256x128xf32>
    %1 = vector.shape_cast %0 : vector<1x256x128xf32> to vector<256x128xf32>
    %2 = arith.truncf %1 : vector<256x128xf32> to vector<256x128xbf16>
    %c0_2 = arith.constant 0 : index
    %c0_3 = arith.constant 0 : index
    %3 = vector.load %arg2[%c0_2, %c0_3] : memref<128x128xbf16, #tpu.memory_space<vmem>>, vector<128x128xbf16>
    %cst = arith.constant dense<0.000000e+00> : vector<256x128xf32>
    %4 = tpu.matmul %2, %3, %cst {dimension_numbers = #tpu.dot_dimension_numbers<[1], [0], [0], [1], [0, 0, 1, 1], [], []>} : vector<256x128xbf16>, vector<128x128xbf16>, vector<256x128xf32> -> vector<256x128xf32>
    %c0_4 = arith.constant 0 : index
    %c0_5 = arith.constant 0 : index
    %5 = vector.load %arg3[%c0_4, %c0_5] : memref<1x128xf32, #tpu.memory_space<vmem>>, vector<1x128xf32>
    %c0_6 = arith.constant 0 : index
    %c0_7 = arith.constant 0 : index
    %6 = vector.load %arg4[%c0_6, %c0_7] : memref<1x128xf32, #tpu.memory_space<vmem>>, vector<1x128xf32>
    %cst_8 = arith.constant dense<0.000000e+00> : vector<128xf32>
    %7 = vector.multi_reduction <add>, %4, %cst_8 [0] : vector<256x128xf32> to vector<128xf32>
    %8 = vector.shape_cast %7 : vector<128xf32> to vector<1x128xf32>
    %9 = arith.mulf %4, %4 : vector<256x128xf32>
    %cst_9 = arith.constant dense<0.000000e+00> : vector<128xf32>
    %10 = vector.multi_reduction <add>, %9, %cst_9 [0] : vector<256x128xf32> to vector<128xf32>
    %11 = vector.shape_cast %10 : vector<128xf32> to vector<1x128xf32>
    %cst_10 = arith.constant dense<0.000000e+00> : vector<1xf32>
    %12 = vector.multi_reduction <add>, %8, %cst_10 [1] : vector<1x128xf32> to vector<1xf32>
    %13 = vector.shape_cast %12 : vector<1xf32> to vector<1x1xf32>
    %cst_11 = arith.constant 2.048000e+03 : f32
    %14 = vector.broadcast %cst_11 : f32 to vector<1x1xf32>
    %15 = arith.divf %13, %14 : vector<1x1xf32>
    %cst_12 = arith.constant dense<0.000000e+00> : vector<1xf32>
    %16 = vector.multi_reduction <add>, %11, %cst_12 [1] : vector<1x128xf32> to vector<1xf32>
    %17 = vector.shape_cast %16 : vector<1xf32> to vector<1x1xf32>
    %cst_13 = arith.constant 2.048000e+03 : f32
    %18 = vector.broadcast %cst_13 : f32 to vector<1x1xf32>
    %19 = arith.divf %17, %18 : vector<1x1xf32>
    %20 = arith.mulf %15, %15 : vector<1x1xf32>
    %21 = arith.subf %19, %20 : vector<1x1xf32>
    %cst_14 = arith.constant 0.000000e+00 : f32
    %22 = vector.broadcast %cst_14 : f32 to vector<1x1xf32>
    %23 = arith.maximumf %21, %22 : vector<1x1xf32>
    %cst_15 = arith.constant 9.99999974E-6 : f32
    %24 = vector.broadcast %cst_15 : f32 to vector<1x1xf32>
    %25 = arith.addf %23, %24 : vector<1x1xf32>
    %26 = math.rsqrt %25 : vector<1x1xf32>
    %27 = vector.broadcast %26 : vector<1x1xf32> to vector<1x128xf32>
    %28 = arith.mulf %27, %5 : vector<1x128xf32>
    %29 = vector.broadcast %15 : vector<1x1xf32> to vector<1x128xf32>
    %30 = arith.mulf %29, %28 : vector<1x128xf32>
    %31 = arith.subf %6, %30 : vector<1x128xf32>
    %32 = vector.broadcast %28 : vector<1x128xf32> to vector<256x128xf32>
    %33 = arith.mulf %4, %32 : vector<256x128xf32>
    %34 = vector.broadcast %31 : vector<1x128xf32> to vector<256x128xf32>
    %35 = arith.addf %33, %34 : vector<256x128xf32>
    %cst_16 = arith.constant 0.000000e+00 : f32
    %36 = vector.broadcast %cst_16 : f32 to vector<256x128xf32>
    %37 = arith.maximumf %35, %36 : vector<256x128xf32>
    %38 = tpu.iota {dimensions = array<i32: 0>} : vector<256x1xi32>
    %c16_i32 = arith.constant 16 : i32
    %c0_i32 = arith.constant 0 : i32
    %39 = arith.cmpi eq, %c16_i32, %c0_i32 : i32
    %c1_i32 = arith.constant 1 : i32
    %40 = arith.select %39, %c1_i32, %c16_i32 : i32
    %41 = vector.broadcast %40 : i32 to vector<256x1xi32>
    %42 = arith.remsi %38, %41 : vector<256x1xi32>
    %c0_i32_17 = arith.constant 0 : i32
    %43 = vector.broadcast %c0_i32_17 : i32 to vector<256x1xi32>
    %44 = arith.cmpi ne, %42, %43 : vector<256x1xi32>
    %c0_i32_18 = arith.constant 0 : i32
    %45 = vector.broadcast %c0_i32_18 : i32 to vector<256x1xi32>
    %46 = arith.cmpi slt, %42, %45 : vector<256x1xi32>
    %c0_i32_19 = arith.constant 0 : i32
    %47 = arith.cmpi slt, %40, %c0_i32_19 : i32
    %48 = vector.broadcast %47 : i1 to vector<256x1xi1>
    %49 = vector.broadcast %48 : vector<256x1xi1> to vector<256x1xi1>
    %50 = arith.xori %46, %49 : vector<256x1xi1>
    %51 = arith.andi %50, %44 : vector<256x1xi1>
    %52 = vector.broadcast %40 : i32 to vector<256x1xi32>
    %53 = arith.addi %42, %52 : vector<256x1xi32>
    %54 = arith.select %51, %53, %42 : vector<256x1xi1>, vector<256x1xi32>
    %cst_20 = arith.constant 0.000000e+00 : f32
    %55 = vector.broadcast %cst_20 : f32 to vector<1x128xf32>
    %c0_i32_21 = arith.constant 0 : i32
    %56 = vector.broadcast %c0_i32_21 : i32 to vector<256x1xi32>
    %57 = arith.cmpi eq, %54, %56 : vector<256x1xi32>
    %58 = vector.extract_strided_slice %37 {offsets = [0, 0], sizes = [255, 128], strides = [1, 1]} : vector<256x128xf32> to vector<255x128xf32>
    %59 = tpu.concatenate %55, %58 in 0 : vector<1x128xf32>, vector<255x128xf32> -> vector<256x128xf32>
    %cst_22 = arith.constant 0.000000e+00 : f32
    %60 = vector.shape_cast %57 : vector<256x1xi1> to vector<256x1xi1>
    %61 = vector.broadcast %60 : vector<256x1xi1> to vector<256x128xi1>
    %62 = vector.broadcast %cst_22 : f32 to vector<256x128xf32>
    %63 = arith.select %61, %62, %59 : vector<256x128xi1>, vector<256x128xf32>
    %c15_i32 = arith.constant 15 : i32
    %64 = vector.broadcast %c15_i32 : i32 to vector<256x1xi32>
    %65 = arith.cmpi eq, %54, %64 : vector<256x1xi32>
    %66 = vector.extract_strided_slice %37 {offsets = [1, 0], sizes = [255, 128], strides = [1, 1]} : vector<256x128xf32> to vector<255x128xf32>
    %67 = tpu.concatenate %66, %55 in 0 : vector<255x128xf32>, vector<1x128xf32> -> vector<256x128xf32>
    %cst_23 = arith.constant 0.000000e+00 : f32
    %68 = vector.shape_cast %65 : vector<256x1xi1> to vector<256x1xi1>
    %69 = vector.broadcast %68 : vector<256x1xi1> to vector<256x128xi1>
    %70 = vector.broadcast %cst_23 : f32 to vector<256x128xf32>
    %71 = arith.select %69, %70, %67 : vector<256x128xi1>, vector<256x128xf32>
    %72 = arith.truncf %63 : vector<256x128xf32> to vector<256x128xbf16>
    %73 = arith.truncf %37 : vector<256x128xf32> to vector<256x128xbf16>
    %74 = arith.truncf %71 : vector<256x128xf32> to vector<256x128xbf16>
    %cst_24 = arith.constant 0.000000e+00 : bf16
    %75 = vector.broadcast %cst_24 : bf16 to vector<16x128xbf16>
    %cst_25 = arith.constant 0.000000e+00 : f32
    %76 = vector.broadcast %cst_25 : f32 to vector<256x128xf32>
    %77 = vector.extract_strided_slice %72 {offsets = [0, 0], sizes = [240, 128], strides = [1, 1]} : vector<256x128xbf16> to vector<240x128xbf16>
    %78 = tpu.concatenate %75, %77 in 0 : vector<16x128xbf16>, vector<240x128xbf16> -> vector<256x128xbf16>
    %c0_26 = arith.constant 0 : index
    %c0_27 = arith.constant 0 : index
    %c0_28 = arith.constant 0 : index
    %79 = vector.load %arg5[%c0_26, %c0_27, %c0_28] : memref<9x128x128xbf16, #tpu.memory_space<vmem>>, vector<1x128x128xbf16>
    %80 = vector.shape_cast %79 : vector<1x128x128xbf16> to vector<128x128xbf16>
    %cst_29 = arith.constant dense<0.000000e+00> : vector<256x128xf32>
    %81 = tpu.matmul %78, %80, %cst_29 {dimension_numbers = #tpu.dot_dimension_numbers<[1], [0], [0], [1], [0, 0, 1, 1], [], []>} : vector<256x128xbf16>, vector<128x128xbf16>, vector<256x128xf32> -> vector<256x128xf32>
    %82 = arith.addf %76, %81 : vector<256x128xf32>
    %83 = vector.extract_strided_slice %73 {offsets = [0, 0], sizes = [240, 128], strides = [1, 1]} : vector<256x128xbf16> to vector<240x128xbf16>
    %84 = tpu.concatenate %75, %83 in 0 : vector<16x128xbf16>, vector<240x128xbf16> -> vector<256x128xbf16>
    %c1 = arith.constant 1 : index
    %c0_30 = arith.constant 0 : index
    %c0_31 = arith.constant 0 : index
    %85 = vector.load %arg5[%c1, %c0_30, %c0_31] : memref<9x128x128xbf16, #tpu.memory_space<vmem>>, vector<1x128x128xbf16>
    %86 = vector.shape_cast %85 : vector<1x128x128xbf16> to vector<128x128xbf16>
    %cst_32 = arith.constant dense<0.000000e+00> : vector<256x128xf32>
    %87 = tpu.matmul %84, %86, %cst_32 {dimension_numbers = #tpu.dot_dimension_numbers<[1], [0], [0], [1], [0, 0, 1, 1], [], []>} : vector<256x128xbf16>, vector<128x128xbf16>, vector<256x128xf32> -> vector<256x128xf32>
    %88 = arith.addf %82, %87 : vector<256x128xf32>
    %89 = vector.extract_strided_slice %74 {offsets = [0, 0], sizes = [240, 128], strides = [1, 1]} : vector<256x128xbf16> to vector<240x128xbf16>
    %90 = tpu.concatenate %75, %89 in 0 : vector<16x128xbf16>, vector<240x128xbf16> -> vector<256x128xbf16>
    %c2 = arith.constant 2 : index
    %c0_33 = arith.constant 0 : index
    %c0_34 = arith.constant 0 : index
    %91 = vector.load %arg5[%c2, %c0_33, %c0_34] : memref<9x128x128xbf16, #tpu.memory_space<vmem>>, vector<1x128x128xbf16>
    %92 = vector.shape_cast %91 : vector<1x128x128xbf16> to vector<128x128xbf16>
    %cst_35 = arith.constant dense<0.000000e+00> : vector<256x128xf32>
    %93 = tpu.matmul %90, %92, %cst_35 {dimension_numbers = #tpu.dot_dimension_numbers<[1], [0], [0], [1], [0, 0, 1, 1], [], []>} : vector<256x128xbf16>, vector<128x128xbf16>, vector<256x128xf32> -> vector<256x128xf32>
    %94 = arith.addf %88, %93 : vector<256x128xf32>
    %c3 = arith.constant 3 : index
    %c0_36 = arith.constant 0 : index
    %c0_37 = arith.constant 0 : index
    %95 = vector.load %arg5[%c3, %c0_36, %c0_37] : memref<9x128x128xbf16, #tpu.memory_space<vmem>>, vector<1x128x128xbf16>
    %96 = vector.shape_cast %95 : vector<1x128x128xbf16> to vector<128x128xbf16>
    %cst_38 = arith.constant dense<0.000000e+00> : vector<256x128xf32>
    %97 = tpu.matmul %72, %96, %cst_38 {dimension_numbers = #tpu.dot_dimension_numbers<[1], [0], [0], [1], [0, 0, 1, 1], [], []>} : vector<256x128xbf16>, vector<128x128xbf16>, vector<256x128xf32> -> vector<256x128xf32>
    %98 = arith.addf %94, %97 : vector<256x128xf32>
    %c4 = arith.constant 4 : index
    %c0_39 = arith.constant 0 : index
    %c0_40 = arith.constant 0 : index
    %99 = vector.load %arg5[%c4, %c0_39, %c0_40] : memref<9x128x128xbf16, #tpu.memory_space<vmem>>, vector<1x128x128xbf16>
    %100 = vector.shape_cast %99 : vector<1x128x128xbf16> to vector<128x128xbf16>
    %cst_41 = arith.constant dense<0.000000e+00> : vector<256x128xf32>
    %101 = tpu.matmul %73, %100, %cst_41 {dimension_numbers = #tpu.dot_dimension_numbers<[1], [0], [0], [1], [0, 0, 1, 1], [], []>} : vector<256x128xbf16>, vector<128x128xbf16>, vector<256x128xf32> -> vector<256x128xf32>
    %102 = arith.addf %98, %101 : vector<256x128xf32>
    %c5 = arith.constant 5 : index
    %c0_42 = arith.constant 0 : index
    %c0_43 = arith.constant 0 : index
    %103 = vector.load %arg5[%c5, %c0_42, %c0_43] : memref<9x128x128xbf16, #tpu.memory_space<vmem>>, vector<1x128x128xbf16>
    %104 = vector.shape_cast %103 : vector<1x128x128xbf16> to vector<128x128xbf16>
    %cst_44 = arith.constant dense<0.000000e+00> : vector<256x128xf32>
    %105 = tpu.matmul %74, %104, %cst_44 {dimension_numbers = #tpu.dot_dimension_numbers<[1], [0], [0], [1], [0, 0, 1, 1], [], []>} : vector<256x128xbf16>, vector<128x128xbf16>, vector<256x128xf32> -> vector<256x128xf32>
    %106 = arith.addf %102, %105 : vector<256x128xf32>
    %107 = vector.extract_strided_slice %72 {offsets = [16, 0], sizes = [240, 128], strides = [1, 1]} : vector<256x128xbf16> to vector<240x128xbf16>
    %108 = tpu.concatenate %107, %75 in 0 : vector<240x128xbf16>, vector<16x128xbf16> -> vector<256x128xbf16>
    %c6 = arith.constant 6 : index
    %c0_45 = arith.constant 0 : index
    %c0_46 = arith.constant 0 : index
    %109 = vector.load %arg5[%c6, %c0_45, %c0_46] : memref<9x128x128xbf16, #tpu.memory_space<vmem>>, vector<1x128x128xbf16>
    %110 = vector.shape_cast %109 : vector<1x128x128xbf16> to vector<128x128xbf16>
    %cst_47 = arith.constant dense<0.000000e+00> : vector<256x128xf32>
    %111 = tpu.matmul %108, %110, %cst_47 {dimension_numbers = #tpu.dot_dimension_numbers<[1], [0], [0], [1], [0, 0, 1, 1], [], []>} : vector<256x128xbf16>, vector<128x128xbf16>, vector<256x128xf32> -> vector<256x128xf32>
    %112 = arith.addf %106, %111 : vector<256x128xf32>
    %113 = vector.extract_strided_slice %73 {offsets = [16, 0], sizes = [240, 128], strides = [1, 1]} : vector<256x128xbf16> to vector<240x128xbf16>
    %114 = tpu.concatenate %113, %75 in 0 : vector<240x128xbf16>, vector<16x128xbf16> -> vector<256x128xbf16>
    %c7 = arith.constant 7 : index
    %c0_48 = arith.constant 0 : index
    %c0_49 = arith.constant 0 : index
    %115 = vector.load %arg5[%c7, %c0_48, %c0_49] : memref<9x128x128xbf16, #tpu.memory_space<vmem>>, vector<1x128x128xbf16>
    %116 = vector.shape_cast %115 : vector<1x128x128xbf16> to vector<128x128xbf16>
    %cst_50 = arith.constant dense<0.000000e+00> : vector<256x128xf32>
    %117 = tpu.matmul %114, %116, %cst_50 {dimension_numbers = #tpu.dot_dimension_numbers<[1], [0], [0], [1], [0, 0, 1, 1], [], []>} : vector<256x128xbf16>, vector<128x128xbf16>, vector<256x128xf32> -> vector<256x128xf32>
    %118 = arith.addf %112, %117 : vector<256x128xf32>
    %119 = vector.extract_strided_slice %74 {offsets = [16, 0], sizes = [240, 128], strides = [1, 1]} : vector<256x128xbf16> to vector<240x128xbf16>
    %120 = tpu.concatenate %119, %75 in 0 : vector<240x128xbf16>, vector<16x128xbf16> -> vector<256x128xbf16>
    %c8 = arith.constant 8 : index
    %c0_51 = arith.constant 0 : index
    %c0_52 = arith.constant 0 : index
    %121 = vector.load %arg5[%c8, %c0_51, %c0_52] : memref<9x128x128xbf16, #tpu.memory_space<vmem>>, vector<1x128x128xbf16>
    %122 = vector.shape_cast %121 : vector<1x128x128xbf16> to vector<128x128xbf16>
    %cst_53 = arith.constant dense<0.000000e+00> : vector<256x128xf32>
    %123 = tpu.matmul %120, %122, %cst_53 {dimension_numbers = #tpu.dot_dimension_numbers<[1], [0], [0], [1], [0, 0, 1, 1], [], []>} : vector<256x128xbf16>, vector<128x128xbf16>, vector<256x128xf32> -> vector<256x128xf32>
    %124 = arith.addf %118, %123 : vector<256x128xf32>
    %c0_54 = arith.constant 0 : index
    %c0_55 = arith.constant 0 : index
    %125 = vector.load %arg6[%c0_54, %c0_55] : memref<1x128xf32, #tpu.memory_space<vmem>>, vector<1x128xf32>
    %c0_56 = arith.constant 0 : index
    %c0_57 = arith.constant 0 : index
    %126 = vector.load %arg7[%c0_56, %c0_57] : memref<1x128xf32, #tpu.memory_space<vmem>>, vector<1x128xf32>
    %cst_58 = arith.constant dense<0.000000e+00> : vector<128xf32>
    %127 = vector.multi_reduction <add>, %124, %cst_58 [0] : vector<256x128xf32> to vector<128xf32>
    %128 = vector.shape_cast %127 : vector<128xf32> to vector<1x128xf32>
    %129 = arith.mulf %124, %124 : vector<256x128xf32>
    %cst_59 = arith.constant dense<0.000000e+00> : vector<128xf32>
    %130 = vector.multi_reduction <add>, %129, %cst_59 [0] : vector<256x128xf32> to vector<128xf32>
    %131 = vector.shape_cast %130 : vector<128xf32> to vector<1x128xf32>
    %cst_60 = arith.constant dense<0.000000e+00> : vector<1xf32>
    %132 = vector.multi_reduction <add>, %128, %cst_60 [1] : vector<1x128xf32> to vector<1xf32>
    %133 = vector.shape_cast %132 : vector<1xf32> to vector<1x1xf32>
    %cst_61 = arith.constant 2.048000e+03 : f32
    %134 = vector.broadcast %cst_61 : f32 to vector<1x1xf32>
    %135 = arith.divf %133, %134 : vector<1x1xf32>
    %cst_62 = arith.constant dense<0.000000e+00> : vector<1xf32>
    %136 = vector.multi_reduction <add>, %131, %cst_62 [1] : vector<1x128xf32> to vector<1xf32>
    %137 = vector.shape_cast %136 : vector<1xf32> to vector<1x1xf32>
    %cst_63 = arith.constant 2.048000e+03 : f32
    %138 = vector.broadcast %cst_63 : f32 to vector<1x1xf32>
    %139 = arith.divf %137, %138 : vector<1x1xf32>
    %140 = arith.mulf %135, %135 : vector<1x1xf32>
    %141 = arith.subf %139, %140 : vector<1x1xf32>
    %cst_64 = arith.constant 0.000000e+00 : f32
    %142 = vector.broadcast %cst_64 : f32 to vector<1x1xf32>
    %143 = arith.maximumf %141, %142 : vector<1x1xf32>
    %cst_65 = arith.constant 9.99999974E-6 : f32
    %144 = vector.broadcast %cst_65 : f32 to vector<1x1xf32>
    %145 = arith.addf %143, %144 : vector<1x1xf32>
    %146 = math.rsqrt %145 : vector<1x1xf32>
    %147 = vector.broadcast %146 : vector<1x1xf32> to vector<1x128xf32>
    %148 = arith.mulf %147, %125 : vector<1x128xf32>
    %149 = vector.broadcast %135 : vector<1x1xf32> to vector<1x128xf32>
    %150 = arith.mulf %149, %148 : vector<1x128xf32>
    %151 = arith.subf %126, %150 : vector<1x128xf32>
    %152 = vector.broadcast %148 : vector<1x128xf32> to vector<256x128xf32>
    %153 = arith.mulf %124, %152 : vector<256x128xf32>
    %154 = vector.broadcast %151 : vector<1x128xf32> to vector<256x128xf32>
    %155 = arith.addf %153, %154 : vector<256x128xf32>
    %cst_66 = arith.constant 0.000000e+00 : f32
    %156 = vector.broadcast %cst_66 : f32 to vector<256x128xf32>
    %157 = arith.maximumf %155, %156 : vector<256x128xf32>
    %158 = arith.truncf %157 : vector<256x128xf32> to vector<256x128xbf16>
    %c0_67 = arith.constant 0 : index
    %c0_68 = arith.constant 0 : index
    %159 = vector.load %arg8[%c0_67, %c0_68] : memref<128x128xbf16, #tpu.memory_space<vmem>>, vector<128x128xbf16>
    %cst_69 = arith.constant dense<0.000000e+00> : vector<256x128xf32>
    %160 = tpu.matmul %158, %159, %cst_69 {dimension_numbers = #tpu.dot_dimension_numbers<[1], [0], [0], [1], [0, 0, 1, 1], [], []>} : vector<256x128xbf16>, vector<128x128xbf16>, vector<256x128xf32> -> vector<256x128xf32>
    %c0_70 = arith.constant 0 : index
    %c0_71 = arith.constant 0 : index
    %161 = vector.load %arg9[%c0_70, %c0_71] : memref<1x128xf32, #tpu.memory_space<vmem>>, vector<1x128xf32>
    %c0_72 = arith.constant 0 : index
    %c0_73 = arith.constant 0 : index
    %162 = vector.load %arg10[%c0_72, %c0_73] : memref<1x128xf32, #tpu.memory_space<vmem>>, vector<1x128xf32>
    %cst_74 = arith.constant dense<0.000000e+00> : vector<128xf32>
    %163 = vector.multi_reduction <add>, %160, %cst_74 [0] : vector<256x128xf32> to vector<128xf32>
    %164 = vector.shape_cast %163 : vector<128xf32> to vector<1x128xf32>
    %165 = arith.mulf %160, %160 : vector<256x128xf32>
    %cst_75 = arith.constant dense<0.000000e+00> : vector<128xf32>
    %166 = vector.multi_reduction <add>, %165, %cst_75 [0] : vector<256x128xf32> to vector<128xf32>
    %167 = vector.shape_cast %166 : vector<128xf32> to vector<1x128xf32>
    %cst_76 = arith.constant dense<0.000000e+00> : vector<1xf32>
    %168 = vector.multi_reduction <add>, %164, %cst_76 [1] : vector<1x128xf32> to vector<1xf32>
    %169 = vector.shape_cast %168 : vector<1xf32> to vector<1x1xf32>
    %cst_77 = arith.constant 8.192000e+03 : f32
    %170 = vector.broadcast %cst_77 : f32 to vector<1x1xf32>
    %171 = arith.divf %169, %170 : vector<1x1xf32>
    %cst_78 = arith.constant dense<0.000000e+00> : vector<1xf32>
    %172 = vector.multi_reduction <add>, %167, %cst_78 [1] : vector<1x128xf32> to vector<1xf32>
    %173 = vector.shape_cast %172 : vector<1xf32> to vector<1x1xf32>
    %cst_79 = arith.constant 8.192000e+03 : f32
    %174 = vector.broadcast %cst_79 : f32 to vector<1x1xf32>
    %175 = arith.divf %173, %174 : vector<1x1xf32>
    %176 = arith.mulf %171, %171 : vector<1x1xf32>
    %177 = arith.subf %175, %176 : vector<1x1xf32>
    %cst_80 = arith.constant 0.000000e+00 : f32
    %178 = vector.broadcast %cst_80 : f32 to vector<1x1xf32>
    %179 = arith.maximumf %177, %178 : vector<1x1xf32>
    %cst_81 = arith.constant 9.99999974E-6 : f32
    %180 = vector.broadcast %cst_81 : f32 to vector<1x1xf32>
    %181 = arith.addf %179, %180 : vector<1x1xf32>
    %182 = math.rsqrt %181 : vector<1x1xf32>
    %183 = vector.broadcast %182 : vector<1x1xf32> to vector<1x128xf32>
    %184 = arith.mulf %183, %161 : vector<1x128xf32>
    %185 = vector.broadcast %171 : vector<1x1xf32> to vector<1x128xf32>
    %186 = arith.mulf %185, %184 : vector<1x128xf32>
    %187 = arith.subf %162, %186 : vector<1x128xf32>
    %188 = vector.broadcast %184 : vector<1x128xf32> to vector<256x128xf32>
    %189 = arith.mulf %160, %188 : vector<256x128xf32>
    %190 = vector.broadcast %187 : vector<1x128xf32> to vector<256x128xf32>
    %191 = arith.addf %189, %190 : vector<256x128xf32>
    %192 = arith.addf %191, %1 : vector<256x128xf32>
    %cst_82 = arith.constant 0.000000e+00 : f32
    %193 = vector.broadcast %cst_82 : f32 to vector<256x128xf32>
    %194 = arith.maximumf %192, %193 : vector<256x128xf32>
    %c0_83 = arith.constant 0 : index
    %c0_84 = arith.constant 0 : index
    %c0_85 = arith.constant 0 : index
    %195 = vector.load %arg11[%c0_83, %c0_84, %c0_85] : memref<1x256x128xf32, #tpu.memory_space<vmem>>, vector<1x256x128xf32>
    %196 = vector.shape_cast %195 : vector<1x256x128xf32> to vector<256x128xf32>
    %197 = vector.shape_cast %194 : vector<256x128xf32> to vector<1x256x128xf32>
    tpu.vector_store %arg11[%c0_83, %c0_84, %c0_85], %197 {strides = array<i32>} : memref<1x256x128xf32, #tpu.memory_space<vmem>>, vector<1x256x128xf32>,
    return
  }
  func.func @transform_0(%arg0: i32) -> (i32, i32, i32) {
    %c0_i32 = arith.constant 0 : i32
    %c0_i32_0 = arith.constant 0 : i32
    %c0_i32_1 = arith.constant 0 : i32
    return %arg0, %c0_i32, %c0_i32_0 : i32, i32, i32
  }
  func.func @transform_1(%arg0: i32) -> (i32, i32) {
    %c0_i32 = arith.constant 0 : i32
    %c0_i32_0 = arith.constant 0 : i32
    %c0_i32_1 = arith.constant 0 : i32
    return %c0_i32, %c0_i32_0 : i32, i32
  }
  func.func @transform_2(%arg0: i32) -> (i32, i32) {
    %c0_i32 = arith.constant 0 : i32
    %c0_i32_0 = arith.constant 0 : i32
    %c0_i32_1 = arith.constant 0 : i32
    return %c0_i32, %c0_i32_0 : i32, i32
  }
  func.func @transform_3(%arg0: i32) -> (i32, i32) {
    %c0_i32 = arith.constant 0 : i32
    %c0_i32_0 = arith.constant 0 : i32
    %c0_i32_1 = arith.constant 0 : i32
    return %c0_i32, %c0_i32_0 : i32, i32
  }
  func.func @transform_4(%arg0: i32) -> (i32, i32, i32) {
    %c0_i32 = arith.constant 0 : i32
    %c0_i32_0 = arith.constant 0 : i32
    %c0_i32_1 = arith.constant 0 : i32
    %c0_i32_2 = arith.constant 0 : i32
    return %c0_i32, %c0_i32_0, %c0_i32_1 : i32, i32, i32
  }
  func.func @transform_5(%arg0: i32) -> (i32, i32) {
    %c0_i32 = arith.constant 0 : i32
    %c0_i32_0 = arith.constant 0 : i32
    %c0_i32_1 = arith.constant 0 : i32
    return %c0_i32, %c0_i32_0 : i32, i32
  }
  func.func @transform_6(%arg0: i32) -> (i32, i32) {
    %c0_i32 = arith.constant 0 : i32
    %c0_i32_0 = arith.constant 0 : i32
    %c0_i32_1 = arith.constant 0 : i32
    return %c0_i32, %c0_i32_0 : i32, i32
  }
  func.func @transform_7(%arg0: i32) -> (i32, i32) {
    %c0_i32 = arith.constant 0 : i32
    %c0_i32_0 = arith.constant 0 : i32
    %c0_i32_1 = arith.constant 0 : i32
    return %c0_i32, %c0_i32_0 : i32, i32
  }
  func.func @transform_8(%arg0: i32) -> (i32, i32) {
    %c0_i32 = arith.constant 0 : i32
    %c0_i32_0 = arith.constant 0 : i32
    %c0_i32_1 = arith.constant 0 : i32
    return %c0_i32, %c0_i32_0 : i32, i32
  }
  func.func @transform_9(%arg0: i32) -> (i32, i32) {
    %c0_i32 = arith.constant 0 : i32
    %c0_i32_0 = arith.constant 0 : i32
    %c0_i32_1 = arith.constant 0 : i32
    return %c0_i32, %c0_i32_0 : i32, i32
  }
  func.func @transform_10(%arg0: i32) -> (i32, i32, i32) {
    %c0_i32 = arith.constant 0 : i32
    %c0_i32_0 = arith.constant 0 : i32
    %c0_i32_1 = arith.constant 0 : i32
    return %arg0, %c0_i32, %c0_i32_0 : i32, i32, i32
  }
}

</mosaic_0001>

<bundles_post_ra>
// kernel: _bottleneck_forward.1
= control target key start
LH: loop header
LB: loop body
LE: loop exit
PB: predicated region body
PF: predicated region fallthrough
CT: control target
= control target key end

     0   :  { %s6792_s13 = smov 0   ;;  %s9050_s0 = inlined_call_operand.vmem [shape: f32[2,256,128], index: 0, kind: input, shape index: {}, may-alias: {0,10}]   ;;  %s9051_s1 = inlined_call_operand.vmem [shape: bf16[128,128], index: 1, kind: input, shape index: {}]   ;;  %s9052_s2 = inlined_call_operand.vmem [shape: f32[1,128], index: 2, kind: input, shape index: {}]   ;;  %s9053_s3 = inlined_call_operand.vmem [shape: f32[1,128], index: 3, kind: input, shape index: {}]   ;;  %s9054_s4 = inlined_call_operand.vmem [shape: bf16[9,128,128], index: 4, kind: input, shape index: {}]   ;;  %s9055_s5 = inlined_call_operand.vmem [shape: f32[1,128], index: 5, kind: input, shape index: {}]   ;;  %s9056_s6 = inlined_call_operand.vmem [shape: f32[1,128], index: 6, kind: input, shape index: {}]   ;;  %s9057_s7 = inlined_call_operand.vmem [shape: bf16[128,128], index: 7, kind: input, shape index: {}]   ;;  %s9058_s8 = inlined_call_operand.vmem [shape: f32[1,128], index: 8, kind: input, shape index: {}]   ;;  %s9059_s9 = inlined_call_operand.vmem [shape: f32[1,128], index: 9, kind: input, shape index: {}]   ;;  %s9060_s10 = inlined_call_operand.vmem [shape: f32[2,256,128], index: 10, kind: output, shape index: {}, may-alias: {0,10}]  }
   0x1 LB: > { %s4890_s14 = sadd.s32 4294967295, %s6733_s13   ;;  %p4894_p0 = scmp.ge.s32.totalorder %s6733_s13, 1  ;;  %s6733_s13 = sphi %s6792_s13, %s20_s13  }
   0x2   : > { %p312_p1 = scmp.lt.s32.totalorder %s6733_s13, 3 }
   0x4   : > { %p313_p2 = pnand %p4894_p0, %p312_p1 }
   0x6   : > { %316 = sbr.rel (%p313_p2) target bundleno = 1807 (0x70f), region = 60 }
   0xd   : > { %v6593_v0 = vld [vmem:[%s9051_s1] sm:$0xff]   ;;  %p350_p3 = scmp.lt.s32.totalorder %s4890_s14, 1  ;;  %v6594_v1 = vld [vmem:[%s9051_s1 + $0x8] sm:$0xff]   ;;  %v6595_v2 = vld [vmem:[%s9051_s1 + $0x10] sm:$0xff]   ;;  %vm1346_vm0 = vcmask 1040384   ;;  %vm1571_vm1 = vcmask 1046528  }
   0xe   : > { %5783 = vmatprep.subr.bf16.mxu0 %v6593_v0  ;;  %v6596_v3 = vld [vmem:[%s9051_s1 + $0x18] sm:$0xff]   ;;  %v6597_v7 = vld [vmem:[%s9051_s1 + $0x20] sm:$0xff]   ;;  %v6598_v8 = vld [vmem:[%s9051_s1 + $0x28] sm:$0xff]   ;;  %vm9113_vm7 = vmmov 1  }
   0xf   : > { %s9380_s14 = smov (!%p350_p3, %s4890_s14), 1  ;;  %5784 = vmatpush3.bf16.msra.mxu0 %v6593_v0  ;;  %v6599_v9 = vld [vmem:[%s9051_s1 + $0x30] sm:$0xff]   ;;  %v6600_v10 = vld [vmem:[%s9051_s1 + $0x38] sm:$0xff]  }
  0x10   : > { %5785 = vmatprep.subr.bf16.mxu0 %v6594_v1  ;;  %s5485_s21 = sshll.u32 %s9380_s14, 8 }
  0x11   : > { %s6817_s24 = scalar_lea.vmem %s9050_s0, %s5485_s21  ;;  %s8966_s15 = scalar_lea.vmem %s9060_s10, %s5485_s21 }
  0x12   : > { %v361_v4 = vld [vmem:[%s6817_s24] sm:$0xff]  ;;  %v362_v5 = vld [vmem:[%s6817_s24 + $0x8] sm:$0xff]  ;;  %v363_v11 = vld [vmem:[%s6817_s24 + $0x10] sm:$0xff] }
  0x13   : > { %5786 = vmatpush3.bf16.msra.mxu0 %v6594_v1  ;;  %v393_v6 = vpack.c.bf16 %v362_v5, %v361_v4  ;;  %v364_v12 = vld [vmem:[%s6817_s24 + $0x18] sm:$0xff]  ;;  %v365_v13 = vld [vmem:[%s6817_s24 + $0x20] sm:$0xff]  ;;  %v366_v14 = vld [vmem:[%s6817_s24 + $0x28] sm:$0xff] }
  0x14   : > { %5787 = vmatprep.subr.bf16.mxu0 %v6595_v2  ;;  %v394_v15 = vpack.c.bf16 %v364_v12, %v363_v11  ;;  %v395_v16 = vpack.c.bf16 %v366_v14, %v365_v13  ;;  %v367_v17 = vld [vmem:[%s6817_s24 + $0x30] sm:$0xff]  ;;  %v368_v18 = vld [vmem:[%s6817_s24 + $0x38] sm:$0xff]  ;;  %v369_v19 = vld [vmem:[%s6817_s24 + $0x40] sm:$0xff] }
  0x15   : > { %5799 = vmatprep.mubr.bf16.mxu0 %v393_v6  ;;  %v370_v20 = vld [vmem:[%s6817_s24 + $0x48] sm:$0xff]  ;;  %v396_v21 = vpack.c.bf16 %v368_v18, %v367_v17  ;;  %v371_v23 = vld [vmem:[%s6817_s24 + $0x50] sm:$0xff]  ;;  %v372_v24 = vld [vmem:[%s6817_s24 + $0x58] sm:$0xff] }
  0x16   : > { %v397_v22 = vpack.c.bf16 %v370_v20, %v369_v19  ;;  %v373_v25 = vld [vmem:[%s6817_s24 + $0x60] sm:$0xff]  ;;  %v374_v26 = vld [vmem:[%s6817_s24 + $0x68] sm:$0xff]  ;;  %v398_v27 = vpack.c.bf16 %v372_v24, %v371_v23  ;;  %v375_v29 = vld [vmem:[%s6817_s24 + $0x70] sm:$0xff] }
  0x17   : > { %5788 = vmatpush3.bf16.msra.mxu0 %v6595_v2  ;;  %v399_v28 = vpack.c.bf16 %v374_v26, %v373_v25  ;;  %v376_v30 = vld [vmem:[%s6817_s24 + $0x78] sm:$0xff]  ;;  %v377_v31 = vld [vmem:[%s6817_s24 + $0x80] sm:$0xff]  ;;  %v378_v32 = vld [vmem:[%s6817_s24 + $0x88] sm:$0xff] }
  0x18   : > { %5789 = vmatprep.subr.bf16.mxu0 %v6596_v3  ;;  %v400_v33 = vpack.c.bf16 %v376_v30, %v375_v29  ;;  %v401_v34 = vpack.c.bf16 %v378_v32, %v377_v31  ;;  %v379_v35 = vld [vmem:[%s6817_s24 + $0x90] sm:$0xff]  ;;  %v380_v36 = vld [vmem:[%s6817_s24 + $0x98] sm:$0xff]  ;;  %v381_v37 = vld [vmem:[%s6817_s24 + $0xa0] sm:$0xff] }
  0x19   : > { %v382_v38 = vld [vmem:[%s6817_s24 + $0xa8] sm:$0xff]  ;;  %v402_v39 = vpack.c.bf16 %v380_v36, %v379_v35  ;;  %v383_v41 = vld [vmem:[%s6817_s24 + $0xb0] sm:$0xff]  ;;  %v384_v42 = vld [vmem:[%s6817_s24 + $0xb8] sm:$0xff] }
  0x1a   : > { %v403_v40 = vpack.c.bf16 %v382_v38, %v381_v37  ;;  %v385_v43 = vld [vmem:[%s6817_s24 + $0xc0] sm:$0xff]  ;;  %v386_v44 = vld [vmem:[%s6817_s24 + $0xc8] sm:$0xff]  ;;  %v404_v45 = vpack.c.bf16 %v384_v42, %v383_v41  ;;  %v387_v47 = vld [vmem:[%s6817_s24 + $0xd0] sm:$0xff] }
  0x1b   : > { %5790 = vmatpush3.bf16.msra.mxu0 %v6596_v3  ;;  %v405_v46 = vpack.c.bf16 %v386_v44, %v385_v43  ;;  %v388_v48 = vld [vmem:[%s6817_s24 + $0xd8] sm:$0xff]  ;;  %v389_v49 = vld [vmem:[%s6817_s24 + $0xe0] sm:$0xff]  ;;  %v390_v50 = vld [vmem:[%s6817_s24 + $0xe8] sm:$0xff] }
  0x1c   : > { %5791 = vmatprep.subr.bf16.mxu0 %v6597_v7  ;;  %v406_v51 = vpack.c.bf16 %v388_v48, %v387_v47  ;;  %v407_v52 = vpack.c.bf16 %v390_v50, %v389_v49  ;;  %v391_v53 = vld [vmem:[%s6817_s24 + $0xf0] sm:$0xff]  ;;  %v392_v54 = vld [vmem:[%s6817_s24 + $0xf8] sm:$0xff] }
  0x1d   : > { %v408_v55 = vpack.c.bf16 %v392_v54, %v391_v53 }
  0x1f   : > { %5792 = vmatpush3.bf16.msra.mxu0 %v6597_v7 }
  0x20   : > { %5793 = vmatprep.subr.bf16.mxu0 %v6598_v8 }
  0x23   : > { %5794 = vmatpush3.bf16.msra.mxu0 %v6598_v8 }
  0x24   : > { %5795 = vmatprep.subr.bf16.mxu0 %v6599_v9 }
  0x27   : > { %5796 = vmatpush3.bf16.msra.mxu0 %v6599_v9 }
  0x28   : > { %5797 = vmatprep.subr.bf16.mxu0 %v6600_v10 }
  0x2b   : > { %5798 = vmatpush3.bf16.msra.mxu0 %v6600_v10 }
  0x2e   : > { %5800 = vmatmul.mubr.bf16.vlgmr.msra.gmra.mrb[0].mxu0 %v394_v15 }
  0x2f   : > { %5803 = vmatprep.mubr.bf16.mxu0 %v395_v16 }
  0x36   : > { %5804 = vmatmul.mubr.bf16.gmra.mrb[4].mxu0 %v396_v21 }
  0x37   : > { %5807 = vmatprep.mubr.bf16.mxu0 %v397_v22 }
  0x3e   : > { %5808 = vmatmul.mubr.bf16.gmra.mrb[8].mxu0 %v398_v27 }
  0x3f   : > { %5811 = vmatprep.mubr.bf16.mxu0 %v399_v28 }
  0x46   : > { %5812 = vmatmul.mubr.bf16.gmra.mrb[12].mxu0 %v400_v33 }
  0x47   : > { %5815 = vmatprep.mubr.bf16.mxu0 %v401_v34 }
  0x4e   : > { %5816 = vmatmul.mubr.bf16.gmra.mrb[16].mxu0 %v402_v39 }
  0x4f   : > { %5819 = vmatprep.mubr.bf16.mxu0 %v403_v40 }
  0x56   : > { %5820 = vmatmul.mubr.bf16.gmra.mrb[20].mxu0 %v404_v45 }
  0x57   : > { %5823 = vmatprep.mubr.bf16.mxu0 %v405_v46 }
  0x5e   : > { %5824 = vmatmul.mubr.bf16.gmra.mrb[24].mxu0 %v406_v51 }
  0x5f   : > { %5827 = vmatprep.mubr.bf16.mxu0 %v407_v52 }
  0x66   : > { %5828 = vmatmul.mubr.bf16.gmra.mrb[28].mxu0 %v408_v55 }
 0x101   : > { %v6866_v56 = vpop.f32.mrb[0].mxu0 }
 0x102   : > { %v6868_v57 = vpop.f32.mrb[1].mxu0  ;;  %v675_v63 = vmul.f32 %v6866_v56, %v6866_v56 }
 0x103   : > { %v6870_v58 = vpop.f32.mrb[2].mxu0  ;;  %v673_v60 = vmul.f32 %v6868_v57, %v6868_v57 }
 0x104   : > { %v6872_v59 = vpop.f32.mrb[3].mxu0  ;;  %v676_v2 = vmul.f32 %v6870_v58, %v6870_v58 }
 0x105   : > { %v636_v61 = vadd.f32 %v6872_v59, %v6868_v57  ;;  %v674_v62 = vmul.f32 %v6872_v59, %v6872_v59 }
 0x107   : > { %v637_v0 = vadd.f32 %v6866_v56, %v636_v61  ;;  %v705_v1 = vadd.f32 %v674_v62, %v673_v60 }
 0x109   : > { %v706_v3 = vadd.f32 %v705_v1, %v675_v63  ;;  %v6885_v4 = vpop.f32.mrb[4].mxu0  ;;  %v638_v5 = vadd.f32 %v6870_v58, %v637_v0 }
 0x10a   : > { %v6888_v6 = vpop.f32.mrb[5].mxu0  ;;  %v679_v15 = vmul.f32 %v6885_v4, %v6885_v4 }
 0x10b   : > { %v639_v7 = vadd.f32 %v638_v5, %v6888_v6  ;;  %v677_v8 = vmul.f32 %v6888_v6, %v6888_v6  ;;  %v707_v9 = vadd.f32 %v706_v3, %v676_v2  ;;  %v6893_v10 = vpop.f32.mrb[6].mxu0 }
 0x10c   : > { %v6895_v11 = vpop.f32.mrb[7].mxu0  ;;  %v680_v18 = vmul.f32 %v6893_v10, %v6893_v10 }
 0x10d   : > { %v708_v12 = vadd.f32 %v707_v9, %v677_v8  ;;  %v640_v13 = vadd.f32 %v639_v7, %v6895_v11  ;;  %v678_v14 = vmul.f32 %v6895_v11, %v6895_v11 }
 0x10f   : > { %v641_v16 = vadd.f32 %v6885_v4, %v640_v13  ;;  %v709_v17 = vadd.f32 %v708_v12, %v678_v14 }
 0x111   : > { %v710_v19 = vadd.f32 %v709_v17, %v679_v15  ;;  %v6905_v20 = vpop.f32.mrb[8].mxu0  ;;  %v642_v21 = vadd.f32 %v6893_v10, %v641_v16 }
 0x112   : > { %v6908_v22 = vpop.f32.mrb[9].mxu0  ;;  %v683_v31 = vmul.f32 %v6905_v20, %v6905_v20 }
 0x113   : > { %v643_v23 = vadd.f32 %v642_v21, %v6908_v22  ;;  %v681_v24 = vmul.f32 %v6908_v22, %v6908_v22  ;;  %v711_v25 = vadd.f32 %v710_v19, %v680_v18  ;;  %v6913_v26 = vpop.f32.mrb[10].mxu0 }
 0x114   : > { %v6915_v27 = vpop.f32.mrb[11].mxu0  ;;  %v684_v34 = vmul.f32 %v6913_v26, %v6913_v26 }
 0x115   : > { %v712_v28 = vadd.f32 %v711_v25, %v681_v24  ;;  %v644_v29 = vadd.f32 %v643_v23, %v6915_v27  ;;  %v682_v30 = vmul.f32 %v6915_v27, %v6915_v27 }
 0x117   : > { %v645_v32 = vadd.f32 %v6905_v20, %v644_v29  ;;  %v713_v33 = vadd.f32 %v712_v28, %v682_v30 }
 0x119   : > { %v714_v35 = vadd.f32 %v713_v33, %v683_v31  ;;  %v6925_v36 = vpop.f32.mrb[12].mxu0  ;;  %v646_v37 = vadd.f32 %v6913_v26, %v645_v32 }
 0x11a   : > { %v6928_v38 = vpop.f32.mrb[13].mxu0  ;;  %v687_v47 = vmul.f32 %v6925_v36, %v6925_v36 }
 0x11b   : > { %v647_v39 = vadd.f32 %v646_v37, %v6928_v38  ;;  %v685_v40 = vmul.f32 %v6928_v38, %v6928_v38  ;;  %v715_v41 = vadd.f32 %v714_v35, %v684_v34  ;;  %v6933_v42 = vpop.f32.mrb[14].mxu0 }
 0x11c   : > { %v6935_v43 = vpop.f32.mrb[15].mxu0  ;;  %v688_v50 = vmul.f32 %v6933_v42, %v6933_v42 }
 0x11d   : > { %v716_v44 = vadd.f32 %v715_v41, %v685_v40  ;;  %v648_v45 = vadd.f32 %v647_v39, %v6935_v43  ;;  %v686_v46 = vmul.f32 %v6935_v43, %v6935_v43 }
 0x11f   : > { %v649_v48 = vadd.f32 %v6925_v36, %v648_v45  ;;  %v717_v49 = vadd.f32 %v716_v44, %v686_v46 }
 0x121   : > { %v718_v51 = vadd.f32 %v717_v49, %v687_v47  ;;  %v6945_v52 = vpop.f32.mrb[16].mxu0  ;;  %v650_v53 = vadd.f32 %v6933_v42, %v649_v48 }
 0x122   : > { %v6948_v54 = vpop.f32.mrb[17].mxu0  ;;  %v691_v3 = vmul.f32 %v6945_v52, %v6945_v52 }
 0x123   : > { %v651_v55 = vadd.f32 %v650_v53, %v6948_v54  ;;  %v689_v60 = vmul.f32 %v6948_v54, %v6948_v54  ;;  %v719_v61 = vadd.f32 %v718_v51, %v688_v50  ;;  %v6953_v62 = vpop.f32.mrb[18].mxu0 }
 0x124   : > { %v6955_v63 = vpop.f32.mrb[19].mxu0  ;;  %v692_v8 = vmul.f32 %v6953_v62, %v6953_v62 }
 0x125   : > { %v720_v0 = vadd.f32 %v719_v61, %v689_v60  ;;  %v652_v1 = vadd.f32 %v651_v55, %v6955_v63  ;;  %v690_v2 = vmul.f32 %v6955_v63, %v6955_v63 }
 0x127   : > { %v653_v5 = vadd.f32 %v6945_v52, %v652_v1  ;;  %v721_v7 = vadd.f32 %v720_v0, %v690_v2 }
 0x129   : > { %v722_v9 = vadd.f32 %v721_v7, %v691_v3  ;;  %v6965_v12 = vpop.f32.mrb[20].mxu0  ;;  %v654_v13 = vadd.f32 %v6953_v62, %v653_v5 }
 0x12a   : > { %v6968_v14 = vpop.f32.mrb[21].mxu0  ;;  %v695_v25 = vmul.f32 %v6965_v12, %v6965_v12 }
 0x12b   : > { %v655_v15 = vadd.f32 %v654_v13, %v6968_v14  ;;  %v693_v16 = vmul.f32 %v6968_v14, %v6968_v14  ;;  %v723_v17 = vadd.f32 %v722_v9, %v692_v8  ;;  %v6973_v18 = vpop.f32.mrb[22].mxu0 }
 0x12c   : > { %v6975_v19 = vpop.f32.mrb[23].mxu0  ;;  %v696_v30 = vmul.f32 %v6973_v18, %v6973_v18 }
 0x12d   : > { %v724_v21 = vadd.f32 %v723_v17, %v693_v16  ;;  %v656_v23 = vadd.f32 %v655_v15, %v6975_v19  ;;  %v694_v24 = vmul.f32 %v6975_v19, %v6975_v19 }
 0x12f   : > { %v657_v28 = vadd.f32 %v6965_v12, %v656_v23  ;;  %v725_v29 = vadd.f32 %v724_v21, %v694_v24 }
 0x131   : > { %v726_v31 = vadd.f32 %v725_v29, %v695_v25  ;;  %v6985_v32 = vpop.f32.mrb[24].mxu0  ;;  %v658_v33 = vadd.f32 %v6973_v18, %v657_v28 }
 0x132   : > { %v6988_v34 = vpop.f32.mrb[25].mxu0  ;;  %v699_v47 = vmul.f32 %v6985_v32, %v6985_v32 }
 0x133   : > { %v659_v35 = vadd.f32 %v658_v33, %v6988_v34  ;;  %v697_v37 = vmul.f32 %v6988_v34, %v6988_v34  ;;  %v727_v39 = vadd.f32 %v726_v31, %v696_v30  ;;  %v6993_v40 = vpop.f32.mrb[26].mxu0 }
 0x134   : > { %v6995_v41 = vpop.f32.mrb[27].mxu0  ;;  %v700_v50 = vmul.f32 %v6993_v40, %v6993_v40 }
 0x135   : > { %v728_v44 = vadd.f32 %v727_v39, %v697_v37  ;;  %v660_v45 = vadd.f32 %v659_v35, %v6995_v41  ;;  %v698_v46 = vmul.f32 %v6995_v41, %v6995_v41 }
 0x137   : > { %v661_v48 = vadd.f32 %v6985_v32, %v660_v45  ;;  %v729_v49 = vadd.f32 %v728_v44, %v698_v46  ;;  %v6601_v46 = vld [vmem:[%s9054_s4 + $0x40] sm:$0xff]  }
 0x138   : > { %5831 = vmatprep.subr.bf16.mxu0 %v6601_v46 }
 0x139   : > { %v730_v51 = vadd.f32 %v729_v49, %v699_v47  ;;  %v7005_v53 = vpop.f32.mrb[28].mxu0  ;;  %v662_v55 = vadd.f32 %v6993_v40, %v661_v48  ;;  %5832 = vmatpush3.bf16.msra.mxu0 %v6601_v46  ;;  %v6602_v47 = vld [vmem:[%s9054_s4 + $0xc0] sm:$0xff]   ;;  %v6603_v48 = vld [vmem:[%s9054_s4 + $0x48] sm:$0xff]  }
 0x13a   : > { %v7008_v60 = vpop.f32.mrb[29].mxu0  ;;  %v703_v9 = vmul.f32 %v7005_v53, %v7005_v53  ;;  %6311 = vmatprep.subr.bf16.mxu1 %v6602_v47  ;;  %5833 = vmatprep.subr.bf16.mxu0 %v6603_v48  ;;  %v6604_v49 = vld [vmem:[%s9054_s4 + $0xc8] sm:$0xff]  }
 0x13b   : > { %v663_v61 = vadd.f32 %v662_v55, %v7008_v60  ;;  %v701_v0 = vmul.f32 %v7008_v60, %v7008_v60  ;;  %v731_v1 = vadd.f32 %v730_v51, %v700_v50  ;;  %v7013_v2 = vpop.f32.mrb[30].mxu0  ;;  %6319 = vmatpush3.bf16.msra.mxu1 %v6602_v47  ;;  %v6605_v50 = vld [vmem:[%s9054_s4 + $0x50] sm:$0xff]   ;;  %v6607_v55 = vld [vmem:[%s9054_s4 + $0x58] sm:$0xff]  }
 0x13c   : > { %v7015_v3 = vpop.f32.mrb[31].mxu0  ;;  %v704_v16 = vmul.f32 %v7013_v2, %v7013_v2  ;;  %6312 = vmatprep.subr.bf16.mxu1 %v6604_v49  ;;  %v6606_v51 = vld [vmem:[%s9054_s4 + $0xd0] sm:$0xff]  }
 0x13d   : > { %v732_v5 = vadd.f32 %v731_v1, %v701_v0  ;;  %v664_v7 = vadd.f32 %v663_v61, %v7015_v3  ;;  %v702_v8 = vmul.f32 %v7015_v3, %v7015_v3  ;;  %5834 = vmatpush3.bf16.msra.mxu0 %v6603_v48  ;;  %v6608_v61 = vld [vmem:[%s9054_s4 + $0xd8] sm:$0xff]   ;;  %v6609_v0 = vld [vmem:[%s9054_s4 + $0x60] sm:$0xff]  }
 0x13e   : > { %5835 = vmatprep.subr.bf16.mxu0 %v6605_v50  ;;  %v6610_v1 = vld [vmem:[%s9054_s4 + $0xe0] sm:$0xff]  }
 0x13f   : > { %v665_v13 = vadd.f32 %v7005_v53, %v664_v7  ;;  %v733_v15 = vadd.f32 %v732_v5, %v702_v8  ;;  %6320 = vmatpush3.bf16.msra.mxu1 %v6604_v49  ;;  %v6611_v5 = vld [vmem:[%s9054_s4 + $0x68] sm:$0xff]   ;;  %v6613_v8 = vld [vmem:[%s9054_s4 + $0x70] sm:$0xff]  }
 0x140   : > { %6313 = vmatprep.subr.bf16.mxu1 %v6606_v51  ;;  %v6612_v7 = vld [vmem:[%s9054_s4 + $0xe8] sm:$0xff]  }
 0x141   : > { %v734_v17 = vadd.f32 %v733_v15, %v703_v9  ;;  %v666_v21 = vadd.f32 %v7013_v2, %v665_v13  ;;  %5836 = vmatpush3.bf16.msra.mxu0 %v6605_v50  ;;  %v6614_v9 = vld [vmem:[%s9054_s4 + $0xf0] sm:$0xff]   ;;  %v6615_v13 = vld [vmem:[%s9054_s4 + $0x78] sm:$0xff]   ;;  %v635_v50 = vld [vmem:[%s9053_s3] sm:$0x1] }
 0x142   : > { %5837 = vmatprep.subr.bf16.mxu0 %v6607_v55  ;;  %v6616_v15 = vld [vmem:[%s9054_s4 + $0xf8] sm:$0xff]  }
 0x143   : > { %v667_v23 = vrot.slane %v666_v21, 4  ;;  %v735_v24 = vadd.f32 %v734_v17, %v704_v16  ;;  %6321 = vmatpush3.bf16.msra.mxu1 %v6606_v51  ;;  %v9061_v16 = vmov 0   ;;  %v7078_v17 = vld [vmem:[%s9054_s4 + $0x100] sm:$0xff]  }
 0x144   : > { %6314 = vmatprep.subr.bf16.mxu1 %v6608_v61  ;;  %5847 = vmatprep.mubr.bf16.mxu0 %v9061_v16 }
 0x145   : > { %v668_v25 = vadd.f32 %v667_v23, %v666_v21  ;;  %v736_v28 = vrot.slane %v735_v24, 4  ;;  %5838 = vmatpush3.bf16.msra.mxu0 %v6607_v55  ;;  %v7084_v21 = vld [vmem:[%s9054_s4] sm:$0xff]  }
 0x146   : > { %5839 = vmatprep.subr.bf16.mxu0 %v6609_v0 }
 0x147   : > { %v669_v29 = vrot.slane %v668_v25, 2  ;;  %v737_v30 = vadd.f32 %v736_v28, %v735_v24  ;;  %6322 = vmatpush3.bf16.msra.mxu1 %v6608_v61 }
 0x148   : > { %6315 = vmatprep.subr.bf16.mxu1 %v6610_v1 }
 0x149   : > { %v670_v31 = vadd.f32 %v669_v29, %v668_v25  ;;  %v738_v33 = vrot.slane %v737_v30, 2  ;;  %5840 = vmatpush3.bf16.msra.mxu0 %v6609_v0 }
 0x14a   : > { %5841 = vmatprep.subr.bf16.mxu0 %v6611_v5 }
 0x14b   : > { %v671_v35 = vrot.slane %v670_v31, 1  ;;  %v739_v37 = vadd.f32 %v738_v33, %v737_v30  ;;  %6323 = vmatpush3.bf16.msra.mxu1 %v6610_v1 }
 0x14c   : > { %6316 = vmatprep.subr.bf16.mxu1 %v6612_v7 }
 0x14d   : > { %v672_v39 = vadd.f32 %v671_v35, %v670_v31  ;;  %v740_v44 = vrot.slane %v739_v37, 1  ;;  %5842 = vmatpush3.bf16.msra.mxu0 %v6611_v5  ;;  %v758_v35 = vlaneseq }
 0x14e   : > { %5843 = vmatprep.subr.bf16.mxu0 %v6613_v8 }
 0x14f   : > { %742 = vadd.xlane.f32.xlu0 %v672_v39  ;;  %v741_v45 = vadd.f32 %v740_v44, %v739_v37  ;;  %6324 = vmatpush3.bf16.msra.mxu1 %v6612_v7  ;;  %v634_v37 = vld [vmem:[%s9052_s2] sm:$0x1]  ;;  %v7090_v44 = vshrl.u32 %v758_v35, 7 }
 0x150   : > { %6317 = vmatprep.subr.bf16.mxu1 %v6614_v9 }
 0x151   : > { %5844 = vmatpush3.bf16.msra.mxu0 %v6613_v8  ;;  %9153 = vst [vmem:[#allocation2_spill] sm:$0xff] %v7090_v44  ;;  %v7093_v46 = vsub.s32 0, %v7090_v44  ;;  %v7096_v48 = vadd.s32 128, %v7090_v44  ;;  %v7099_v49 = vadd.s32 144, %v7090_v44  ;;  %v7105_v51 = vadd.s32 160, %v7090_v44 }
 0x152   : > { %5845 = vmatprep.subr.bf16.mxu0 %v6615_v13  ;;  %v7108_v55 = vadd.s32 176, %v7090_v44  ;;  %v7111_v61 = vadd.s32 192, %v7090_v44  ;;  %v7114_v0 = vadd.s32 208, %v7090_v44  ;;  %v7118_v5 = vadd.s32 224, %v7090_v44 }
 0x153   : > { %746 = vadd.xlane.f32.xlu0 %v741_v45  ;;  %6325 = vmatpush3.bf16.msra.mxu1 %v6614_v9  ;;  %9154 = vst [vmem:[#allocation3_spill] sm:$0xff] %v7093_v46 }
 0x154   : > { %6318 = vmatprep.subr.bf16.mxu1 %v6616_v15  ;;  %9155 = vst [vmem:[#allocation4_spill] sm:$0xff] %v7118_v5 }
 0x155   : > { %5846 = vmatpush3.bf16.msra.mxu0 %v6615_v13 }
 0x156   : > { %5879 = vmatprep.subr.bf16.mxu0 %v7084_v21 }
 0x157   : > { %6326 = vmatpush3.bf16.msra.mxu1 %v6616_v15 }
 0x158   : > { %6023 = vmatprep.subr.bf16.mxu1 %v7078_v17 }
 0x1dc   : > { %v743_v23 = vpop.xlane.xlu0 %742 }
 0x1dd   : > { %v745_v24 = vmul.f32 0.00048828125, %v743_v23 }
 0x1df   : > { %v749_v28 = vmul.f32 %v745_v24, %v745_v24 }
 0x1e0   : > { %v747_v25 = vpop.xlane.xlu0 %746 }
 0x1e1   : > { %v748_v29 = vmul.f32 0.00048828125, %v747_v25 }
 0x1e3   : > { %v750_v30 = vsub.f32 %v748_v29, %v749_v28 }
 0x1e5   : > { %v751_v31 = vmax.f32 %v750_v30, 0.0  ;;  %v7130_v30 = vadd.s32 240, %v7090_v44 }
 0x1e7   : > { %v752_v33 = vadd.f32 1e-05, %v751_v31  ;;  %9156 = vst [vmem:[#allocation5_spill] sm:$0xff] %v7130_v30 }
 0x1e9   : > { %6681 = vrsqrt.f32 %v752_v33 }
 0x1f3   : > { %v6682_v39 = vpop.eup %6681 }
 0x1f4   : > { %v754_v45 = vmul.f32 %v6682_v39, %v634_v37 }
 0x1f6   : > { %v755_v47 = vmul.f32 %v754_v45, %v745_v24  ;;  %v761_v1 = vrot.slane %v754_v45, %v7093_v46 }
 0x1f8   : > { %v756_v7 = vsub.f32 %v635_v50, %v755_v47  ;;  %v763_v25 = vmul.f32 %v761_v1, %v6868_v57  ;;  %v764_v28 = vmul.f32 %v761_v1, %v6872_v59  ;;  %v765_v31 = vmul.f32 %v6866_v56, %v761_v1 }
 0x1f9   : > { %v766_v33 = vmul.f32 %v6870_v58, %v761_v1  ;;  %v767_v35 = vmul.f32 %v761_v1, %v6888_v6  ;;  %v768_v37 = vmul.f32 %v761_v1, %v6895_v11  ;;  %v769_v45 = vmul.f32 %v6885_v4, %v761_v1 }
 0x1fa   : > { %v799_v39 = vrot.slane %v756_v7, %v7093_v46  ;;  %v770_v57 = vmul.f32 %v6893_v10, %v761_v1  ;;  %v771_v59 = vmul.f32 %v761_v1, %v6908_v22  ;;  %v772_v47 = vmul.f32 %v761_v1, %v6915_v27 }
 0x1fb   : > { %v773_v50 = vmul.f32 %v6905_v20, %v761_v1  ;;  %v774_v56 = vmul.f32 %v6913_v26, %v761_v1  ;;  %v775_v58 = vmul.f32 %v761_v1, %v6928_v38  ;;  %v776_v6 = vmul.f32 %v761_v1, %v6935_v43 }
 0x1fc   : > { %v777_v11 = vmul.f32 %v6925_v36, %v761_v1  ;;  %v778_v7 = vmul.f32 %v6933_v42, %v761_v1  ;;  %v779_v4 = vmul.f32 %v761_v1, %v6948_v54  ;;  %v780_v10 = vmul.f32 %v761_v1, %v6955_v63 }
 0x1fd   : > { %v781_v22 = vmul.f32 %v6945_v52, %v761_v1  ;;  %v782_v27 = vmul.f32 %v6953_v62, %v761_v1  ;;  %v783_v20 = vmul.f32 %v761_v1, %v6968_v14  ;;  %v784_v26 = vmul.f32 %v761_v1, %v6975_v19 }
 0x1fe   : > { %v785_v38 = vmul.f32 %v6965_v12, %v761_v1  ;;  %v786_v43 = vmul.f32 %v6973_v18, %v761_v1  ;;  %v787_v36 = vmul.f32 %v761_v1, %v6988_v34  ;;  %v788_v42 = vmul.f32 %v761_v1, %v6995_v41 }
 0x1ff   : > { %v789_v54 = vmul.f32 %v6985_v32, %v761_v1  ;;  %v790_v63 = vmul.f32 %v6993_v40, %v761_v1  ;;  %v791_v52 = vmul.f32 %v761_v1, %v7008_v60  ;;  %v792_v62 = vmul.f32 %v761_v1, %v7015_v3 }
 0x200   : > { %v793_v14 = vmul.f32 %v7005_v53, %v761_v1  ;;  %v794_v19 = vmul.f32 %v7013_v2, %v761_v1  ;;  %v801_v12 = vadd.f32 %v799_v39, %v763_v25  ;;  %v802_v16 = vadd.f32 %v799_v39, %v764_v28 }
 0x201   : > { %v803_v18 = vadd.f32 %v799_v39, %v765_v31  ;;  %v804_v29 = vadd.f32 %v799_v39, %v766_v33  ;;  %v805_v34 = vadd.f32 %v799_v39, %v767_v35  ;;  %v806_v24 = vadd.f32 %v799_v39, %v768_v37 }
 0x202   : > { %v807_v41 = vadd.f32 %v799_v39, %v769_v45  ;;  %v808_v23 = vadd.f32 %v799_v39, %v770_v57  ;;  %v809_v32 = vadd.f32 %v799_v39, %v771_v59  ;;  %v810_v15 = vadd.f32 %v799_v39, %v772_v47 }
 0x203   : > { %v811_v40 = vadd.f32 %v799_v39, %v773_v50  ;;  %v812_v13 = vadd.f32 %v799_v39, %v774_v56  ;;  %v813_v60 = vadd.f32 %v799_v39, %v775_v58  ;;  %v814_v9 = vadd.f32 %v799_v39, %v776_v6 }
 0x204   : > { %v815_v8 = vadd.f32 %v799_v39, %v777_v11  ;;  %v816_v3 = vadd.f32 %v799_v39, %v778_v7  ;;  %v817_v46 = vadd.f32 %v799_v39, %v779_v4  ;;  %v818_v53 = vadd.f32 %v799_v39, %v780_v10 }
 0x205   : > { %v819_v44 = vadd.f32 %v799_v39, %v781_v22  ;;  %v7163_v2 = vmax.f32 %v801_v12, 0.0  ;;  %v7165_v1 = vmax.f32 %v802_v16, 0.0  ;;  %v820_v25 = vadd.f32 %v799_v39, %v782_v27 }
 0x206   : > { %v821_v28 = vadd.f32 %v799_v39, %v783_v20  ;;  %v822_v31 = vadd.f32 %v799_v39, %v784_v26  ;;  %v823_v33 = vadd.f32 %v799_v39, %v785_v38  ;;  %v824_v35 = vadd.f32 %v799_v39, %v786_v43 }
 0x207   : > { %v825_v37 = vadd.f32 %v799_v39, %v787_v36  ;;  %v826_v45 = vadd.f32 %v799_v39, %v788_v42  ;;  %v827_v57 = vadd.f32 %v799_v39, %v789_v54  ;;  %v828_v59 = vadd.f32 %v799_v39, %v790_v63 }
 0x208   : > { %v829_v47 = vadd.f32 %v799_v39, %v791_v52  ;;  %v830_v50 = vadd.f32 %v799_v39, %v792_v62  ;;  %v831_v56 = vadd.f32 %v799_v39, %v793_v14  ;;  %v832_v58 = vadd.f32 %v799_v39, %v794_v19 }
 0x209   : > { %v7167_v6 = vmax.f32 %v803_v18, 0.0  ;;  %v1347_v11 = vrot.slane %v7163_v2, 7  ;;  %v9069_v16 = vrot.slane %v7165_v1, 7  ;;  %v7171_v7 = vmax.f32 %v804_v29, 0.0 }
 0x20a   : > { %v7173_v4 = vmax.f32 %v805_v34, 0.0  ;;  %v7175_v10 = vmax.f32 %v806_v24, 0.0  ;;  %v7177_v22 = vmax.f32 %v807_v41, 0.0  ;;  %v7179_v27 = vmax.f32 %v808_v23, 0.0 }
 0x20b   : > { %9157 = vst [vmem:[#allocation6_spill] sm:$0xff] %v7171_v7  ;;  %v7181_v20 = vmax.f32 %v809_v32, 0.0  ;;  %v7183_v26 = vmax.f32 %v810_v15, 0.0  ;;  %v1349_v39 = vsel %vm1346_vm0, %v1347_v11, %v9069_v16  ;;  %v7188_v38 = vmax.f32 %v811_v40, 0.0 }
 0x20c   : > { %v7190_v29 = vmax.f32 %v812_v13, 0.0  ;;  %v7192_v43 = vmax.f32 %v813_v60, 0.0  ;;  %v7194_v24 = vmax.f32 %v814_v9, 0.0  ;;  %v7196_v36 = vmax.f32 %v815_v8, 0.0 }
 0x20d   : > { %v7198_v23 = vmax.f32 %v816_v3, 0.0  ;;  %v7200_v42 = vmax.f32 %v817_v46, 0.0  ;;  %v7202_v15 = vmax.f32 %v818_v53, 0.0  ;;  %v7204_v54 = vmax.f32 %v819_v44, 0.0 }
 0x20e   : > { %v7206_v63 = vmax.f32 %v820_v25, 0.0  ;;  %v7208_v52 = vmax.f32 %v821_v28, 0.0  ;;  %v7210_v13 = vmax.f32 %v822_v31, 0.0  ;;  %v7212_v62 = vmax.f32 %v823_v33, 0.0 }
 0x20f   : > { %v7214_v9 = vmax.f32 %v824_v35, 0.0  ;;  %v7216_v8 = vmax.f32 %v825_v37, 0.0  ;;  %v7218_v14 = vmax.f32 %v826_v45, 0.0  ;;  %v7220_v46 = vmax.f32 %v827_v57, 0.0 }
 0x210   : > { %v7222_v19 = vmax.f32 %v828_v59, 0.0  ;;  %v7224_v44 = vmax.f32 %v829_v47, 0.0  ;;  %v7226_v12 = vmax.f32 %v830_v50, 0.0  ;;  %v7228_v18 = vmax.f32 %v831_v56, 0.0 }
 0x211   : > { %v7230_v34 = vmax.f32 %v832_v58, 0.0  ;;  %v9067_v32 = vrot.slane %v7167_v6, 1  ;;  %v1577_v3 = vrot.slane %v7171_v7, 1  ;;  %v9068_v53 = vrot.slane %v7173_v4, 1 }
 0x212   : > { %9158 = vst [vmem:[#allocation7_spill] sm:$0xff] %v7228_v18  ;;  %v9160_v25 = vand.u32 15, %v7096_v48  ;;  %v9163_v45 = vand.u32 15, %v7099_v49  ;;  %v9166_v56 = vand.u32 15, %v7105_v51  ;;  %v1382_v59 = vrot.slane %v7204_v54, 7 }
 0x213   : > { %9159 = vst [vmem:[#allocation8_spill] sm:$0xff] %v7230_v34  ;;  %v1578_v47 = vsel %vm1571_vm1, %v9067_v32, %v1577_v3  ;;  %v1580_v50 = vsel %vm1571_vm1, %v1577_v3, %v9068_v53  ;;  %v1384_v32 = vrot.slane %v7206_v63, 7  ;;  %v1386_v48 = vrot.slane %v7208_v52, 7 }
 0x214   : > { %vm7240_vm2 = vcmp.ne.s32.totalorder %v9160_v25, 0  ;;  %vm7250_vm3 = vcmp.ne.s32.totalorder %v9163_v45, 0  ;;  %vm7264_vm4 = vcmp.ne.s32.totalorder %v9166_v56, 0  ;;  %v1388_v3 = vrot.slane %v7210_v13, 7 }
 0x215   : > { %v1442_v51 = vsel %vm1346_vm0, 0.0, %v1347_v11  ;;  %v1390_v56 = vrot.slane %v7212_v62, 7  ;;  %v1392_v53 = vrot.slane %v7214_v9, 7  ;;  %v1394_v58 = vrot.slane %v7216_v8, 7  ;;  %vm7338_vm8 = vmpackc.low %vm9113_vm7, %vm7240_vm2 }
 0x216   : > { %v1396_v25 = vrot.slane %v7218_v14, 7  ;;  %v1398_v45 = vrot.slane %v7220_v46, 7  ;;  %v1400_v37 = vrot.slane %v7222_v19, 7  ;;  %v1402_v35 = vrot.slane %v7224_v44, 7  ;;  %vm7351_vm9 = vmpackc.low %vm9113_vm7, %vm7250_vm3 }
 0x217   : > { %v1404_v33 = vrot.slane %v7226_v12, 7  ;;  %v1406_v31 = vrot.slane %v7228_v18, 7  ;;  %v1408_v11 = vrot.slane %v7230_v34, 7  ;;  %v7288_v60 = vpack.c.bf16 %v7165_v1, %v7163_v2  ;;  %v6627_v34 = vld [vmem:[%s9054_s4 + $0x8] sm:$0xff]   ;;  %vm7363_vm10 = vmpackc.low %vm9113_vm7, %vm7264_vm4 }
 0x218   : > { %v7290_v40 = vpack.c.bf16 %v1349_v39, %v1442_v51  ;;  %v7292_v16 = vpack.c.bf16 %v1580_v50, %v1578_v47  ;;  %v7296_v41 = vpack.c.bf16 %v7171_v7, %v7167_v6  ;;  %v1378_v5 = vrot.slane %v7200_v42, 7 }
 0x219   : > { %9169 = vst [vmem:[#allocation9_spill] sm:$0xff] %v7288_v60  ;;  %5848 = vmatmul.mubr.bf16.vlgmr.msra.gmra.mrb[32].mxu0 %v7288_v60  ;;  %v1380_v18 = vrot.slane %v7202_v15, 7  ;;  %v1385_v39 = vsel %vm1346_vm0, %v1382_v59, %v1384_v32  ;;  %v1387_v47 = vsel %vm1346_vm0, %v1384_v32, %v1386_v48  ;;  %v1389_v50 = vsel %vm1346_vm0, %v1386_v48, %v1388_v3 }
 0x21a   : > { %9170 = vst [vmem:[#allocation10_spill] sm:$0xff] %v7290_v40  ;;  %9171 = vst [vmem:[#allocation11_spill] sm:$0xff] %v7292_v16  ;;  %v9173_v51 = vand.u32 15, %v7108_v55  ;;  %5851 = vmatprep.mubr.bf16.mxu0 %v7296_v41  ;;  %v9176_v16 = vrot.slane %v7198_v23, 7  ;;  %v7318_v60 = vpack.c.bf16 %v1389_v50, %v1387_v47  ;;  %v7322_v7 = vpack.c.bf16 %v7175_v10, %v7173_v4 }
 0x21b   : > { %9172 = vst [vmem:[#allocation12_spill] sm:$0xff] %v7296_v41  ;;  %v7326_v32 = vpack.c.bf16 %v7179_v27, %v7177_v22  ;;  %v9180_v55 = vand.u32 15, %v7111_v61  ;;  %v1383_v47 = vsel %vm1346_vm0, %v1380_v18, %v1382_v59  ;;  %v1391_v50 = vsel %vm1346_vm0, %v1388_v3, %v1390_v56  ;;  %5880 = vmatpush3.bf16.msra.mxu0 %v7084_v21 }
 0x21c   : > { %vm7310_vm5 = vcmp.ne.s32.totalorder %v9173_v51, 0  ;;  %v1379_v40 = vsel %vm1346_vm0, %v9176_v16, %v1378_v5  ;;  %9177 = vst [vmem:[#allocation13_spill] sm:$0xff] %v7318_v60  ;;  %9178 = vst [vmem:[#allocation14_spill] sm:$0xff] %v7322_v7  ;;  %v1381_v51 = vsel %vm1346_vm0, %v1378_v5, %v1380_v18  ;;  %v9183_v16 = vmov 0  ;;  %5881 = vmatprep.subr.bf16.mxu0 %v6627_v34 }
 0x21d   : > { %9179 = vst [vmem:[#allocation15_spill] sm:$0xff] %v7326_v32  ;;  %vm7330_vm6 = vcmp.ne.s32.totalorder %v9180_v55, 0  ;;  %v9184_v16 = vsel %vm7338_vm8, 4294967295, %v9183_v16  ;;  %v1393_v61 = vsel %vm1346_vm0, %v1390_v56, %v1392_v53  ;;  %v7346_v55 = vpack.c.bf16 %v1381_v51, %v1379_v40  ;;  %v6618_v40 = vld [vmem:[%s9054_s4 + $0x108] sm:$0xff]   ;;  %vm7477_vm12 = vmpackc.low %vm9113_vm7, %vm7310_vm5 }
 0x21e   : > { %9185 = vst [vmem:[#allocation16_spill] sm:$0xff] %v9184_v16  ;;  %v9187_v5 = vmov 0  ;;  %v7355_v28 = vpack.c.bf16 %v1385_v39, %v1383_v47  ;;  %v7357_v41 = vpack.c.bf16 %v1393_v61, %v1391_v50  ;;  %v1395_v18 = vsel %vm1346_vm0, %v1392_v53, %v1394_v58  ;;  %vm7501_vm13 = vmpackc.low %vm9113_vm7, %vm7330_vm6 }
 0x21f   : > { %9186 = vst [vmem:[#allocation17_spill] sm:$0xff] %v7346_v55  ;;  %v9188_v5 = vsel %vm7351_vm9, 4294967295, %v9187_v5  ;;  %v9191_v21 = vmov 0  ;;  %v1397_v57 = vsel %vm1346_vm0, %v1394_v58, %v1396_v25  ;;  %v7373_v59 = vpack.c.bf16 %v7183_v26, %v7181_v20  ;;  %6007 = vmatprep.mubr.msk.bf16.mxu1 %vm7338_vm8, %v7346_v55  ;;  %5882 = vmatpush3.bf16.msra.mxu0 %v6627_v34 }
 0x220   : > { %9189 = vst [vmem:[#allocation18_spill] sm:$0xff] %v9188_v5  ;;  %9190 = vst [vmem:[#allocation19_spill] sm:$0xff] %v7355_v28  ;;  %v9192_v21 = vsel %vm7363_vm10, 4294967295, %v9191_v21  ;;  %v7377_v53 = vpack.c.bf16 %v7190_v29, %v7188_v38  ;;  %v1399_v49 = vsel %vm1346_vm0, %v1396_v25, %v1398_v45  ;;  %v7383_v3 = vpack.c.bf16 %v1397_v57, %v1395_v18 }
 0x221   : > { %9193 = vst [vmem:[#allocation20_spill] sm:$0xff] %v9192_v21  ;;  %9194 = vst [vmem:[#allocation21_spill] sm:$0xff] %v7373_v59  ;;  %v1401_v56 = vsel %vm1346_vm0, %v1398_v45, %v1400_v37  ;;  %v1403_v58 = vsel %vm1346_vm0, %v1400_v37, %v1402_v35  ;;  %v1405_v39 = vsel %vm1346_vm0, %v1402_v35, %v1404_v33  ;;  %6008 = vmatmul.mubr.msk.bf16.vlgmr.msra.gmra.mrb[0].mxu1 %vm7351_vm9, %v7355_v28  ;;  %v6628_v35 = vld [vmem:[%s9054_s4 + $0x10] sm:$0xff]  }
 0x222   : > { %9195 = vst [vmem:[#allocation22_spill] sm:$0xff] %v7377_v53  ;;  %9196 = vst [vmem:[#allocation23_spill] sm:$0xff] %v7383_v3  ;;  %v7391_v51 = vpack.c.bf16 %v1401_v56, %v1399_v49  ;;  %v7393_v47 = vpack.c.bf16 %v1405_v39, %v1403_v58  ;;  %v7397_v25 = vpack.c.bf16 %v7194_v24, %v7192_v43  ;;  %v1374_v37 = vrot.slane %v7196_v36, 7 }
 0x223   : > { %v7401_v50 = vpack.c.bf16 %v7198_v23, %v7196_v36  ;;  %6024 = vmatpush3.bf16.msra.mxu1 %v7078_v17  ;;  %6011 = vmatprep.mubr.msk.bf16.mxu1 %vm7363_vm10, %v7318_v60  ;;  %v1407_v45 = vsel %vm1346_vm0, %v1404_v33, %v1406_v31  ;;  %v1409_v61 = vsel %vm1346_vm0, %v1406_v31, %v1408_v11  ;;  %v1572_v57 = vrot.slane %v7163_v2, 1  ;;  %v6619_v17 = vld [vmem:[%s9054_s4 + $0x110] sm:$0xff]   ;;  %v9212_v60 = vld [vmem:[#allocation6_spill] sm:$0xff] }
 0x224   : > { %9197 = vst [vmem:[#allocation24_spill] sm:$0xff] %v7397_v25  ;;  %v7415_v18 = vpack.c.bf16 %v7202_v15, %v7200_v42  ;;  %6025 = vmatprep.subr.bf16.mxu1 %v6618_v40  ;;  %5852 = vmatmul.mubr.bf16.gmra.mrb[36].mxu0 %v7322_v7  ;;  %v9200_v49 = vand.u32 15, %v7114_v0  ;;  %v7428_v31 = vpack.c.bf16 %v1409_v61, %v1407_v45  ;;  %v1573_v11 = vrot.slane %v7165_v1, 1  ;;  %v6630_v45 = vld [vmem:[%s9054_s4 + $0x18] sm:$0xff]  }
 0x225   : > { %9198 = vst [vmem:[#allocation25_spill] sm:$0xff] %v7401_v50  ;;  %v7432_v33 = vpack.c.bf16 %v7206_v63, %v7204_v54  ;;  %v7436_v2 = vpack.c.bf16 %v7210_v13, %v7208_v52  ;;  %5855 = vmatprep.mubr.bf16.mxu0 %v7326_v32  ;;  %v7442_v0 = vpack.c.bf16 %v7214_v9, %v7212_v62  ;;  %v9210_v61 = vrot.slane %v7167_v6, 7 }
 0x226   : > { %9199 = vst [vmem:[#allocation26_spill] sm:$0xff] %v7415_v18  ;;  %vm7424_vm11 = vcmp.ne.s32.totalorder %v9200_v49, 0  ;;  %9203 = vst [vmem:[#allocation27_spill] sm:$0xff] %v7428_v31  ;;  %v7446_v58 = vpack.c.bf16 %v7218_v14, %v7216_v8  ;;  %v7450_v39 = vpack.c.bf16 %v7222_v19, %v7220_v46  ;;  %5883 = vmatprep.subr.bf16.mxu0 %v6628_v35  ;;  %v9211_v49 = vrot.slane %v7165_v1, 7 }
 0x227   : > { %9204 = vst [vmem:[#allocation28_spill] sm:$0xff] %v7432_v33  ;;  %9205 = vst [vmem:[#allocation29_spill] sm:$0xff] %v7436_v2  ;;  %v7457_v34 = vpack.c.bf16 %v7226_v12, %v7224_v44  ;;  %v9213_v5 = vrot.slane %v9212_v60, 7  ;;  %v9214_v28 = vmov %v9210_v61  ;;  %v9215_v55 = vrot.slane %v7173_v4, 7  ;;  %6026 = vmatpush3.bf16.msra.mxu1 %v6618_v40  ;;  %5884 = vmatpush3.bf16.msra.mxu0 %v6628_v35 }
 0x228   : > { %9206 = vst [vmem:[#allocation30_spill] sm:$0xff] %v7442_v0  ;;  %9207 = vst [vmem:[#allocation31_spill] sm:$0xff] %v7446_v58  ;;  %v1351_v21 = vsel %vm1346_vm0, %v9211_v49, %v9210_v61  ;;  %v9217_v1 = vmov 0  ;;  %v9221_v49 = vrot.slane %v7175_v10, 7  ;;  %v9223_v60 = vrot.slane %v7177_v22, 7  ;;  %6027 = vmatprep.subr.bf16.mxu1 %v6619_v17  ;;  %5885 = vmatprep.subr.bf16.mxu0 %v6630_v45 }
 0x229   : > { %9208 = vst [vmem:[#allocation32_spill] sm:$0xff] %v7450_v39  ;;  %9209 = vst [vmem:[#allocation33_spill] sm:$0xff] %v7457_v34  ;;  %v1353_v16 = vsel %vm1346_vm0, %v9214_v28, %v9213_v5  ;;  %v9216_v39 = vmov %v9213_v5  ;;  %v9218_v1 = vsel %vm7477_vm12, 4294967295, %v9217_v1  ;;  %v9222_v5 = vmov %v9215_v55  ;;  %6012 = vmatmul.mubr.msk.bf16.gmra.mrb[4].mxu1 %vm7477_vm12, %v7357_v41 }
 0x22a   : > { %v1355_v58 = vsel %vm1346_vm0, %v9216_v39, %v9215_v55  ;;  %9219 = vst [vmem:[#allocation6_spill] sm:$0xff] %v9218_v1  ;;  %v7481_v61 = vpack.c.bf16 %v1353_v16, %v1351_v21  ;;  %v1357_v28 = vsel %vm1346_vm0, %v9222_v5, %v9221_v49  ;;  %v9224_v55 = vmov %v9221_v49  ;;  %v6620_v21 = vld [vmem:[%s9054_s4 + $0x118] sm:$0xff]   ;;  %vm7605_vm15 = vmpackc.low %vm9113_vm7, %vm7424_vm11 }
 0x22b   : > { %v1359_v40 = vsel %vm1346_vm0, %v9224_v55, %v9223_v60  ;;  %v9225_v30 = vrot.slane %v7179_v27, 7  ;;  %v9226_v39 = vmov %v9223_v60  ;;  %v9227_v16 = vmov 0  ;;  %6028 = vmatpush3.bf16.msra.mxu1 %v6619_v17  ;;  %6015 = vmatprep.mubr.msk.bf16.mxu1 %vm7501_vm13, %v7383_v3 }
 0x22c   : > { %9220 = vst [vmem:[#allocation34_spill] sm:$0xff] %v7481_v61  ;;  %v9228_v16 = vsel %vm7501_vm13, 4294967295, %v9227_v16  ;;  %v7508_v49 = vpack.c.bf16 %v1357_v28, %v1355_v58  ;;  %v9232_v60 = vrot.slane %v7181_v20, 7  ;;  %v9234_v48 = vrot.slane %v7183_v26, 7  ;;  %6029 = vmatprep.subr.bf16.mxu1 %v6620_v21  ;;  %5856 = vmatmul.mubr.bf16.gmra.mrb[40].mxu0 %v7373_v59 }
 0x22d   : > { %v1361_v34 = vsel %vm1346_vm0, %v9226_v39, %v9225_v30  ;;  %9229 = vst [vmem:[#allocation35_spill] sm:$0xff] %v9228_v16  ;;  %v9233_v55 = vmov %v9225_v30  ;;  %v9236_v58 = vrot.slane %v7188_v38, 7  ;;  %5859 = vmatprep.mubr.bf16.mxu0 %v7377_v53  ;;  %v9253_v16 = vld [vmem:[#allocation5_spill] sm:$0xff]  ;;  %5886 = vmatpush3.bf16.msra.mxu0 %v6630_v45  ;;  %v1591_v1 = vrot.slane %v7188_v38, 1 }
 0x22e   : > { %9230 = vst [vmem:[#allocation36_spill] sm:$0xff] %v7508_v49  ;;  %v7510_v5 = vpack.c.bf16 %v1361_v34, %v1359_v40  ;;  %v1363_v30 = vsel %vm1346_vm0, %v9233_v55, %v9232_v60  ;;  %v9235_v39 = vmov %v9232_v60  ;;  %v9237_v34 = vmov %v9234_v48 }
 0x22f   : > { %v1365_v61 = vsel %vm1346_vm0, %v9235_v39, %v9234_v48  ;;  %v1367_v28 = vsel %vm1346_vm0, %v9237_v34, %v9236_v58  ;;  %v9238_v40 = vrot.slane %v7190_v29, 7  ;;  %v9240_v55 = vrot.slane %v7192_v43, 7  ;;  %v6631_v48 = vld [vmem:[%s9054_s4 + $0x20] sm:$0xff]   ;;  %6030 = vmatpush3.bf16.msra.mxu1 %v6620_v21 }
 0x230   : > { %9231 = vst [vmem:[#allocation37_spill] sm:$0xff] %v7510_v5  ;;  %v7522_v32 = vpack.c.bf16 %v1365_v61, %v1363_v30  ;;  %v9239_v5 = vmov %v9236_v58  ;;  %v1581_v61 = vrot.slane %v7175_v10, 1  ;;  %v1583_v30 = vrot.slane %v7177_v22, 1  ;;  %5887 = vmatprep.subr.bf16.mxu0 %v6631_v48 }
 0x231   : > { %v1369_v60 = vsel %vm1346_vm0, %v9239_v5, %v9238_v40  ;;  %v9241_v49 = vmov %v9238_v40  ;;  %v9242_v39 = vrot.slane %v7194_v24, 7  ;;  %v9243_v58 = vmov %v9240_v55  ;;  %5888 = vmatpush3.bf16.msra.mxu0 %v6631_v48  ;;  %6016 = vmatmul.mubr.msk.bf16.gmra.mrb[8].mxu1 %vm7605_vm15, %v7391_v51 }
 0x232   : > { %v1371_v35 = vsel %vm1346_vm0, %v9241_v49, %v9240_v55  ;;  %v7547_v5 = vpack.c.bf16 %v1369_v60, %v1367_v28  ;;  %v1585_v10 = vrot.slane %v7179_v27, 1  ;;  %v9245_v40 = vrot.slane %v7198_v23, 7  ;;  %v6621_v27 = vld [vmem:[%s9054_s4 + $0x120] sm:$0xff]  }
 0x233   : > { %v1373_v49 = vsel %vm1346_vm0, %v9243_v58, %v9242_v39  ;;  %v9244_v34 = vmov %v9242_v39  ;;  %v1587_v55 = vrot.slane %v7181_v20, 1  ;;  %v9247_v39 = vld [vmem:[#allocation8_spill] sm:$0xff]  ;;  %v1112_v3 = vand.u32 15, %v9253_v16  ;;  %6031 = vmatprep.subr.bf16.mxu1 %v6621_v27 }
 0x234   : > { %v7558_v22 = vpack.c.bf16 %v1373_v49, %v1371_v35  ;;  %v1375_v28 = vsel %vm1346_vm0, %v9244_v34, %v1374_v37  ;;  %v1377_v60 = vsel %vm1346_vm0, %v1374_v37, %v9245_v40  ;;  %v9246_v35 = vld [vmem:[#allocation7_spill] sm:$0xff]  ;;  %v1574_v49 = vsel %vm1571_vm1, %v1572_v57, %v1573_v11  ;;  %v9249_v20 = vld [vmem:[#allocation4_spill] sm:$0xff]  ;;  %6032 = vmatpush3.bf16.msra.mxu1 %v6621_v27 }
 0x235   : > { %v7571_v17 = vpack.c.bf16 %v1377_v60, %v1375_v28  ;;  %v7575_v58 = vpack.c.bf16 %v9247_v39, %v9246_v35  ;;  %v1589_v34 = vrot.slane %v7183_v26, 1  ;;  %v9250_v37 = vand.u32 15, %v9249_v20  ;;  %v6633_v26 = vld [vmem:[%s9054_s4 + $0x28] sm:$0xff]   ;;  %5860 = vmatmul.mubr.bf16.gmra.mrb[44].mxu0 %v7397_v25 }
 0x236   : > { %v9254_v28 = vrot.slane %v7167_v6, 1  ;;  %v9255_v20 = vrot.slane %v7173_v4, 1  ;;  %v1584_v16 = vsel %vm1571_vm1, %v1581_v61, %v1583_v30  ;;  %v1593_v45 = vrot.slane %v7190_v29, 1  ;;  %5889 = vmatprep.subr.bf16.mxu0 %v6633_v26  ;;  %5863 = vmatprep.mubr.bf16.mxu0 %v7401_v50 }
 0x237   : > { %9248 = vst [vmem:[#allocation7_spill] sm:$0xff] %v7575_v58  ;;  %vm7582_vm14 = vcmp.ne.s32.totalorder %v9250_v37, 0  ;;  %v1595_v6 = vrot.slane %v7192_v43, 1  ;;  %v9256_v38 = vmov 0  ;;  %v1597_v4 = vrot.slane %v7194_v24, 1  ;;  %v6622_v43 = vld [vmem:[%s9054_s4 + $0x128] sm:$0xff]   ;;  %5890 = vmatpush3.bf16.msra.mxu0 %v6633_v26 }
 0x238   : > { %v1576_v60 = vsel %vm1571_vm1, %v1573_v11, %v9254_v28  ;;  %v1582_v37 = vsel %vm1571_vm1, %v9255_v20, %v1581_v61  ;;  %v9257_v38 = vsel %vm7605_vm15, 4294967295, %v9256_v38  ;;  %vm7615_vm0 = vmpackc.low %vm9113_vm7, %vm7582_vm14  ;;  %v9258_v29 = vmov 0  ;;  %6033 = vmatprep.subr.bf16.mxu1 %v6622_v43 }
 0x239   : > { %v7594_v57 = vpack.c.bf16 %v1576_v60, %v1574_v49  ;;  %v7609_v11 = vpack.c.bf16 %v1584_v16, %v1582_v37  ;;  %v9259_v29 = vsel %vm7615_vm0, 4294967295, %v9258_v29  ;;  %v1586_v56 = vsel %vm1571_vm1, %v1583_v30, %v1585_v10  ;;  %6019 = vmatprep.mubr.msk.bf16.mxu1 %vm7615_vm0, %v7393_v47  ;;  %v6636_v37 = vld [vmem:[%s9054_s4 + $0x38] sm:$0xff]   ;;  %6034 = vmatpush3.bf16.msra.mxu1 %v6622_v43 }
 0x23a   : > { %v1588_v21 = vsel %vm1571_vm1, %v1585_v10, %v1587_v55  ;;  %v1599_v61 = vrot.slane %v7196_v36, 1  ;;  %v1601_v24 = vrot.slane %v7198_v23, 1  ;;  %v1590_v40 = vsel %vm1571_vm1, %v1587_v55, %v1589_v34  ;;  %v6634_v36 = vld [vmem:[%s9054_s4 + $0x30] sm:$0xff]  }
 0x23b   : > { %v7626_v49 = vpack.c.bf16 %v1588_v21, %v1586_v56  ;;  %v1603_v28 = vrot.slane %v7200_v42, 1  ;;  %vm7633_vm2 = vcmp.ne.s32.totalorder %v1112_v3, 0  ;;  %v1592_v23 = vsel %vm1571_vm1, %v1589_v34, %v1591_v1  ;;  %5891 = vmatprep.subr.bf16.mxu0 %v6634_v36 }
 0x23c   : > { %v1605_v30 = vrot.slane %v7202_v15, 1  ;;  %v7645_v42 = vpack.c.bf16 %v1592_v23, %v1590_v40  ;;  %v1594_v3 = vsel %vm1571_vm1, %v1591_v1, %v1593_v45  ;;  %v1596_v48 = vsel %vm1571_vm1, %v1593_v45, %v1595_v6  ;;  %v6623_v15 = vld [vmem:[%s9054_s4 + $0x130] sm:$0xff]   ;;  %vm7674_vm3 = vmpackc.low %vm9113_vm7, %vm7633_vm2  ;;  %5892 = vmatpush3.bf16.msra.mxu0 %v6634_v36 }
 0x23d   : > { %v1607_v10 = vrot.slane %v7204_v54, 1  ;;  %v1609_v55 = vrot.slane %v7206_v63, 1  ;;  %v7655_v27 = vpack.c.bf16 %v1596_v48, %v1594_v3  ;;  %v1598_v34 = vsel %vm1571_vm1, %v1595_v6, %v1597_v4  ;;  %6035 = vmatprep.subr.bf16.mxu1 %v6623_v15  ;;  %6020 = vmatmul.mubr.msk.bf16.gmra.mrb[12].mxu1 %vm7674_vm3, %v7428_v31  ;;  %v6626_v3 = vld [vmem:[%s9054_s4 + $0x140] sm:$0xff]  }
 0x23e   : > { %v1611_v20 = vrot.slane %v7208_v52, 1  ;;  %v1600_v54 = vsel %vm1571_vm1, %v1597_v4, %v1599_v61  ;;  %v1602_v63 = vsel %vm1571_vm1, %v1599_v61, %v1601_v24  ;;  %v1613_v1 = vrot.slane %v7210_v13, 1  ;;  %5893 = vmatprep.subr.bf16.mxu0 %v6636_v37  ;;  %6036 = vmatpush3.bf16.msra.mxu1 %v6623_v15 }
 0x23f   : > { %v7666_v16 = vpack.c.bf16 %v1600_v54, %v1598_v34  ;;  %v1604_v45 = vsel %vm1571_vm1, %v1601_v24, %v1603_v28  ;;  %v1615_v52 = vrot.slane %v7212_v62, 1  ;;  %v1617_v6 = vrot.slane %v7214_v9, 1  ;;  %v6624_v62 = vld [vmem:[%s9054_s4 + $0x138] sm:$0xff]   ;;  %5864 = vmatmul.mubr.bf16.gmra.mrb[48].mxu0 %v7415_v18 }
 0x240   : > { %v9262_v26 = vmov 0  ;;  %v7678_v13 = vpack.c.bf16 %v1604_v45, %v1602_v63  ;;  %v1606_v4 = vsel %vm1571_vm1, %v1603_v28, %v1605_v30  ;;  %v1619_v56 = vrot.slane %v7216_v8, 1  ;;  %v7699_v28 = vld [vmem:[%s9054_s4 + $0x80] sm:$0xff]   ;;  %6037 = vmatprep.subr.bf16.mxu1 %v6624_v62  ;;  %5867 = vmatprep.mubr.bf16.mxu0 %v7432_v33 }
 0x241   : > { %v9263_v26 = vsel %vm7674_vm3, 4294967295, %v9262_v26  ;;  %v1608_v9 = vsel %vm1571_vm1, %v1605_v30, %v1607_v10  ;;  %v1610_v43 = vsel %vm1571_vm1, %v1607_v10, %v1609_v55  ;;  %v1621_v21 = vrot.slane %v7218_v14, 1  ;;  %5894 = vmatpush3.bf16.msra.mxu0 %v6636_v37 }
 0x242   : > { %9264 = vst [vmem:[#allocation8_spill] sm:$0xff] %v9263_v26  ;;  %v7688_v61 = vpack.c.bf16 %v1608_v9, %v1606_v4  ;;  %v1612_v24 = vsel %vm1571_vm1, %v1609_v55, %v1611_v20  ;;  %v1623_v40 = vrot.slane %v7220_v46, 1  ;;  %v1625_v8 = vrot.slane %v7222_v19, 1  ;;  %v9265_v46 = vld [vmem:[#allocation9_spill] sm:$0xff]  ;;  %5927 = vmatprep.subr.bf16.mxu0 %v7699_v28  ;;  %6038 = vmatpush3.bf16.msra.mxu1 %v6624_v62  ;;  %v6632_v62 = vld [vmem:[%s9054_s4 + $0x150] sm:$0xff]   ;;  %v6654_v26 = vld [vmem:[%s9054_s4 + $0x1a8] sm:$0xff]  }
 0x243   : > { %v7701_v14 = vpack.c.bf16 %v1612_v24, %v1610_v43  ;;  %v1614_v60 = vsel %vm1571_vm1, %v1611_v20, %v1613_v1  ;;  %v1627_v36 = vrot.slane %v7224_v44, 1  ;;  %6039 = vmatprep.mubr.bf16.mxu1 %v9265_v46  ;;  %v1616_v19 = vsel %vm1571_vm1, %v1613_v1, %v1615_v52  ;;  %6071 = vmatprep.subr.bf16.mxu1 %v6626_v3  ;;  %v9267_v43 = vld [vmem:[#allocation15_spill] sm:$0xff]  ;;  %v6637_v24 = vld [vmem:[%s9054_s4 + $0x160] sm:$0xff]  }
 0x244   : > { %v1618_v23 = vsel %vm1571_vm1, %v1615_v52, %v1617_v6  ;;  %v1629_v30 = vrot.slane %v7226_v12, 1  ;;  %v7713_v48 = vpack.c.bf16 %v1616_v19, %v1614_v60  ;;  %v1620_v44 = vsel %vm1571_vm1, %v1617_v6, %v1619_v56  ;;  %v9266_v52 = vld [vmem:[#allocation12_spill] sm:$0xff] }
 0x245   : > { %v1631_v10 = vrot.slane %v9246_v35, 1  ;;  %v7718_v55 = vpack.c.bf16 %v1620_v44, %v1618_v23  ;;  %v1622_v12 = vsel %vm1571_vm1, %v1619_v56, %v1621_v21  ;;  %v1624_v15 = vsel %vm1571_vm1, %v1621_v21, %v1623_v40  ;;  %v6629_v35 = vld [vmem:[%s9054_s4 + $0x148] sm:$0xff]   ;;  %6040 = vmatmul.mubr.bf16.vlgmr.msra.gmra.mrb[16].mxu1 %v9266_v52  ;;  %v9271_v23 = vld [vmem:[#allocation33_spill] sm:$0xff] }
 0x246   : > { %v1626_v34 = vsel %vm1571_vm1, %v1623_v40, %v1625_v8  ;;  %v7724_v20 = vpack.c.bf16 %v1624_v15, %v1622_v12  ;;  %v1628_v54 = vsel %vm1571_vm1, %v1625_v8, %v1627_v36  ;;  %v1630_v1 = vsel %vm1571_vm1, %v1627_v36, %v1629_v30  ;;  %6072 = vmatpush3.bf16.msra.mxu1 %v6626_v3  ;;  %v9268_v21 = vld [vmem:[#allocation31_spill] sm:$0xff]  ;;  %v9269_v40 = vld [vmem:[#allocation32_spill] sm:$0xff]  ;;  %v9270_v8 = vld [vmem:[#allocation2_spill] sm:$0xff] }
 0x247   : > { %v7730_v63 = vpack.c.bf16 %v1628_v54, %v1626_v34  ;;  %v1632_v37 = vsel %vm1571_vm1, %v1629_v30, %v1631_v10  ;;  %v1633_v45 = vrot.slane %v9247_v39, 1  ;;  %6043 = vmatprep.mubr.bf16.mxu1 %v7322_v7  ;;  %5868 = vmatmul.mubr.bf16.gmra.mrb[52].mxu0 %v7436_v2  ;;  %v6635_v39 = vld [vmem:[%s9054_s4 + $0x158] sm:$0xff]   ;;  %v868_v60 = vadd.s32 16, %v9270_v8  ;;  %v6638_v36 = vld [vmem:[%s9054_s4 + $0x168] sm:$0xff]   ;;  %v6639_v30 = vld [vmem:[%s9054_s4 + $0x170] sm:$0xff]  }
 0x248   : > { %v7736_v6 = vpack.c.bf16 %v1632_v37, %v1630_v1  ;;  %6073 = vmatprep.subr.bf16.mxu1 %v6629_v35  ;;  %5871 = vmatprep.mubr.bf16.mxu0 %v7442_v0  ;;  %v902_v46 = vand.u32 15, %v9270_v8  ;;  %v9272_v3 = vmov 0   ;;  %v870_v44 = vadd.s32 32, %v9270_v8  ;;  %v6640_v12 = vld [vmem:[%s9054_s4 + $0x178] sm:$0xff]   ;;  %v9277_v37 = vld [vmem:[#allocation10_spill] sm:$0xff]  ;;  %v6670_v34 = vld [vmem:[%s9054_s4 + $0x228] sm:$0xff]  }
 0x249   : > { %v1634_v4 = vsel %vm1571_vm1, %v1631_v10, %v1633_v45  ;;  %v1667_v56 = vsel %vm1571_vm1, %v1633_v45, 0.0  ;;  %v916_v19 = vand.u32 15, %v868_v60  ;;  %v872_v10 = vadd.s32 48, %v9270_v8  ;;  %v7796_v45 = vld [vmem:[%s9054_s4 + $0x180] sm:$0xff]  }
 0x24a   : > { %v7745_v9 = vpack.c.bf16 %v1667_v56, %v1634_v4  ;;  %6074 = vmatpush3.bf16.msra.mxu1 %v6629_v35  ;;  %vm5487_vm1 = vcmp.ne.s32.totalorder %v902_v46, 0  ;;  %v9273_v15 = vmov 0  ;;  %v930_v54 = vand.u32 15, %v870_v44  ;;  %v6643_v35 = vld [vmem:[%s9054_s4 + $0x88] sm:$0xff]   ;;  %v9278_v4 = vld [vmem:[#allocation34_spill] sm:$0xff] }
 0x24b   : > { %6075 = vmatprep.subr.bf16.mxu1 %v6632_v62  ;;  %vm5488_vm4 = vcmp.ne.s32.totalorder %v916_v19, 0  ;;  %vm7776_vm5 = vmpackc.low %vm9113_vm7, %vm5487_vm1  ;;  %v944_v1 = vand.u32 15, %v872_v10  ;;  %v874_v56 = vadd.s32 64, %v9270_v8  ;;  %v9283_v19 = vld [vmem:[#allocation36_spill] sm:$0xff]  ;;  %v878_v44 = vadd.s32 96, %v9270_v8  ;;  %v6647_v10 = vld [vmem:[%s9054_s4 + $0xa0] sm:$0xff]  }
 0x24c   : > { %v9274_v15 = vsel %vm7776_vm5, 4294967295, %v9273_v15  ;;  %vm7782_vm6 = vmpackc.low %vm9113_vm7, %vm5488_vm4  ;;  %vm5489_vm11 = vcmp.ne.s32.totalorder %v930_v54, 0  ;;  %v9285_v54 = vmov 0  ;;  %v883_v7 = vadd.s32 136, %v9270_v8 }
 0x24d   : > { %6044 = vmatmul.mubr.bf16.gmra.mrb[20].mxu1 %v9267_v43  ;;  %vm5490_vm14 = vcmp.ne.s32.totalorder %v944_v1, 0  ;;  %vm7809_vm2 = vmpackc.low %vm9113_vm7, %vm5489_vm11  ;;  %v958_v60 = vand.u32 15, %v874_v56  ;;  %v986_v1 = vand.u32 15, %v878_v44  ;;  %v6649_v56 = vld [vmem:[%s9054_s4 + $0xa8] sm:$0xff]   ;;  %v9291_v44 = vmov 0 }
 0x24e   : > { %6047 = vmatprep.mubr.bf16.mxu1 %v7373_v59  ;;  %6076 = vmatpush3.bf16.msra.mxu1 %v6632_v62  ;;  %v6644_v62 = vld [vmem:[%s9054_s4 + $0x90] sm:$0xff]   ;;  %vm7815_vm1 = vmpackc.low %vm9113_vm7, %vm5490_vm14  ;;  %v6651_v59 = vld [vmem:[%s9054_s4 + $0x198] sm:$0xff]  }
 0x24f   : > { %5872 = vmatmul.mubr.bf16.gmra.mrb[56].mxu0 %v9268_v21  ;;  %6077 = vmatprep.subr.bf16.mxu1 %v6635_v39  ;;  %vm5491_vm4 = vcmp.ne.s32.totalorder %v958_v60, 0  ;;  %v6650_v60 = vld [vmem:[%s9054_s4 + $0xb0] sm:$0xff]   ;;  %v9314_v43 = vld [vmem:[#allocation35_spill] sm:$0xff] }
 0x250   : > { %5875 = vmatprep.mubr.bf16.mxu0 %v9269_v40  ;;  %vm7835_vm14 = vmpackc.low %vm9113_vm7, %vm5491_vm4  ;;  %vm5493_vm4 = vcmp.ne.s32.totalorder %v986_v1, 0  ;;  %v871_v1 = vadd.s32 40, %v9270_v8 }
 0x251   : > { %v9286_v54 = vsel %vm7835_vm14, 4294967295, %v9285_v54 }
 0x252   : > { %6078 = vmatpush3.bf16.msra.mxu1 %v6635_v39  ;;  %v876_v39 = vadd.s32 80, %v9270_v8 }
 0x253   : > { %6079 = vmatprep.subr.bf16.mxu1 %v6637_v24 }
 0x254   : > { %v972_v46 = vand.u32 15, %v876_v39  ;;  %v867_v39 = vadd.s32 8, %v9270_v8 }
 0x255   : > { %6048 = vmatmul.mubr.bf16.gmra.mrb[24].mxu1 %v7377_v53 }
 0x256   : > { %6051 = vmatprep.mubr.bf16.mxu1 %v7397_v25  ;;  %6080 = vmatpush3.bf16.msra.mxu1 %v6637_v24  ;;  %vm5492_vm11 = vcmp.ne.s32.totalorder %v972_v46, 0  ;;  %v909_v46 = vand.u32 15, %v867_v39  ;;  %v937_v39 = vand.u32 15, %v871_v1  ;;  %v9298_v1 = vld [vmem:[#allocation18_spill] sm:$0xff]  ;;  %v9308_v25 = vmov 0  ;;  %v6671_v24 = vld [vmem:[%s9054_s4 + $0x230] sm:$0xff]  }
 0x257   : > { %5876 = vmatmul.mubr.bf16.gmra.mrb[60].mxu0 %v9271_v23  ;;  %6081 = vmatprep.subr.bf16.mxu1 %v6638_v36  ;;  %vm7841_vm3 = vmpackc.low %vm9113_vm7, %vm5492_vm11 }
 0x258   : > { %5895 = vmatprep.mubr.bf16.mxu0 %v9272_v3 }
 0x25a   : > { %6082 = vmatpush3.bf16.msra.mxu1 %v6638_v36  ;;  %v6646_v36 = vld [vmem:[%s9054_s4 + $0x98] sm:$0xff]  }
 0x25b   : > { %6083 = vmatprep.subr.bf16.mxu1 %v6639_v30 }
 0x25d   : > { %6052 = vmatmul.mubr.bf16.gmra.mrb[28].mxu1 %v7401_v50  ;;  %v9307_v50 = vld [vmem:[#allocation6_spill] sm:$0xff] }
 0x25e   : > { %6055 = vmatprep.mubr.bf16.mxu1 %v7415_v18  ;;  %6084 = vmatpush3.bf16.msra.mxu1 %v6639_v30  ;;  %v9284_v30 = vld [vmem:[#allocation37_spill] sm:$0xff]  ;;  %v9306_v18 = vld [vmem:[#allocation20_spill] sm:$0xff] }
 0x25f   : > { %5896 = vmatmul.mubr.msk.bf16.vlgmr.msra.gmra.mrb[32].mxu0 %vm7776_vm5, %v9277_v37  ;;  %6085 = vmatprep.subr.bf16.mxu1 %v6640_v12  ;;  %vm7860_vm5 = vmpackc.low %vm9113_vm7, %vm5493_vm4  ;;  %vm5502_vm4 = vcmp.ne.s32.totalorder %v909_v46, 15  ;;  %v9296_v46 = vld [vmem:[#allocation16_spill] sm:$0xff] }
 0x260   : > { %5899 = vmatprep.mubr.msk.bf16.mxu0 %vm7782_vm6, %v9278_v4  ;;  %5928 = vmatpush3.bf16.msra.mxu0 %v7699_v28  ;;  %v6672_v28 = vld [vmem:[%s9054_s4 + $0x238] sm:$0xff]  }
 0x261   : > { %5929 = vmatprep.subr.bf16.mxu0 %v6643_v35 }
 0x262   : > { %6086 = vmatpush3.bf16.msra.mxu1 %v6640_v12  ;;  %v880_v12 = vadd.s32 112, %v9270_v8 }
 0x263   : > { %6119 = vmatprep.subr.bf16.mxu1 %v7796_v45 }
 0x264   : > { %5930 = vmatpush3.bf16.msra.mxu0 %v6643_v35  ;;  %v9287_v35 = vmov 0 }
 0x265   : > { %6056 = vmatmul.mubr.bf16.gmra.mrb[0].mxu1 %v7432_v33  ;;  %5931 = vmatprep.subr.bf16.mxu0 %v6644_v62  ;;  %v9288_v35 = vsel %vm7841_vm3, 4294967295, %v9287_v35  ;;  %v9304_v33 = vld [vmem:[#allocation11_spill] sm:$0xff] }
 0x266   : > { %6059 = vmatprep.mubr.bf16.mxu1 %v7436_v2 }
 0x267   : > { %5900 = vmatmul.mubr.msk.bf16.gmra.mrb[36].mxu0 %vm7809_vm2, %v9283_v19 }
 0x268   : > { %5903 = vmatprep.mubr.msk.bf16.mxu0 %vm7815_vm1, %v9284_v30  ;;  %5932 = vmatpush3.bf16.msra.mxu0 %v6644_v62  ;;  %v1000_v62 = vand.u32 15, %v880_v12  ;;  %v869_v12 = vadd.s32 24, %v9270_v8 }
 0x269   : > { %5933 = vmatprep.subr.bf16.mxu0 %v6646_v36 }
 0x26a   : > { %vm5494_vm11 = vcmp.ne.s32.totalorder %v1000_v62, 0  ;;  %v923_v62 = vand.u32 15, %v869_v12  ;;  %v9297_v12 = vld [vmem:[#allocation19_spill] sm:$0xff] }
 0x26c   : > { %5934 = vmatpush3.bf16.msra.mxu0 %v6646_v36  ;;  %v9289_v36 = vmov 0 }
 0x26d   : > { %6060 = vmatmul.mubr.bf16.gmra.mrb[4].mxu1 %v7442_v0  ;;  %5935 = vmatprep.subr.bf16.mxu0 %v6647_v10  ;;  %v9290_v36 = vsel %vm7860_vm5, 4294967295, %v9289_v36 }
 0x26e   : > { %6063 = vmatprep.mubr.bf16.mxu1 %v9268_v21  ;;  %v9302_v21 = vmov 0 }
 0x26f   : > { %5904 = vmatmul.mubr.msk.bf16.gmra.mrb[40].mxu0 %vm7835_vm14, %v7522_v32 }
 0x270   : > { %5907 = vmatprep.mubr.msk.bf16.mxu0 %vm7841_vm3, %v7547_v5  ;;  %5936 = vmatpush3.bf16.msra.mxu0 %v6647_v10  ;;  %vm7866_vm3 = vmpackc.low %vm9113_vm7, %vm5494_vm11  ;;  %v6652_v10 = vld [vmem:[%s9054_s4 + $0xb8] sm:$0xff]  }
 0x271   : > { %5937 = vmatprep.subr.bf16.mxu0 %v6649_v56  ;;  %v9292_v44 = vsel %vm7866_vm3, 4294967295, %v9291_v44  ;;  %vm7883_vm11 = vmpackc.low %vm5502_vm4, %vm9113_vm7  ;;  %vm5503_vm4 = vcmp.ne.s32.totalorder %v923_v62, 15  ;;  %vm5504_vm7 = vcmp.ne.s32.totalorder %v937_v39, 15  ;;  %v6645_v62 = vld [vmem:[%s9054_s4 + $0x188] sm:$0xff]   ;;  %v9305_v39 = vld [vmem:[#allocation13_spill] sm:$0xff] }
 0x274   : > { %5938 = vmatpush3.bf16.msra.mxu0 %v6649_v56 }
 0x275   : > { %6064 = vmatmul.mubr.bf16.gmra.mrb[8].mxu1 %v9269_v40  ;;  %5939 = vmatprep.subr.bf16.mxu0 %v6650_v60  ;;  %v9300_v40 = vmov 0 }
 0x276   : > { %6067 = vmatprep.mubr.bf16.mxu1 %v9271_v23  ;;  %v7891_v23 = vld [vmem:[%s9054_s4 + $0xc0] sm:$0xff]  }
 0x277   : > { %5908 = vmatmul.mubr.msk.bf16.gmra.mrb[44].mxu0 %vm7860_vm5, %v7558_v22 }
 0x278   : > { %5911 = vmatprep.mubr.msk.bf16.mxu0 %vm7866_vm3, %v7571_v17  ;;  %5940 = vmatpush3.bf16.msra.mxu0 %v6650_v60  ;;  %v9295_v60 = vld [vmem:[#allocation17_spill] sm:$0xff]  ;;  %vm9299_vm3 = vmmov 1  }
 0x279   : > { %5941 = vmatprep.subr.bf16.mxu0 %v6652_v10  ;;  %vm7906_vm5 = vmpackc.low %vm5503_vm4, %vm9299_vm3 }
 0x27a   : > { %v9301_v40 = vsel %vm7906_vm5, 4294967295, %v9300_v40  ;;  %vm7911_vm14 = vmpackc.low %vm5504_vm7, %vm9299_vm3 }
 0x27b   : > { %v9303_v21 = vsel %vm7911_vm14, 4294967295, %v9302_v21 }
 0x27c   : > { %5942 = vmatpush3.bf16.msra.mxu0 %v6652_v10  ;;  %v873_v10 = vadd.s32 56, %v9270_v8 }
 0x27d   : > { %6068 = vmatmul.mubr.bf16.gmra.mrb[12].mxu1 %v7575_v58  ;;  %5975 = vmatprep.subr.bf16.mxu0 %v7891_v23  ;;  %v875_v58 = vadd.s32 72, %v9270_v8 }
 0x27e   : > { %6087 = vmatprep.mubr.msk.bf16.mxu1 %vm7883_vm11, %v7594_v57  ;;  %v951_v0 = vand.u32 15, %v873_v10  ;;  %v877_v10 = vadd.s32 88, %v9270_v8 }
 0x27f   : > { %5912 = vmatmul.mubr.msk.bf16.gmra.mrb[48].mxu0 %vm7338_vm8, %v9295_v60  ;;  %v965_v2 = vand.u32 15, %v875_v58  ;;  %v6648_v58 = vld [vmem:[%s9054_s4 + $0x190] sm:$0xff]  }
 0x280   : > { %5915 = vmatprep.mubr.msk.bf16.mxu0 %vm7351_vm9, %v9297_v12  ;;  %vm5505_vm7 = vcmp.ne.s32.totalorder %v951_v0, 15  ;;  %v9311_v0 = vmov 0  ;;  %v979_v53 = vand.u32 15, %v877_v10  ;;  %v881_v10 = vadd.s32 120, %v9270_v8 }
 0x281   : > { %vm5506_vm4 = vcmp.ne.s32.totalorder %v965_v2, 15  ;;  %vm7937_vm9 = vmpackc.low %vm5505_vm7, %vm9299_vm3 }
 0x282   : > { %v9309_v25 = vsel %vm7937_vm9, 4294967295, %v9308_v25  ;;  %vm5507_vm7 = vcmp.ne.s32.totalorder %v979_v53, 15  ;;  %v1007_v52 = vand.u32 15, %v881_v10  ;;  %v887_v10 = vadd.s32 168, %v9270_v8 }
 0x283   : > { %9310 = vst [vmem:[#allocation4_spill] sm:$0xff] %v9309_v25 }
 0x285   : > { %6088 = vmatmul.mubr.msk.bf16.vlgmr.msra.gmra.mrb[16].mxu1 %vm7906_vm5, %v9304_v33 }
 0x286   : > { %6120 = vmatpush3.bf16.msra.mxu1 %v7796_v45  ;;  %6091 = vmatprep.mubr.msk.bf16.mxu1 %vm7911_vm14, %v7609_v11  ;;  %v879_v45 = vadd.s32 104, %v9270_v8 }
 0x287   : > { %5916 = vmatmul.mubr.msk.bf16.gmra.mrb[52].mxu0 %vm7363_vm10, %v9305_v39  ;;  %6121 = vmatprep.subr.bf16.mxu1 %v6645_v62  ;;  %vm7942_vm10 = vmpackc.low %vm5506_vm4, %vm9299_vm3 }
 0x288   : > { %5919 = vmatprep.mubr.msk.bf16.mxu0 %vm7477_vm12, %v7357_v41  ;;  %v9312_v0 = vsel %vm7942_vm10, 4294967295, %v9311_v0  ;;  %v993_v2 = vand.u32 15, %v879_v45  ;;  %v6653_v45 = vld [vmem:[%s9054_s4 + $0x1a0] sm:$0xff]   ;;  %vm7967_vm12 = vmpackc.low %vm5507_vm7, %vm9299_vm3  ;;  %vm5509_vm7 = vcmp.ne.s32.totalorder %v1007_v52, 15 }
 0x28a   : > { %6122 = vmatpush3.bf16.msra.mxu1 %v6645_v62  ;;  %v9313_v62 = vld [vmem:[#allocation23_spill] sm:$0xff]  ;;  %vm5508_vm4 = vcmp.ne.s32.totalorder %v993_v2, 15  ;;  %v1021_v2 = vand.u32 15, %v883_v7  ;;  %v6655_v7 = vld [vmem:[%s9054_s4 + $0x1b0] sm:$0xff]  }
 0x28b   : > { %6123 = vmatprep.subr.bf16.mxu1 %v6648_v58 }
 0x28d   : > { %6092 = vmatmul.mubr.msk.bf16.gmra.mrb[20].mxu1 %vm7937_vm9, %v7626_v49 }
 0x28e   : > { %6095 = vmatprep.mubr.msk.bf16.mxu1 %vm7942_vm10, %v7645_v42  ;;  %6124 = vmatpush3.bf16.msra.mxu1 %v6648_v58 }
 0x28f   : > { %5920 = vmatmul.mubr.msk.bf16.gmra.mrb[56].mxu0 %vm7501_vm13, %v9313_v62  ;;  %6125 = vmatprep.subr.bf16.mxu1 %v6651_v59  ;;  %vm7972_vm13 = vmpackc.low %vm5508_vm4, %vm9299_vm3  ;;  %vm5510_vm4 = vcmp.ne.s32.totalorder %v1021_v2, 15  ;;  %v6656_v2 = vld [vmem:[%s9054_s4 + $0x1b8] sm:$0xff]  }
 0x290   : > { %5923 = vmatprep.mubr.msk.bf16.mxu0 %vm7605_vm15, %v7391_v51  ;;  %vm7995_vm15 = vmpackc.low %vm5509_vm7, %vm9299_vm3 }
 0x292   : > { %6126 = vmatpush3.bf16.msra.mxu1 %v6651_v59  ;;  %v885_v59 = vadd.s32 152, %v9270_v8 }
 0x293   : > { %6127 = vmatprep.subr.bf16.mxu1 %v6653_v45 }
 0x294   : > { %v1035_v31 = vand.u32 15, %v885_v59  ;;  %v8020_v59 = vld [vmem:[%s9054_s4 + $0x1c0] sm:$0xff]  }
 0x295   : > { %6096 = vmatmul.mubr.msk.bf16.gmra.mrb[24].mxu1 %vm7967_vm12, %v7655_v27 }
 0x296   : > { %6099 = vmatprep.mubr.msk.bf16.mxu1 %vm7972_vm13, %v7666_v16  ;;  %6128 = vmatpush3.bf16.msra.mxu1 %v6653_v45  ;;  %vm5511_vm7 = vcmp.ne.s32.totalorder %v1035_v31, 15  ;;  %v6688_v31 = vld [vmem:[%s9054_s4 + $0xc8] sm:$0xff]  }
 0x297   : > { %5924 = vmatmul.mubr.msk.bf16.gmra.mrb[60].mxu0 %vm7615_vm0, %v7393_v47  ;;  %6129 = vmatprep.subr.bf16.mxu1 %v6654_v26  ;;  %vm8000_vm0 = vmpackc.low %vm5510_vm4, %vm9299_vm3 }
 0x298   : > { %5943 = vmatprep.mubr.bf16.mxu0 %v9272_v3  ;;  %v1049_v3 = vand.u32 15, %v887_v10  ;;  %v6689_v10 = vld [vmem:[%s9054_s4 + $0xd0] sm:$0xff]  }
 0x29a   : > { %6130 = vmatpush3.bf16.msra.mxu1 %v6654_v26  ;;  %v889_v26 = vadd.s32 184, %v9270_v8  ;;  %vm5512_vm4 = vcmp.ne.s32.totalorder %v1049_v3, 15 }
 0x29b   : > { %6131 = vmatprep.subr.bf16.mxu1 %v6655_v7  ;;  %vm8036_vm8 = vmpackc.low %vm5512_vm4, %vm9299_vm3 }
 0x29c   : > { %v1063_v3 = vand.u32 15, %v889_v26  ;;  %v895_v26 = vadd.s32 232, %v9270_v8 }
 0x29d   : > { %6100 = vmatmul.mubr.msk.bf16.gmra.mrb[28].mxu1 %vm7995_vm15, %v7678_v13 }
 0x29e   : > { %6103 = vmatprep.mubr.msk.bf16.mxu1 %vm8000_vm0, %v7688_v61  ;;  %6132 = vmatpush3.bf16.msra.mxu1 %v6655_v7  ;;  %v891_v7 = vadd.s32 200, %v9270_v8 }
 0x29f   : > { %5944 = vmatmul.mubr.msk.bf16.vlgmr.msra.gmra.mrb[32].mxu0 %vm7883_vm11, %v7594_v57  ;;  %6133 = vmatprep.subr.bf16.mxu1 %v6656_v2  ;;  %vm8031_vm11 = vmpackc.low %vm5511_vm7, %vm9299_vm3  ;;  %vm5513_vm7 = vcmp.ne.s32.totalorder %v1063_v3, 15  ;;  %v9329_v3 = vmov 0 }
 0x2a0   : > { %5947 = vmatprep.mubr.msk.bf16.mxu0 %vm7906_vm5, %v9304_v33  ;;  %5976 = vmatpush3.bf16.msra.mxu0 %v7891_v23  ;;  %v1077_v23 = vand.u32 15, %v891_v7  ;;  %v6690_v7 = vld [vmem:[%s9054_s4 + $0xd8] sm:$0xff]   ;;  %vm8062_vm5 = vmpackc.low %vm5513_vm7, %vm9299_vm3 }
 0x2a1   : > { %5977 = vmatprep.subr.bf16.mxu0 %v6688_v31 }
 0x2a2   : > { %6134 = vmatpush3.bf16.msra.mxu1 %v6656_v2  ;;  %v893_v2 = vadd.s32 216, %v9270_v8  ;;  %vm5514_vm4 = vcmp.ne.s32.totalorder %v1077_v23, 15  ;;  %v1105_v23 = vand.u32 15, %v895_v26  ;;  %v6692_v26 = vld [vmem:[%s9054_s4 + $0xe8] sm:$0xff]  }
 0x2a3   : > { %6167 = vmatprep.subr.bf16.mxu1 %v8020_v59 }
 0x2a4   : > { %5978 = vmatpush3.bf16.msra.mxu0 %v6688_v31  ;;  %v9327_v31 = vmov 0  ;;  %v1091_v25 = vand.u32 15, %v893_v2  ;;  %v897_v2 = vadd.s32 248, %v9270_v8 }
 0x2a5   : > { %6104 = vmatmul.mubr.msk.bf16.gmra.mrb[0].mxu1 %vm8031_vm11, %v7701_v14  ;;  %5979 = vmatprep.subr.bf16.mxu0 %v6689_v10  ;;  %v9328_v31 = vsel %vm8062_vm5, 4294967295, %v9327_v31 }
 0x2a6   : > { %6107 = vmatprep.mubr.msk.bf16.mxu1 %vm8036_vm8, %v7713_v48  ;;  %vm5515_vm7 = vcmp.ne.s32.totalorder %v1091_v25, 15  ;;  %v9333_v25 = vmov 0  ;;  %v1119_v8 = vand.u32 15, %v897_v2  ;;  %v9335_v2 = vmov 0 }
 0x2a7   : > { %5948 = vmatmul.mubr.msk.bf16.gmra.mrb[36].mxu0 %vm7911_vm14, %v7609_v11  ;;  %vm8067_vm14 = vmpackc.low %vm5514_vm4, %vm9299_vm3  ;;  %vm5516_vm4 = vcmp.ne.s32.totalorder %v1105_v23, 15  ;;  %v6693_v23 = vld [vmem:[%s9054_s4 + $0xf0] sm:$0xff]  }
 0x2a8   : > { %5951 = vmatprep.mubr.msk.bf16.mxu0 %vm7937_vm9, %v7626_v49  ;;  %5980 = vmatpush3.bf16.msra.mxu0 %v6689_v10  ;;  %v9330_v3 = vsel %vm8067_vm14, 4294967295, %v9329_v3  ;;  %v6691_v10 = vld [vmem:[%s9054_s4 + $0xe0] sm:$0xff]   ;;  %vm8091_vm9 = vmpackc.low %vm5515_vm7, %vm9299_vm3  ;;  %vm5518_vm7 = vcmp.ne.s32.totalorder %v1119_v8, 15  ;;  %v6659_v8 = vld [vmem:[%s9054_s4 + $0x1d0] sm:$0xff]  }
 0x2a9   : > { %5981 = vmatprep.subr.bf16.mxu0 %v6690_v7 }
 0x2ac   : > { %5982 = vmatpush3.bf16.msra.mxu0 %v6690_v7  ;;  %v9331_v7 = vmov 0 }
 0x2ad   : > { %6108 = vmatmul.mubr.msk.bf16.gmra.mrb[4].mxu1 %vm8062_vm5, %v7718_v55  ;;  %5983 = vmatprep.subr.bf16.mxu0 %v6691_v10  ;;  %v9332_v7 = vsel %vm8091_vm9, 4294967295, %v9331_v7 }
 0x2ae   : > { %6111 = vmatprep.mubr.msk.bf16.mxu1 %vm8067_vm14, %v7724_v20 }
 0x2af   : > { %5952 = vmatmul.mubr.msk.bf16.gmra.mrb[40].mxu0 %vm7942_vm10, %v7645_v42  ;;  %vm8096_vm10 = vmpackc.low %vm5516_vm4, %vm9299_vm3 }
 0x2b0   : > { %5955 = vmatprep.mubr.msk.bf16.mxu0 %vm7967_vm12, %v7655_v27  ;;  %5984 = vmatpush3.bf16.msra.mxu0 %v6691_v10  ;;  %v9334_v25 = vsel %vm8096_vm10, 4294967295, %v9333_v25  ;;  %v6694_v10 = vld [vmem:[%s9054_s4 + $0xf8] sm:$0xff]   ;;  %vm8119_vm4 = vmpackc.low %vm5518_vm7, %vm9299_vm3  ;;  %vm9337_vm3 = vnez %v9286_v54  ;;  %vm9338_vm7 = vnez %v9288_v35  ;;  %v9363_v35 = vld [vmem:[#allocation30_spill] sm:$0xff] }
 0x2b1   : > { %5985 = vmatprep.subr.bf16.mxu0 %v6692_v26  ;;  %v9336_v2 = vsel %vm8119_vm4, 4294967295, %v9335_v2  ;;  %v9362_v54 = vld [vmem:[#allocation29_spill] sm:$0xff] }
 0x2b4   : > { %5986 = vmatpush3.bf16.msra.mxu0 %v6692_v26  ;;  %v6658_v26 = vld [vmem:[%s9054_s4 + $0x1c8] sm:$0xff]  }
 0x2b5   : > { %6112 = vmatmul.mubr.msk.bf16.gmra.mrb[8].mxu1 %vm8091_vm9, %v7730_v63  ;;  %5987 = vmatprep.subr.bf16.mxu0 %v6693_v23 }
 0x2b6   : > { %6115 = vmatprep.mubr.msk.bf16.mxu1 %vm8096_vm10, %v7736_v6 }
 0x2b7   : > { %5956 = vmatmul.mubr.msk.bf16.gmra.mrb[44].mxu0 %vm7972_vm13, %v7666_v16 }
 0x2b8   : > { %5959 = vmatprep.mubr.msk.bf16.mxu0 %vm7995_vm15, %v7678_v13  ;;  %5988 = vmatpush3.bf16.msra.mxu0 %v6693_v23  ;;  %v6661_v23 = vld [vmem:[%s9054_s4 + $0x1e0] sm:$0xff]  }
 0x2b9   : > { %5989 = vmatprep.subr.bf16.mxu0 %v6694_v10 }
 0x2bc   : > { %5990 = vmatpush3.bf16.msra.mxu0 %v6694_v10  ;;  %v6662_v10 = vld [vmem:[%s9054_s4 + $0x1e8] sm:$0xff]  }
 0x2bd   : > { %6116 = vmatmul.mubr.msk.bf16.gmra.mrb[12].mxu1 %vm8119_vm4, %v7745_v9  ;;  %vm9339_vm4 = vnez %v9290_v36  ;;  %v9364_v36 = vld [vmem:[#allocation31_spill] sm:$0xff] }
 0x2be   : > { %6135 = vmatprep.mubr.msk.bf16.mxu1 %vm7782_vm6, %v9278_v4 }
 0x2bf   : > { %5960 = vmatmul.mubr.msk.bf16.gmra.mrb[48].mxu0 %vm8000_vm0, %v7688_v61 }
 0x2c0   : > { %5963 = vmatprep.mubr.msk.bf16.mxu0 %vm8031_vm11, %v7701_v14 }
 0x2c5   : > { %6136 = vmatmul.mubr.msk.bf16.vlgmr.msra.gmra.mrb[16].mxu1 %vm7809_vm2, %v9283_v19 }
 0x2c6   : > { %6168 = vmatpush3.bf16.msra.mxu1 %v8020_v59  ;;  %6139 = vmatprep.mubr.msk.bf16.mxu1 %vm7815_vm1, %v9284_v30  ;;  %v6660_v59 = vld [vmem:[%s9054_s4 + $0x1d8] sm:$0xff]  }
 0x2c7   : > { %5964 = vmatmul.mubr.msk.bf16.gmra.mrb[52].mxu0 %vm8036_vm8, %v7713_v48  ;;  %6169 = vmatprep.subr.bf16.mxu1 %v6658_v26 }
 0x2c8   : > { %5967 = vmatprep.mubr.msk.bf16.mxu0 %vm8062_vm5, %v7718_v55  ;;  %vm9342_vm5 = vnez %v9296_v46  ;;  %v9367_v46 = vld [vmem:[#allocation7_spill] sm:$0xff] }
 0x2ca   : > { %6170 = vmatpush3.bf16.msra.mxu1 %v6658_v26  ;;  %v6663_v26 = vld [vmem:[%s9054_s4 + $0x1f0] sm:$0xff]  }
 0x2cb   : > { %6171 = vmatprep.subr.bf16.mxu1 %v6659_v8 }
 0x2cd   : > { %6140 = vmatmul.mubr.msk.bf16.gmra.mrb[20].mxu1 %vm9337_vm3, %v7522_v32 }
 0x2ce   : > { %6143 = vmatprep.mubr.msk.bf16.mxu1 %vm9338_vm7, %v7547_v5  ;;  %6172 = vmatpush3.bf16.msra.mxu1 %v6659_v8  ;;  %v6664_v8 = vld [vmem:[%s9054_s4 + $0x1f8] sm:$0xff]  }
 0x2cf   : > { %5968 = vmatmul.mubr.msk.bf16.gmra.mrb[56].mxu0 %vm8067_vm14, %v7724_v20  ;;  %6173 = vmatprep.subr.bf16.mxu1 %v6660_v59  ;;  %vm9340_vm14 = vnez %v9292_v44  ;;  %v9365_v44 = vld [vmem:[#allocation32_spill] sm:$0xff] }
 0x2d0   : > { %5971 = vmatprep.mubr.msk.bf16.mxu0 %vm8091_vm9, %v7730_v63  ;;  %vm9341_vm9 = vnez %v9274_v15  ;;  %v6665_v15 = vld [vmem:[%s9054_s4 + $0x200] sm:$0xff]  }
 0x2d2   : > { %6174 = vmatpush3.bf16.msra.mxu1 %v6660_v59 }
 0x2d3   : > { %6175 = vmatprep.subr.bf16.mxu1 %v6661_v23 }
 0x2d5   : > { %6144 = vmatmul.mubr.msk.bf16.gmra.mrb[24].mxu1 %vm9339_vm4, %v7558_v22 }
 0x2d6   : > { %6147 = vmatprep.mubr.msk.bf16.mxu1 %vm9340_vm14, %v7571_v17  ;;  %6176 = vmatpush3.bf16.msra.mxu1 %v6661_v23 }
 0x2d7   : > { %5972 = vmatmul.mubr.msk.bf16.gmra.mrb[60].mxu0 %vm8096_vm10, %v7736_v6  ;;  %6177 = vmatprep.subr.bf16.mxu1 %v6662_v10  ;;  %vm9343_vm10 = vnez %v9298_v1 }
 0x2d8   : > { %5991 = vmatprep.mubr.msk.bf16.mxu0 %vm9341_vm9, %v9277_v37  ;;  %vm9344_vm9 = vnez %v9306_v18  ;;  %v6666_v18 = vld [vmem:[%s9054_s4 + $0x208] sm:$0xff]   ;;  %v9358_v37 = vld [vmem:[#allocation24_spill] sm:$0xff] }
 0x2da   : > { %6178 = vmatpush3.bf16.msra.mxu1 %v6662_v10 }
 0x2db   : > { %6179 = vmatprep.subr.bf16.mxu1 %v6663_v26 }
 0x2dd   : > { %6148 = vmatmul.mubr.msk.bf16.gmra.mrb[28].mxu1 %vm9342_vm5, %v9295_v60  ;;  %vm9346_vm5 = vnez %v9314_v43  ;;  %v6669_v43 = vld [vmem:[%s9054_s4 + $0x220] sm:$0xff]   ;;  %v9366_v60 = vld [vmem:[#allocation33_spill] sm:$0xff] }
 0x2de   : > { %6151 = vmatprep.mubr.msk.bf16.mxu1 %vm9343_vm10, %v9297_v12  ;;  %6180 = vmatpush3.bf16.msra.mxu1 %v6663_v26  ;;  %vm9345_vm10 = vnez %v9307_v50  ;;  %v9353_v50 = vld [vmem:[#allocation12_spill] sm:$0xff] }
 0x2df   : > { %5992 = vmatmul.mubr.msk.bf16.vlgmr.msra.gmra.mrb[32].mxu0 %vm7782_vm6, %v9278_v4  ;;  %6181 = vmatprep.subr.bf16.mxu1 %v6664_v8  ;;  %vm9347_vm6 = vnez %v9257_v38  ;;  %v9356_v38 = vld [vmem:[#allocation21_spill] sm:$0xff]  ;;  %v9370_v12 = vld [vmem:[#allocation4_spill] sm:$0xff] }
 0x2e0   : > { %5995 = vmatprep.mubr.msk.bf16.mxu0 %vm7809_vm2, %v9283_v19  ;;  %vm9348_vm2 = vnez %v9259_v29  ;;  %v9357_v29 = vld [vmem:[#allocation22_spill] sm:$0xff]  ;;  %v9359_v4 = vld [vmem:[#allocation25_spill] sm:$0xff] }
 0x2e1   : > { %v9360_v19 = vld [vmem:[#allocation26_spill] sm:$0xff] }
 0x2e2   : > { %6182 = vmatpush3.bf16.msra.mxu1 %v6664_v8 }
 0x2e3   : > { %6215 = vmatprep.subr.bf16.mxu1 %v6665_v15 }
 0x2e5   : > { %6152 = vmatmul.mubr.msk.bf16.gmra.mrb[0].mxu1 %vm9344_vm9, %v9305_v39 }
 0x2e6   : > { %6155 = vmatprep.mubr.msk.bf16.mxu1 %vm9345_vm10, %v7357_v41  ;;  %v9349_v41 = vld [vmem:[#allocation27_spill] sm:$0xff] }
 0x2e7   : > { %5996 = vmatmul.mubr.msk.bf16.gmra.mrb[36].mxu0 %vm7815_vm1, %v9284_v30  ;;  %v9361_v30 = vld [vmem:[#allocation28_spill] sm:$0xff] }
 0x2e8   : > { %5999 = vmatprep.mubr.msk.bf16.mxu0 %vm9337_vm3, %v7522_v32  ;;  %v9350_v32 = vld [vmem:[#allocation8_spill] sm:$0xff]  ;;  %vm9371_vm3 = vnez %v9370_v12 }
 0x2e9   : > { %vm9351_vm1 = vnez %v9350_v32 }
 0x2ed   : > { %6156 = vmatmul.mubr.msk.bf16.gmra.mrb[4].mxu1 %vm9346_vm5, %v9313_v62 }
 0x2ee   : > { %6159 = vmatprep.mubr.msk.bf16.mxu1 %vm9347_vm6, %v7391_v51  ;;  %v9352_v51 = vmov 0  }
 0x2ef   : > { %6000 = vmatmul.mubr.msk.bf16.gmra.mrb[40].mxu0 %vm9338_vm7, %v7547_v5  ;;  %v9354_v5 = vld [vmem:[#allocation14_spill] sm:$0xff]  ;;  %vm9372_vm7 = vnez %v9312_v0 }
 0x2f0   : > { %6003 = vmatprep.mubr.msk.bf16.mxu0 %vm9339_vm4, %v7558_v22  ;;  %v6667_v22 = vld [vmem:[%s9054_s4 + $0x210] sm:$0xff]   ;;  %vm9369_vm4 = vnez %v9303_v21 }
 0x2f5   : > { %6160 = vmatmul.mubr.msk.bf16.gmra.mrb[8].mxu1 %vm9348_vm2, %v7393_v47  ;;  %v9355_v47 = vld [vmem:[#allocation15_spill] sm:$0xff] }
 0x2f6   : > { %6163 = vmatprep.mubr.msk.bf16.mxu1 %vm9351_vm1, %v9349_v41 }
 0x2f7   : > { %6004 = vmatmul.mubr.msk.bf16.gmra.mrb[44].mxu0 %vm9340_vm14, %v7571_v17  ;;  %v6668_v17 = vld [vmem:[%s9054_s4 + $0x218] sm:$0xff]   ;;  %vm9368_vm14 = vnez %v9301_v40 }
 0x2fd   : > { %6164 = vmatmul.mubr.bf16.gmra.mrb[12].mxu1 %v9352_v51 }
 0x2fe   : > { %6183 = vmatprep.mubr.bf16.mxu1 %v9353_v50 }
 0x305   : > { %6184 = vmatmul.mubr.bf16.vlgmr.msra.gmra.mrb[16].mxu1 %v9354_v5 }
 0x306   : > { %6216 = vmatpush3.bf16.msra.mxu1 %v6665_v15  ;;  %6187 = vmatprep.mubr.bf16.mxu1 %v9355_v47 }
 0x307   : > { %6217 = vmatprep.subr.bf16.mxu1 %v6666_v18 }
 0x30a   : > { %6218 = vmatpush3.bf16.msra.mxu1 %v6666_v18 }
 0x30b   : > { %6219 = vmatprep.subr.bf16.mxu1 %v6667_v22 }
 0x30d   : > { %6188 = vmatmul.mubr.bf16.gmra.mrb[20].mxu1 %v9356_v38 }
 0x30e   : > { %6191 = vmatprep.mubr.bf16.mxu1 %v9357_v29  ;;  %6220 = vmatpush3.bf16.msra.mxu1 %v6667_v22 }
 0x30f   : > { %6221 = vmatprep.subr.bf16.mxu1 %v6668_v17 }
 0x312   : > { %6222 = vmatpush3.bf16.msra.mxu1 %v6668_v17 }
 0x313   : > { %6223 = vmatprep.subr.bf16.mxu1 %v6669_v43 }
 0x315   : > { %6192 = vmatmul.mubr.bf16.gmra.mrb[24].mxu1 %v9358_v37 }
 0x316   : > { %6195 = vmatprep.mubr.bf16.mxu1 %v9359_v4  ;;  %6224 = vmatpush3.bf16.msra.mxu1 %v6669_v43 }
 0x317   : > { %6225 = vmatprep.subr.bf16.mxu1 %v6670_v34 }
 0x31a   : > { %6226 = vmatpush3.bf16.msra.mxu1 %v6670_v34 }
 0x31b   : > { %6227 = vmatprep.subr.bf16.mxu1 %v6671_v24 }
 0x31d   : > { %6196 = vmatmul.mubr.bf16.gmra.mrb[28].mxu1 %v9360_v19 }
 0x31e   : > { %6199 = vmatprep.mubr.bf16.mxu1 %v9361_v30  ;;  %6228 = vmatpush3.bf16.msra.mxu1 %v6671_v24 }
 0x31f   : > { %6229 = vmatprep.subr.bf16.mxu1 %v6672_v28 }
 0x322   : > { %6230 = vmatpush3.bf16.msra.mxu1 %v6672_v28 }
 0x325   : > { %6200 = vmatmul.mubr.bf16.gmra.mrb[0].mxu1 %v9362_v54 }
 0x326   : > { %6203 = vmatprep.mubr.bf16.mxu1 %v9363_v35 }
 0x32d   : > { %6204 = vmatmul.mubr.bf16.gmra.mrb[4].mxu1 %v9364_v36 }
 0x32e   : > { %6207 = vmatprep.mubr.bf16.mxu1 %v9365_v44 }
 0x335   : > { %6208 = vmatmul.mubr.bf16.gmra.mrb[8].mxu1 %v9366_v60 }
 0x336   : > { %6211 = vmatprep.mubr.bf16.mxu1 %v9367_v46 }
 0x33d   : > { %6212 = vmatmul.mubr.bf16.gmra.mrb[12].mxu1 %v9352_v51 }
 0x33e   : > { %6231 = vmatprep.mubr.msk.bf16.mxu1 %vm9368_vm14, %v9304_v33 }
 0x345   : > { %6232 = vmatmul.mubr.msk.bf16.vlgmr.msra.gmra.mrb[16].mxu1 %vm9369_vm4, %v7609_v11 }
 0x346   : > { %6235 = vmatprep.mubr.msk.bf16.mxu1 %vm9371_vm3, %v7626_v49 }
 0x34d   : > { %6236 = vmatmul.mubr.msk.bf16.gmra.mrb[20].mxu1 %vm9372_vm7, %v7645_v42 }
 0x34e   : > { %6239 = vmatprep.mubr.msk.bf16.mxu1 %vm7967_vm12, %v7655_v27  ;;  %vm9373_vm12 = vnez %v9328_v31 }
 0x355   : > { %6240 = vmatmul.mubr.msk.bf16.gmra.mrb[24].mxu1 %vm7972_vm13, %v7666_v16  ;;  %vm9374_vm13 = vnez %v9330_v3 }
 0x356   : > { %6243 = vmatprep.mubr.msk.bf16.mxu1 %vm7995_vm15, %v7678_v13  ;;  %vm9375_vm15 = vnez %v9332_v7 }
 0x35d   : > { %6244 = vmatmul.mubr.msk.bf16.gmra.mrb[28].mxu1 %vm8000_vm0, %v7688_v61  ;;  %vm9376_vm0 = vnez %v9334_v25 }
 0x35e   : > { %6247 = vmatprep.mubr.msk.bf16.mxu1 %vm8031_vm11, %v7701_v14  ;;  %vm9377_vm11 = vnez %v9336_v2 }
 0x365   : > { %6248 = vmatmul.mubr.msk.bf16.gmra.mrb[0].mxu1 %vm8036_vm8, %v7713_v48 }
 0x366   : > { %6251 = vmatprep.mubr.msk.bf16.mxu1 %vm9373_vm12, %v7718_v55 }
 0x36d   : > { %6252 = vmatmul.mubr.msk.bf16.gmra.mrb[4].mxu1 %vm9374_vm13, %v7724_v20 }
 0x36e   : > { %6255 = vmatprep.mubr.msk.bf16.mxu1 %vm9375_vm15, %v7730_v63 }
 0x375   : > { %6256 = vmatmul.mubr.msk.bf16.gmra.mrb[8].mxu1 %vm9376_vm0, %v7736_v6 }
 0x376   : > { %6259 = vmatprep.mubr.msk.bf16.mxu1 %vm9377_vm11, %v7745_v9 }
 0x37d   : > { %6260 = vmatmul.mubr.bf16.gmra.mrb[12].mxu1 %v9352_v51 }
 0x392   : > { %v8325_v33 = vpop.f32.mrb[48].mxu0 }
 0x393   : > { %v8327_v11 = vpop.f32.mrb[49].mxu0 }
 0x394   : > { %v8329_v49 = vpop.f32.mrb[50].mxu0 }
 0x395   : > { %v8331_v42 = vpop.f32.mrb[51].mxu0 }
 0x39a   : > { %v8333_v27 = vpop.f32.mrb[52].mxu0 }
 0x39b   : > { %v8335_v16 = vpop.f32.mrb[53].mxu0 }
 0x39c   : > { %v8337_v13 = vpop.f32.mrb[54].mxu0 }
 0x39d   : > { %v8339_v61 = vpop.f32.mrb[55].mxu0 }
 0x3a2   : > { %v8341_v14 = vpop.f32.mrb[56].mxu0 }
 0x3a3   : > { %v8343_v48 = vpop.f32.mrb[57].mxu0 }
 0x3a4   : > { %v8345_v55 = vpop.f32.mrb[58].mxu0 }
 0x3a5   : > { %v8347_v20 = vpop.f32.mrb[59].mxu0 }
 0x3aa   : > { %v8349_v63 = vpop.f32.mrb[60].mxu0 }
 0x3ab   : > { %v8351_v6 = vpop.f32.mrb[61].mxu0 }
 0x3ac   : > { %v8353_v9 = vpop.f32.mrb[62].mxu0 }
 0x3ad   : > { %v8355_v21 = vpop.f32.mrb[63].mxu0 }
 0x3b2   : > { %v5993_v40 = vpop.f32.mrb[32].mxu0 }
 0x3b3   : > { %v2620_v1 = vpop.f32.mrb[33].mxu0 }
 0x3b4   : > { %v5994_v39 = vpop.f32.mrb[34].mxu0 }
 0x3b5   : > { %v2623_v0 = vpop.f32.mrb[35].mxu0 }
 0x3ba   : > { %v5997_v62 = vpop.f32.mrb[36].mxu0 }
 0x3bb   : > { %v2636_v58 = vpop.f32.mrb[37].mxu0 }
 0x3bc   : > { %v5998_v53 = vpop.f32.mrb[38].mxu0 }
 0x3bd   : > { %v2639_v45 = vpop.f32.mrb[39].mxu0 }
 0x3c2   : > { %v6001_v52 = vpop.f32.mrb[40].mxu0 }
 0x3c3   : > { %v2652_v57 = vpop.f32.mrb[41].mxu0 }
 0x3c4   : > { %v6002_v56 = vpop.f32.mrb[42].mxu0 }
 0x3c5   : > { %v2655_v31 = vpop.f32.mrb[43].mxu0 }
 0x3ca   : > { %v6005_v3 = vpop.f32.mrb[44].mxu0 }
 0x3cb   : > { %v2668_v7 = vpop.f32.mrb[45].mxu0 }
 0x3cc   : > { %v8357_v25 = vpop.f32.mrb[46].mxu0 }
 0x3cd   : > { %v8359_v2 = vpop.f32.mrb[47].mxu0 }
 0x418   : > { %v6233_v59 = vpop.f32.mrb[16].mxu1 }
 0x419   : > { %v8361_v23 = vadd.f32 %v6233_v59, %v5993_v40  ;;  %v3910_v10 = vpop.f32.mrb[17].mxu1 }
 0x41a   : > { %v8363_v26 = vadd.f32 %v3910_v10, %v2620_v1  ;;  %v6234_v8 = vpop.f32.mrb[18].mxu1 }
 0x41b   : > { %v8365_v15 = vadd.f32 %v6234_v8, %v5994_v39  ;;  %v3913_v41 = vpop.f32.mrb[19].mxu1  ;;  %v4110_v5 = vmul.f32 %v8361_v23, %v8361_v23 }
 0x41c   : > { %v8367_v32 = vadd.f32 %v3913_v41, %v2623_v0  ;;  %v4108_v51 = vmul.f32 %v8363_v26, %v8363_v26 }
 0x41d   : > { %v4111_v43 = vmul.f32 %v8365_v15, %v8365_v15 }
 0x41e   : > { %v4071_v50 = vadd.f32 %v8367_v32, %v8363_v26  ;;  %v4109_v18 = vmul.f32 %v8367_v32, %v8367_v32 }
 0x420   : > { %v4072_v47 = vadd.f32 %v8361_v23, %v4071_v50  ;;  %v4140_v22 = vadd.f32 %v4109_v18, %v4108_v51  ;;  %v6237_v17 = vpop.f32.mrb[20].mxu1 }
 0x421   : > { %v8378_v38 = vadd.f32 %v6237_v17, %v5997_v62  ;;  %v3926_v29 = vpop.f32.mrb[21].mxu1 }
 0x422   : > { %v4141_v34 = vadd.f32 %v4140_v22, %v4110_v5  ;;  %v8382_v37 = vadd.f32 %v3926_v29, %v2636_v58  ;;  %v4073_v4 = vadd.f32 %v8365_v15, %v4072_v47  ;;  %v6238_v24 = vpop.f32.mrb[22].mxu1 }
 0x423   : > { %v8385_v28 = vadd.f32 %v6238_v24, %v5998_v53  ;;  %v3929_v19 = vpop.f32.mrb[23].mxu1  ;;  %v4114_v12 = vmul.f32 %v8378_v38, %v8378_v38 }
 0x424   : > { %v4074_v30 = vadd.f32 %v8382_v37, %v4073_v4  ;;  %v4112_v54 = vmul.f32 %v8382_v37, %v8382_v37  ;;  %v4142_v35 = vadd.f32 %v4141_v34, %v4111_v43  ;;  %v8390_v36 = vadd.f32 %v3929_v19, %v2639_v45 }
 0x425   : > { %v4115_v58 = vmul.f32 %v8385_v28, %v8385_v28 }
 0x426   : > { %v4143_v44 = vadd.f32 %v4142_v35, %v4112_v54  ;;  %v4075_v60 = vadd.f32 %v8390_v36, %v4074_v30  ;;  %v4113_v46 = vmul.f32 %v8390_v36, %v8390_v36 }
 0x428   : > { %v4076_v40 = vadd.f32 %v8378_v38, %v4075_v60  ;;  %v4144_v1 = vadd.f32 %v4143_v44, %v4113_v46  ;;  %v6241_v39 = vpop.f32.mrb[24].mxu1 }
 0x429   : > { %v8398_v0 = vadd.f32 %v6241_v39, %v6001_v52  ;;  %v3942_v62 = vpop.f32.mrb[25].mxu1 }
 0x42a   : > { %v4145_v53 = vadd.f32 %v4144_v1, %v4114_v12  ;;  %v8402_v45 = vadd.f32 %v3942_v62, %v2652_v57  ;;  %v4077_v59 = vadd.f32 %v8385_v28, %v4076_v40  ;;  %v6242_v10 = vpop.f32.mrb[26].mxu1 }
 0x42b   : > { %v8405_v8 = vadd.f32 %v6242_v10, %v6002_v56  ;;  %v3945_v41 = vpop.f32.mrb[27].mxu1  ;;  %v4118_v22 = vmul.f32 %v8398_v0, %v8398_v0 }
 0x42c   : > { %v4078_v51 = vadd.f32 %v8402_v45, %v4077_v59  ;;  %v4116_v50 = vmul.f32 %v8402_v45, %v8402_v45  ;;  %v4146_v52 = vadd.f32 %v4145_v53, %v4115_v58  ;;  %v8410_v18 = vadd.f32 %v3945_v41, %v2655_v31 }
 0x42d   : > { %v4119_v31 = vmul.f32 %v8405_v8, %v8405_v8 }
 0x42e   : > { %v4147_v5 = vadd.f32 %v4146_v52, %v4116_v50  ;;  %v4079_v47 = vadd.f32 %v8410_v18, %v4078_v51  ;;  %v4117_v57 = vmul.f32 %v8410_v18, %v8410_v18 }
 0x430   : > { %v4080_v56 = vadd.f32 %v8398_v0, %v4079_v47  ;;  %v4148_v17 = vadd.f32 %v4147_v5, %v4117_v57  ;;  %v6245_v29 = vpop.f32.mrb[28].mxu1 }
 0x431   : > { %v8418_v43 = vadd.f32 %v6245_v29, %v6005_v3  ;;  %v3958_v34 = vpop.f32.mrb[29].mxu1 }
 0x432   : > { %v4149_v4 = vadd.f32 %v4148_v17, %v4118_v22  ;;  %v8422_v24 = vadd.f32 %v3958_v34, %v2668_v7  ;;  %v4081_v19 = vadd.f32 %v8405_v8, %v4080_v56  ;;  %v6246_v30 = vpop.f32.mrb[30].mxu1 }
 0x433   : > { %v8426_v54 = vadd.f32 %v6246_v30, %v8357_v25  ;;  %v3961_v35 = vpop.f32.mrb[31].mxu1  ;;  %v4122_v25 = vmul.f32 %v8418_v43, %v8418_v43 }
 0x434   : > { %v4082_v44 = vadd.f32 %v8422_v24, %v4081_v19  ;;  %v4120_v3 = vmul.f32 %v8422_v24, %v8422_v24  ;;  %v4150_v60 = vadd.f32 %v4149_v4, %v4119_v31  ;;  %v8432_v46 = vadd.f32 %v3961_v35, %v8359_v2 }
 0x435   : > { %v4123_v2 = vmul.f32 %v8426_v54, %v8426_v54 }
 0x436   : > { %v4151_v12 = vadd.f32 %v4150_v60, %v4120_v3  ;;  %v4083_v7 = vadd.f32 %v8432_v46, %v4082_v44  ;;  %v4121_v40 = vmul.f32 %v8432_v46, %v8432_v46 }
 0x438   : > { %v4084_v1 = vadd.f32 %v8418_v43, %v4083_v7  ;;  %v4152_v39 = vadd.f32 %v4151_v12, %v4121_v40  ;;  %v6249_v62 = vpop.f32.mrb[0].mxu1 }
 0x439   : > { %v8441_v58 = vadd.f32 %v6249_v62, %v8325_v33  ;;  %v3974_v53 = vpop.f32.mrb[1].mxu1 }
 0x43a   : > { %v4153_v59 = vadd.f32 %v4152_v39, %v4122_v25  ;;  %v8446_v10 = vadd.f32 %v3974_v53, %v8327_v11  ;;  %v4085_v41 = vadd.f32 %v8426_v54, %v4084_v1  ;;  %v6250_v51 = vpop.f32.mrb[2].mxu1 }
 0x43b   : > { %v8450_v50 = vadd.f32 %v6250_v51, %v8329_v49  ;;  %v3977_v52 = vpop.f32.mrb[3].mxu1  ;;  %v4126_v49 = vmul.f32 %v8441_v58, %v8441_v58 }
 0x43c   : > { %v4086_v5 = vadd.f32 %v8446_v10, %v4085_v41  ;;  %v4124_v33 = vmul.f32 %v8446_v10, %v8446_v10  ;;  %v4154_v47 = vadd.f32 %v4153_v59, %v4123_v2  ;;  %v8456_v57 = vadd.f32 %v3977_v52, %v8331_v42 }
 0x43d   : > { %v4127_v42 = vmul.f32 %v8450_v50, %v8450_v50 }
 0x43e   : > { %v4155_v22 = vadd.f32 %v4154_v47, %v4124_v33  ;;  %v4087_v11 = vadd.f32 %v8456_v57, %v4086_v5  ;;  %v4125_v56 = vmul.f32 %v8456_v57, %v8456_v57 }
 0x440   : > { %v4088_v17 = vadd.f32 %v8441_v58, %v4087_v11  ;;  %v4156_v29 = vadd.f32 %v4155_v22, %v4125_v56  ;;  %v6253_v34 = vpop.f32.mrb[4].mxu1 }
 0x441   : > { %v8465_v31 = vadd.f32 %v6253_v34, %v8333_v27  ;;  %v3990_v4 = vpop.f32.mrb[5].mxu1 }
 0x442   : > { %v4157_v19 = vadd.f32 %v4156_v29, %v4126_v49  ;;  %v8470_v30 = vadd.f32 %v3990_v4, %v8335_v16  ;;  %v4089_v35 = vadd.f32 %v8450_v50, %v4088_v17  ;;  %v6254_v44 = vpop.f32.mrb[6].mxu1 }
 0x443   : > { %v8474_v3 = vadd.f32 %v6254_v44, %v8337_v13  ;;  %v3993_v60 = vpop.f32.mrb[7].mxu1  ;;  %v4130_v13 = vmul.f32 %v8465_v31, %v8465_v31 }
 0x444   : > { %v4090_v12 = vadd.f32 %v8470_v30, %v4089_v35  ;;  %v4128_v27 = vmul.f32 %v8470_v30, %v8470_v30  ;;  %v4158_v7 = vadd.f32 %v4157_v19, %v4127_v42  ;;  %v8480_v40 = vadd.f32 %v3993_v60, %v8339_v61 }
 0x445   : > { %v4131_v61 = vmul.f32 %v8474_v3, %v8474_v3 }
 0x446   : > { %v4159_v25 = vadd.f32 %v4158_v7, %v4128_v27  ;;  %v4091_v16 = vadd.f32 %v8480_v40, %v4090_v12  ;;  %v4129_v1 = vmul.f32 %v8480_v40, %v8480_v40 }
 0x448   : > { %v4092_v39 = vadd.f32 %v8465_v31, %v4091_v16  ;;  %v4160_v62 = vadd.f32 %v4159_v25, %v4129_v1  ;;  %v6257_v53 = vpop.f32.mrb[8].mxu1 }
 0x449   : > { %v8489_v2 = vadd.f32 %v6257_v53, %v8341_v14  ;;  %v4006_v59 = vpop.f32.mrb[9].mxu1 }
 0x44a   : > { %v4161_v41 = vadd.f32 %v4160_v62, %v4130_v13  ;;  %v8494_v51 = vadd.f32 %v4006_v59, %v8343_v48  ;;  %v4093_v52 = vadd.f32 %v8474_v3, %v4092_v39  ;;  %v6258_v5 = vpop.f32.mrb[10].mxu1 }
 0x44b   : > { %v8498_v33 = vadd.f32 %v6258_v5, %v8345_v55  ;;  %v4009_v47 = vpop.f32.mrb[11].mxu1  ;;  %v4134_v55 = vmul.f32 %v8489_v2, %v8489_v2 }
 0x44c   : > { %v4094_v22 = vadd.f32 %v8494_v51, %v4093_v52  ;;  %v4132_v14 = vmul.f32 %v8494_v51, %v8494_v51  ;;  %v4162_v11 = vadd.f32 %v4161_v41, %v4131_v61  ;;  %v8504_v56 = vadd.f32 %v4009_v47, %v8347_v20 }
 0x44d   : > { %v4135_v20 = vmul.f32 %v8498_v33, %v8498_v33 }
 0x44e   : > { %v4163_v49 = vadd.f32 %v4162_v11, %v4132_v14  ;;  %v4095_v48 = vadd.f32 %v8504_v56, %v4094_v22  ;;  %v4133_v17 = vmul.f32 %v8504_v56, %v8504_v56 }
 0x450   : > { %v4096_v29 = vadd.f32 %v8489_v2, %v4095_v48  ;;  %v4164_v34 = vadd.f32 %v4163_v49, %v4133_v17  ;;  %v6261_v4 = vpop.f32.mrb[12].mxu1 }
 0x451   : > { %v8513_v42 = vadd.f32 %v6261_v4, %v8349_v63  ;;  %v4022_v19 = vpop.f32.mrb[13].mxu1  ;;  %v6673_v4 = vld [vmem:[%s9057_s7] sm:$0xff]  }
 0x452   : > { %v4165_v35 = vadd.f32 %v4164_v34, %v4134_v55  ;;  %v8518_v44 = vadd.f32 %v4022_v19, %v8351_v6  ;;  %v4097_v60 = vadd.f32 %v8498_v33, %v4096_v29  ;;  %v6262_v12 = vpop.f32.mrb[14].mxu1  ;;  %v6674_v19 = vld [vmem:[%s9057_s7 + $0x8] sm:$0xff]   ;;  %6263 = vmatprep.subr.bf16.mxu0 %v6673_v4 }
 0x453   : > { %v8522_v27 = vadd.f32 %v6262_v12, %v8353_v9  ;;  %v4025_v7 = vpop.f32.mrb[15].mxu1  ;;  %v4138_v9 = vmul.f32 %v8513_v42, %v8513_v42  ;;  %6264 = vmatpush3.bf16.msra.mxu0 %v6673_v4  ;;  %v6678_v12 = vld [vmem:[%s9057_s7 + $0x28] sm:$0xff]  }
 0x454   : > { %v4098_v25 = vadd.f32 %v8518_v44, %v4097_v60  ;;  %v4136_v63 = vmul.f32 %v8518_v44, %v8518_v44  ;;  %v4166_v16 = vadd.f32 %v4165_v35, %v4135_v20  ;;  %v8528_v1 = vadd.f32 %v4025_v7, %v8355_v21  ;;  %6265 = vmatprep.subr.bf16.mxu0 %v6674_v19  ;;  %v6675_v20 = vld [vmem:[%s9057_s7 + $0x10] sm:$0xff]   ;;  %v6676_v35 = vld [vmem:[%s9057_s7 + $0x18] sm:$0xff]   ;;  %v6677_v60 = vld [vmem:[%s9057_s7 + $0x20] sm:$0xff]  }
 0x455   : > { %v4139_v59 = vmul.f32 %v8522_v27, %v8522_v27  ;;  %v6679_v7 = vld [vmem:[%s9057_s7 + $0x30] sm:$0xff]  }
 0x456   : > { %v4167_v13 = vadd.f32 %v4166_v16, %v4136_v63  ;;  %v4099_v6 = vadd.f32 %v8528_v1, %v4098_v25  ;;  %v4137_v39 = vmul.f32 %v8528_v1, %v8528_v1  ;;  %v6680_v25 = vld [vmem:[%s9057_s7 + $0x38] sm:$0xff]  }
 0x457   : > { %6266 = vmatpush3.bf16.msra.mxu0 %v6674_v19 }
 0x458   : > { %v4100_v62 = vadd.f32 %v8513_v42, %v4099_v6  ;;  %v4168_v53 = vadd.f32 %v4167_v13, %v4137_v39  ;;  %6267 = vmatprep.subr.bf16.mxu0 %v6675_v20 }
 0x45a   : > { %v4169_v61 = vadd.f32 %v4168_v53, %v4138_v9  ;;  %v4101_v41 = vadd.f32 %v8522_v27, %v4100_v62 }
 0x45b   : > { %6268 = vmatpush3.bf16.msra.mxu0 %v6675_v20 }
 0x45c   : > { %v4102_v21 = vrot.slane %v4101_v41, 4  ;;  %v4170_v52 = vadd.f32 %v4169_v61, %v4139_v59  ;;  %6269 = vmatprep.subr.bf16.mxu0 %v6676_v35  ;;  %v4069_v59 = vld [vmem:[%s9055_s5] sm:$0x1] }
 0x45e   : > { %v4103_v5 = vadd.f32 %v4102_v21, %v4101_v41  ;;  %v4171_v47 = vrot.slane %v4170_v52, 4  ;;  %v4070_v21 = vld [vmem:[%s9056_s6] sm:$0x1] }
 0x45f   : > { %6270 = vmatpush3.bf16.msra.mxu0 %v6676_v35 }
 0x460   : > { %v4104_v22 = vrot.slane %v4103_v5, 2  ;;  %v4172_v14 = vadd.f32 %v4171_v47, %v4170_v52  ;;  %6271 = vmatprep.subr.bf16.mxu0 %v6677_v60  ;;  %v9378_v47 = vld [vmem:[#allocation3_spill] sm:$0xff] }
 0x462   : > { %v4105_v11 = vadd.f32 %v4104_v22, %v4103_v5  ;;  %v4173_v49 = vrot.slane %v4172_v14, 2 }
 0x463   : > { %6272 = vmatpush3.bf16.msra.mxu0 %v6677_v60 }
 0x464   : > { %v4106_v48 = vrot.slane %v4105_v11, 1  ;;  %v4174_v17 = vadd.f32 %v4173_v49, %v4172_v14  ;;  %6273 = vmatprep.subr.bf16.mxu0 %v6678_v12 }
 0x466   : > { %v4107_v55 = vadd.f32 %v4106_v48, %v4105_v11  ;;  %v4175_v29 = vrot.slane %v4174_v17, 1 }
 0x467   : > { %6274 = vmatpush3.bf16.msra.mxu0 %v6678_v12 }
 0x468   : > { %4177 = vadd.xlane.f32.xlu1 %v4107_v55  ;;  %v4176_v34 = vadd.f32 %v4175_v29, %v4174_v17  ;;  %6275 = vmatprep.subr.bf16.mxu0 %v6679_v7 }
 0x46b   : > { %6276 = vmatpush3.bf16.msra.mxu0 %v6679_v7 }
 0x46c   : > { %4180 = vadd.xlane.f32.xlu1 %v4176_v34  ;;  %6277 = vmatprep.subr.bf16.mxu0 %v6680_v25 }
 0x46f   : > { %6278 = vmatpush3.bf16.msra.mxu0 %v6680_v25 }
 0x4f5   : > { %v4178_v63 = vpop.xlane.xlu1 %4177 }
 0x4f6   : > { %v4179_v16 = vmul.f32 0.00048828125, %v4178_v63 }
 0x4f8   : > { %v4183_v6 = vmul.f32 %v4179_v16, %v4179_v16 }
 0x4f9   : > { %v4181_v13 = vpop.xlane.xlu1 %4180 }
 0x4fa   : > { %v4182_v39 = vmul.f32 0.00048828125, %v4181_v13 }
 0x4fc   : > { %v4184_v9 = vsub.f32 %v4182_v39, %v4183_v6 }
 0x4fe   : > { %v4185_v62 = vmax.f32 %v4184_v9, 0.0 }
 0x500   : > { %v4186_v53 = vadd.f32 1e-05, %v4185_v62 }
 0x502   : > { %6683 = vrsqrt.f32 %v4186_v53 }
 0x50c   : > { %v6684_v61 = vpop.eup %6683 }
 0x50d   : > { %v4188_v41 = vmul.f32 %v6684_v61, %v4069_v59 }
 0x50f   : > { %v4189_v52 = vmul.f32 %v4188_v41, %v4179_v16  ;;  %v8570_v22 = vrot.slane %v4188_v41, %v9378_v47 }
 0x511   : > { %v4190_v5 = vsub.f32 %v4070_v21, %v4189_v52  ;;  %v4199_v11 = vmul.f32 %v8361_v23, %v8570_v22  ;;  %v4200_v49 = vmul.f32 %v8365_v15, %v8570_v22  ;;  %v4197_v48 = vmul.f32 %v8363_v26, %v8570_v22 }
 0x512   : > { %v4198_v17 = vmul.f32 %v8367_v32, %v8570_v22  ;;  %v4201_v55 = vmul.f32 %v8382_v37, %v8570_v22  ;;  %v4202_v29 = vmul.f32 %v8390_v36, %v8570_v22  ;;  %v4203_v36 = vmul.f32 %v8378_v38, %v8570_v22 }
 0x513   : > { %v8573_v14 = vrot.slane %v4190_v5, %v9378_v47  ;;  %v4204_v7 = vmul.f32 %v8385_v28, %v8570_v22  ;;  %v4205_v63 = vmul.f32 %v8402_v45, %v8570_v22  ;;  %v4206_v16 = vmul.f32 %v8410_v18, %v8570_v22 }
 0x514   : > { %v4207_v18 = vmul.f32 %v8398_v0, %v8570_v22  ;;  %v4208_v61 = vmul.f32 %v8405_v8, %v8570_v22  ;;  %v4209_v41 = vmul.f32 %v8422_v24, %v8570_v22  ;;  %v4210_v21 = vmul.f32 %v8432_v46, %v8570_v22 }
 0x515   : > { %v4237_v34 = vadd.f32 %v8573_v14, %v4199_v11  ;;  %v4238_v4 = vadd.f32 %v8573_v14, %v4200_v49  ;;  %v4235_v23 = vadd.f32 %v8573_v14, %v4197_v48  ;;  %v4236_v15 = vadd.f32 %v8573_v14, %v4198_v17 }
 0x516   : > { %v4239_v19 = vadd.f32 %v8573_v14, %v4201_v55  ;;  %v4240_v26 = vadd.f32 %v8573_v14, %v4202_v29  ;;  %v4241_v6 = vadd.f32 %v8573_v14, %v4203_v36  ;;  %v4242_v39 = vadd.f32 %v8573_v14, %v4204_v7 }
 0x517   : > { %v4269_v20 = vmax.f32 %v4237_v34, 0.0  ;;  %v4270_v32 = vmax.f32 %v4238_v4, 0.0  ;;  %v4267_v35 = vmax.f32 %v4235_v23, 0.0  ;;  %v4268_v60 = vmax.f32 %v4236_v15, 0.0 }
 0x518   : > { %v4271_v37 = vmax.f32 %v4239_v19, 0.0  ;;  %v4272_v12 = vmax.f32 %v4240_v26, 0.0  ;;  %v4243_v62 = vadd.f32 %v8573_v14, %v4205_v63  ;;  %v4244_v38 = vadd.f32 %v8573_v14, %v4206_v16 }
 0x519   : > { %v4300_v25 = vpack.c.bf16 %v4270_v32, %v4269_v20  ;;  %v4299_v13 = vpack.c.bf16 %v4268_v60, %v4267_v35  ;;  %v4273_v28 = vmax.f32 %v4241_v6, 0.0  ;;  %v4274_v53 = vmax.f32 %v4242_v39, 0.0 }
 0x51a   : > { %v4301_v9 = vpack.c.bf16 %v4272_v12, %v4271_v37  ;;  %v4275_v59 = vmax.f32 %v4243_v62, 0.0  ;;  %v4276_v45 = vmax.f32 %v4244_v38, 0.0  ;;  %v4245_v5 = vadd.f32 %v8573_v14, %v4207_v18 }
 0x51b   : > { %6279 = vmatprep.mubr.bf16.mxu0 %v4299_v13  ;;  %v4302_v52 = vpack.c.bf16 %v4274_v53, %v4273_v28  ;;  %v4246_v11 = vadd.f32 %v8573_v14, %v4208_v61  ;;  %v4247_v48 = vadd.f32 %v8573_v14, %v4209_v41  ;;  %v4248_v17 = vadd.f32 %v8573_v14, %v4210_v21 }
 0x51c   : > { %6280 = vmatmul.mubr.bf16.vlgmr.msra.gmra.mrb[64].mxu0 %v4300_v25  ;;  %v4303_v49 = vpack.c.bf16 %v4276_v45, %v4275_v59  ;;  %v4277_v0 = vmax.f32 %v4245_v5, 0.0  ;;  %v4211_v24 = vmul.f32 %v8418_v43, %v8570_v22  ;;  %v4212_v46 = vmul.f32 %v8426_v54, %v8570_v22 }
 0x51d   : > { %6283 = vmatprep.mubr.bf16.mxu0 %v4301_v9  ;;  %v4278_v8 = vmax.f32 %v4246_v11, 0.0  ;;  %v4279_v55 = vmax.f32 %v4247_v48, 0.0  ;;  %v4280_v29 = vmax.f32 %v4248_v17, 0.0  ;;  %v4213_v34 = vmul.f32 %v8446_v10, %v8570_v22 }
 0x51e   : > { %v4214_v4 = vmul.f32 %v8456_v57, %v8570_v22  ;;  %v4249_v15 = vadd.f32 %v8573_v14, %v4211_v24  ;;  %v4250_v19 = vadd.f32 %v8573_v14, %v4212_v46  ;;  %v4215_v10 = vmul.f32 %v8441_v58, %v8570_v22 }
 0x51f   : > { %v4304_v23 = vpack.c.bf16 %v4278_v8, %v4277_v0  ;;  %v4305_v26 = vpack.c.bf16 %v4280_v29, %v4279_v55  ;;  %v4251_v20 = vadd.f32 %v8573_v14, %v4213_v34  ;;  %v4216_v57 = vmul.f32 %v8450_v50, %v8570_v22 }
 0x520   : > { %v4252_v32 = vadd.f32 %v8573_v14, %v4214_v4  ;;  %v4281_v43 = vmax.f32 %v4249_v15, 0.0  ;;  %v4282_v54 = vmax.f32 %v4250_v19, 0.0  ;;  %v4217_v37 = vmul.f32 %v8470_v30, %v8570_v22 }
 0x521   : > { %v4283_v35 = vmax.f32 %v4251_v20, 0.0  ;;  %v4218_v12 = vmul.f32 %v8480_v40, %v8570_v22  ;;  %v4253_v7 = vadd.f32 %v8573_v14, %v4215_v10  ;;  %v4254_v25 = vadd.f32 %v8573_v14, %v4216_v57 }
 0x522   : > { %v4284_v60 = vmax.f32 %v4252_v32, 0.0  ;;  %v4306_v36 = vpack.c.bf16 %v4282_v54, %v4281_v43  ;;  %v4255_v16 = vadd.f32 %v8573_v14, %v4217_v37  ;;  %v4219_v30 = vmul.f32 %v8465_v31, %v8570_v22 }
 0x523   : > { %v4256_v13 = vadd.f32 %v8573_v14, %v4218_v12  ;;  %v4285_v58 = vmax.f32 %v4253_v7, 0.0  ;;  %v4286_v50 = vmax.f32 %v4254_v25, 0.0  ;;  %v4220_v40 = vmul.f32 %v8474_v3, %v8570_v22 }
 0x524   : > { %6284 = vmatmul.mubr.bf16.gmra.mrb[68].mxu0 %v4302_v52  ;;  %v4307_v63 = vpack.c.bf16 %v4284_v60, %v4283_v35  ;;  %v4287_v6 = vmax.f32 %v4255_v16, 0.0  ;;  %v4221_v9 = vmul.f32 %v8494_v51, %v8570_v22  ;;  %v4222_v62 = vmul.f32 %v8504_v56, %v8570_v22 }
 0x525   : > { %6287 = vmatprep.mubr.bf16.mxu0 %v4303_v49  ;;  %v4288_v39 = vmax.f32 %v4256_v13, 0.0  ;;  %v4308_v38 = vpack.c.bf16 %v4286_v50, %v4285_v58  ;;  %v4257_v28 = vadd.f32 %v8573_v14, %v4219_v30  ;;  %v4258_v53 = vadd.f32 %v8573_v14, %v4220_v40 }
 0x526   : > { %v4259_v45 = vadd.f32 %v8573_v14, %v4221_v9  ;;  %v4260_v18 = vadd.f32 %v8573_v14, %v4222_v62  ;;  %v4223_v51 = vmul.f32 %v8489_v2, %v8570_v22  ;;  %v4224_v56 = vmul.f32 %v8498_v33, %v8570_v22 }
 0x527   : > { %v4309_v59 = vpack.c.bf16 %v4288_v39, %v4287_v6  ;;  %v4289_v31 = vmax.f32 %v4257_v28, 0.0  ;;  %v4290_v3 = vmax.f32 %v4258_v53, 0.0  ;;  %v4225_v21 = vmul.f32 %v8518_v44, %v8570_v22 }
 0x528   : > { %v4291_v61 = vmax.f32 %v4259_v45, 0.0  ;;  %v4292_v41 = vmax.f32 %v4260_v18, 0.0  ;;  %v4226_v52 = vmul.f32 %v8528_v1, %v8570_v22  ;;  %v4261_v11 = vadd.f32 %v8573_v14, %v4223_v51 }
 0x529   : > { %v4310_v5 = vpack.c.bf16 %v4290_v3, %v4289_v31  ;;  %v4262_v49 = vadd.f32 %v8573_v14, %v4224_v56  ;;  %v4263_v17 = vadd.f32 %v8573_v14, %v4225_v21  ;;  %v4227_v44 = vmul.f32 %v8513_v42, %v8570_v22 }
 0x52a   : > { %v4311_v48 = vpack.c.bf16 %v4292_v41, %v4291_v61  ;;  %v4264_v0 = vadd.f32 %v8573_v14, %v4226_v52  ;;  %v4293_v2 = vmax.f32 %v4261_v11, 0.0  ;;  %v4228_v1 = vmul.f32 %v8522_v27, %v8570_v22 }
 0x52b   : > { %v4294_v33 = vmax.f32 %v4262_v49, 0.0  ;;  %v4295_v8 = vmax.f32 %v4263_v17, 0.0  ;;  %v4265_v24 = vadd.f32 %v8573_v14, %v4227_v44 }
 0x52c   : > { %6288 = vmatmul.mubr.bf16.gmra.mrb[72].mxu0 %v4304_v23  ;;  %v4296_v55 = vmax.f32 %v4264_v0, 0.0  ;;  %v4266_v46 = vadd.f32 %v8573_v14, %v4228_v1 }
 0x52d   : > { %6291 = vmatprep.mubr.bf16.mxu0 %v4305_v26  ;;  %v4312_v29 = vpack.c.bf16 %v4294_v33, %v4293_v2  ;;  %v4297_v4 = vmax.f32 %v4265_v24, 0.0 }
 0x52e   : > { %v4313_v34 = vpack.c.bf16 %v4296_v55, %v4295_v8  ;;  %v4298_v23 = vmax.f32 %v4266_v46, 0.0 }
 0x530   : > { %v4314_v15 = vpack.c.bf16 %v4298_v23, %v4297_v4 }
 0x534   : > { %6292 = vmatmul.mubr.bf16.gmra.mrb[76].mxu0 %v4306_v36 }
 0x535   : > { %6295 = vmatprep.mubr.bf16.mxu0 %v4307_v63 }
 0x53c   : > { %6296 = vmatmul.mubr.bf16.gmra.mrb[80].mxu0 %v4308_v38 }
 0x53d   : > { %6299 = vmatprep.mubr.bf16.mxu0 %v4309_v59 }
 0x544   : > { %6300 = vmatmul.mubr.bf16.gmra.mrb[84].mxu0 %v4310_v5 }
 0x545   : > { %6303 = vmatprep.mubr.bf16.mxu0 %v4311_v48 }
 0x54c   : > { %6304 = vmatmul.mubr.bf16.gmra.mrb[88].mxu0 %v4312_v29 }
 0x54d   : > { %6307 = vmatprep.mubr.bf16.mxu0 %v4313_v34 }
 0x554   : > { %6308 = vmatmul.mubr.bf16.gmra.mrb[92].mxu0 %v4314_v15 }
 0x5ef   : > { %v8671_v19 = vpop.f32.mrb[64].mxu0 }
 0x5f0   : > { %v8673_v26 = vpop.f32.mrb[65].mxu0  ;;  %v4581_v32 = vmul.f32 %v8671_v19, %v8671_v19 }
 0x5f1   : > { %v8675_v42 = vpop.f32.mrb[66].mxu0  ;;  %v4579_v27 = vmul.f32 %v8673_v26, %v8673_v26 }
 0x5f2   : > { %v8677_v20 = vpop.f32.mrb[67].mxu0  ;;  %v4582_v35 = vmul.f32 %v8675_v42, %v8675_v42 }
 0x5f3   : > { %v4542_v22 = vadd.f32 %v8677_v20, %v8673_v26  ;;  %v4580_v14 = vmul.f32 %v8677_v20, %v8677_v20 }
 0x5f5   : > { %v4543_v43 = vadd.f32 %v8671_v19, %v4542_v22  ;;  %v4611_v54 = vadd.f32 %v4580_v14, %v4579_v27 }
 0x5f7   : > { %v4612_v60 = vadd.f32 %v4611_v54, %v4581_v32  ;;  %v8690_v10 = vpop.f32.mrb[68].mxu0  ;;  %v4544_v57 = vadd.f32 %v8675_v42, %v4543_v43 }
 0x5f8   : > { %v8693_v37 = vpop.f32.mrb[69].mxu0  ;;  %v4585_v50 = vmul.f32 %v8690_v10, %v8690_v10 }
 0x5f9   : > { %v4545_v12 = vadd.f32 %v4544_v57, %v8693_v37  ;;  %v4583_v36 = vmul.f32 %v8693_v37, %v8693_v37  ;;  %v4613_v7 = vadd.f32 %v4612_v60, %v4582_v35  ;;  %v8698_v25 = vpop.f32.mrb[70].mxu0 }
 0x5fa   : > { %v8700_v63 = vpop.f32.mrb[71].mxu0  ;;  %v4586_v30 = vmul.f32 %v8698_v25, %v8698_v25 }
 0x5fb   : > { %v4614_v16 = vadd.f32 %v4613_v7, %v4583_v36  ;;  %v4546_v13 = vadd.f32 %v4545_v12, %v8700_v63  ;;  %v4584_v58 = vmul.f32 %v8700_v63, %v8700_v63 }
 0x5fd   : > { %v4547_v6 = vadd.f32 %v8690_v10, %v4546_v13  ;;  %v4615_v39 = vadd.f32 %v4614_v16, %v4584_v58 }
 0x5ff   : > { %v4616_v40 = vadd.f32 %v4615_v39, %v4585_v50  ;;  %v8710_v9 = vpop.f32.mrb[72].mxu0  ;;  %v4548_v62 = vadd.f32 %v8698_v25, %v4547_v6 }
 0x600   : > { %v8713_v38 = vpop.f32.mrb[73].mxu0  ;;  %v4589_v41 = vmul.f32 %v8710_v9, %v8710_v9 }
 0x601   : > { %v4549_v28 = vadd.f32 %v4548_v62, %v8713_v38  ;;  %v4587_v53 = vmul.f32 %v8713_v38, %v8713_v38  ;;  %v4617_v59 = vadd.f32 %v4616_v40, %v4586_v30  ;;  %v8718_v45 = vpop.f32.mrb[74].mxu0 }
 0x602   : > { %v8720_v18 = vpop.f32.mrb[75].mxu0  ;;  %v4590_v21 = vmul.f32 %v8718_v45, %v8718_v45 }
 0x603   : > { %v4618_v31 = vadd.f32 %v4617_v59, %v4587_v53  ;;  %v4550_v3 = vadd.f32 %v4549_v28, %v8720_v18  ;;  %v4588_v61 = vmul.f32 %v8720_v18, %v8720_v18 }
 0x605   : > { %v4551_v51 = vadd.f32 %v8710_v9, %v4550_v3  ;;  %v4619_v56 = vadd.f32 %v4618_v31, %v4588_v61 }
 0x607   : > { %v4620_v52 = vadd.f32 %v4619_v56, %v4589_v41  ;;  %v8730_v5 = vpop.f32.mrb[76].mxu0  ;;  %v4552_v11 = vadd.f32 %v8718_v45, %v4551_v51 }
 0x608   : > { %v8733_v49 = vpop.f32.mrb[77].mxu0  ;;  %v4593_v1 = vmul.f32 %v8730_v5, %v8730_v5 }
 0x609   : > { %v4553_v48 = vadd.f32 %v4552_v11, %v8733_v49  ;;  %v4591_v17 = vmul.f32 %v8733_v49, %v8733_v49  ;;  %v4621_v0 = vadd.f32 %v4620_v52, %v4590_v21  ;;  %v8738_v2 = vpop.f32.mrb[78].mxu0 }
 0x60a   : > { %v8740_v33 = vpop.f32.mrb[79].mxu0  ;;  %v4594_v46 = vmul.f32 %v8738_v2, %v8738_v2 }
 0x60b   : > { %v4622_v8 = vadd.f32 %v4621_v0, %v4591_v17  ;;  %v4554_v55 = vadd.f32 %v4553_v48, %v8740_v33  ;;  %v4592_v44 = vmul.f32 %v8740_v33, %v8740_v33 }
 0x60d   : > { %v4555_v29 = vadd.f32 %v8730_v5, %v4554_v55  ;;  %v4623_v24 = vadd.f32 %v4622_v8, %v4592_v44 }
 0x60f   : > { %v4624_v34 = vadd.f32 %v4623_v24, %v4593_v1  ;;  %v8750_v4 = vpop.f32.mrb[80].mxu0  ;;  %v4556_v23 = vadd.f32 %v8738_v2, %v4555_v29 }
 0x610   : > { %v8753_v15 = vpop.f32.mrb[81].mxu0  ;;  %v4597_v57 = vmul.f32 %v8750_v4, %v8750_v4 }
 0x611   : > { %v4557_v27 = vadd.f32 %v4556_v23, %v8753_v15  ;;  %v4595_v22 = vmul.f32 %v8753_v15, %v8753_v15  ;;  %v4625_v14 = vadd.f32 %v4624_v34, %v4594_v46  ;;  %v8758_v32 = vpop.f32.mrb[82].mxu0 }
 0x612   : > { %v8760_v43 = vpop.f32.mrb[83].mxu0  ;;  %v4598_v7 = vmul.f32 %v8758_v32, %v8758_v32 }
 0x613   : > { %v4626_v54 = vadd.f32 %v4625_v14, %v4595_v22  ;;  %v4558_v35 = vadd.f32 %v4557_v27, %v8760_v43  ;;  %v4596_v60 = vmul.f32 %v8760_v43, %v8760_v43 }
 0x615   : > { %v4559_v12 = vadd.f32 %v8750_v4, %v4558_v35  ;;  %v4627_v36 = vadd.f32 %v4626_v54, %v4596_v60 }
 0x617   : > { %v4628_v16 = vadd.f32 %v4627_v36, %v4597_v57  ;;  %v8770_v13 = vpop.f32.mrb[84].mxu0  ;;  %v4560_v58 = vadd.f32 %v8758_v32, %v4559_v12 }
 0x618   : > { %v8773_v50 = vpop.f32.mrb[85].mxu0  ;;  %v4601_v31 = vmul.f32 %v8770_v13, %v8770_v13 }
 0x619   : > { %v4561_v6 = vadd.f32 %v4560_v58, %v8773_v50  ;;  %v4599_v39 = vmul.f32 %v8773_v50, %v8773_v50  ;;  %v4629_v30 = vadd.f32 %v4628_v16, %v4598_v7  ;;  %v8778_v40 = vpop.f32.mrb[86].mxu0 }
 0x61a   : > { %v8780_v62 = vpop.f32.mrb[87].mxu0  ;;  %v4602_v41 = vmul.f32 %v8778_v40, %v8778_v40 }
 0x61b   : > { %v4630_v28 = vadd.f32 %v4629_v30, %v4599_v39  ;;  %v4562_v53 = vadd.f32 %v4561_v6, %v8780_v62  ;;  %v4600_v59 = vmul.f32 %v8780_v62, %v8780_v62 }
 0x61d   : > { %v4563_v3 = vadd.f32 %v8770_v13, %v4562_v53  ;;  %v4631_v61 = vadd.f32 %v4630_v28, %v4600_v59 }
 0x61f   : > { %v4632_v51 = vadd.f32 %v4631_v61, %v4601_v31  ;;  %v8790_v56 = vpop.f32.mrb[88].mxu0  ;;  %v4564_v21 = vadd.f32 %v8778_v40, %v4563_v3 }
 0x620   : > { %v8793_v52 = vpop.f32.mrb[89].mxu0  ;;  %v4605_v29 = vmul.f32 %v8790_v56, %v8790_v56 }
 0x621   : > { %v4565_v11 = vadd.f32 %v4564_v21, %v8793_v52  ;;  %v4603_v48 = vmul.f32 %v8793_v52, %v8793_v52  ;;  %v4633_v17 = vadd.f32 %v4632_v51, %v4602_v41  ;;  %v8798_v0 = vpop.f32.mrb[90].mxu0 }
 0x622   : > { %v8800_v8 = vpop.f32.mrb[91].mxu0  ;;  %v4606_v34 = vmul.f32 %v8798_v0, %v8798_v0 }
 0x623   : > { %v4634_v55 = vadd.f32 %v4633_v17, %v4603_v48  ;;  %v4566_v44 = vadd.f32 %v4565_v11, %v8800_v8  ;;  %v4604_v1 = vmul.f32 %v8800_v8, %v8800_v8 }
 0x625   : > { %v4567_v24 = vadd.f32 %v8790_v56, %v4566_v44  ;;  %v4635_v46 = vadd.f32 %v4634_v55, %v4604_v1 }
 0x627   : > { %v4636_v23 = vadd.f32 %v4635_v46, %v4605_v29  ;;  %v8810_v27 = vpop.f32.mrb[92].mxu0  ;;  %v4568_v22 = vadd.f32 %v8798_v0, %v4567_v24 }
 0x628   : > { %v8813_v14 = vpop.f32.mrb[93].mxu0  ;;  %v4609_v58 = vmul.f32 %v8810_v27, %v8810_v27 }
 0x629   : > { %v4569_v54 = vadd.f32 %v4568_v22, %v8813_v14  ;;  %v4607_v35 = vmul.f32 %v8813_v14, %v8813_v14  ;;  %v4637_v60 = vadd.f32 %v4636_v23, %v4606_v34  ;;  %v8818_v57 = vpop.f32.mrb[94].mxu0 }
 0x62a   : > { %v8820_v12 = vpop.f32.mrb[95].mxu0  ;;  %v4610_v30 = vmul.f32 %v8818_v57, %v8818_v57 }
 0x62b   : > { %v4638_v36 = vadd.f32 %v4637_v60, %v4607_v35  ;;  %v4570_v7 = vadd.f32 %v4569_v54, %v8820_v12  ;;  %v4608_v16 = vmul.f32 %v8820_v12, %v8820_v12  ;;  %v4540_v60 = vld [vmem:[%s9058_s8] sm:$0x1] }
 0x62d   : > { %v4571_v6 = vadd.f32 %v8810_v27, %v4570_v7  ;;  %v4639_v39 = vadd.f32 %v4638_v36, %v4608_v16  ;;  %v4541_v16 = vld [vmem:[%s9059_s9] sm:$0x1] }
 0x62f   : > { %v4572_v28 = vadd.f32 %v8818_v57, %v4571_v6  ;;  %v4640_v53 = vadd.f32 %v4639_v39, %v4609_v58 }
 0x631   : > { %v4573_v59 = vrot.slane %v4572_v28, 4  ;;  %v4641_v31 = vadd.f32 %v4640_v53, %v4610_v30 }
 0x633   : > { %v4574_v3 = vadd.f32 %v4573_v59, %v4572_v28  ;;  %v4642_v61 = vrot.slane %v4641_v31, 4 }
 0x635   : > { %v4575_v41 = vrot.slane %v4574_v3, 2  ;;  %v4643_v51 = vadd.f32 %v4642_v61, %v4641_v31 }
 0x637   : > { %v4576_v21 = vadd.f32 %v4575_v41, %v4574_v3  ;;  %v4644_v11 = vrot.slane %v4643_v51, 2 }
 0x639   : > { %v4577_v48 = vrot.slane %v4576_v21, 1  ;;  %v4645_v17 = vadd.f32 %v4644_v11, %v4643_v51 }
 0x63b   : > { %v4578_v55 = vadd.f32 %v4577_v48, %v4576_v21  ;;  %v4646_v44 = vrot.slane %v4645_v17, 1 }
 0x63d   : > { %4648 = vadd.xlane.f32.xlu0 %v4578_v55  ;;  %v4647_v1 = vadd.f32 %v4646_v44, %v4645_v17 }
 0x63f   : > { %4652 = vadd.xlane.f32.xlu1 %v4647_v1 }
 0x6ca   : > { %v4649_v29 = vpop.xlane.xlu0 %4648 }
 0x6cb   : > { %v4651_v24 = vmul.f32 0.00012207031, %v4649_v29 }
 0x6cc   : > { %v4653_v46 = vpop.xlane.xlu1 %4652 }
 0x6cd   : > { %v4655_v34 = vmul.f32 %v4651_v24, %v4651_v24  ;;  %v4654_v23 = vmul.f32 0.00012207031, %v4653_v46 }
 0x6cf   : > { %v4656_v22 = vsub.f32 %v4654_v23, %v4655_v34 }
 0x6d1   : > { %v4657_v54 = vmax.f32 %v4656_v22, 0.0 }
 0x6d3   : > { %v4658_v35 = vadd.f32 1e-05, %v4657_v54 }
 0x6d5   : > { %6685 = vrsqrt.f32 %v4658_v35 }
 0x6df   : > { %v6686_v36 = vpop.eup %6685 }
 0x6e0   : > { %v4660_v7 = vmul.f32 %v6686_v36, %v4540_v60 }
 0x6e2   : > { %v4661_v58 = vmul.f32 %v4660_v7, %v4651_v24  ;;  %v4667_v6 = vrot.slane %v4660_v7, %v9378_v47 }
 0x6e4   : > { %v4662_v39 = vsub.f32 %v4541_v16, %v4661_v58  ;;  %v4669_v30 = vmul.f32 %v4667_v6, %v8673_v26  ;;  %v4670_v28 = vmul.f32 %v4667_v6, %v8677_v20  ;;  %v4671_v53 = vmul.f32 %v8671_v19, %v4667_v6 }
 0x6e5   : > { %v4672_v59 = vmul.f32 %v8675_v42, %v4667_v6  ;;  %v4673_v31 = vmul.f32 %v4667_v6, %v8693_v37  ;;  %v4674_v3 = vmul.f32 %v4667_v6, %v8700_v63  ;;  %v4675_v61 = vmul.f32 %v8690_v10, %v4667_v6 }
 0x6e6   : > { %v4676_v41 = vmul.f32 %v8698_v25, %v4667_v6  ;;  %v4677_v51 = vmul.f32 %v4667_v6, %v8713_v38  ;;  %v4678_v21 = vmul.f32 %v4667_v6, %v8720_v18  ;;  %v4679_v26 = vmul.f32 %v8710_v9, %v4667_v6 }
 0x6e7   : > { %v4680_v20 = vmul.f32 %v8718_v45, %v4667_v6  ;;  %v4681_v19 = vmul.f32 %v4667_v6, %v8733_v49  ;;  %v4682_v42 = vmul.f32 %v4667_v6, %v8740_v33  ;;  %v4683_v37 = vmul.f32 %v8730_v5, %v4667_v6 }
 0x6e8   : > { %v4684_v63 = vmul.f32 %v8738_v2, %v4667_v6  ;;  %v4685_v10 = vmul.f32 %v4667_v6, %v8753_v15  ;;  %v4686_v25 = vmul.f32 %v4667_v6, %v8760_v43  ;;  %v4687_v38 = vmul.f32 %v8750_v4, %v4667_v6 }
 0x6e9   : > { %v4688_v18 = vmul.f32 %v8758_v32, %v4667_v6  ;;  %v4689_v9 = vmul.f32 %v4667_v6, %v8773_v50  ;;  %v4690_v45 = vmul.f32 %v4667_v6, %v8780_v62  ;;  %v4691_v49 = vmul.f32 %v8770_v13, %v4667_v6 }
 0x6ea   : > { %v4692_v33 = vmul.f32 %v8778_v40, %v4667_v6  ;;  %v4693_v5 = vmul.f32 %v4667_v6, %v8793_v52  ;;  %v4694_v2 = vmul.f32 %v4667_v6, %v8800_v8  ;;  %v4695_v15 = vmul.f32 %v8790_v56, %v4667_v6 }
 0x6eb   : > { %v4696_v43 = vmul.f32 %v8798_v0, %v4667_v6  ;;  %v4705_v4 = vrot.slane %v4662_v39, %v9378_v47  ;;  %v4697_v32 = vmul.f32 %v4667_v6, %v8813_v14  ;;  %v4698_v50 = vmul.f32 %v4667_v6, %v8820_v12 }
 0x6ec   : > { %v4699_v62 = vmul.f32 %v8810_v27, %v4667_v6  ;;  %v4700_v13 = vmul.f32 %v8818_v57, %v4667_v6 }
 0x6ed   : > { %v4707_v11 = vadd.f32 %v4705_v4, %v4669_v30  ;;  %v4708_v40 = vadd.f32 %v4705_v4, %v4670_v28  ;;  %v4709_v48 = vadd.f32 %v4705_v4, %v4671_v53  ;;  %v4710_v52 = vadd.f32 %v4705_v4, %v4672_v59  ;;  %v6695_v28 = vld [vmem:[%s6817_s24] sm:$0xff]  ;;  %v6696_v59 = vld [vmem:[%s6817_s24 + $0x8] sm:$0xff] }
 0x6ee   : > { %v4711_v17 = vadd.f32 %v4705_v4, %v4673_v31  ;;  %v4712_v8 = vadd.f32 %v4705_v4, %v4674_v3  ;;  %v4713_v55 = vadd.f32 %v4705_v4, %v4675_v61  ;;  %v4714_v56 = vadd.f32 %v4705_v4, %v4676_v41  ;;  %v6697_v3 = vld [vmem:[%s6817_s24 + $0x10] sm:$0xff]  ;;  %v6698_v41 = vld [vmem:[%s6817_s24 + $0x18] sm:$0xff] }
 0x6ef   : > { %v4715_v44 = vadd.f32 %v4705_v4, %v4677_v51  ;;  %v4716_v0 = vadd.f32 %v4705_v4, %v4678_v21  ;;  %v4717_v1 = vadd.f32 %v4705_v4, %v4679_v26  ;;  %v4718_v47 = vadd.f32 %v4705_v4, %v4680_v20  ;;  %v6699_v21 = vld [vmem:[%s6817_s24 + $0x20] sm:$0xff]  ;;  %v6700_v20 = vld [vmem:[%s6817_s24 + $0x28] sm:$0xff] }
 0x6f0   : > { %v4719_v29 = vadd.f32 %v4705_v4, %v4681_v19  ;;  %v4720_v14 = vadd.f32 %v4705_v4, %v4682_v42  ;;  %v4721_v24 = vadd.f32 %v4705_v4, %v4683_v37  ;;  %v4722_v12 = vadd.f32 %v4705_v4, %v4684_v63  ;;  %v6701_v42 = vld [vmem:[%s6817_s24 + $0x30] sm:$0xff]  ;;  %v6702_v63 = vld [vmem:[%s6817_s24 + $0x38] sm:$0xff] }
 0x6f1   : > { %v4723_v46 = vadd.f32 %v4705_v4, %v4685_v10  ;;  %v4724_v27 = vadd.f32 %v4705_v4, %v4686_v25  ;;  %v4725_v57 = vadd.f32 %v4705_v4, %v4687_v38  ;;  %v4726_v34 = vadd.f32 %v4705_v4, %v4688_v18  ;;  %v6703_v25 = vld [vmem:[%s6817_s24 + $0x40] sm:$0xff]  ;;  %v6704_v18 = vld [vmem:[%s6817_s24 + $0x48] sm:$0xff] }
 0x6f2   : > { %v4727_v23 = vadd.f32 %v4705_v4, %v4689_v9  ;;  %v4728_v22 = vadd.f32 %v4705_v4, %v4690_v45  ;;  %v4729_v54 = vadd.f32 %v4705_v4, %v4691_v49  ;;  %v4730_v35 = vadd.f32 %v4705_v4, %v4692_v33  ;;  %v6705_v45 = vld [vmem:[%s6817_s24 + $0x50] sm:$0xff]  ;;  %v6706_v33 = vld [vmem:[%s6817_s24 + $0x58] sm:$0xff] }
 0x6f3   : > { %v4731_v60 = vadd.f32 %v4705_v4, %v4693_v5  ;;  %v4732_v36 = vadd.f32 %v4705_v4, %v4694_v2  ;;  %v4733_v7 = vadd.f32 %v4705_v4, %v4695_v15  ;;  %v4734_v16 = vadd.f32 %v4705_v4, %v4696_v43  ;;  %v6707_v2 = vld [vmem:[%s6817_s24 + $0x60] sm:$0xff]  ;;  %v6708_v43 = vld [vmem:[%s6817_s24 + $0x68] sm:$0xff] }
 0x6f4   : > { %v4735_v58 = vadd.f32 %v4705_v4, %v4697_v32  ;;  %v8871_v6 = vadd.f32 %v4705_v4, %v4698_v50  ;;  %v8873_v39 = vadd.f32 %v4705_v4, %v4699_v62  ;;  %v8875_v30 = vadd.f32 %v4705_v4, %v4700_v13  ;;  %v6709_v32 = vld [vmem:[%s6817_s24 + $0x70] sm:$0xff]  ;;  %v6710_v62 = vld [vmem:[%s6817_s24 + $0x78] sm:$0xff] }
 0x6f5   : > { %v8878_v53 = vadd.f32 %v6695_v28, %v4707_v11  ;;  %v8881_v31 = vadd.f32 %v6696_v59, %v4708_v40  ;;  %v8884_v61 = vadd.f32 %v6697_v3, %v4709_v48  ;;  %v8887_v51 = vadd.f32 %v6698_v41, %v4710_v52  ;;  %v6711_v11 = vld [vmem:[%s6817_s24 + $0x80] sm:$0xff]  ;;  %v6712_v48 = vld [vmem:[%s6817_s24 + $0x88] sm:$0xff] }
 0x6f6   : > { %v8890_v26 = vadd.f32 %v6699_v21, %v4711_v17  ;;  %v8893_v19 = vadd.f32 %v6700_v20, %v4712_v8  ;;  %v8896_v37 = vadd.f32 %v6701_v42, %v4713_v55  ;;  %v8899_v10 = vadd.f32 %v6702_v63, %v4714_v56  ;;  %v6713_v17 = vld [vmem:[%s6817_s24 + $0x90] sm:$0xff]  ;;  %v6714_v55 = vld [vmem:[%s6817_s24 + $0x98] sm:$0xff] }
 0x6f7   : > { %v8902_v38 = vadd.f32 %v6703_v25, %v4715_v44  ;;  %v8905_v9 = vadd.f32 %v6704_v18, %v4716_v0  ;;  %v8908_v49 = vadd.f32 %v6705_v45, %v4717_v1  ;;  %v8911_v5 = vadd.f32 %v6706_v33, %v4718_v47  ;;  %v6715_v44 = vld [vmem:[%s6817_s24 + $0xa0] sm:$0xff]  ;;  %v6716_v1 = vld [vmem:[%s6817_s24 + $0xa8] sm:$0xff] }
 0x6f8   : > { %v8914_v15 = vadd.f32 %v6707_v2, %v4719_v29  ;;  %v8917_v4 = vadd.f32 %v6708_v43, %v4720_v14  ;;  %v8920_v50 = vadd.f32 %v6709_v32, %v4721_v24  ;;  %v8923_v13 = vadd.f32 %v6710_v62, %v4722_v12  ;;  %v6717_v29 = vld [vmem:[%s6817_s24 + $0xb0] sm:$0xff]  ;;  %v6718_v24 = vld [vmem:[%s6817_s24 + $0xb8] sm:$0xff] }
 0x6f9   : > { %v8926_v40 = vadd.f32 %v6711_v11, %v4723_v46  ;;  %v8929_v52 = vadd.f32 %v6712_v48, %v4724_v27  ;;  %v8932_v8 = vadd.f32 %v6713_v17, %v4725_v57  ;;  %v8935_v56 = vadd.f32 %v6714_v55, %v4726_v34  ;;  %v6719_v46 = vld [vmem:[%s6817_s24 + $0xc0] sm:$0xff]  ;;  %v6720_v57 = vld [vmem:[%s6817_s24 + $0xc8] sm:$0xff] }
 0x6fa   : > { %v8938_v0 = vadd.f32 %v6715_v44, %v4727_v23  ;;  %v8941_v47 = vadd.f32 %v6716_v1, %v4728_v22  ;;  %v8944_v14 = vadd.f32 %v6717_v29, %v4729_v54  ;;  %v8947_v12 = vadd.f32 %v6718_v24, %v4730_v35  ;;  %v6721_v23 = vld [vmem:[%s6817_s24 + $0xd0] sm:$0xff]  ;;  %v6722_v22 = vld [vmem:[%s6817_s24 + $0xd8] sm:$0xff]  ;;  %v6723_v54 = vld [vmem:[%s6817_s24 + $0xe0] sm:$0xff] }
 0x6fb   : > { %v8950_v27 = vadd.f32 %v6719_v46, %v4731_v60  ;;  %v8953_v34 = vadd.f32 %v6720_v57, %v4732_v36  ;;  %v8956_v28 = vadd.f32 %v6721_v23, %v4733_v7  ;;  %v8959_v59 = vadd.f32 %v6722_v22, %v4734_v16  ;;  %v6724_v60 = vld [vmem:[%s6817_s24 + $0xe8] sm:$0xff]  ;;  %v6725_v36 = vld [vmem:[%s6817_s24 + $0xf0] sm:$0xff]  ;;  %v6726_v16 = vld [vmem:[%s6817_s24 + $0xf8] sm:$0xff] }
 0x6fc   : > { %v8969_v35 = vadd.f32 %v6723_v54, %v4735_v58  ;;  %v8973_v3 = vadd.f32 %v6724_v60, %v8871_v6  ;;  %v8977_v7 = vadd.f32 %v6725_v36, %v8873_v39  ;;  %v8981_v41 = vadd.f32 %v6726_v16, %v8875_v30 }
 0x6fd   : > { %v4771_v21 = vmax.f32 %v8878_v53, 0.0  ;;  %v4772_v58 = vmax.f32 %v8881_v31, 0.0  ;;  %v4773_v20 = vmax.f32 %v8884_v61, 0.0  ;;  %v4774_v6 = vmax.f32 %v8887_v51, 0.0 }
 0x6fe   : > { %v4775_v42 = vmax.f32 %v8890_v26, 0.0  ;;  %v4776_v39 = vmax.f32 %v8893_v19, 0.0  ;;  %v4777_v63 = vmax.f32 %v8896_v37, 0.0  ;;  %v4778_v30 = vmax.f32 %v8899_v10, 0.0 }
 0x6ff   : > { %v4779_v53 = vmax.f32 %v8902_v38, 0.0  ;;  %v4780_v31 = vmax.f32 %v8905_v9, 0.0  ;;  %v4781_v61 = vmax.f32 %v8908_v49, 0.0  ;;  %v4782_v51 = vmax.f32 %v8911_v5, 0.0  ;;  %4803 = vst [vmem:[%s8966_s15] sm:$0xff] %v4771_v21  ;;  %4804 = vst [vmem:[%s8966_s15 + $0x8] sm:$0xff] %v4772_v58 }
 0x700   : > { %4805 = vst [vmem:[%s8966_s15 + $0x10] sm:$0xff] %v4773_v20  ;;  %4806 = vst [vmem:[%s8966_s15 + $0x18] sm:$0xff] %v4774_v6  ;;  %v4783_v26 = vmax.f32 %v8914_v15, 0.0  ;;  %v4784_v19 = vmax.f32 %v8917_v4, 0.0  ;;  %v4785_v37 = vmax.f32 %v8920_v50, 0.0  ;;  %v4786_v10 = vmax.f32 %v8923_v13, 0.0 }
 0x701   : > { %4807 = vst [vmem:[%s8966_s15 + $0x20] sm:$0xff] %v4775_v42  ;;  %4808 = vst [vmem:[%s8966_s15 + $0x28] sm:$0xff] %v4776_v39  ;;  %v4787_v25 = vmax.f32 %v8926_v40, 0.0  ;;  %v4788_v38 = vmax.f32 %v8929_v52, 0.0  ;;  %v4789_v18 = vmax.f32 %v8932_v8, 0.0  ;;  %v4790_v9 = vmax.f32 %v8935_v56, 0.0 }
 0x702   : > { %4809 = vst [vmem:[%s8966_s15 + $0x30] sm:$0xff] %v4777_v63  ;;  %4810 = vst [vmem:[%s8966_s15 + $0x38] sm:$0xff] %v4778_v30  ;;  %v4791_v45 = vmax.f32 %v8938_v0, 0.0  ;;  %v4792_v49 = vmax.f32 %v8941_v47, 0.0  ;;  %v4793_v33 = vmax.f32 %v8944_v14, 0.0  ;;  %v4794_v5 = vmax.f32 %v8947_v12, 0.0 }
 0x703   : > { %4811 = vst [vmem:[%s8966_s15 + $0x40] sm:$0xff] %v4779_v53  ;;  %4812 = vst [vmem:[%s8966_s15 + $0x48] sm:$0xff] %v4780_v31  ;;  %v4795_v2 = vmax.f32 %v8950_v27, 0.0  ;;  %v4796_v15 = vmax.f32 %v8953_v34, 0.0  ;;  %v4797_v43 = vmax.f32 %v8956_v28, 0.0  ;;  %v4798_v4 = vmax.f32 %v8959_v59, 0.0 }
 0x704   : > { %4813 = vst [vmem:[%s8966_s15 + $0x50] sm:$0xff] %v4781_v61  ;;  %4814 = vst [vmem:[%s8966_s15 + $0x58] sm:$0xff] %v4782_v51  ;;  %v4799_v32 = vmax.f32 %v8969_v35, 0.0  ;;  %v4800_v50 = vmax.f32 %v8973_v3, 0.0  ;;  %v4801_v62 = vmax.f32 %v8977_v7, 0.0  ;;  %v4802_v13 = vmax.f32 %v8981_v41, 0.0 }
 0x705   : > { %4815 = vst [vmem:[%s8966_s15 + $0x60] sm:$0xff] %v4783_v26  ;;  %4816 = vst [vmem:[%s8966_s15 + $0x68] sm:$0xff] %v4784_v19 }
 0x706   : > { %4817 = vst [vmem:[%s8966_s15 + $0x70] sm:$0xff] %v4785_v37  ;;  %4818 = vst [vmem:[%s8966_s15 + $0x78] sm:$0xff] %v4786_v10 }
 0x707   : > { %4819 = vst [vmem:[%s8966_s15 + $0x80] sm:$0xff] %v4787_v25  ;;  %4820 = vst [vmem:[%s8966_s15 + $0x88] sm:$0xff] %v4788_v38 }
 0x708   : > { %4821 = vst [vmem:[%s8966_s15 + $0x90] sm:$0xff] %v4789_v18  ;;  %4822 = vst [vmem:[%s8966_s15 + $0x98] sm:$0xff] %v4790_v9 }
 0x709   : > { %4823 = vst [vmem:[%s8966_s15 + $0xa0] sm:$0xff] %v4791_v45  ;;  %4824 = vst [vmem:[%s8966_s15 + $0xa8] sm:$0xff] %v4792_v49 }
 0x70a   : > { %4825 = vst [vmem:[%s8966_s15 + $0xb0] sm:$0xff] %v4793_v33  ;;  %4826 = vst [vmem:[%s8966_s15 + $0xb8] sm:$0xff] %v4794_v5 }
 0x70b   : > { %4827 = vst [vmem:[%s8966_s15 + $0xc0] sm:$0xff] %v4795_v2  ;;  %4828 = vst [vmem:[%s8966_s15 + $0xc8] sm:$0xff] %v4796_v15 }
 0x70c   : > { %4829 = vst [vmem:[%s8966_s15 + $0xd0] sm:$0xff] %v4797_v43  ;;  %4830 = vst [vmem:[%s8966_s15 + $0xd8] sm:$0xff] %v4798_v4 }
 0x70d   : > { %4831 = vst [vmem:[%s8966_s15 + $0xe0] sm:$0xff] %v4799_v32  ;;  %4832 = vst [vmem:[%s8966_s15 + $0xe8] sm:$0xff] %v4800_v50 }
 0x70e   : > { %4833 = vst [vmem:[%s8966_s15 + $0xf0] sm:$0xff] %v4801_v62  ;;  %4834 = vst [vmem:[%s8966_s15 + $0xf8] sm:$0xff] %v4802_v13 }
 0x70f PF: > { %s20_s13 = sadd.s32 1, %s6733_s13  }
 0x710   : > { %p17_p4 = scmp.ge.s32.totalorder %s20_s13, 4  }
 0x712   :  { %19 = sbr.rel (!%p17_p4) target bundleno = 1 (0x1), region = 98 }

// kernel: _bottleneck_forward.1
= control target key start
LH: loop header
LB: loop body
LE: loop exit
PB: predicated region body
PF: predicated region fallthrough
CT: control target
= control target key end

     0   :  { %s6792_s13 = smov 0   ;;  %s9050_s0 = inlined_call_operand.vmem [shape: f32[2,256,128], index: 0, kind: input, shape index: {}, may-alias: {0,10}]   ;;  %s9051_s1 = inlined_call_operand.vmem [shape: bf16[128,128], index: 1, kind: input, shape index: {}]   ;;  %s9052_s2 = inlined_call_operand.vmem [shape: f32[1,128], index: 2, kind: input, shape index: {}]   ;;  %s9053_s3 = inlined_call_operand.vmem [shape: f32[1,128], index: 3, kind: input, shape index: {}]   ;;  %s9054_s4 = inlined_call_operand.vmem [shape: bf16[9,128,128], index: 4, kind: input, shape index: {}]   ;;  %s9055_s5 = inlined_call_operand.vmem [shape: f32[1,128], index: 5, kind: input, shape index: {}]   ;;  %s9056_s6 = inlined_call_operand.vmem [shape: f32[1,128], index: 6, kind: input, shape index: {}]   ;;  %s9057_s7 = inlined_call_operand.vmem [shape: bf16[128,128], index: 7, kind: input, shape index: {}]   ;;  %s9058_s8 = inlined_call_operand.vmem [shape: f32[1,128], index: 8, kind: input, shape index: {}]   ;;  %s9059_s9 = inlined_call_operand.vmem [shape: f32[1,128], index: 9, kind: input, shape index: {}]   ;;  %s9060_s10 = inlined_call_operand.vmem [shape: f32[2,256,128], index: 10, kind: output, shape index: {}, may-alias: {0,10}]  }
   0x1 LB: > { %s4890_s14 = sadd.s32 4294967295, %s6733_s13   ;;  %p4894_p0 = scmp.ge.s32.totalorder %s6733_s13, 1  ;;  %s6733_s13 = sphi %s6792_s13, %s20_s13  }
   0x2   : > { %p312_p1 = scmp.lt.s32.totalorder %s6733_s13, 3 }
   0x4   : > { %p313_p2 = pnand %p4894_p0, %p312_p1 }
   0x6   : > { %316 = sbr.rel (%p313_p2) target bundleno = 1807 (0x70f), region = 60 }
   0xd   : > { %v6593_v0 = vld [vmem:[%s9051_s1] sm:$0xff]   ;;  %p350_p3 = scmp.lt.s32.totalorder %s4890_s14, 1  ;;  %v6594_v1 = vld [vmem:[%s9051_s1 + $0x8] sm:$0xff]   ;;  %v6595_v2 = vld [vmem:[%s9051_s1 + $0x10] sm:$0xff]   ;;  %vm1346_vm0 = vcmask 1040384   ;;  %vm1571_vm1 = vcmask 1046528  }
   0xe   : > { %5783 = vmatprep.subr.bf16.mxu0 %v6593_v0  ;;  %v6596_v3 = vld [vmem:[%s9051_s1 + $0x18] sm:$0xff]   ;;  %v6597_v7 = vld [vmem:[%s9051_s1 + $0x20] sm:$0xff]   ;;  %v6598_v8 = vld [vmem:[%s9051_s1 + $0x28] sm:$0xff]   ;;  %vm9113_vm7 = vmmov 1  }
   0xf   : > { %s9380_s14 = smov (!%p350_p3, %s4890_s14), 1  ;;  %5784 = vmatpush3.bf16.msra.mxu0 %v6593_v0  ;;  %v6599_v9 = vld [vmem:[%s9051_s1 + $0x30] sm:$0xff]   ;;  %v6600_v10 = vld [vmem:[%s9051_s1 + $0x38] sm:$0xff]  }
  0x10   : > { %5785 = vmatprep.subr.bf16.mxu0 %v6594_v1  ;;  %s5485_s21 = sshll.u32 %s9380_s14, 8 }
  0x11   : > { %s6817_s24 = scalar_lea.vmem %s9050_s0, %s5485_s21  ;;  %s8966_s15 = scalar_lea.vmem %s9060_s10, %s5485_s21 }
  0x12   : > { %v361_v4 = vld [vmem:[%s6817_s24] sm:$0xff]  ;;  %v362_v5 = vld [vmem:[%s6817_s24 + $0x8] sm:$0xff]  ;;  %v363_v11 = vld [vmem:[%s6817_s24 + $0x10] sm:$0xff] }
  0x13   : > { %5786 = vmatpush3.bf16.msra.mxu0 %v6594_v1  ;;  %v393_v6 = vpack.c.bf16 %v362_v5, %v361_v4  ;;  %v364_v12 = vld [vmem:[%s6817_s24 + $0x18] sm:$0xff]  ;;  %v365_v13 = vld [vmem:[%s6817_s24 + $0x20] sm:$0xff]  ;;  %v366_v14 = vld [vmem:[%s6817_s24 + $0x28] sm:$0xff] }
  0x14   : > { %5787 = vmatprep.subr.bf16.mxu0 %v6595_v2  ;;  %v394_v15 = vpack.c.bf16 %v364_v12, %v363_v11  ;;  %v395_v16 = vpack.c.bf16 %v366_v14, %v365_v13  ;;  %v367_v17 = vld [vmem:[%s6817_s24 + $0x30] sm:$0xff]  ;;  %v368_v18 = vld [vmem:[%s6817_s24 + $0x38] sm:$0xff]  ;;  %v369_v19 = vld [vmem:[%s6817_s24 + $0x40] sm:$0xff] }
  0x15   : > { %5799 = vmatprep.mubr.bf16.mxu0 %v393_v6  ;;  %v370_v20 = vld [vmem:[%s6817_s24 + $0x48] sm:$0xff]  ;;  %v396_v21 = vpack.c.bf16 %v368_v18, %v367_v17  ;;  %v371_v23 = vld [vmem:[%s6817_s24 + $0x50] sm:$0xff]  ;;  %v372_v24 = vld [vmem:[%s6817_s24 + $0x58] sm:$0xff] }
  0x16   : > { %v397_v22 = vpack.c.bf16 %v370_v20, %v369_v19  ;;  %v373_v25 = vld [vmem:[%s6817_s24 + $0x60] sm:$0xff]  ;;  %v374_v26 = vld [vmem:[%s6817_s24 + $0x68] sm:$0xff]  ;;  %v398_v27 = vpack.c.bf16 %v372_v24, %v371_v23  ;;  %v375_v29 = vld [vmem:[%s6817_s24 + $0x70] sm:$0xff] }
  0x17   : > { %5788 = vmatpush3.bf16.msra.mxu0 %v6595_v2  ;;  %v399_v28 = vpack.c.bf16 %v374_v26, %v373_v25  ;;  %v376_v30 = vld [vmem:[%s6817_s24 + $0x78] sm:$0xff]  ;;  %v377_v31 = vld [vmem:[%s6817_s24 + $0x80] sm:$0xff]  ;;  %v378_v32 = vld [vmem:[%s6817_s24 + $0x88] sm:$0xff] }
  0x18   : > { %5789 = vmatprep.subr.bf16.mxu0 %v6596_v3  ;;  %v400_v33 = vpack.c.bf16 %v376_v30, %v375_v29  ;;  %v401_v34 = vpack.c.bf16 %v378_v32, %v377_v31  ;;  %v379_v35 = vld [vmem:[%s6817_s24 + $0x90] sm:$0xff]  ;;  %v380_v36 = vld [vmem:[%s6817_s24 + $0x98] sm:$0xff]  ;;  %v381_v37 = vld [vmem:[%s6817_s24 + $0xa0] sm:$0xff] }
  0x19   : > { %v382_v38 = vld [vmem:[%s6817_s24 + $0xa8] sm:$0xff]  ;;  %v402_v39 = vpack.c.bf16 %v380_v36, %v379_v35  ;;  %v383_v41 = vld [vmem:[%s6817_s24 + $0xb0] sm:$0xff]  ;;  %v384_v42 = vld [vmem:[%s6817_s24 + $0xb8] sm:$0xff] }
  0x1a   : > { %v403_v40 = vpack.c.bf16 %v382_v38, %v381_v37  ;;  %v385_v43 = vld [vmem:[%s6817_s24 + $0xc0] sm:$0xff]  ;;  %v386_v44 = vld [vmem:[%s6817_s24 + $0xc8] sm:$0xff]  ;;  %v404_v45 = vpack.c.bf16 %v384_v42, %v383_v41  ;;  %v387_v47 = vld [vmem:[%s6817_s24 + $0xd0] sm:$0xff] }
  0x1b   : > { %5790 = vmatpush3.bf16.msra.mxu0 %v6596_v3  ;;  %v405_v46 = vpack.c.bf16 %v386_v44, %v385_v43  ;;  %v388_v48 = vld [vmem:[%s6817_s24 + $0xd8] sm:$0xff]  ;;  %v389_v49 = vld [vmem:[%s6817_s24 + $0xe0] sm:$0xff]  ;;  %v390_v50 = vld [vmem:[%s6817_s24 + $0xe8] sm:$0xff] }
  0x1c   : > { %5791 = vmatprep.subr.bf16.mxu0 %v6597_v7  ;;  %v406_v51 = vpack.c.bf16 %v388_v48, %v387_v47  ;;  %v407_v52 = vpack.c.bf16 %v390_v50, %v389_v49  ;;  %v391_v53 = vld [vmem:[%s6817_s24 + $0xf0] sm:$0xff]  ;;  %v392_v54 = vld [vmem:[%s6817_s24 + $0xf8] sm:$0xff] }
  0x1d   : > { %v408_v55 = vpack.c.bf16 %v392_v54, %v391_v53 }
  0x1f   : > { %5792 = vmatpush3.bf16.msra.mxu0 %v6597_v7 }
  0x20   : > { %5793 = vmatprep.subr.bf16.mxu0 %v6598_v8 }
  0x23   : > { %5794 = vmatpush3.bf16.msra.mxu0 %v6598_v8 }
  0x24   : > { %5795 = vmatprep.subr.bf16.mxu0 %v6599_v9 }
  0x27   : > { %5796 = vmatpush3.bf16.msra.mxu0 %v6599_v9 }
  0x28   : > { %5797 = vmatprep.subr.bf16.mxu0 %v6600_v10 }
  0x2b   : > { %5798 = vmatpush3.bf16.msra.mxu0 %v6600_v10 }
  0x2e   : > { %5800 = vmatmul.mubr.bf16.vlgmr.msra.gmra.mrb[0].mxu0 %v394_v15 }
  0x2f   : > { %5803 = vmatprep.mubr.bf16.mxu0 %v395_v16 }
  0x36   : > { %5804 = vmatmul.mubr.bf16.gmra.mrb[4].mxu0 %v396_v21 }
  0x37   : > { %5807 = vmatprep.mubr.bf16.mxu0 %v397_v22 }
  0x3e   : > { %5808 = vmatmul.mubr.bf16.gmra.mrb[8].mxu0 %v398_v27 }
  0x3f   : > { %5811 = vmatprep.mubr.bf16.mxu0 %v399_v28 }
  0x46   : > { %5812 = vmatmul.mubr.bf16.gmra.mrb[12].mxu0 %v400_v33 }
  0x47   : > { %5815 = vmatprep.mubr.bf16.mxu0 %v401_v34 }
  0x4e   : > { %5816 = vmatmul.mubr.bf16.gmra.mrb[16].mxu0 %v402_v39 }
  0x4f   : > { %5819 = vmatprep.mubr.bf16.mxu0 %v403_v40 }
  0x56   : > { %5820 = vmatmul.mubr.bf16.gmra.mrb[20].mxu0 %v404_v45 }
  0x57   : > { %5823 = vmatprep.mubr.bf16.mxu0 %v405_v46 }
  0x5e   : > { %5824 = vmatmul.mubr.bf16.gmra.mrb[24].mxu0 %v406_v51 }
  0x5f   : > { %5827 = vmatprep.mubr.bf16.mxu0 %v407_v52 }
  0x66   : > { %5828 = vmatmul.mubr.bf16.gmra.mrb[28].mxu0 %v408_v55 }
 0x101   : > { %v6866_v56 = vpop.f32.mrb[0].mxu0 }
 0x102   : > { %v6868_v57 = vpop.f32.mrb[1].mxu0  ;;  %v675_v63 = vmul.f32 %v6866_v56, %v6866_v56 }
 0x103   : > { %v6870_v58 = vpop.f32.mrb[2].mxu0  ;;  %v673_v60 = vmul.f32 %v6868_v57, %v6868_v57 }
 0x104   : > { %v6872_v59 = vpop.f32.mrb[3].mxu0  ;;  %v676_v2 = vmul.f32 %v6870_v58, %v6870_v58 }
 0x105   : > { %v636_v61 = vadd.f32 %v6872_v59, %v6868_v57  ;;  %v674_v62 = vmul.f32 %v6872_v59, %v6872_v59 }
 0x107   : > { %v637_v0 = vadd.f32 %v6866_v56, %v636_v61  ;;  %v705_v1 = vadd.f32 %v674_v62, %v673_v60 }
 0x109   : > { %v706_v3 = vadd.f32 %v705_v1, %v675_v63  ;;  %v6885_v4 = vpop.f32.mrb[4].mxu0  ;;  %v638_v5 = vadd.f32 %v6870_v58, %v637_v0 }
 0x10a   : > { %v6888_v6 = vpop.f32.mrb[5].mxu0  ;;  %v679_v15 = vmul.f32 %v6885_v4, %v6885_v4 }
 0x10b   : > { %v639_v7 = vadd.f32 %v638_v5, %v6888_v6  ;;  %v677_v8 = vmul.f32 %v6888_v6, %v6888_v6  ;;  %v707_v9 = vadd.f32 %v706_v3, %v676_v2  ;;  %v6893_v10 = vpop.f32.mrb[6].mxu0 }
 0x10c   : > { %v6895_v11 = vpop.f32.mrb[7].mxu0  ;;  %v680_v18 = vmul.f32 %v6893_v10, %v6893_v10 }
 0x10d   : > { %v708_v12 = vadd.f32 %v707_v9, %v677_v8  ;;  %v640_v13 = vadd.f32 %v639_v7, %v6895_v11  ;;  %v678_v14 = vmul.f32 %v6895_v11, %v6895_v11 }
 0x10f   : > { %v641_v16 = vadd.f32 %v6885_v4, %v640_v13  ;;  %v709_v17 = vadd.f32 %v708_v12, %v678_v14 }
 0x111   : > { %v710_v19 = vadd.f32 %v709_v17, %v679_v15  ;;  %v6905_v20 = vpop.f32.mrb[8].mxu0  ;;  %v642_v21 = vadd.f32 %v6893_v10, %v641_v16 }
 0x112   : > { %v6908_v22 = vpop.f32.mrb[9].mxu0  ;;  %v683_v31 = vmul.f32 %v6905_v20, %v6905_v20 }
 0x113   : > { %v643_v23 = vadd.f32 %v642_v21, %v6908_v22  ;;  %v681_v24 = vmul.f32 %v6908_v22, %v6908_v22  ;;  %v711_v25 = vadd.f32 %v710_v19, %v680_v18  ;;  %v6913_v26 = vpop.f32.mrb[10].mxu0 }
 0x114   : > { %v6915_v27 = vpop.f32.mrb[11].mxu0  ;;  %v684_v34 = vmul.f32 %v6913_v26, %v6913_v26 }
 0x115   : > { %v712_v28 = vadd.f32 %v711_v25, %v681_v24  ;;  %v644_v29 = vadd.f32 %v643_v23, %v6915_v27  ;;  %v682_v30 = vmul.f32 %v6915_v27, %v6915_v27 }
 0x117   : > { %v645_v32 = vadd.f32 %v6905_v20, %v644_v29  ;;  %v713_v33 = vadd.f32 %v712_v28, %v682_v30 }
 0x119   : > { %v714_v35 = vadd.f32 %v713_v33, %v683_v31  ;;  %v6925_v36 = vpop.f32.mrb[12].mxu0  ;;  %v646_v37 = vadd.f32 %v6913_v26, %v645_v32 }
 0x11a   : > { %v6928_v38 = vpop.f32.mrb[13].mxu0  ;;  %v687_v47 = vmul.f32 %v6925_v36, %v6925_v36 }
 0x11b   : > { %v647_v39 = vadd.f32 %v646_v37, %v6928_v38  ;;  %v685_v40 = vmul.f32 %v6928_v38, %v6928_v38  ;;  %v715_v41 = vadd.f32 %v714_v35, %v684_v34  ;;  %v6933_v42 = vpop.f32.mrb[14].mxu0 }
 0x11c   : > { %v6935_v43 = vpop.f32.mrb[15].mxu0  ;;  %v688_v50 = vmul.f32 %v6933_v42, %v6933_v42 }
 0x11d   : > { %v716_v44 = vadd.f32 %v715_v41, %v685_v40  ;;  %v648_v45 = vadd.f32 %v647_v39, %v6935_v43  ;;  %v686_v46 = vmul.f32 %v6935_v43, %v6935_v43 }
 0x11f   : > { %v649_v48 = vadd.f32 %v6925_v36, %v648_v45  ;;  %v717_v49 = vadd.f32 %v716_v44, %v686_v46 }
 0x121   : > { %v718_v51 = vadd.f32 %v717_v49, %v687_v47  ;;  %v6945_v52 = vpop.f32.mrb[16].mxu0  ;;  %v650_v53 = vadd.f32 %v6933_v42, %v649_v48 }
 0x122   : > { %v6948_v54 = vpop.f32.mrb[17].mxu0  ;;  %v691_v3 = vmul.f32 %v6945_v52, %v6945_v52 }
 0x123   : > { %v651_v55 = vadd.f32 %v650_v53, %v6948_v54  ;;  %v689_v60 = vmul.f32 %v6948_v54, %v6948_v54  ;;  %v719_v61 = vadd.f32 %v718_v51, %v688_v50  ;;  %v6953_v62 = vpop.f32.mrb[18].mxu0 }
 0x124   : > { %v6955_v63 = vpop.f32.mrb[19].mxu0  ;;  %v692_v8 = vmul.f32 %v6953_v62, %v6953_v62 }
 0x125   : > { %v720_v0 = vadd.f32 %v719_v61, %v689_v60  ;;  %v652_v1 = vadd.f32 %v651_v55, %v6955_v63  ;;  %v690_v2 = vmul.f32 %v6955_v63, %v6955_v63 }
 0x127   : > { %v653_v5 = vadd.f32 %v6945_v52, %v652_v1  ;;  %v721_v7 = vadd.f32 %v720_v0, %v690_v2 }
 0x129   : > { %v722_v9 = vadd.f32 %v721_v7, %v691_v3  ;;  %v6965_v12 = vpop.f32.mrb[20].mxu0  ;;  %v654_v13 = vadd.f32 %v6953_v62, %v653_v5 }
 0x12a   : > { %v6968_v14 = vpop.f32.mrb[21].mxu0  ;;  %v695_v25 = vmul.f32 %v6965_v12, %v6965_v12 }
 0x12b   : > { %v655_v15 = vadd.f32 %v654_v13, %v6968_v14  ;;  %v693_v16 = vmul.f32 %v6968_v14, %v6968_v14  ;;  %v723_v17 = vadd.f32 %v722_v9, %v692_v8  ;;  %v6973_v18 = vpop.f32.mrb[22].mxu0 }
 0x12c   : > { %v6975_v19 = vpop.f32.mrb[23].mxu0  ;;  %v696_v30 = vmul.f32 %v6973_v18, %v6973_v18 }
 0x12d   : > { %v724_v21 = vadd.f32 %v723_v17, %v693_v16  ;;  %v656_v23 = vadd.f32 %v655_v15, %v6975_v19  ;;  %v694_v24 = vmul.f32 %v6975_v19, %v6975_v19 }
 0x12f   : > { %v657_v28 = vadd.f32 %v6965_v12, %v656_v23  ;;  %v725_v29 = vadd.f32 %v724_v21, %v694_v24 }
 0x131   : > { %v726_v31 = vadd.f32 %v725_v29, %v695_v25  ;;  %v6985_v32 = vpop.f32.mrb[24].mxu0  ;;  %v658_v33 = vadd.f32 %v6973_v18, %v657_v28 }
 0x132   : > { %v6988_v34 = vpop.f32.mrb[25].mxu0  ;;  %v699_v47 = vmul.f32 %v6985_v32, %v6985_v32 }
 0x133   : > { %v659_v35 = vadd.f32 %v658_v33, %v6988_v34  ;;  %v697_v37 = vmul.f32 %v6988_v34, %v6988_v34  ;;  %v727_v39 = vadd.f32 %v726_v31, %v696_v30  ;;  %v6993_v40 = vpop.f32.mrb[26].mxu0 }
 0x134   : > { %v6995_v41 = vpop.f32.mrb[27].mxu0  ;;  %v700_v50 = vmul.f32 %v6993_v40, %v6993_v40 }
 0x135   : > { %v728_v44 = vadd.f32 %v727_v39, %v697_v37  ;;  %v660_v45 = vadd.f32 %v659_v35, %v6995_v41  ;;  %v698_v46 = vmul.f32 %v6995_v41, %v6995_v41 }
 0x137   : > { %v661_v48 = vadd.f32 %v6985_v32, %v660_v45  ;;  %v729_v49 = vadd.f32 %v728_v44, %v698_v46  ;;  %v6601_v46 = vld [vmem:[%s9054_s4 + $0x40] sm:$0xff]  }
 0x138   : > { %5831 = vmatprep.subr.bf16.mxu0 %v6601_v46 }
 0x139   : > { %v730_v51 = vadd.f32 %v729_v49, %v699_v47  ;;  %v7005_v53 = vpop.f32.mrb[28].mxu0  ;;  %v662_v55 = vadd.f32 %v6993_v40, %v661_v48  ;;  %5832 = vmatpush3.bf16.msra.mxu0 %v6601_v46  ;;  %v6602_v47 = vld [vmem:[%s9054_s4 + $0xc0] sm:$0xff]   ;;  %v6603_v48 = vld [vmem:[%s9054_s4 + $0x48] sm:$0xff]  }
 0x13a   : > { %v7008_v60 = vpop.f32.mrb[29].mxu0  ;;  %v703_v9 = vmul.f32 %v7005_v53, %v7005_v53  ;;  %6311 = vmatprep.subr.bf16.mxu1 %v6602_v47  ;;  %5833 = vmatprep.subr.bf16.mxu0 %v6603_v48  ;;  %v6604_v49 = vld [vmem:[%s9054_s4 + $0xc8] sm:$0xff]  }
 0x13b   : > { %v663_v61 = vadd.f32 %v662_v55, %v7008_v60  ;;  %v701_v0 = vmul.f32 %v7008_v60, %v7008_v60  ;;  %v731_v1 = vadd.f32 %v730_v51, %v700_v50  ;;  %v7013_v2 = vpop.f32.mrb[30].mxu0  ;;  %6319 = vmatpush3.bf16.msra.mxu1 %v6602_v47  ;;  %v6605_v50 = vld [vmem:[%s9054_s4 + $0x50] sm:$0xff]   ;;  %v6607_v55 = vld [vmem:[%s9054_s4 + $0x58] sm:$0xff]  }
 0x13c   : > { %v7015_v3 = vpop.f32.mrb[31].mxu0  ;;  %v704_v16 = vmul.f32 %v7013_v2, %v7013_v2  ;;  %6312 = vmatprep.subr.bf16.mxu1 %v6604_v49  ;;  %v6606_v51 = vld [vmem:[%s9054_s4 + $0xd0] sm:$0xff]  }
 0x13d   : > { %v732_v5 = vadd.f32 %v731_v1, %v701_v0  ;;  %v664_v7 = vadd.f32 %v663_v61, %v7015_v3  ;;  %v702_v8 = vmul.f32 %v7015_v3, %v7015_v3  ;;  %5834 = vmatpush3.bf16.msra.mxu0 %v6603_v48  ;;  %v6608_v61 = vld [vmem:[%s9054_s4 + $0xd8] sm:$0xff]   ;;  %v6609_v0 = vld [vmem:[%s9054_s4 + $0x60] sm:$0xff]  }
 0x13e   : > { %5835 = vmatprep.subr.bf16.mxu0 %v6605_v50  ;;  %v6610_v1 = vld [vmem:[%s9054_s4 + $0xe0] sm:$0xff]  }
 0x13f   : > { %v665_v13 = vadd.f32 %v7005_v53, %v664_v7  ;;  %v733_v15 = vadd.f32 %v732_v5, %v702_v8  ;;  %6320 = vmatpush3.bf16.msra.mxu1 %v6604_v49  ;;  %v6611_v5 = vld [vmem:[%s9054_s4 + $0x68] sm:$0xff]   ;;  %v6613_v8 = vld [vmem:[%s9054_s4 + $0x70] sm:$0xff]  }
 0x140   : > { %6313 = vmatprep.subr.bf16.mxu1 %v6606_v51  ;;  %v6612_v7 = vld [vmem:[%s9054_s4 + $0xe8] sm:$0xff]  }
 0x141   : > { %v734_v17 = vadd.f32 %v733_v15, %v703_v9  ;;  %v666_v21 = vadd.f32 %v7013_v2, %v665_v13  ;;  %5836 = vmatpush3.bf16.msra.mxu0 %v6605_v50  ;;  %v6614_v9 = vld [vmem:[%s9054_s4 + $0xf0] sm:$0xff]   ;;  %v6615_v13 = vld [vmem:[%s9054_s4 + $0x78] sm:$0xff]   ;;  %v635_v50 = vld [vmem:[%s9053_s3] sm:$0x1] }
 0x142   : > { %5837 = vmatprep.subr.bf16.mxu0 %v6607_v55  ;;  %v6616_v15 = vld [vmem:[%s9054_s4 + $0xf8] sm:$0xff]  }
 0x143   : > { %v667_v23 = vrot.slane %v666_v21, 4  ;;  %v735_v24 = vadd.f32 %v734_v17, %v704_v16  ;;  %6321 = vmatpush3.bf16.msra.mxu1 %v6606_v51  ;;  %v9061_v16 = vmov 0   ;;  %v7078_v17 = vld [vmem:[%s9054_s4 + $0x100] sm:$0xff]  }
 0x144   : > { %6314 = vmatprep.subr.bf16.mxu1 %v6608_v61  ;;  %5847 = vmatprep.mubr.bf16.mxu0 %v9061_v16 }
 0x145   : > { %v668_v25 = vadd.f32 %v667_v23, %v666_v21  ;;  %v736_v28 = vrot.slane %v735_v24, 4  ;;  %5838 = vmatpush3.bf16.msra.mxu0 %v6607_v55  ;;  %v7084_v21 = vld [vmem:[%s9054_s4] sm:$0xff]  }
 0x146   : > { %5839 = vmatprep.subr.bf16.mxu0 %v6609_v0 }
 0x147   : > { %v669_v29 = vrot.slane %v668_v25, 2  ;;  %v737_v30 = vadd.f32 %v736_v28, %v735_v24  ;;  %6322 = vmatpush3.bf16.msra.mxu1 %v6608_v61 }
 0x148   : > { %6315 = vmatprep.subr.bf16.mxu1 %v6610_v1 }
 0x149   : > { %v670_v31 = vadd.f32 %v669_v29, %v668_v25  ;;  %v738_v33 = vrot.slane %v737_v30, 2  ;;  %5840 = vmatpush3.bf16.msra.mxu0 %v6609_v0 }
 0x14a   : > { %5841 = vmatprep.subr.bf16.mxu0 %v6611_v5 }
 0x14b   : > { %v671_v35 = vrot.slane %v670_v31, 1  ;;  %v739_v37 = vadd.f32 %v738_v33, %v737_v30  ;;  %6323 = vmatpush3.bf16.msra.mxu1 %v6610_v1 }
 0x14c   : > { %6316 = vmatprep.subr.bf16.mxu1 %v6612_v7 }
 0x14d   : > { %v672_v39 = vadd.f32 %v671_v35, %v670_v31  ;;  %v740_v44 = vrot.slane %v739_v37, 1  ;;  %5842 = vmatpush3.bf16.msra.mxu0 %v6611_v5  ;;  %v758_v35 = vlaneseq }
 0x14e   : > { %5843 = vmatprep.subr.bf16.mxu0 %v6613_v8 }
 0x14f   : > { %742 = vadd.xlane.f32.xlu0 %v672_v39  ;;  %v741_v45 = vadd.f32 %v740_v44, %v739_v37  ;;  %6324 = vmatpush3.bf16.msra.mxu1 %v6612_v7  ;;  %v634_v37 = vld [vmem:[%s9052_s2] sm:$0x1]  ;;  %v7090_v44 = vshrl.u32 %v758_v35, 7 }
 0x150   : > { %6317 = vmatprep.subr.bf16.mxu1 %v6614_v9 }
 0x151   : > { %5844 = vmatpush3.bf16.msra.mxu0 %v6613_v8  ;;  %9153 = vst [vmem:[#allocation2_spill] sm:$0xff] %v7090_v44  ;;  %v7093_v46 = vsub.s32 0, %v7090_v44  ;;  %v7096_v48 = vadd.s32 128, %v7090_v44  ;;  %v7099_v49 = vadd.s32 144, %v7090_v44  ;;  %v7105_v51 = vadd.s32 160, %v7090_v44 }
 0x152   : > { %5845 = vmatprep.subr.bf16.mxu0 %v6615_v13  ;;  %v7108_v55 = vadd.s32 176, %v7090_v44  ;;  %v7111_v61 = vadd.s32 192, %v7090_v44  ;;  %v7114_v0 = vadd.s32 208, %v7090_v44  ;;  %v7118_v5 = vadd.s32 224, %v7090_v44 }
 0x153   : > { %746 = vadd.xlane.f32.xlu0 %v741_v45  ;;  %6325 = vmatpush3.bf16.msra.mxu1 %v6614_v9  ;;  %9154 = vst [vmem:[#allocation3_spill] sm:$0xff] %v7093_v46 }
 0x154   : > { %6318 = vmatprep.subr.bf16.mxu1 %v6616_v15  ;;  %9155 = vst [vmem:[#allocation4_spill] sm:$0xff] %v7118_v5 }
 0x155   : > { %5846 = vmatpush3.bf16.msra.mxu0 %v6615_v13 }
 0x156   : > { %5879 = vmatprep.subr.bf16.mxu0 %v7084_v21 }
 0x157   : > { %6326 = vmatpush3.bf16.msra.mxu1 %v6616_v15 }
 0x158   : > { %6023 = vmatprep.subr.bf16.mxu1 %v7078_v17 }
 0x1dc   : > { %v743_v23 = vpop.xlane.xlu0 %742 }
 0x1dd   : > { %v745_v24 = vmul.f32 0.00048828125, %v743_v23 }
 0x1df   : > { %v749_v28 = vmul.f32 %v745_v24, %v745_v24 }
 0x1e0   : > { %v747_v25 = vpop.xlane.xlu0 %746 }
 0x1e1   : > { %v748_v29 = vmul.f32 0.00048828125, %v747_v25 }
 0x1e3   : > { %v750_v30 = vsub.f32 %v748_v29, %v749_v28 }
 0x1e5   : > { %v751_v31 = vmax.f32 %v750_v30, 0.0  ;;  %v7130_v30 = vadd.s32 240, %v7090_v44 }
 0x1e7   : > { %v752_v33 = vadd.f32 1e-05, %v751_v31  ;;  %9156 = vst [vmem:[#allocation5_spill] sm:$0xff] %v7130_v30 }
 0x1e9   : > { %6681 = vrsqrt.f32 %v752_v33 }
 0x1f3   : > { %v6682_v39 = vpop.eup %6681 }
 0x1f4   : > { %v754_v45 = vmul.f32 %v6682_v39, %v634_v37 }
 0x1f6   : > { %v755_v47 = vmul.f32 %v754_v45, %v745_v24  ;;  %v761_v1 = vrot.slane %v754_v45, %v7093_v46 }
 0x1f8   : > { %v756_v7 = vsub.f32 %v635_v50, %v755_v47  ;;  %v763_v25 = vmul.f32 %v761_v1, %v6868_v57  ;;  %v764_v28 = vmul.f32 %v761_v1, %v6872_v59  ;;  %v765_v31 = vmul.f32 %v6866_v56, %v761_v1 }
 0x1f9   : > { %v766_v33 = vmul.f32 %v6870_v58, %v761_v1  ;;  %v767_v35 = vmul.f32 %v761_v1, %v6888_v6  ;;  %v768_v37 = vmul.f32 %v761_v1, %v6895_v11  ;;  %v769_v45 = vmul.f32 %v6885_v4, %v761_v1 }
 0x1fa   : > { %v799_v39 = vrot.slane %v756_v7, %v7093_v46  ;;  %v770_v57 = vmul.f32 %v6893_v10, %v761_v1  ;;  %v771_v59 = vmul.f32 %v761_v1, %v6908_v22  ;;  %v772_v47 = vmul.f32 %v761_v1, %v6915_v27 }
 0x1fb   : > { %v773_v50 = vmul.f32 %v6905_v20, %v761_v1  ;;  %v774_v56 = vmul.f32 %v6913_v26, %v761_v1  ;;  %v775_v58 = vmul.f32 %v761_v1, %v6928_v38  ;;  %v776_v6 = vmul.f32 %v761_v1, %v6935_v43 }
 0x1fc   : > { %v777_v11 = vmul.f32 %v6925_v36, %v761_v1  ;;  %v778_v7 = vmul.f32 %v6933_v42, %v761_v1  ;;  %v779_v4 = vmul.f32 %v761_v1, %v6948_v54  ;;  %v780_v10 = vmul.f32 %v761_v1, %v6955_v63 }
 0x1fd   : > { %v781_v22 = vmul.f32 %v6945_v52, %v761_v1  ;;  %v782_v27 = vmul.f32 %v6953_v62, %v761_v1  ;;  %v783_v20 = vmul.f32 %v761_v1, %v6968_v14  ;;  %v784_v26 = vmul.f32 %v761_v1, %v6975_v19 }
 0x1fe   : > { %v785_v38 = vmul.f32 %v6965_v12, %v761_v1  ;;  %v786_v43 = vmul.f32 %v6973_v18, %v761_v1  ;;  %v787_v36 = vmul.f32 %v761_v1, %v6988_v34  ;;  %v788_v42 = vmul.f32 %v761_v1, %v6995_v41 }
 0x1ff   : > { %v789_v54 = vmul.f32 %v6985_v32, %v761_v1  ;;  %v790_v63 = vmul.f32 %v6993_v40, %v761_v1  ;;  %v791_v52 = vmul.f32 %v761_v1, %v7008_v60  ;;  %v792_v62 = vmul.f32 %v761_v1, %v7015_v3 }
 0x200   : > { %v793_v14 = vmul.f32 %v7005_v53, %v761_v1  ;;  %v794_v19 = vmul.f32 %v7013_v2, %v761_v1  ;;  %v801_v12 = vadd.f32 %v799_v39, %v763_v25  ;;  %v802_v16 = vadd.f32 %v799_v39, %v764_v28 }
 0x201   : > { %v803_v18 = vadd.f32 %v799_v39, %v765_v31  ;;  %v804_v29 = vadd.f32 %v799_v39, %v766_v33  ;;  %v805_v34 = vadd.f32 %v799_v39, %v767_v35  ;;  %v806_v24 = vadd.f32 %v799_v39, %v768_v37 }
 0x202   : > { %v807_v41 = vadd.f32 %v799_v39, %v769_v45  ;;  %v808_v23 = vadd.f32 %v799_v39, %v770_v57  ;;  %v809_v32 = vadd.f32 %v799_v39, %v771_v59  ;;  %v810_v15 = vadd.f32 %v799_v39, %v772_v47 }
 0x203   : > { %v811_v40 = vadd.f32 %v799_v39, %v773_v50  ;;  %v812_v13 = vadd.f32 %v799_v39, %v774_v56  ;;  %v813_v60 = vadd.f32 %v799_v39, %v775_v58  ;;  %v814_v9 = vadd.f32 %v799_v39, %v776_v6 }
 0x204   : > { %v815_v8 = vadd.f32 %v799_v39, %v777_v11  ;;  %v816_v3 = vadd.f32 %v799_v39, %v778_v7  ;;  %v817_v46 = vadd.f32 %v799_v39, %v779_v4  ;;  %v818_v53 = vadd.f32 %v799_v39, %v780_v10 }
 0x205   : > { %v819_v44 = vadd.f32 %v799_v39, %v781_v22  ;;  %v7163_v2 = vmax.f32 %v801_v12, 0.0  ;;  %v7165_v1 = vmax.f32 %v802_v16, 0.0  ;;  %v820_v25 = vadd.f32 %v799_v39, %v782_v27 }
 0x206   : > { %v821_v28 = vadd.f32 %v799_v39, %v783_v20  ;;  %v822_v31 = vadd.f32 %v799_v39, %v784_v26  ;;  %v823_v33 = vadd.f32 %v799_v39, %v785_v38  ;;  %v824_v35 = vadd.f32 %v799_v39, %v786_v43 }
 0x207   : > { %v825_v37 = vadd.f32 %v799_v39, %v787_v36  ;;  %v826_v45 = vadd.f32 %v799_v39, %v788_v42  ;;  %v827_v57 = vadd.f32 %v799_v39, %v789_v54  ;;  %v828_v59 = vadd.f32 %v799_v39, %v790_v63 }
 0x208   : > { %v829_v47 = vadd.f32 %v799_v39, %v791_v52  ;;  %v830_v50 = vadd.f32 %v799_v39, %v792_v62  ;;  %v831_v56 = vadd.f32 %v799_v39, %v793_v14  ;;  %v832_v58 = vadd.f32 %v799_v39, %v794_v19 }
 0x209   : > { %v7167_v6 = vmax.f32 %v803_v18, 0.0  ;;  %v1347_v11 = vrot.slane %v7163_v2, 7  ;;  %v9069_v16 = vrot.slane %v7165_v1, 7  ;;  %v7171_v7 = vmax.f32 %v804_v29, 0.0 }
 0x20a   : > { %v7173_v4 = vmax.f32 %v805_v34, 0.0  ;;  %v7175_v10 = vmax.f32 %v806_v24, 0.0  ;;  %v7177_v22 = vmax.f32 %v807_v41, 0.0  ;;  %v7179_v27 = vmax.f32 %v808_v23, 0.0 }
 0x20b   : > { %9157 = vst [vmem:[#allocation6_spill] sm:$0xff] %v7171_v7  ;;  %v7181_v20 = vmax.f32 %v809_v32, 0.0  ;;  %v7183_v26 = vmax.f32 %v810_v15, 0.0  ;;  %v1349_v39 = vsel %vm1346_vm0, %v1347_v11, %v9069_v16  ;;  %v7188_v38 = vmax.f32 %v811_v40, 0.0 }
 0x20c   : > { %v7190_v29 = vmax.f32 %v812_v13, 0.0  ;;  %v7192_v43 = vmax.f32 %v813_v60, 0.0  ;;  %v7194_v24 = vmax.f32 %v814_v9, 0.0  ;;  %v7196_v36 = vmax.f32 %v815_v8, 0.0 }
 0x20d   : > { %v7198_v23 = vmax.f32 %v816_v3, 0.0  ;;  %v7200_v42 = vmax.f32 %v817_v46, 0.0  ;;  %v7202_v15 = vmax.f32 %v818_v53, 0.0  ;;  %v7204_v54 = vmax.f32 %v819_v44, 0.0 }
 0x20e   : > { %v7206_v63 = vmax.f32 %v820_v25, 0.0  ;;  %v7208_v52 = vmax.f32 %v821_v28, 0.0  ;;  %v7210_v13 = vmax.f32 %v822_v31, 0.0  ;;  %v7212_v62 = vmax.f32 %v823_v33, 0.0 }
 0x20f   : > { %v7214_v9 = vmax.f32 %v824_v35, 0.0  ;;  %v7216_v8 = vmax.f32 %v825_v37, 0.0  ;;  %v7218_v14 = vmax.f32 %v826_v45, 0.0  ;;  %v7220_v46 = vmax.f32 %v827_v57, 0.0 }
 0x210   : > { %v7222_v19 = vmax.f32 %v828_v59, 0.0  ;;  %v7224_v44 = vmax.f32 %v829_v47, 0.0  ;;  %v7226_v12 = vmax.f32 %v830_v50, 0.0  ;;  %v7228_v18 = vmax.f32 %v831_v56, 0.0 }
 0x211   : > { %v7230_v34 = vmax.f32 %v832_v58, 0.0  ;;  %v9067_v32 = vrot.slane %v7167_v6, 1  ;;  %v1577_v3 = vrot.slane %v7171_v7, 1  ;;  %v9068_v53 = vrot.slane %v7173_v4, 1 }
 0x212   : > { %9158 = vst [vmem:[#allocation7_spill] sm:$0xff] %v7228_v18  ;;  %v9160_v25 = vand.u32 15, %v7096_v48  ;;  %v9163_v45 = vand.u32 15, %v7099_v49  ;;  %v9166_v56 = vand.u32 15, %v7105_v51  ;;  %v1382_v59 = vrot.slane %v7204_v54, 7 }
 0x213   : > { %9159 = vst [vmem:[#allocation8_spill] sm:$0xff] %v7230_v34  ;;  %v1578_v47 = vsel %vm1571_vm1, %v9067_v32, %v1577_v3  ;;  %v1580_v50 = vsel %vm1571_vm1, %v1577_v3, %v9068_v53  ;;  %v1384_v32 = vrot.slane %v7206_v63, 7  ;;  %v1386_v48 = vrot.slane %v7208_v52, 7 }
 0x214   : > { %vm7240_vm2 = vcmp.ne.s32.totalorder %v9160_v25, 0  ;;  %vm7250_vm3 = vcmp.ne.s32.totalorder %v9163_v45, 0  ;;  %vm7264_vm4 = vcmp.ne.s32.totalorder %v9166_v56, 0  ;;  %v1388_v3 = vrot.slane %v7210_v13, 7 }
 0x215   : > { %v1442_v51 = vsel %vm1346_vm0, 0.0, %v1347_v11  ;;  %v1390_v56 = vrot.slane %v7212_v62, 7  ;;  %v1392_v53 = vrot.slane %v7214_v9, 7  ;;  %v1394_v58 = vrot.slane %v7216_v8, 7  ;;  %vm7338_vm8 = vmpackc.low %vm9113_vm7, %vm7240_vm2 }
 0x216   : > { %v1396_v25 = vrot.slane %v7218_v14, 7  ;;  %v1398_v45 = vrot.slane %v7220_v46, 7  ;;  %v1400_v37 = vrot.slane %v7222_v19, 7  ;;  %v1402_v35 = vrot.slane %v7224_v44, 7  ;;  %vm7351_vm9 = vmpackc.low %vm9113_vm7, %vm7250_vm3 }
 0x217   : > { %v1404_v33 = vrot.slane %v7226_v12, 7  ;;  %v1406_v31 = vrot.slane %v7228_v18, 7  ;;  %v1408_v11 = vrot.slane %v7230_v34, 7  ;;  %v7288_v60 = vpack.c.bf16 %v7165_v1, %v7163_v2  ;;  %v6627_v34 = vld [vmem:[%s9054_s4 + $0x8] sm:$0xff]   ;;  %vm7363_vm10 = vmpackc.low %vm9113_vm7, %vm7264_vm4 }
 0x218   : > { %v7290_v40 = vpack.c.bf16 %v1349_v39, %v1442_v51  ;;  %v7292_v16 = vpack.c.bf16 %v1580_v50, %v1578_v47  ;;  %v7296_v41 = vpack.c.bf16 %v7171_v7, %v7167_v6  ;;  %v1378_v5 = vrot.slane %v7200_v42, 7 }
 0x219   : > { %9169 = vst [vmem:[#allocation9_spill] sm:$0xff] %v7288_v60  ;;  %5848 = vmatmul.mubr.bf16.vlgmr.msra.gmra.mrb[32].mxu0 %v7288_v60  ;;  %v1380_v18 = vrot.slane %v7202_v15, 7  ;;  %v1385_v39 = vsel %vm1346_vm0, %v1382_v59, %v1384_v32  ;;  %v1387_v47 = vsel %vm1346_vm0, %v1384_v32, %v1386_v48  ;;  %v1389_v50 = vsel %vm1346_vm0, %v1386_v48, %v1388_v3 }
 0x21a   : > { %9170 = vst [vmem:[#allocation10_spill] sm:$0xff] %v7290_v40  ;;  %9171 = vst [vmem:[#allocation11_spill] sm:$0xff] %v7292_v16  ;;  %v9173_v51 = vand.u32 15, %v7108_v55  ;;  %5851 = vmatprep.mubr.bf16.mxu0 %v7296_v41  ;;  %v9176_v16 = vrot.slane %v7198_v23, 7  ;;  %v7318_v60 = vpack.c.bf16 %v1389_v50, %v1387_v47  ;;  %v7322_v7 = vpack.c.bf16 %v7175_v10, %v7173_v4 }
 0x21b   : > { %9172 = vst [vmem:[#allocation12_spill] sm:$0xff] %v7296_v41  ;;  %v7326_v32 = vpack.c.bf16 %v7179_v27, %v7177_v22  ;;  %v9180_v55 = vand.u32 15, %v7111_v61  ;;  %v1383_v47 = vsel %vm1346_vm0, %v1380_v18, %v1382_v59  ;;  %v1391_v50 = vsel %vm1346_vm0, %v1388_v3, %v1390_v56  ;;  %5880 = vmatpush3.bf16.msra.mxu0 %v7084_v21 }
 0x21c   : > { %vm7310_vm5 = vcmp.ne.s32.totalorder %v9173_v51, 0  ;;  %v1379_v40 = vsel %vm1346_vm0, %v9176_v16, %v1378_v5  ;;  %9177 = vst [vmem:[#allocation13_spill] sm:$0xff] %v7318_v60  ;;  %9178 = vst [vmem:[#allocation14_spill] sm:$0xff] %v7322_v7  ;;  %v1381_v51 = vsel %vm1346_vm0, %v1378_v5, %v1380_v18  ;;  %v9183_v16 = vmov 0  ;;  %5881 = vmatprep.subr.bf16.mxu0 %v6627_v34 }
 0x21d   : > { %9179 = vst [vmem:[#allocation15_spill] sm:$0xff] %v7326_v32  ;;  %vm7330_vm6 = vcmp.ne.s32.totalorder %v9180_v55, 0  ;;  %v9184_v16 = vsel %vm7338_vm8, 4294967295, %v9183_v16  ;;  %v1393_v61 = vsel %vm1346_vm0, %v1390_v56, %v1392_v53  ;;  %v7346_v55 = vpack.c.bf16 %v1381_v51, %v1379_v40  ;;  %v6618_v40 = vld [vmem:[%s9054_s4 + $0x108] sm:$0xff]   ;;  %vm7477_vm12 = vmpackc.low %vm9113_vm7, %vm7310_vm5 }
 0x21e   : > { %9185 = vst [vmem:[#allocation16_spill] sm:$0xff] %v9184_v16  ;;  %v9187_v5 = vmov 0  ;;  %v7355_v28 = vpack.c.bf16 %v1385_v39, %v1383_v47  ;;  %v7357_v41 = vpack.c.bf16 %v1393_v61, %v1391_v50  ;;  %v1395_v18 = vsel %vm1346_vm0, %v1392_v53, %v1394_v58  ;;  %vm7501_vm13 = vmpackc.low %vm9113_vm7, %vm7330_vm6 }
 0x21f   : > { %9186 = vst [vmem:[#allocation17_spill] sm:$0xff] %v7346_v55  ;;  %v9188_v5 = vsel %vm7351_vm9, 4294967295, %v9187_v5  ;;  %v9191_v21 = vmov 0  ;;  %v1397_v57 = vsel %vm1346_vm0, %v1394_v58, %v1396_v25  ;;  %v7373_v59 = vpack.c.bf16 %v7183_v26, %v7181_v20  ;;  %6007 = vmatprep.mubr.msk.bf16.mxu1 %vm7338_vm8, %v7346_v55  ;;  %5882 = vmatpush3.bf16.msra.mxu0 %v6627_v34 }
 0x220   : > { %9189 = vst [vmem:[#allocation18_spill] sm:$0xff] %v9188_v5  ;;  %9190 = vst [vmem:[#allocation19_spill] sm:$0xff] %v7355_v28  ;;  %v9192_v21 = vsel %vm7363_vm10, 4294967295, %v9191_v21  ;;  %v7377_v53 = vpack.c.bf16 %v7190_v29, %v7188_v38  ;;  %v1399_v49 = vsel %vm1346_vm0, %v1396_v25, %v1398_v45  ;;  %v7383_v3 = vpack.c.bf16 %v1397_v57, %v1395_v18 }
 0x221   : > { %9193 = vst [vmem:[#allocation20_spill] sm:$0xff] %v9192_v21  ;;  %9194 = vst [vmem:[#allocation21_spill] sm:$0xff] %v7373_v59  ;;  %v1401_v56 = vsel %vm1346_vm0, %v1398_v45, %v1400_v37  ;;  %v1403_v58 = vsel %vm1346_vm0, %v1400_v37, %v1402_v35  ;;  %v1405_v39 = vsel %vm1346_vm0, %v1402_v35, %v1404_v33  ;;  %6008 = vmatmul.mubr.msk.bf16.vlgmr.msra.gmra.mrb[0].mxu1 %vm7351_vm9, %v7355_v28  ;;  %v6628_v35 = vld [vmem:[%s9054_s4 + $0x10] sm:$0xff]  }
 0x222   : > { %9195 = vst [vmem:[#allocation22_spill] sm:$0xff] %v7377_v53  ;;  %9196 = vst [vmem:[#allocation23_spill] sm:$0xff] %v7383_v3  ;;  %v7391_v51 = vpack.c.bf16 %v1401_v56, %v1399_v49  ;;  %v7393_v47 = vpack.c.bf16 %v1405_v39, %v1403_v58  ;;  %v7397_v25 = vpack.c.bf16 %v7194_v24, %v7192_v43  ;;  %v1374_v37 = vrot.slane %v7196_v36, 7 }
 0x223   : > { %v7401_v50 = vpack.c.bf16 %v7198_v23, %v7196_v36  ;;  %6024 = vmatpush3.bf16.msra.mxu1 %v7078_v17  ;;  %6011 = vmatprep.mubr.msk.bf16.mxu1 %vm7363_vm10, %v7318_v60  ;;  %v1407_v45 = vsel %vm1346_vm0, %v1404_v33, %v1406_v31  ;;  %v1409_v61 = vsel %vm1346_vm0, %v1406_v31, %v1408_v11  ;;  %v1572_v57 = vrot.slane %v7163_v2, 1  ;;  %v6619_v17 = vld [vmem:[%s9054_s4 + $0x110] sm:$0xff]   ;;  %v9212_v60 = vld [vmem:[#allocation6_spill] sm:$0xff] }
 0x224   : > { %9197 = vst [vmem:[#allocation24_spill] sm:$0xff] %v7397_v25  ;;  %v7415_v18 = vpack.c.bf16 %v7202_v15, %v7200_v42  ;;  %6025 = vmatprep.subr.bf16.mxu1 %v6618_v40  ;;  %5852 = vmatmul.mubr.bf16.gmra.mrb[36].mxu0 %v7322_v7  ;;  %v9200_v49 = vand.u32 15, %v7114_v0  ;;  %v7428_v31 = vpack.c.bf16 %v1409_v61, %v1407_v45  ;;  %v1573_v11 = vrot.slane %v7165_v1, 1  ;;  %v6630_v45 = vld [vmem:[%s9054_s4 + $0x18] sm:$0xff]  }
 0x225   : > { %9198 = vst [vmem:[#allocation25_spill] sm:$0xff] %v7401_v50  ;;  %v7432_v33 = vpack.c.bf16 %v7206_v63, %v7204_v54  ;;  %v7436_v2 = vpack.c.bf16 %v7210_v13, %v7208_v52  ;;  %5855 = vmatprep.mubr.bf16.mxu0 %v7326_v32  ;;  %v7442_v0 = vpack.c.bf16 %v7214_v9, %v7212_v62  ;;  %v9210_v61 = vrot.slane %v7167_v6, 7 }
 0x226   : > { %9199 = vst [vmem:[#allocation26_spill] sm:$0xff] %v7415_v18  ;;  %vm7424_vm11 = vcmp.ne.s32.totalorder %v9200_v49, 0  ;;  %9203 = vst [vmem:[#allocation27_spill] sm:$0xff] %v7428_v31  ;;  %v7446_v58 = vpack.c.bf16 %v7218_v14, %v7216_v8  ;;  %v7450_v39 = vpack.c.bf16 %v7222_v19, %v7220_v46  ;;  %5883 = vmatprep.subr.bf16.mxu0 %v6628_v35  ;;  %v9211_v49 = vrot.slane %v7165_v1, 7 }
 0x227   : > { %9204 = vst [vmem:[#allocation28_spill] sm:$0xff] %v7432_v33  ;;  %9205 = vst [vmem:[#allocation29_spill] sm:$0xff] %v7436_v2  ;;  %v7457_v34 = vpack.c.bf16 %v7226_v12, %v7224_v44  ;;  %v9213_v5 = vrot.slane %v9212_v60, 7  ;;  %v9214_v28 = vmov %v9210_v61  ;;  %v9215_v55 = vrot.slane %v7173_v4, 7  ;;  %6026 = vmatpush3.bf16.msra.mxu1 %v6618_v40  ;;  %5884 = vmatpush3.bf16.msra.mxu0 %v6628_v35 }
 0x228   : > { %9206 = vst [vmem:[#allocation30_spill] sm:$0xff] %v7442_v0  ;;  %9207 = vst [vmem:[#allocation31_spill] sm:$0xff] %v7446_v58  ;;  %v1351_v21 = vsel %vm1346_vm0, %v9211_v49, %v9210_v61  ;;  %v9217_v1 = vmov 0  ;;  %v9221_v49 = vrot.slane %v7175_v10, 7  ;;  %v9223_v60 = vrot.slane %v7177_v22, 7  ;;  %6027 = vmatprep.subr.bf16.mxu1 %v6619_v17  ;;  %5885 = vmatprep.subr.bf16.mxu0 %v6630_v45 }
 0x229   : > { %9208 = vst [vmem:[#allocation32_spill] sm:$0xff] %v7450_v39  ;;  %9209 = vst [vmem:[#allocation33_spill] sm:$0xff] %v7457_v34  ;;  %v1353_v16 = vsel %vm1346_vm0, %v9214_v28, %v9213_v5  ;;  %v9216_v39 = vmov %v9213_v5  ;;  %v9218_v1 = vsel %vm7477_vm12, 4294967295, %v9217_v1  ;;  %v9222_v5 = vmov %v9215_v55  ;;  %6012 = vmatmul.mubr.msk.bf16.gmra.mrb[4].mxu1 %vm7477_vm12, %v7357_v41 }
 0x22a   : > { %v1355_v58 = vsel %vm1346_vm0, %v9216_v39, %v9215_v55  ;;  %9219 = vst [vmem:[#allocation6_spill] sm:$0xff] %v9218_v1  ;;  %v7481_v61 = vpack.c.bf16 %v1353_v16, %v1351_v21  ;;  %v1357_v28 = vsel %vm1346_vm0, %v9222_v5, %v9221_v49  ;;  %v9224_v55 = vmov %v9221_v49  ;;  %v6620_v21 = vld [vmem:[%s9054_s4 + $0x118] sm:$0xff]   ;;  %vm7605_vm15 = vmpackc.low %vm9113_vm7, %vm7424_vm11 }
 0x22b   : > { %v1359_v40 = vsel %vm1346_vm0, %v9224_v55, %v9223_v60  ;;  %v9225_v30 = vrot.slane %v7179_v27, 7  ;;  %v9226_v39 = vmov %v9223_v60  ;;  %v9227_v16 = vmov 0  ;;  %6028 = vmatpush3.bf16.msra.mxu1 %v6619_v17  ;;  %6015 = vmatprep.mubr.msk.bf16.mxu1 %vm7501_vm13, %v7383_v3 }
 0x22c   : > { %9220 = vst [vmem:[#allocation34_spill] sm:$0xff] %v7481_v61  ;;  %v9228_v16 = vsel %vm7501_vm13, 4294967295, %v9227_v16  ;;  %v7508_v49 = vpack.c.bf16 %v1357_v28, %v1355_v58  ;;  %v9232_v60 = vrot.slane %v7181_v20, 7  ;;  %v9234_v48 = vrot.slane %v7183_v26, 7  ;;  %6029 = vmatprep.subr.bf16.mxu1 %v6620_v21  ;;  %5856 = vmatmul.mubr.bf16.gmra.mrb[40].mxu0 %v7373_v59 }
 0x22d   : > { %v1361_v34 = vsel %vm1346_vm0, %v9226_v39, %v9225_v30  ;;  %9229 = vst [vmem:[#allocation35_spill] sm:$0xff] %v9228_v16  ;;  %v9233_v55 = vmov %v9225_v30  ;;  %v9236_v58 = vrot.slane %v7188_v38, 7  ;;  %5859 = vmatprep.mubr.bf16.mxu0 %v7377_v53  ;;  %v9253_v16 = vld [vmem:[#allocation5_spill] sm:$0xff]  ;;  %5886 = vmatpush3.bf16.msra.mxu0 %v6630_v45  ;;  %v1591_v1 = vrot.slane %v7188_v38, 1 }
 0x22e   : > { %9230 = vst [vmem:[#allocation36_spill] sm:$0xff] %v7508_v49  ;;  %v7510_v5 = vpack.c.bf16 %v1361_v34, %v1359_v40  ;;  %v1363_v30 = vsel %vm1346_vm0, %v9233_v55, %v9232_v60  ;;  %v9235_v39 = vmov %v9232_v60  ;;  %v9237_v34 = vmov %v9234_v48 }
 0x22f   : > { %v1365_v61 = vsel %vm1346_vm0, %v9235_v39, %v9234_v48  ;;  %v1367_v28 = vsel %vm1346_vm0, %v9237_v34, %v9236_v58  ;;  %v9238_v40 = vrot.slane %v7190_v29, 7  ;;  %v9240_v55 = vrot.slane %v7192_v43, 7  ;;  %v6631_v48 = vld [vmem:[%s9054_s4 + $0x20] sm:$0xff]   ;;  %6030 = vmatpush3.bf16.msra.mxu1 %v6620_v21 }
 0x230   : > { %9231 = vst [vmem:[#allocation37_spill] sm:$0xff] %v7510_v5  ;;  %v7522_v32 = vpack.c.bf16 %v1365_v61, %v1363_v30  ;;  %v9239_v5 = vmov %v9236_v58  ;;  %v1581_v61 = vrot.slane %v7175_v10, 1  ;;  %v1583_v30 = vrot.slane %v7177_v22, 1  ;;  %5887 = vmatprep.subr.bf16.mxu0 %v6631_v48 }
 0x231   : > { %v1369_v60 = vsel %vm1346_vm0, %v9239_v5, %v9238_v40  ;;  %v9241_v49 = vmov %v9238_v40  ;;  %v9242_v39 = vrot.slane %v7194_v24, 7  ;;  %v9243_v58 = vmov %v9240_v55  ;;  %5888 = vmatpush3.bf16.msra.mxu0 %v6631_v48  ;;  %6016 = vmatmul.mubr.msk.bf16.gmra.mrb[8].mxu1 %vm7605_vm15, %v7391_v51 }
 0x232   : > { %v1371_v35 = vsel %vm1346_vm0, %v9241_v49, %v9240_v55  ;;  %v7547_v5 = vpack.c.bf16 %v1369_v60, %v1367_v28  ;;  %v1585_v10 = vrot.slane %v7179_v27, 1  ;;  %v9245_v40 = vrot.slane %v7198_v23, 7  ;;  %v6621_v27 = vld [vmem:[%s9054_s4 + $0x120] sm:$0xff]  }
 0x233   : > { %v1373_v49 = vsel %vm1346_vm0, %v9243_v58, %v9242_v39  ;;  %v9244_v34 = vmov %v9242_v39  ;;  %v1587_v55 = vrot.slane %v7181_v20, 1  ;;  %v9247_v39 = vld [vmem:[#allocation8_spill] sm:$0xff]  ;;  %v1112_v3 = vand.u32 15, %v9253_v16  ;;  %6031 = vmatprep.subr.bf16.mxu1 %v6621_v27 }
 0x234   : > { %v7558_v22 = vpack.c.bf16 %v1373_v49, %v1371_v35  ;;  %v1375_v28 = vsel %vm1346_vm0, %v9244_v34, %v1374_v37  ;;  %v1377_v60 = vsel %vm1346_vm0, %v1374_v37, %v9245_v40  ;;  %v9246_v35 = vld [vmem:[#allocation7_spill] sm:$0xff]  ;;  %v1574_v49 = vsel %vm1571_vm1, %v1572_v57, %v1573_v11  ;;  %v9249_v20 = vld [vmem:[#allocation4_spill] sm:$0xff]  ;;  %6032 = vmatpush3.bf16.msra.mxu1 %v6621_v27 }
 0x235   : > { %v7571_v17 = vpack.c.bf16 %v1377_v60, %v1375_v28  ;;  %v7575_v58 = vpack.c.bf16 %v9247_v39, %v9246_v35  ;;  %v1589_v34 = vrot.slane %v7183_v26, 1  ;;  %v9250_v37 = vand.u32 15, %v9249_v20  ;;  %v6633_v26 = vld [vmem:[%s9054_s4 + $0x28] sm:$0xff]   ;;  %5860 = vmatmul.mubr.bf16.gmra.mrb[44].mxu0 %v7397_v25 }
 0x236   : > { %v9254_v28 = vrot.slane %v7167_v6, 1  ;;  %v9255_v20 = vrot.slane %v7173_v4, 1  ;;  %v1584_v16 = vsel %vm1571_vm1, %v1581_v61, %v1583_v30  ;;  %v1593_v45 = vrot.slane %v7190_v29, 1  ;;  %5889 = vmatprep.subr.bf16.mxu0 %v6633_v26  ;;  %5863 = vmatprep.mubr.bf16.mxu0 %v7401_v50 }
 0x237   : > { %9248 = vst [vmem:[#allocation7_spill] sm:$0xff] %v7575_v58  ;;  %vm7582_vm14 = vcmp.ne.s32.totalorder %v9250_v37, 0  ;;  %v1595_v6 = vrot.slane %v7192_v43, 1  ;;  %v9256_v38 = vmov 0  ;;  %v1597_v4 = vrot.slane %v7194_v24, 1  ;;  %v6622_v43 = vld [vmem:[%s9054_s4 + $0x128] sm:$0xff]   ;;  %5890 = vmatpush3.bf16.msra.mxu0 %v6633_v26 }
 0x238   : > { %v1576_v60 = vsel %vm1571_vm1, %v1573_v11, %v9254_v28  ;;  %v1582_v37 = vsel %vm1571_vm1, %v9255_v20, %v1581_v61  ;;  %v9257_v38 = vsel %vm7605_vm15, 4294967295, %v9256_v38  ;;  %vm7615_vm0 = vmpackc.low %vm9113_vm7, %vm7582_vm14  ;;  %v9258_v29 = vmov 0  ;;  %6033 = vmatprep.subr.bf16.mxu1 %v6622_v43 }
 0x239   : > { %v7594_v57 = vpack.c.bf16 %v1576_v60, %v1574_v49  ;;  %v7609_v11 = vpack.c.bf16 %v1584_v16, %v1582_v37  ;;  %v9259_v29 = vsel %vm7615_vm0, 4294967295, %v9258_v29  ;;  %v1586_v56 = vsel %vm1571_vm1, %v1583_v30, %v1585_v10  ;;  %6019 = vmatprep.mubr.msk.bf16.mxu1 %vm7615_vm0, %v7393_v47  ;;  %v6636_v37 = vld [vmem:[%s9054_s4 + $0x38] sm:$0xff]   ;;  %6034 = vmatpush3.bf16.msra.mxu1 %v6622_v43 }
 0x23a   : > { %v1588_v21 = vsel %vm1571_vm1, %v1585_v10, %v1587_v55  ;;  %v1599_v61 = vrot.slane %v7196_v36, 1  ;;  %v1601_v24 = vrot.slane %v7198_v23, 1  ;;  %v1590_v40 = vsel %vm1571_vm1, %v1587_v55, %v1589_v34  ;;  %v6634_v36 = vld [vmem:[%s9054_s4 + $0x30] sm:$0xff]  }
 0x23b   : > { %v7626_v49 = vpack.c.bf16 %v1588_v21, %v1586_v56  ;;  %v1603_v28 = vrot.slane %v7200_v42, 1  ;;  %vm7633_vm2 = vcmp.ne.s32.totalorder %v1112_v3, 0  ;;  %v1592_v23 = vsel %vm1571_vm1, %v1589_v34, %v1591_v1  ;;  %5891 = vmatprep.subr.bf16.mxu0 %v6634_v36 }
 0x23c   : > { %v1605_v30 = vrot.slane %v7202_v15, 1  ;;  %v7645_v42 = vpack.c.bf16 %v1592_v23, %v1590_v40  ;;  %v1594_v3 = vsel %vm1571_vm1, %v1591_v1, %v1593_v45  ;;  %v1596_v48 = vsel %vm1571_vm1, %v1593_v45, %v1595_v6  ;;  %v6623_v15 = vld [vmem:[%s9054_s4 + $0x130] sm:$0xff]   ;;  %vm7674_vm3 = vmpackc.low %vm9113_vm7, %vm7633_vm2  ;;  %5892 = vmatpush3.bf16.msra.mxu0 %v6634_v36 }
 0x23d   : > { %v1607_v10 = vrot.slane %v7204_v54, 1  ;;  %v1609_v55 = vrot.slane %v7206_v63, 1  ;;  %v7655_v27 = vpack.c.bf16 %v1596_v48, %v1594_v3  ;;  %v1598_v34 = vsel %vm1571_vm1, %v1595_v6, %v1597_v4  ;;  %6035 = vmatprep.subr.bf16.mxu1 %v6623_v15  ;;  %6020 = vmatmul.mubr.msk.bf16.gmra.mrb[12].mxu1 %vm7674_vm3, %v7428_v31  ;;  %v6626_v3 = vld [vmem:[%s9054_s4 + $0x140] sm:$0xff]  }
 0x23e   : > { %v1611_v20 = vrot.slane %v7208_v52, 1  ;;  %v1600_v54 = vsel %vm1571_vm1, %v1597_v4, %v1599_v61  ;;  %v1602_v63 = vsel %vm1571_vm1, %v1599_v61, %v1601_v24  ;;  %v1613_v1 = vrot.slane %v7210_v13, 1  ;;  %5893 = vmatprep.subr.bf16.mxu0 %v6636_v37  ;;  %6036 = vmatpush3.bf16.msra.mxu1 %v6623_v15 }
 0x23f   : > { %v7666_v16 = vpack.c.bf16 %v1600_v54, %v1598_v34  ;;  %v1604_v45 = vsel %vm1571_vm1, %v1601_v24, %v1603_v28  ;;  %v1615_v52 = vrot.slane %v7212_v62, 1  ;;  %v1617_v6 = vrot.slane %v7214_v9, 1  ;;  %v6624_v62 = vld [vmem:[%s9054_s4 + $0x138] sm:$0xff]   ;;  %5864 = vmatmul.mubr.bf16.gmra.mrb[48].mxu0 %v7415_v18 }
 0x240   : > { %v9262_v26 = vmov 0  ;;  %v7678_v13 = vpack.c.bf16 %v1604_v45, %v1602_v63  ;;  %v1606_v4 = vsel %vm1571_vm1, %v1603_v28, %v1605_v30  ;;  %v1619_v56 = vrot.slane %v7216_v8, 1  ;;  %v7699_v28 = vld [vmem:[%s9054_s4 + $0x80] sm:$0xff]   ;;  %6037 = vmatprep.subr.bf16.mxu1 %v6624_v62  ;;  %5867 = vmatprep.mubr.bf16.mxu0 %v7432_v33 }
 0x241   : > { %v9263_v26 = vsel %vm7674_vm3, 4294967295, %v9262_v26  ;;  %v1608_v9 = vsel %vm1571_vm1, %v1605_v30, %v1607_v10  ;;  %v1610_v43 = vsel %vm1571_vm1, %v1607_v10, %v1609_v55  ;;  %v1621_v21 = vrot.slane %v7218_v14, 1  ;;  %5894 = vmatpush3.bf16.msra.mxu0 %v6636_v37 }
 0x242   : > { %9264 = vst [vmem:[#allocation8_spill] sm:$0xff] %v9263_v26  ;;  %v7688_v61 = vpack.c.bf16 %v1608_v9, %v1606_v4  ;;  %v1612_v24 = vsel %vm1571_vm1, %v1609_v55, %v1611_v20  ;;  %v1623_v40 = vrot.slane %v7220_v46, 1  ;;  %v1625_v8 = vrot.slane %v7222_v19, 1  ;;  %v9265_v46 = vld [vmem:[#allocation9_spill] sm:$0xff]  ;;  %5927 = vmatprep.subr.bf16.mxu0 %v7699_v28  ;;  %6038 = vmatpush3.bf16.msra.mxu1 %v6624_v62  ;;  %v6632_v62 = vld [vmem:[%s9054_s4 + $0x150] sm:$0xff]   ;;  %v6654_v26 = vld [vmem:[%s9054_s4 + $0x1a8] sm:$0xff]  }
 0x243   : > { %v7701_v14 = vpack.c.bf16 %v1612_v24, %v1610_v43  ;;  %v1614_v60 = vsel %vm1571_vm1, %v1611_v20, %v1613_v1  ;;  %v1627_v36 = vrot.slane %v7224_v44, 1  ;;  %6039 = vmatprep.mubr.bf16.mxu1 %v9265_v46  ;;  %v1616_v19 = vsel %vm1571_vm1, %v1613_v1, %v1615_v52  ;;  %6071 = vmatprep.subr.bf16.mxu1 %v6626_v3  ;;  %v9267_v43 = vld [vmem:[#allocation15_spill] sm:$0xff]  ;;  %v6637_v24 = vld [vmem:[%s9054_s4 + $0x160] sm:$0xff]  }
 0x244   : > { %v1618_v23 = vsel %vm1571_vm1, %v1615_v52, %v1617_v6  ;;  %v1629_v30 = vrot.slane %v7226_v12, 1  ;;  %v7713_v48 = vpack.c.bf16 %v1616_v19, %v1614_v60  ;;  %v1620_v44 = vsel %vm1571_vm1, %v1617_v6, %v1619_v56  ;;  %v9266_v52 = vld [vmem:[#allocation12_spill] sm:$0xff] }
 0x245   : > { %v1631_v10 = vrot.slane %v9246_v35, 1  ;;  %v7718_v55 = vpack.c.bf16 %v1620_v44, %v1618_v23  ;;  %v1622_v12 = vsel %vm1571_vm1, %v1619_v56, %v1621_v21  ;;  %v1624_v15 = vsel %vm1571_vm1, %v1621_v21, %v1623_v40  ;;  %v6629_v35 = vld [vmem:[%s9054_s4 + $0x148] sm:$0xff]   ;;  %6040 = vmatmul.mubr.bf16.vlgmr.msra.gmra.mrb[16].mxu1 %v9266_v52  ;;  %v9271_v23 = vld [vmem:[#allocation33_spill] sm:$0xff] }
 0x246   : > { %v1626_v34 = vsel %vm1571_vm1, %v1623_v40, %v1625_v8  ;;  %v7724_v20 = vpack.c.bf16 %v1624_v15, %v1622_v12  ;;  %v1628_v54 = vsel %vm1571_vm1, %v1625_v8, %v1627_v36  ;;  %v1630_v1 = vsel %vm1571_vm1, %v1627_v36, %v1629_v30  ;;  %6072 = vmatpush3.bf16.msra.mxu1 %v6626_v3  ;;  %v9268_v21 = vld [vmem:[#allocation31_spill] sm:$0xff]  ;;  %v9269_v40 = vld [vmem:[#allocation32_spill] sm:$0xff]  ;;  %v9270_v8 = vld [vmem:[#allocation2_spill] sm:$0xff] }
 0x247   : > { %v7730_v63 = vpack.c.bf16 %v1628_v54, %v1626_v34  ;;  %v1632_v37 = vsel %vm1571_vm1, %v1629_v30, %v1631_v10  ;;  %v1633_v45 = vrot.slane %v9247_v39, 1  ;;  %6043 = vmatprep.mubr.bf16.mxu1 %v7322_v7  ;;  %5868 = vmatmul.mubr.bf16.gmra.mrb[52].mxu0 %v7436_v2  ;;  %v6635_v39 = vld [vmem:[%s9054_s4 + $0x158] sm:$0xff]   ;;  %v868_v60 = vadd.s32 16, %v9270_v8  ;;  %v6638_v36 = vld [vmem:[%s9054_s4 + $0x168] sm:$0xff]   ;;  %v6639_v30 = vld [vmem:[%s9054_s4 + $0x170] sm:$0xff]  }
 0x248   : > { %v7736_v6 = vpack.c.bf16 %v1632_v37, %v1630_v1  ;;  %6073 = vmatprep.subr.bf16.mxu1 %v6629_v35  ;;  %5871 = vmatprep.mubr.bf16.mxu0 %v7442_v0  ;;  %v902_v46 = vand.u32 15, %v9270_v8  ;;  %v9272_v3 = vmov 0   ;;  %v870_v44 = vadd.s32 32, %v9270_v8  ;;  %v6640_v12 = vld [vmem:[%s9054_s4 + $0x178] sm:$0xff]   ;;  %v9277_v37 = vld [vmem:[#allocation10_spill] sm:$0xff]  ;;  %v6670_v34 = vld [vmem:[%s9054_s4 + $0x228] sm:$0xff]  }
 0x249   : > { %v1634_v4 = vsel %vm1571_vm1, %v1631_v10, %v1633_v45  ;;  %v1667_v56 = vsel %vm1571_vm1, %v1633_v45, 0.0  ;;  %v916_v19 = vand.u32 15, %v868_v60  ;;  %v872_v10 = vadd.s32 48, %v9270_v8  ;;  %v7796_v45 = vld [vmem:[%s9054_s4 + $0x180] sm:$0xff]  }
 0x24a   : > { %v7745_v9 = vpack.c.bf16 %v1667_v56, %v1634_v4  ;;  %6074 = vmatpush3.bf16.msra.mxu1 %v6629_v35  ;;  %vm5487_vm1 = vcmp.ne.s32.totalorder %v902_v46, 0  ;;  %v9273_v15 = vmov 0  ;;  %v930_v54 = vand.u32 15, %v870_v44  ;;  %v6643_v35 = vld [vmem:[%s9054_s4 + $0x88] sm:$0xff]   ;;  %v9278_v4 = vld [vmem:[#allocation34_spill] sm:$0xff] }
 0x24b   : > { %6075 = vmatprep.subr.bf16.mxu1 %v6632_v62  ;;  %vm5488_vm4 = vcmp.ne.s32.totalorder %v916_v19, 0  ;;  %vm7776_vm5 = vmpackc.low %vm9113_vm7, %vm5487_vm1  ;;  %v944_v1 = vand.u32 15, %v872_v10  ;;  %v874_v56 = vadd.s32 64, %v9270_v8  ;;  %v9283_v19 = vld [vmem:[#allocation36_spill] sm:$0xff]  ;;  %v878_v44 = vadd.s32 96, %v9270_v8  ;;  %v6647_v10 = vld [vmem:[%s9054_s4 + $0xa0] sm:$0xff]  }
 0x24c   : > { %v9274_v15 = vsel %vm7776_vm5, 4294967295, %v9273_v15  ;;  %vm7782_vm6 = vmpackc.low %vm9113_vm7, %vm5488_vm4  ;;  %vm5489_vm11 = vcmp.ne.s32.totalorder %v930_v54, 0  ;;  %v9285_v54 = vmov 0  ;;  %v883_v7 = vadd.s32 136, %v9270_v8 }
 0x24d   : > { %6044 = vmatmul.mubr.bf16.gmra.mrb[20].mxu1 %v9267_v43  ;;  %vm5490_vm14 = vcmp.ne.s32.totalorder %v944_v1, 0  ;;  %vm7809_vm2 = vmpackc.low %vm9113_vm7, %vm5489_vm11  ;;  %v958_v60 = vand.u32 15, %v874_v56  ;;  %v986_v1 = vand.u32 15, %v878_v44  ;;  %v6649_v56 = vld [vmem:[%s9054_s4 + $0xa8] sm:$0xff]   ;;  %v9291_v44 = vmov 0 }
 0x24e   : > { %6047 = vmatprep.mubr.bf16.mxu1 %v7373_v59  ;;  %6076 = vmatpush3.bf16.msra.mxu1 %v6632_v62  ;;  %v6644_v62 = vld [vmem:[%s9054_s4 + $0x90] sm:$0xff]   ;;  %vm7815_vm1 = vmpackc.low %vm9113_vm7, %vm5490_vm14  ;;  %v6651_v59 = vld [vmem:[%s9054_s4 + $0x198] sm:$0xff]  }
 0x24f   : > { %5872 = vmatmul.mubr.bf16.gmra.mrb[56].mxu0 %v9268_v21  ;;  %6077 = vmatprep.subr.bf16.mxu1 %v6635_v39  ;;  %vm5491_vm4 = vcmp.ne.s32.totalorder %v958_v60, 0  ;;  %v6650_v60 = vld [vmem:[%s9054_s4 + $0xb0] sm:$0xff]   ;;  %v9314_v43 = vld [vmem:[#allocation35_spill] sm:$0xff] }
 0x250   : > { %5875 = vmatprep.mubr.bf16.mxu0 %v9269_v40  ;;  %vm7835_vm14 = vmpackc.low %vm9113_vm7, %vm5491_vm4  ;;  %vm5493_vm4 = vcmp.ne.s32.totalorder %v986_v1, 0  ;;  %v871_v1 = vadd.s32 40, %v9270_v8 }
 0x251   : > { %v9286_v54 = vsel %vm7835_vm14, 4294967295, %v9285_v54 }
 0x252   : > { %6078 = vmatpush3.bf16.msra.mxu1 %v6635_v39  ;;  %v876_v39 = vadd.s32 80, %v9270_v8 }
 0x253   : > { %6079 = vmatprep.subr.bf16.mxu1 %v6637_v24 }
 0x254   : > { %v972_v46 = vand.u32 15, %v876_v39  ;;  %v867_v39 = vadd.s32 8, %v9270_v8 }
 0x255   : > { %6048 = vmatmul.mubr.bf16.gmra.mrb[24].mxu1 %v7377_v53 }
 0x256   : > { %6051 = vmatprep.mubr.bf16.mxu1 %v7397_v25  ;;  %6080 = vmatpush3.bf16.msra.mxu1 %v6637_v24  ;;  %vm5492_vm11 = vcmp.ne.s32.totalorder %v972_v46, 0  ;;  %v909_v46 = vand.u32 15, %v867_v39  ;;  %v937_v39 = vand.u32 15, %v871_v1  ;;  %v9298_v1 = vld [vmem:[#allocation18_spill] sm:$0xff]  ;;  %v9308_v25 = vmov 0  ;;  %v6671_v24 = vld [vmem:[%s9054_s4 + $0x230] sm:$0xff]  }
 0x257   : > { %5876 = vmatmul.mubr.bf16.gmra.mrb[60].mxu0 %v9271_v23  ;;  %6081 = vmatprep.subr.bf16.mxu1 %v6638_v36  ;;  %vm7841_vm3 = vmpackc.low %vm9113_vm7, %vm5492_vm11 }
 0x258   : > { %5895 = vmatprep.mubr.bf16.mxu0 %v9272_v3 }
 0x25a   : > { %6082 = vmatpush3.bf16.msra.mxu1 %v6638_v36  ;;  %v6646_v36 = vld [vmem:[%s9054_s4 + $0x98] sm:$0xff]  }
 0x25b   : > { %6083 = vmatprep.subr.bf16.mxu1 %v6639_v30 }
 0x25d   : > { %6052 = vmatmul.mubr.bf16.gmra.mrb[28].mxu1 %v7401_v50  ;;  %v9307_v50 = vld [vmem:[#allocation6_spill] sm:$0xff] }
 0x25e   : > { %6055 = vmatprep.mubr.bf16.mxu1 %v7415_v18  ;;  %6084 = vmatpush3.bf16.msra.mxu1 %v6639_v30  ;;  %v9284_v30 = vld [vmem:[#allocation37_spill] sm:$0xff]  ;;  %v9306_v18 = vld [vmem:[#allocation20_spill] sm:$0xff] }
 0x25f   : > { %5896 = vmatmul.mubr.msk.bf16.vlgmr.msra.gmra.mrb[32].mxu0 %vm7776_vm5, %v9277_v37  ;;  %6085 = vmatprep.subr.bf16.mxu1 %v6640_v12  ;;  %vm7860_vm5 = vmpackc.low %vm9113_vm7, %vm5493_vm4  ;;  %vm5502_vm4 = vcmp.ne.s32.totalorder %v909_v46, 15  ;;  %v9296_v46 = vld [vmem:[#allocation16_spill] sm:$0xff] }
 0x260   : > { %5899 = vmatprep.mubr.msk.bf16.mxu0 %vm7782_vm6, %v9278_v4  ;;  %5928 = vmatpush3.bf16.msra.mxu0 %v7699_v28  ;;  %v6672_v28 = vld [vmem:[%s9054_s4 + $0x238] sm:$0xff]  }
 0x261   : > { %5929 = vmatprep.subr.bf16.mxu0 %v6643_v35 }
 0x262   : > { %6086 = vmatpush3.bf16.msra.mxu1 %v6640_v12  ;;  %v880_v12 = vadd.s32 112, %v9270_v8 }
 0x263   : > { %6119 = vmatprep.subr.bf16.mxu1 %v7796_v45 }
 0x264   : > { %5930 = vmatpush3.bf16.msra.mxu0 %v6643_v35  ;;  %v9287_v35 = vmov 0 }
 0x265   : > { %6056 = vmatmul.mubr.bf16.gmra.mrb[0].mxu1 %v7432_v33  ;;  %5931 = vmatprep.subr.bf16.mxu0 %v6644_v62  ;;  %v9288_v35 = vsel %vm7841_vm3, 4294967295, %v9287_v35  ;;  %v9304_v33 = vld [vmem:[#allocation11_spill] sm:$0xff] }
 0x266   : > { %6059 = vmatprep.mubr.bf16.mxu1 %v7436_v2 }
 0x267   : > { %5900 = vmatmul.mubr.msk.bf16.gmra.mrb[36].mxu0 %vm7809_vm2, %v9283_v19 }
 0x268   : > { %5903 = vmatprep.mubr.msk.bf16.mxu0 %vm7815_vm1, %v9284_v30  ;;  %5932 = vmatpush3.bf16.msra.mxu0 %v6644_v62  ;;  %v1000_v62 = vand.u32 15, %v880_v12  ;;  %v869_v12 = vadd.s32 24, %v9270_v8 }
 0x269   : > { %5933 = vmatprep.subr.bf16.mxu0 %v6646_v36 }
 0x26a   : > { %vm5494_vm11 = vcmp.ne.s32.totalorder %v1000_v62, 0  ;;  %v923_v62 = vand.u32 15, %v869_v12  ;;  %v9297_v12 = vld [vmem:[#allocation19_spill] sm:$0xff] }
 0x26c   : > { %5934 = vmatpush3.bf16.msra.mxu0 %v6646_v36  ;;  %v9289_v36 = vmov 0 }
 0x26d   : > { %6060 = vmatmul.mubr.bf16.gmra.mrb[4].mxu1 %v7442_v0  ;;  %5935 = vmatprep.subr.bf16.mxu0 %v6647_v10  ;;  %v9290_v36 = vsel %vm7860_vm5, 4294967295, %v9289_v36 }
 0x26e   : > { %6063 = vmatprep.mubr.bf16.mxu1 %v9268_v21  ;;  %v9302_v21 = vmov 0 }
 0x26f   : > { %5904 = vmatmul.mubr.msk.bf16.gmra.mrb[40].mxu0 %vm7835_vm14, %v7522_v32 }
 0x270   : > { %5907 = vmatprep.mubr.msk.bf16.mxu0 %vm7841_vm3, %v7547_v5  ;;  %5936 = vmatpush3.bf16.msra.mxu0 %v6647_v10  ;;  %vm7866_vm3 = vmpackc.low %vm9113_vm7, %vm5494_vm11  ;;  %v6652_v10 = vld [vmem:[%s9054_s4 + $0xb8] sm:$0xff]  }
 0x271   : > { %5937 = vmatprep.subr.bf16.mxu0 %v6649_v56  ;;  %v9292_v44 = vsel %vm7866_vm3, 4294967295, %v9291_v44  ;;  %vm7883_vm11 = vmpackc.low %vm5502_vm4, %vm9113_vm7  ;;  %vm5503_vm4 = vcmp.ne.s32.totalorder %v923_v62, 15  ;;  %vm5504_vm7 = vcmp.ne.s32.totalorder %v937_v39, 15  ;;  %v6645_v62 = vld [vmem:[%s9054_s4 + $0x188] sm:$0xff]   ;;  %v9305_v39 = vld [vmem:[#allocation13_spill] sm:$0xff] }
 0x274   : > { %5938 = vmatpush3.bf16.msra.mxu0 %v6649_v56 }
 0x275   : > { %6064 = vmatmul.mubr.bf16.gmra.mrb[8].mxu1 %v9269_v40  ;;  %5939 = vmatprep.subr.bf16.mxu0 %v6650_v60  ;;  %v9300_v40 = vmov 0 }
 0x276   : > { %6067 = vmatprep.mubr.bf16.mxu1 %v9271_v23  ;;  %v7891_v23 = vld [vmem:[%s9054_s4 + $0xc0] sm:$0xff]  }
 0x277   : > { %5908 = vmatmul.mubr.msk.bf16.gmra.mrb[44].mxu0 %vm7860_vm5, %v7558_v22 }
 0x278   : > { %5911 = vmatprep.mubr.msk.bf16.mxu0 %vm7866_vm3, %v7571_v17  ;;  %5940 = vmatpush3.bf16.msra.mxu0 %v6650_v60  ;;  %v9295_v60 = vld [vmem:[#allocation17_spill] sm:$0xff]  ;;  %vm9299_vm3 = vmmov 1  }
 0x279   : > { %5941 = vmatprep.subr.bf16.mxu0 %v6652_v10  ;;  %vm7906_vm5 = vmpackc.low %vm5503_vm4, %vm9299_vm3 }
 0x27a   : > { %v9301_v40 = vsel %vm7906_vm5, 4294967295, %v9300_v40  ;;  %vm7911_vm14 = vmpackc.low %vm5504_vm7, %vm9299_vm3 }
 0x27b   : > { %v9303_v21 = vsel %vm7911_vm14, 4294967295, %v9302_v21 }
 0x27c   : > { %5942 = vmatpush3.bf16.msra.mxu0 %v6652_v10  ;;  %v873_v10 = vadd.s32 56, %v9270_v8 }
 0x27d   : > { %6068 = vmatmul.mubr.bf16.gmra.mrb[12].mxu1 %v7575_v58  ;;  %5975 = vmatprep.subr.bf16.mxu0 %v7891_v23  ;;  %v875_v58 = vadd.s32 72, %v9270_v8 }
 0x27e   : > { %6087 = vmatprep.mubr.msk.bf16.mxu1 %vm7883_vm11, %v7594_v57  ;;  %v951_v0 = vand.u32 15, %v873_v10  ;;  %v877_v10 = vadd.s32 88, %v9270_v8 }
 0x27f   : > { %5912 = vmatmul.mubr.msk.bf16.gmra.mrb[48].mxu0 %vm7338_vm8, %v9295_v60  ;;  %v965_v2 = vand.u32 15, %v875_v58  ;;  %v6648_v58 = vld [vmem:[%s9054_s4 + $0x190] sm:$0xff]  }
 0x280   : > { %5915 = vmatprep.mubr.msk.bf16.mxu0 %vm7351_vm9, %v9297_v12  ;;  %vm5505_vm7 = vcmp.ne.s32.totalorder %v951_v0, 15  ;;  %v9311_v0 = vmov 0  ;;  %v979_v53 = vand.u32 15, %v877_v10  ;;  %v881_v10 = vadd.s32 120, %v9270_v8 }
 0x281   : > { %vm5506_vm4 = vcmp.ne.s32.totalorder %v965_v2, 15  ;;  %vm7937_vm9 = vmpackc.low %vm5505_vm7, %vm9299_vm3 }
 0x282   : > { %v9309_v25 = vsel %vm7937_vm9, 4294967295, %v9308_v25  ;;  %vm5507_vm7 = vcmp.ne.s32.totalorder %v979_v53, 15  ;;  %v1007_v52 = vand.u32 15, %v881_v10  ;;  %v887_v10 = vadd.s32 168, %v9270_v8 }
 0x283   : > { %9310 = vst [vmem:[#allocation4_spill] sm:$0xff] %v9309_v25 }
 0x285   : > { %6088 = vmatmul.mubr.msk.bf16.vlgmr.msra.gmra.mrb[16].mxu1 %vm7906_vm5, %v9304_v33 }
 0x286   : > { %6120 = vmatpush3.bf16.msra.mxu1 %v7796_v45  ;;  %6091 = vmatprep.mubr.msk.bf16.mxu1 %vm7911_vm14, %v7609_v11  ;;  %v879_v45 = vadd.s32 104, %v9270_v8 }
 0x287   : > { %5916 = vmatmul.mubr.msk.bf16.gmra.mrb[52].mxu0 %vm7363_vm10, %v9305_v39  ;;  %6121 = vmatprep.subr.bf16.mxu1 %v6645_v62  ;;  %vm7942_vm10 = vmpackc.low %vm5506_vm4, %vm9299_vm3 }
 0x288   : > { %5919 = vmatprep.mubr.msk.bf16.mxu0 %vm7477_vm12, %v7357_v41  ;;  %v9312_v0 = vsel %vm7942_vm10, 4294967295, %v9311_v0  ;;  %v993_v2 = vand.u32 15, %v879_v45  ;;  %v6653_v45 = vld [vmem:[%s9054_s4 + $0x1a0] sm:$0xff]   ;;  %vm7967_vm12 = vmpackc.low %vm5507_vm7, %vm9299_vm3  ;;  %vm5509_vm7 = vcmp.ne.s32.totalorder %v1007_v52, 15 }
 0x28a   : > { %6122 = vmatpush3.bf16.msra.mxu1 %v6645_v62  ;;  %v9313_v62 = vld [vmem:[#allocation23_spill] sm:$0xff]  ;;  %vm5508_vm4 = vcmp.ne.s32.totalorder %v993_v2, 15  ;;  %v1021_v2 = vand.u32 15, %v883_v7  ;;  %v6655_v7 = vld [vmem:[%s9054_s4 + $0x1b0] sm:$0xff]  }
 0x28b   : > { %6123 = vmatprep.subr.bf16.mxu1 %v6648_v58 }
 0x28d   : > { %6092 = vmatmul.mubr.msk.bf16.gmra.mrb[20].mxu1 %vm7937_vm9, %v7626_v49 }
 0x28e   : > { %6095 = vmatprep.mubr.msk.bf16.mxu1 %vm7942_vm10, %v7645_v42  ;;  %6124 = vmatpush3.bf16.msra.mxu1 %v6648_v58 }
 0x28f   : > { %5920 = vmatmul.mubr.msk.bf16.gmra.mrb[56].mxu0 %vm7501_vm13, %v9313_v62  ;;  %6125 = vmatprep.subr.bf16.mxu1 %v6651_v59  ;;  %vm7972_vm13 = vmpackc.low %vm5508_vm4, %vm9299_vm3  ;;  %vm5510_vm4 = vcmp.ne.s32.totalorder %v1021_v2, 15  ;;  %v6656_v2 = vld [vmem:[%s9054_s4 + $0x1b8] sm:$0xff]  }
 0x290   : > { %5923 = vmatprep.mubr.msk.bf16.mxu0 %vm7605_vm15, %v7391_v51  ;;  %vm7995_vm15 = vmpackc.low %vm5509_vm7, %vm9299_vm3 }
 0x292   : > { %6126 = vmatpush3.bf16.msra.mxu1 %v6651_v59  ;;  %v885_v59 = vadd.s32 152, %v9270_v8 }
 0x293   : > { %6127 = vmatprep.subr.bf16.mxu1 %v6653_v45 }
 0x294   : > { %v1035_v31 = vand.u32 15, %v885_v59  ;;  %v8020_v59 = vld [vmem:[%s9054_s4 + $0x1c0] sm:$0xff]  }
 0x295   : > { %6096 = vmatmul.mubr.msk.bf16.gmra.mrb[24].mxu1 %vm7967_vm12, %v7655_v27 }
 0x296   : > { %6099 = vmatprep.mubr.msk.bf16.mxu1 %vm7972_vm13, %v7666_v16  ;;  %6128 = vmatpush3.bf16.msra.mxu1 %v6653_v45  ;;  %vm5511_vm7 = vcmp.ne.s32.totalorder %v1035_v31, 15  ;;  %v6688_v31 = vld [vmem:[%s9054_s4 + $0xc8] sm:$0xff]  }
 0x297   : > { %5924 = vmatmul.mubr.msk.bf16.gmra.mrb[60].mxu0 %vm7615_vm0, %v7393_v47  ;;  %6129 = vmatprep.subr.bf16.mxu1 %v6654_v26  ;;  %vm8000_vm0 = vmpackc.low %vm5510_vm4, %vm9299_vm3 }
 0x298   : > { %5943 = vmatprep.mubr.bf16.mxu0 %v9272_v3  ;;  %v1049_v3 = vand.u32 15, %v887_v10  ;;  %v6689_v10 = vld [vmem:[%s9054_s4 + $0xd0] sm:$0xff]  }
 0x29a   : > { %6130 = vmatpush3.bf16.msra.mxu1 %v6654_v26  ;;  %v889_v26 = vadd.s32 184, %v9270_v8  ;;  %vm5512_vm4 = vcmp.ne.s32.totalorder %v1049_v3, 15 }
 0x29b   : > { %6131 = vmatprep.subr.bf16.mxu1 %v6655_v7  ;;  %vm8036_vm8 = vmpackc.low %vm5512_vm4, %vm9299_vm3 }
 0x29c   : > { %v1063_v3 = vand.u32 15, %v889_v26  ;;  %v895_v26 = vadd.s32 232, %v9270_v8 }
 0x29d   : > { %6100 = vmatmul.mubr.msk.bf16.gmra.mrb[28].mxu1 %vm7995_vm15, %v7678_v13 }
 0x29e   : > { %6103 = vmatprep.mubr.msk.bf16.mxu1 %vm8000_vm0, %v7688_v61  ;;  %6132 = vmatpush3.bf16.msra.mxu1 %v6655_v7  ;;  %v891_v7 = vadd.s32 200, %v9270_v8 }
 0x29f   : > { %5944 = vmatmul.mubr.msk.bf16.vlgmr.msra.gmra.mrb[32].mxu0 %vm7883_vm11, %v7594_v57  ;;  %6133 = vmatprep.subr.bf16.mxu1 %v6656_v2  ;;  %vm8031_vm11 = vmpackc.low %vm5511_vm7, %vm9299_vm3  ;;  %vm5513_vm7 = vcmp.ne.s32.totalorder %v1063_v3, 15  ;;  %v9329_v3 = vmov 0 }
 0x2a0   : > { %5947 = vmatprep.mubr.msk.bf16.mxu0 %vm7906_vm5, %v9304_v33  ;;  %5976 = vmatpush3.bf16.msra.mxu0 %v7891_v23  ;;  %v1077_v23 = vand.u32 15, %v891_v7  ;;  %v6690_v7 = vld [vmem:[%s9054_s4 + $0xd8] sm:$0xff]   ;;  %vm8062_vm5 = vmpackc.low %vm5513_vm7, %vm9299_vm3 }
 0x2a1   : > { %5977 = vmatprep.subr.bf16.mxu0 %v6688_v31 }
 0x2a2   : > { %6134 = vmatpush3.bf16.msra.mxu1 %v6656_v2  ;;  %v893_v2 = vadd.s32 216, %v9270_v8  ;;  %vm5514_vm4 = vcmp.ne.s32.totalorder %v1077_v23, 15  ;;  %v1105_v23 = vand.u32 15, %v895_v26  ;;  %v6692_v26 = vld [vmem:[%s9054_s4 + $0xe8] sm:$0xff]  }
 0x2a3   : > { %6167 = vmatprep.subr.bf16.mxu1 %v8020_v59 }
 0x2a4   : > { %5978 = vmatpush3.bf16.msra.mxu0 %v6688_v31  ;;  %v9327_v31 = vmov 0  ;;  %v1091_v25 = vand.u32 15, %v893_v2  ;;  %v897_v2 = vadd.s32 248, %v9270_v8 }
 0x2a5   : > { %6104 = vmatmul.mubr.msk.bf16.gmra.mrb[0].mxu1 %vm8031_vm11, %v7701_v14  ;;  %5979 = vmatprep.subr.bf16.mxu0 %v6689_v10  ;;  %v9328_v31 = vsel %vm8062_vm5, 4294967295, %v9327_v31 }
 0x2a6   : > { %6107 = vmatprep.mubr.msk.bf16.mxu1 %vm8036_vm8, %v7713_v48  ;;  %vm5515_vm7 = vcmp.ne.s32.totalorder %v1091_v25, 15  ;;  %v9333_v25 = vmov 0  ;;  %v1119_v8 = vand.u32 15, %v897_v2  ;;  %v9335_v2 = vmov 0 }
 0x2a7   : > { %5948 = vmatmul.mubr.msk.bf16.gmra.mrb[36].mxu0 %vm7911_vm14, %v7609_v11  ;;  %vm8067_vm14 = vmpackc.low %vm5514_vm4, %vm9299_vm3  ;;  %vm5516_vm4 = vcmp.ne.s32.totalorder %v1105_v23, 15  ;;  %v6693_v23 = vld [vmem:[%s9054_s4 + $0xf0] sm:$0xff]  }
 0x2a8   : > { %5951 = vmatprep.mubr.msk.bf16.mxu0 %vm7937_vm9, %v7626_v49  ;;  %5980 = vmatpush3.bf16.msra.mxu0 %v6689_v10  ;;  %v9330_v3 = vsel %vm8067_vm14, 4294967295, %v9329_v3  ;;  %v6691_v10 = vld [vmem:[%s9054_s4 + $0xe0] sm:$0xff]   ;;  %vm8091_vm9 = vmpackc.low %vm5515_vm7, %vm9299_vm3  ;;  %vm5518_vm7 = vcmp.ne.s32.totalorder %v1119_v8, 15  ;;  %v6659_v8 = vld [vmem:[%s9054_s4 + $0x1d0] sm:$0xff]  }
 0x2a9   : > { %5981 = vmatprep.subr.bf16.mxu0 %v6690_v7 }
 0x2ac   : > { %5982 = vmatpush3.bf16.msra.mxu0 %v6690_v7  ;;  %v9331_v7 = vmov 0 }
 0x2ad   : > { %6108 = vmatmul.mubr.msk.bf16.gmra.mrb[4].mxu1 %vm8062_vm5, %v7718_v55  ;;  %5983 = vmatprep.subr.bf16.mxu0 %v6691_v10  ;;  %v9332_v7 = vsel %vm8091_vm9, 4294967295, %v9331_v7 }
 0x2ae   : > { %6111 = vmatprep.mubr.msk.bf16.mxu1 %vm8067_vm14, %v7724_v20 }
 0x2af   : > { %5952 = vmatmul.mubr.msk.bf16.gmra.mrb[40].mxu0 %vm7942_vm10, %v7645_v42  ;;  %vm8096_vm10 = vmpackc.low %vm5516_vm4, %vm9299_vm3 }
 0x2b0   : > { %5955 = vmatprep.mubr.msk.bf16.mxu0 %vm7967_vm12, %v7655_v27  ;;  %5984 = vmatpush3.bf16.msra.mxu0 %v6691_v10  ;;  %v9334_v25 = vsel %vm8096_vm10, 4294967295, %v9333_v25  ;;  %v6694_v10 = vld [vmem:[%s9054_s4 + $0xf8] sm:$0xff]   ;;  %vm8119_vm4 = vmpackc.low %vm5518_vm7, %vm9299_vm3  ;;  %vm9337_vm3 = vnez %v9286_v54  ;;  %vm9338_vm7 = vnez %v9288_v35  ;;  %v9363_v35 = vld [vmem:[#allocation30_spill] sm:$0xff] }
 0x2b1   : > { %5985 = vmatprep.subr.bf16.mxu0 %v6692_v26  ;;  %v9336_v2 = vsel %vm8119_vm4, 4294967295, %v9335_v2  ;;  %v9362_v54 = vld [vmem:[#allocation29_spill] sm:$0xff] }
 0x2b4   : > { %5986 = vmatpush3.bf16.msra.mxu0 %v6692_v26  ;;  %v6658_v26 = vld [vmem:[%s9054_s4 + $0x1c8] sm:$0xff]  }
 0x2b5   : > { %6112 = vmatmul.mubr.msk.bf16.gmra.mrb[8].mxu1 %vm8091_vm9, %v7730_v63  ;;  %5987 = vmatprep.subr.bf16.mxu0 %v6693_v23 }
 0x2b6   : > { %6115 = vmatprep.mubr.msk.bf16.mxu1 %vm8096_vm10, %v7736_v6 }
 0x2b7   : > { %5956 = vmatmul.mubr.msk.bf16.gmra.mrb[44].mxu0 %vm7972_vm13, %v7666_v16 }
 0x2b8   : > { %5959 = vmatprep.mubr.msk.bf16.mxu0 %vm7995_vm15, %v7678_v13  ;;  %5988 = vmatpush3.bf16.msra.mxu0 %v6693_v23  ;;  %v6661_v23 = vld [vmem:[%s9054_s4 + $0x1e0] sm:$0xff]  }
 0x2b9   : > { %5989 = vmatprep.subr.bf16.mxu0 %v6694_v10 }
 0x2bc   : > { %5990 = vmatpush3.bf16.msra.mxu0 %v6694_v10  ;;  %v6662_v10 = vld [vmem:[%s9054_s4 + $0x1e8] sm:$0xff]  }
 0x2bd   : > { %6116 = vmatmul.mubr.msk.bf16.gmra.mrb[12].mxu1 %vm8119_vm4, %v7745_v9  ;;  %vm9339_vm4 = vnez %v9290_v36  ;;  %v9364_v36 = vld [vmem:[#allocation31_spill] sm:$0xff] }
 0x2be   : > { %6135 = vmatprep.mubr.msk.bf16.mxu1 %vm7782_vm6, %v9278_v4 }
 0x2bf   : > { %5960 = vmatmul.mubr.msk.bf16.gmra.mrb[48].mxu0 %vm8000_vm0, %v7688_v61 }
 0x2c0   : > { %5963 = vmatprep.mubr.msk.bf16.mxu0 %vm8031_vm11, %v7701_v14 }
 0x2c5   : > { %6136 = vmatmul.mubr.msk.bf16.vlgmr.msra.gmra.mrb[16].mxu1 %vm7809_vm2, %v9283_v19 }
 0x2c6   : > { %6168 = vmatpush3.bf16.msra.mxu1 %v8020_v59  ;;  %6139 = vmatprep.mubr.msk.bf16.mxu1 %vm7815_vm1, %v9284_v30  ;;  %v6660_v59 = vld [vmem:[%s9054_s4 + $0x1d8] sm:$0xff]  }
 0x2c7   : > { %5964 = vmatmul.mubr.msk.bf16.gmra.mrb[52].mxu0 %vm8036_vm8, %v7713_v48  ;;  %6169 = vmatprep.subr.bf16.mxu1 %v6658_v26 }
 0x2c8   : > { %5967 = vmatprep.mubr.msk.bf16.mxu0 %vm8062_vm5, %v7718_v55  ;;  %vm9342_vm5 = vnez %v9296_v46  ;;  %v9367_v46 = vld [vmem:[#allocation7_spill] sm:$0xff] }
 0x2ca   : > { %6170 = vmatpush3.bf16.msra.mxu1 %v6658_v26  ;;  %v6663_v26 = vld [vmem:[%s9054_s4 + $0x1f0] sm:$0xff]  }
 0x2cb   : > { %6171 = vmatprep.subr.bf16.mxu1 %v6659_v8 }
 0x2cd   : > { %6140 = vmatmul.mubr.msk.bf16.gmra.mrb[20].mxu1 %vm9337_vm3, %v7522_v32 }
 0x2ce   : > { %6143 = vmatprep.mubr.msk.bf16.mxu1 %vm9338_vm7, %v7547_v5  ;;  %6172 = vmatpush3.bf16.msra.mxu1 %v6659_v8  ;;  %v6664_v8 = vld [vmem:[%s9054_s4 + $0x1f8] sm:$0xff]  }
 0x2cf   : > { %5968 = vmatmul.mubr.msk.bf16.gmra.mrb[56].mxu0 %vm8067_vm14, %v7724_v20  ;;  %6173 = vmatprep.subr.bf16.mxu1 %v6660_v59  ;;  %vm9340_vm14 = vnez %v9292_v44  ;;  %v9365_v44 = vld [vmem:[#allocation32_spill] sm:$0xff] }
 0x2d0   : > { %5971 = vmatprep.mubr.msk.bf16.mxu0 %vm8091_vm9, %v7730_v63  ;;  %vm9341_vm9 = vnez %v9274_v15  ;;  %v6665_v15 = vld [vmem:[%s9054_s4 + $0x200] sm:$0xff]  }
 0x2d2   : > { %6174 = vmatpush3.bf16.msra.mxu1 %v6660_v59 }
 0x2d3   : > { %6175 = vmatprep.subr.bf16.mxu1 %v6661_v23 }
 0x2d5   : > { %6144 = vmatmul.mubr.msk.bf16.gmra.mrb[24].mxu1 %vm9339_vm4, %v7558_v22 }
 0x2d6   : > { %6147 = vmatprep.mubr.msk.bf16.mxu1 %vm9340_vm14, %v7571_v17  ;;  %6176 = vmatpush3.bf16.msra.mxu1 %v6661_v23 }
 0x2d7   : > { %5972 = vmatmul.mubr.msk.bf16.gmra.mrb[60].mxu0 %vm8096_vm10, %v7736_v6  ;;  %6177 = vmatprep.subr.bf16.mxu1 %v6662_v10  ;;  %vm9343_vm10 = vnez %v9298_v1 }
 0x2d8   : > { %5991 = vmatprep.mubr.msk.bf16.mxu0 %vm9341_vm9, %v9277_v37  ;;  %vm9344_vm9 = vnez %v9306_v18  ;;  %v6666_v18 = vld [vmem:[%s9054_s4 + $0x208] sm:$0xff]   ;;  %v9358_v37 = vld [vmem:[#allocation24_spill] sm:$0xff] }
 0x2da   : > { %6178 = vmatpush3.bf16.msra.mxu1 %v6662_v10 }
 0x2db   : > { %6179 = vmatprep.subr.bf16.mxu1 %v6663_v26 }
 0x2dd   : > { %6148 = vmatmul.mubr.msk.bf16.gmra.mrb[28].mxu1 %vm9342_vm5, %v9295_v60  ;;  %vm9346_vm5 = vnez %v9314_v43  ;;  %v6669_v43 = vld [vmem:[%s9054_s4 + $0x220] sm:$0xff]   ;;  %v9366_v60 = vld [vmem:[#allocation33_spill] sm:$0xff] }
 0x2de   : > { %6151 = vmatprep.mubr.msk.bf16.mxu1 %vm9343_vm10, %v9297_v12  ;;  %6180 = vmatpush3.bf16.msra.mxu1 %v6663_v26  ;;  %vm9345_vm10 = vnez %v9307_v50  ;;  %v9353_v50 = vld [vmem:[#allocation12_spill] sm:$0xff] }
 0x2df   : > { %5992 = vmatmul.mubr.msk.bf16.vlgmr.msra.gmra.mrb[32].mxu0 %vm7782_vm6, %v9278_v4  ;;  %6181 = vmatprep.subr.bf16.mxu1 %v6664_v8  ;;  %vm9347_vm6 = vnez %v9257_v38  ;;  %v9356_v38 = vld [vmem:[#allocation21_spill] sm:$0xff]  ;;  %v9370_v12 = vld [vmem:[#allocation4_spill] sm:$0xff] }
 0x2e0   : > { %5995 = vmatprep.mubr.msk.bf16.mxu0 %vm7809_vm2, %v9283_v19  ;;  %vm9348_vm2 = vnez %v9259_v29  ;;  %v9357_v29 = vld [vmem:[#allocation22_spill] sm:$0xff]  ;;  %v9359_v4 = vld [vmem:[#allocation25_spill] sm:$0xff] }
 0x2e1   : > { %v9360_v19 = vld [vmem:[#allocation26_spill] sm:$0xff] }
 0x2e2   : > { %6182 = vmatpush3.bf16.msra.mxu1 %v6664_v8 }
 0x2e3   : > { %6215 = vmatprep.subr.bf16.mxu1 %v6665_v15 }
 0x2e5   : > { %6152 = vmatmul.mubr.msk.bf16.gmra.mrb[0].mxu1 %vm9344_vm9, %v9305_v39 }
 0x2e6   : > { %6155 = vmatprep.mubr.msk.bf16.mxu1 %vm9345_vm10, %v7357_v41  ;;  %v9349_v41 = vld [vmem:[#allocation27_spill] sm:$0xff] }
 0x2e7   : > { %5996 = vmatmul.mubr.msk.bf16.gmra.mrb[36].mxu0 %vm7815_vm1, %v9284_v30  ;;  %v9361_v30 = vld [vmem:[#allocation28_spill] sm:$0xff] }
 0x2e8   : > { %5999 = vmatprep.mubr.msk.bf16.mxu0 %vm9337_vm3, %v7522_v32  ;;  %v9350_v32 = vld [vmem:[#allocation8_spill] sm:$0xff]  ;;  %vm9371_vm3 = vnez %v9370_v12 }
 0x2e9   : > { %vm9351_vm1 = vnez %v9350_v32 }
 0x2ed   : > { %6156 = vmatmul.mubr.msk.bf16.gmra.mrb[4].mxu1 %vm9346_vm5, %v9313_v62 }
 0x2ee   : > { %6159 = vmatprep.mubr.msk.bf16.mxu1 %vm9347_vm6, %v7391_v51  ;;  %v9352_v51 = vmov 0  }
 0x2ef   : > { %6000 = vmatmul.mubr.msk.bf16.gmra.mrb[40].mxu0 %vm9338_vm7, %v7547_v5  ;;  %v9354_v5 = vld [vmem:[#allocation14_spill] sm:$0xff]  ;;  %vm9372_vm7 = vnez %v9312_v0 }
 0x2f0   : > { %6003 = vmatprep.mubr.msk.bf16.mxu0 %vm9339_vm4, %v7558_v22  ;;  %v6667_v22 = vld [vmem:[%s9054_s4 + $0x210] sm:$0xff]   ;;  %vm9369_vm4 = vnez %v9303_v21 }
 0x2f5   : > { %6160 = vmatmul.mubr.msk.bf16.gmra.mrb[8].mxu1 %vm9348_vm2, %v7393_v47  ;;  %v9355_v47 = vld [vmem:[#allocation15_spill] sm:$0xff] }
 0x2f6   : > { %6163 = vmatprep.mubr.msk.bf16.mxu1 %vm9351_vm1, %v9349_v41 }
 0x2f7   : > { %6004 = vmatmul.mubr.msk.bf16.gmra.mrb[44].mxu0 %vm9340_vm14, %v7571_v17  ;;  %v6668_v17 = vld [vmem:[%s9054_s4 + $0x218] sm:$0xff]   ;;  %vm9368_vm14 = vnez %v9301_v40 }
 0x2fd   : > { %6164 = vmatmul.mubr.bf16.gmra.mrb[12].mxu1 %v9352_v51 }
 0x2fe   : > { %6183 = vmatprep.mubr.bf16.mxu1 %v9353_v50 }
 0x305   : > { %6184 = vmatmul.mubr.bf16.vlgmr.msra.gmra.mrb[16].mxu1 %v9354_v5 }
 0x306   : > { %6216 = vmatpush3.bf16.msra.mxu1 %v6665_v15  ;;  %6187 = vmatprep.mubr.bf16.mxu1 %v9355_v47 }
 0x307   : > { %6217 = vmatprep.subr.bf16.mxu1 %v6666_v18 }
 0x30a   : > { %6218 = vmatpush3.bf16.msra.mxu1 %v6666_v18 }
 0x30b   : > { %6219 = vmatprep.subr.bf16.mxu1 %v6667_v22 }
 0x30d   : > { %6188 = vmatmul.mubr.bf16.gmra.mrb[20].mxu1 %v9356_v38 }
 0x30e   : > { %6191 = vmatprep.mubr.bf16.mxu1 %v9357_v29  ;;  %6220 = vmatpush3.bf16.msra.mxu1 %v6667_v22 }
 0x30f   : > { %6221 = vmatprep.subr.bf16.mxu1 %v6668_v17 }
 0x312   : > { %6222 = vmatpush3.bf16.msra.mxu1 %v6668_v17 }
 0x313   : > { %6223 = vmatprep.subr.bf16.mxu1 %v6669_v43 }
 0x315   : > { %6192 = vmatmul.mubr.bf16.gmra.mrb[24].mxu1 %v9358_v37 }
 0x316   : > { %6195 = vmatprep.mubr.bf16.mxu1 %v9359_v4  ;;  %6224 = vmatpush3.bf16.msra.mxu1 %v6669_v43 }
 0x317   : > { %6225 = vmatprep.subr.bf16.mxu1 %v6670_v34 }
 0x31a   : > { %6226 = vmatpush3.bf16.msra.mxu1 %v6670_v34 }
 0x31b   : > { %6227 = vmatprep.subr.bf16.mxu1 %v6671_v24 }
 0x31d   : > { %6196 = vmatmul.mubr.bf16.gmra.mrb[28].mxu1 %v9360_v19 }
 0x31e   : > { %6199 = vmatprep.mubr.bf16.mxu1 %v9361_v30  ;;  %6228 = vmatpush3.bf16.msra.mxu1 %v6671_v24 }
 0x31f   : > { %6229 = vmatprep.subr.bf16.mxu1 %v6672_v28 }
 0x322   : > { %6230 = vmatpush3.bf16.msra.mxu1 %v6672_v28 }
 0x325   : > { %6200 = vmatmul.mubr.bf16.gmra.mrb[0].mxu1 %v9362_v54 }
 0x326   : > { %6203 = vmatprep.mubr.bf16.mxu1 %v9363_v35 }
 0x32d   : > { %6204 = vmatmul.mubr.bf16.gmra.mrb[4].mxu1 %v9364_v36 }
 0x32e   : > { %6207 = vmatprep.mubr.bf16.mxu1 %v9365_v44 }
 0x335   : > { %6208 = vmatmul.mubr.bf16.gmra.mrb[8].mxu1 %v9366_v60 }
 0x336   : > { %6211 = vmatprep.mubr.bf16.mxu1 %v9367_v46 }
 0x33d   : > { %6212 = vmatmul.mubr.bf16.gmra.mrb[12].mxu1 %v9352_v51 }
 0x33e   : > { %6231 = vmatprep.mubr.msk.bf16.mxu1 %vm9368_vm14, %v9304_v33 }
 0x345   : > { %6232 = vmatmul.mubr.msk.bf16.vlgmr.msra.gmra.mrb[16].mxu1 %vm9369_vm4, %v7609_v11 }
 0x346   : > { %6235 = vmatprep.mubr.msk.bf16.mxu1 %vm9371_vm3, %v7626_v49 }
 0x34d   : > { %6236 = vmatmul.mubr.msk.bf16.gmra.mrb[20].mxu1 %vm9372_vm7, %v7645_v42 }
 0x34e   : > { %6239 = vmatprep.mubr.msk.bf16.mxu1 %vm7967_vm12, %v7655_v27  ;;  %vm9373_vm12 = vnez %v9328_v31 }
 0x355   : > { %6240 = vmatmul.mubr.msk.bf16.gmra.mrb[24].mxu1 %vm7972_vm13, %v7666_v16  ;;  %vm9374_vm13 = vnez %v9330_v3 }
 0x356   : > { %6243 = vmatprep.mubr.msk.bf16.mxu1 %vm7995_vm15, %v7678_v13  ;;  %vm9375_vm15 = vnez %v9332_v7 }
 0x35d   : > { %6244 = vmatmul.mubr.msk.bf16.gmra.mrb[28].mxu1 %vm8000_vm0, %v7688_v61  ;;  %vm9376_vm0 = vnez %v9334_v25 }
 0x35e   : > { %6247 = vmatprep.mubr.msk.bf16.mxu1 %vm8031_vm11, %v7701_v14  ;;  %vm9377_vm11 = vnez %v9336_v2 }
 0x365   : > { %6248 = vmatmul.mubr.msk.bf16.gmra.mrb[0].mxu1 %vm8036_vm8, %v7713_v48 }
 0x366   : > { %6251 = vmatprep.mubr.msk.bf16.mxu1 %vm9373_vm12, %v7718_v55 }
 0x36d   : > { %6252 = vmatmul.mubr.msk.bf16.gmra.mrb[4].mxu1 %vm9374_vm13, %v7724_v20 }
 0x36e   : > { %6255 = vmatprep.mubr.msk.bf16.mxu1 %vm9375_vm15, %v7730_v63 }
 0x375   : > { %6256 = vmatmul.mubr.msk.bf16.gmra.mrb[8].mxu1 %vm9376_vm0, %v7736_v6 }
 0x376   : > { %6259 = vmatprep.mubr.msk.bf16.mxu1 %vm9377_vm11, %v7745_v9 }
 0x37d   : > { %6260 = vmatmul.mubr.bf16.gmra.mrb[12].mxu1 %v9352_v51 }
 0x392   : > { %v8325_v33 = vpop.f32.mrb[48].mxu0 }
 0x393   : > { %v8327_v11 = vpop.f32.mrb[49].mxu0 }
 0x394   : > { %v8329_v49 = vpop.f32.mrb[50].mxu0 }
 0x395   : > { %v8331_v42 = vpop.f32.mrb[51].mxu0 }
 0x39a   : > { %v8333_v27 = vpop.f32.mrb[52].mxu0 }
 0x39b   : > { %v8335_v16 = vpop.f32.mrb[53].mxu0 }
 0x39c   : > { %v8337_v13 = vpop.f32.mrb[54].mxu0 }
 0x39d   : > { %v8339_v61 = vpop.f32.mrb[55].mxu0 }
 0x3a2   : > { %v8341_v14 = vpop.f32.mrb[56].mxu0 }
 0x3a3   : > { %v8343_v48 = vpop.f32.mrb[57].mxu0 }
 0x3a4   : > { %v8345_v55 = vpop.f32.mrb[58].mxu0 }
 0x3a5   : > { %v8347_v20 = vpop.f32.mrb[59].mxu0 }
 0x3aa   : > { %v8349_v63 = vpop.f32.mrb[60].mxu0 }
 0x3ab   : > { %v8351_v6 = vpop.f32.mrb[61].mxu0 }
 0x3ac   : > { %v8353_v9 = vpop.f32.mrb[62].mxu0 }
 0x3ad   : > { %v8355_v21 = vpop.f32.mrb[63].mxu0 }
 0x3b2   : > { %v5993_v40 = vpop.f32.mrb[32].mxu0 }
 0x3b3   : > { %v2620_v1 = vpop.f32.mrb[33].mxu0 }
 0x3b4   : > { %v5994_v39 = vpop.f32.mrb[34].mxu0 }
 0x3b5   : > { %v2623_v0 = vpop.f32.mrb[35].mxu0 }
 0x3ba   : > { %v5997_v62 = vpop.f32.mrb[36].mxu0 }
 0x3bb   : > { %v2636_v58 = vpop.f32.mrb[37].mxu0 }
 0x3bc   : > { %v5998_v53 = vpop.f32.mrb[38].mxu0 }
 0x3bd   : > { %v2639_v45 = vpop.f32.mrb[39].mxu0 }
 0x3c2   : > { %v6001_v52 = vpop.f32.mrb[40].mxu0 }
 0x3c3   : > { %v2652_v57 = vpop.f32.mrb[41].mxu0 }
 0x3c4   : > { %v6002_v56 = vpop.f32.mrb[42].mxu0 }
 0x3c5   : > { %v2655_v31 = vpop.f32.mrb[43].mxu0 }
 0x3ca   : > { %v6005_v3 = vpop.f32.mrb[44].mxu0 }
 0x3cb   : > { %v2668_v7 = vpop.f32.mrb[45].mxu0 }
 0x3cc   : > { %v8357_v25 = vpop.f32.mrb[46].mxu0 }
 0x3cd   : > { %v8359_v2 = vpop.f32.mrb[47].mxu0 }
 0x418   : > { %v6233_v59 = vpop.f32.mrb[16].mxu1 }
 0x419   : > { %v8361_v23 = vadd.f32 %v6233_v59, %v5993_v40  ;;  %v3910_v10 = vpop.f32.mrb[17].mxu1 }
 0x41a   : > { %v8363_v26 = vadd.f32 %v3910_v10, %v2620_v1  ;;  %v6234_v8 = vpop.f32.mrb[18].mxu1 }
 0x41b   : > { %v8365_v15 = vadd.f32 %v6234_v8, %v5994_v39  ;;  %v3913_v41 = vpop.f32.mrb[19].mxu1  ;;  %v4110_v5 = vmul.f32 %v8361_v23, %v8361_v23 }
 0x41c   : > { %v8367_v32 = vadd.f32 %v3913_v41, %v2623_v0  ;;  %v4108_v51 = vmul.f32 %v8363_v26, %v8363_v26 }
 0x41d   : > { %v4111_v43 = vmul.f32 %v8365_v15, %v8365_v15 }
 0x41e   : > { %v4071_v50 = vadd.f32 %v8367_v32, %v8363_v26  ;;  %v4109_v18 = vmul.f32 %v8367_v32, %v8367_v32 }
 0x420   : > { %v4072_v47 = vadd.f32 %v8361_v23, %v4071_v50  ;;  %v4140_v22 = vadd.f32 %v4109_v18, %v4108_v51  ;;  %v6237_v17 = vpop.f32.mrb[20].mxu1 }
 0x421   : > { %v8378_v38 = vadd.f32 %v6237_v17, %v5997_v62  ;;  %v3926_v29 = vpop.f32.mrb[21].mxu1 }
 0x422   : > { %v4141_v34 = vadd.f32 %v4140_v22, %v4110_v5  ;;  %v8382_v37 = vadd.f32 %v3926_v29, %v2636_v58  ;;  %v4073_v4 = vadd.f32 %v8365_v15, %v4072_v47  ;;  %v6238_v24 = vpop.f32.mrb[22].mxu1 }
 0x423   : > { %v8385_v28 = vadd.f32 %v6238_v24, %v5998_v53  ;;  %v3929_v19 = vpop.f32.mrb[23].mxu1  ;;  %v4114_v12 = vmul.f32 %v8378_v38, %v8378_v38 }
 0x424   : > { %v4074_v30 = vadd.f32 %v8382_v37, %v4073_v4  ;;  %v4112_v54 = vmul.f32 %v8382_v37, %v8382_v37  ;;  %v4142_v35 = vadd.f32 %v4141_v34, %v4111_v43  ;;  %v8390_v36 = vadd.f32 %v3929_v19, %v2639_v45 }
 0x425   : > { %v4115_v58 = vmul.f32 %v8385_v28, %v8385_v28 }
 0x426   : > { %v4143_v44 = vadd.f32 %v4142_v35, %v4112_v54  ;;  %v4075_v60 = vadd.f32 %v8390_v36, %v4074_v30  ;;  %v4113_v46 = vmul.f32 %v8390_v36, %v8390_v36 }
 0x428   : > { %v4076_v40 = vadd.f32 %v8378_v38, %v4075_v60  ;;  %v4144_v1 = vadd.f32 %v4143_v44, %v4113_v46  ;;  %v6241_v39 = vpop.f32.mrb[24].mxu1 }
 0x429   : > { %v8398_v0 = vadd.f32 %v6241_v39, %v6001_v52  ;;  %v3942_v62 = vpop.f32.mrb[25].mxu1 }
 0x42a   : > { %v4145_v53 = vadd.f32 %v4144_v1, %v4114_v12  ;;  %v8402_v45 = vadd.f32 %v3942_v62, %v2652_v57  ;;  %v4077_v59 = vadd.f32 %v8385_v28, %v4076_v40  ;;  %v6242_v10 = vpop.f32.mrb[26].mxu1 }
 0x42b   : > { %v8405_v8 = vadd.f32 %v6242_v10, %v6002_v56  ;;  %v3945_v41 = vpop.f32.mrb[27].mxu1  ;;  %v4118_v22 = vmul.f32 %v8398_v0, %v8398_v0 }
 0x42c   : > { %v4078_v51 = vadd.f32 %v8402_v45, %v4077_v59  ;;  %v4116_v50 = vmul.f32 %v8402_v45, %v8402_v45  ;;  %v4146_v52 = vadd.f32 %v4145_v53, %v4115_v58  ;;  %v8410_v18 = vadd.f32 %v3945_v41, %v2655_v31 }
 0x42d   : > { %v4119_v31 = vmul.f32 %v8405_v8, %v8405_v8 }
 0x42e   : > { %v4147_v5 = vadd.f32 %v4146_v52, %v4116_v50  ;;  %v4079_v47 = vadd.f32 %v8410_v18, %v4078_v51  ;;  %v4117_v57 = vmul.f32 %v8410_v18, %v8410_v18 }
 0x430   : > { %v4080_v56 = vadd.f32 %v8398_v0, %v4079_v47  ;;  %v4148_v17 = vadd.f32 %v4147_v5, %v4117_v57  ;;  %v6245_v29 = vpop.f32.mrb[28].mxu1 }
 0x431   : > { %v8418_v43 = vadd.f32 %v6245_v29, %v6005_v3  ;;  %v3958_v34 = vpop.f32.mrb[29].mxu1 }
 0x432   : > { %v4149_v4 = vadd.f32 %v4148_v17, %v4118_v22  ;;  %v8422_v24 = vadd.f32 %v3958_v34, %v2668_v7  ;;  %v4081_v19 = vadd.f32 %v8405_v8, %v4080_v56  ;;  %v6246_v30 = vpop.f32.mrb[30].mxu1 }
 0x433   : > { %v8426_v54 = vadd.f32 %v6246_v30, %v8357_v25  ;;  %v3961_v35 = vpop.f32.mrb[31].mxu1  ;;  %v4122_v25 = vmul.f32 %v8418_v43, %v8418_v43 }
 0x434   : > { %v4082_v44 = vadd.f32 %v8422_v24, %v4081_v19  ;;  %v4120_v3 = vmul.f32 %v8422_v24, %v8422_v24  ;;  %v4150_v60 = vadd.f32 %v4149_v4, %v4119_v31  ;;  %v8432_v46 = vadd.f32 %v3961_v35, %v8359_v2 }
 0x435   : > { %v4123_v2 = vmul.f32 %v8426_v54, %v8426_v54 }
 0x436   : > { %v4151_v12 = vadd.f32 %v4150_v60, %v4120_v3  ;;  %v4083_v7 = vadd.f32 %v8432_v46, %v4082_v44  ;;  %v4121_v40 = vmul.f32 %v8432_v46, %v8432_v46 }
 0x438   : > { %v4084_v1 = vadd.f32 %v8418_v43, %v4083_v7  ;;  %v4152_v39 = vadd.f32 %v4151_v12, %v4121_v40  ;;  %v6249_v62 = vpop.f32.mrb[0].mxu1 }
 0x439   : > { %v8441_v58 = vadd.f32 %v6249_v62, %v8325_v33  ;;  %v3974_v53 = vpop.f32.mrb[1].mxu1 }
 0x43a   : > { %v4153_v59 = vadd.f32 %v4152_v39, %v4122_v25  ;;  %v8446_v10 = vadd.f32 %v3974_v53, %v8327_v11  ;;  %v4085_v41 = vadd.f32 %v8426_v54, %v4084_v1  ;;  %v6250_v51 = vpop.f32.mrb[2].mxu1 }
 0x43b   : > { %v8450_v50 = vadd.f32 %v6250_v51, %v8329_v49  ;;  %v3977_v52 = vpop.f32.mrb[3].mxu1  ;;  %v4126_v49 = vmul.f32 %v8441_v58, %v8441_v58 }
 0x43c   : > { %v4086_v5 = vadd.f32 %v8446_v10, %v4085_v41  ;;  %v4124_v33 = vmul.f32 %v8446_v10, %v8446_v10  ;;  %v4154_v47 = vadd.f32 %v4153_v59, %v4123_v2  ;;  %v8456_v57 = vadd.f32 %v3977_v52, %v8331_v42 }
 0x43d   : > { %v4127_v42 = vmul.f32 %v8450_v50, %v8450_v50 }
 0x43e   : > { %v4155_v22 = vadd.f32 %v4154_v47, %v4124_v33  ;;  %v4087_v11 = vadd.f32 %v8456_v57, %v4086_v5  ;;  %v4125_v56 = vmul.f32 %v8456_v57, %v8456_v57 }
 0x440   : > { %v4088_v17 = vadd.f32 %v8441_v58, %v4087_v11  ;;  %v4156_v29 = vadd.f32 %v4155_v22, %v4125_v56  ;;  %v6253_v34 = vpop.f32.mrb[4].mxu1 }
 0x441   : > { %v8465_v31 = vadd.f32 %v6253_v34, %v8333_v27  ;;  %v3990_v4 = vpop.f32.mrb[5].mxu1 }
 0x442   : > { %v4157_v19 = vadd.f32 %v4156_v29, %v4126_v49  ;;  %v8470_v30 = vadd.f32 %v3990_v4, %v8335_v16  ;;  %v4089_v35 = vadd.f32 %v8450_v50, %v4088_v17  ;;  %v6254_v44 = vpop.f32.mrb[6].mxu1 }
 0x443   : > { %v8474_v3 = vadd.f32 %v6254_v44, %v8337_v13  ;;  %v3993_v60 = vpop.f32.mrb[7].mxu1  ;;  %v4130_v13 = vmul.f32 %v8465_v31, %v8465_v31 }
 0x444   : > { %v4090_v12 = vadd.f32 %v8470_v30, %v4089_v35  ;;  %v4128_v27 = vmul.f32 %v8470_v30, %v8470_v30  ;;  %v4158_v7 = vadd.f32 %v4157_v19, %v4127_v42  ;;  %v8480_v40 = vadd.f32 %v3993_v60, %v8339_v61 }
 0x445   : > { %v4131_v61 = vmul.f32 %v8474_v3, %v8474_v3 }
 0x446   : > { %v4159_v25 = vadd.f32 %v4158_v7, %v4128_v27  ;;  %v4091_v16 = vadd.f32 %v8480_v40, %v4090_v12  ;;  %v4129_v1 = vmul.f32 %v8480_v40, %v8480_v40 }
 0x448   : > { %v4092_v39 = vadd.f32 %v8465_v31, %v4091_v16  ;;  %v4160_v62 = vadd.f32 %v4159_v25, %v4129_v1  ;;  %v6257_v53 = vpop.f32.mrb[8].mxu1 }
 0x449   : > { %v8489_v2 = vadd.f32 %v6257_v53, %v8341_v14  ;;  %v4006_v59 = vpop.f32.mrb[9].mxu1 }
 0x44a   : > { %v4161_v41 = vadd.f32 %v4160_v62, %v4130_v13  ;;  %v8494_v51 = vadd.f32 %v4006_v59, %v8343_v48  ;;  %v4093_v52 = vadd.f32 %v8474_v3, %v4092_v39  ;;  %v6258_v5 = vpop.f32.mrb[10].mxu1 }
 0x44b   : > { %v8498_v33 = vadd.f32 %v6258_v5, %v8345_v55  ;;  %v4009_v47 = vpop.f32.mrb[11].mxu1  ;;  %v4134_v55 = vmul.f32 %v8489_v2, %v8489_v2 }
 0x44c   : > { %v4094_v22 = vadd.f32 %v8494_v51, %v4093_v52  ;;  %v4132_v14 = vmul.f32 %v8494_v51, %v8494_v51  ;;  %v4162_v11 = vadd.f32 %v4161_v41, %v4131_v61  ;;  %v8504_v56 = vadd.f32 %v4009_v47, %v8347_v20 }
 0x44d   : > { %v4135_v20 = vmul.f32 %v8498_v33, %v8498_v33 }
 0x44e   : > { %v4163_v49 = vadd.f32 %v4162_v11, %v4132_v14  ;;  %v4095_v48 = vadd.f32 %v8504_v56, %v4094_v22  ;;  %v4133_v17 = vmul.f32 %v8504_v56, %v8504_v56 }
 0x450   : > { %v4096_v29 = vadd.f32 %v8489_v2, %v4095_v48  ;;  %v4164_v34 = vadd.f32 %v4163_v49, %v4133_v17  ;;  %v6261_v4 = vpop.f32.mrb[12].mxu1 }
 0x451   : > { %v8513_v42 = vadd.f32 %v6261_v4, %v8349_v63  ;;  %v4022_v19 = vpop.f32.mrb[13].mxu1  ;;  %v6673_v4 = vld [vmem:[%s9057_s7] sm:$0xff]  }
 0x452   : > { %v4165_v35 = vadd.f32 %v4164_v34, %v4134_v55  ;;  %v8518_v44 = vadd.f32 %v4022_v19, %v8351_v6  ;;  %v4097_v60 = vadd.f32 %v8498_v33, %v4096_v29  ;;  %v6262_v12 = vpop.f32.mrb[14].mxu1  ;;  %v6674_v19 = vld [vmem:[%s9057_s7 + $0x8] sm:$0xff]   ;;  %6263 = vmatprep.subr.bf16.mxu0 %v6673_v4 }
 0x453   : > { %v8522_v27 = vadd.f32 %v6262_v12, %v8353_v9  ;;  %v4025_v7 = vpop.f32.mrb[15].mxu1  ;;  %v4138_v9 = vmul.f32 %v8513_v42, %v8513_v42  ;;  %6264 = vmatpush3.bf16.msra.mxu0 %v6673_v4  ;;  %v6678_v12 = vld [vmem:[%s9057_s7 + $0x28] sm:$0xff]  }
 0x454   : > { %v4098_v25 = vadd.f32 %v8518_v44, %v4097_v60  ;;  %v4136_v63 = vmul.f32 %v8518_v44, %v8518_v44  ;;  %v4166_v16 = vadd.f32 %v4165_v35, %v4135_v20  ;;  %v8528_v1 = vadd.f32 %v4025_v7, %v8355_v21  ;;  %6265 = vmatprep.subr.bf16.mxu0 %v6674_v19  ;;  %v6675_v20 = vld [vmem:[%s9057_s7 + $0x10] sm:$0xff]   ;;  %v6676_v35 = vld [vmem:[%s9057_s7 + $0x18] sm:$0xff]   ;;  %v6677_v60 = vld [vmem:[%s9057_s7 + $0x20] sm:$0xff]  }
 0x455   : > { %v4139_v59 = vmul.f32 %v8522_v27, %v8522_v27  ;;  %v6679_v7 = vld [vmem:[%s9057_s7 + $0x30] sm:$0xff]  }
 0x456   : > { %v4167_v13 = vadd.f32 %v4166_v16, %v4136_v63  ;;  %v4099_v6 = vadd.f32 %v8528_v1, %v4098_v25  ;;  %v4137_v39 = vmul.f32 %v8528_v1, %v8528_v1  ;;  %v6680_v25 = vld [vmem:[%s9057_s7 + $0x38] sm:$0xff]  }
 0x457   : > { %6266 = vmatpush3.bf16.msra.mxu0 %v6674_v19 }
 0x458   : > { %v4100_v62 = vadd.f32 %v8513_v42, %v4099_v6  ;;  %v4168_v53 = vadd.f32 %v4167_v13, %v4137_v39  ;;  %6267 = vmatprep.subr.bf16.mxu0 %v6675_v20 }
 0x45a   : > { %v4169_v61 = vadd.f32 %v4168_v53, %v4138_v9  ;;  %v4101_v41 = vadd.f32 %v8522_v27, %v4100_v62 }
 0x45b   : > { %6268 = vmatpush3.bf16.msra.mxu0 %v6675_v20 }
 0x45c   : > { %v4102_v21 = vrot.slane %v4101_v41, 4  ;;  %v4170_v52 = vadd.f32 %v4169_v61, %v4139_v59  ;;  %6269 = vmatprep.subr.bf16.mxu0 %v6676_v35  ;;  %v4069_v59 = vld [vmem:[%s9055_s5] sm:$0x1] }
 0x45e   : > { %v4103_v5 = vadd.f32 %v4102_v21, %v4101_v41  ;;  %v4171_v47 = vrot.slane %v4170_v52, 4  ;;  %v4070_v21 = vld [vmem:[%s9056_s6] sm:$0x1] }
 0x45f   : > { %6270 = vmatpush3.bf16.msra.mxu0 %v6676_v35 }
 0x460   : > { %v4104_v22 = vrot.slane %v4103_v5, 2  ;;  %v4172_v14 = vadd.f32 %v4171_v47, %v4170_v52  ;;  %6271 = vmatprep.subr.bf16.mxu0 %v6677_v60  ;;  %v9378_v47 = vld [vmem:[#allocation3_spill] sm:$0xff] }
 0x462   : > { %v4105_v11 = vadd.f32 %v4104_v22, %v4103_v5  ;;  %v4173_v49 = vrot.slane %v4172_v14, 2 }
 0x463   : > { %6272 = vmatpush3.bf16.msra.mxu0 %v6677_v60 }
 0x464   : > { %v4106_v48 = vrot.slane %v4105_v11, 1  ;;  %v4174_v17 = vadd.f32 %v4173_v49, %v4172_v14  ;;  %6273 = vmatprep.subr.bf16.mxu0 %v6678_v12 }
 0x466   : > { %v4107_v55 = vadd.f32 %v4106_v48, %v4105_v11  ;;  %v4175_v29 = vrot.slane %v4174_v17, 1 }
 0x467   : > { %6274 = vmatpush3.bf16.msra.mxu0 %v6678_v12 }
 0x468   : > { %4177 = vadd.xlane.f32.xlu1 %v4107_v55  ;;  %v4176_v34 = vadd.f32 %v4175_v29, %v4174_v17  ;;  %6275 = vmatprep.subr.bf16.mxu0 %v6679_v7 }
 0x46b   : > { %6276 = vmatpush3.bf16.msra.mxu0 %v6679_v7 }
 0x46c   : > { %4180 = vadd.xlane.f32.xlu1 %v4176_v34  ;;  %6277 = vmatprep.subr.bf16.mxu0 %v6680_v25 }
 0x46f   : > { %6278 = vmatpush3.bf16.msra.mxu0 %v6680_v25 }
 0x4f5   : > { %v4178_v63 = vpop.xlane.xlu1 %4177 }
 0x4f6   : > { %v4179_v16 = vmul.f32 0.00048828125, %v4178_v63 }
 0x4f8   : > { %v4183_v6 = vmul.f32 %v4179_v16, %v4179_v16 }
 0x4f9   : > { %v4181_v13 = vpop.xlane.xlu1 %4180 }
 0x4fa   : > { %v4182_v39 = vmul.f32 0.00048828125, %v4181_v13 }
 0x4fc   : > { %v4184_v9 = vsub.f32 %v4182_v39, %v4183_v6 }
 0x4fe   : > { %v4185_v62 = vmax.f32 %v4184_v9, 0.0 }
 0x500   : > { %v4186_v53 = vadd.f32 1e-05, %v4185_v62 }
 0x502   : > { %6683 = vrsqrt.f32 %v4186_v53 }
 0x50c   : > { %v6684_v61 = vpop.eup %6683 }
 0x50d   : > { %v4188_v41 = vmul.f32 %v6684_v61, %v4069_v59 }
 0x50f   : > { %v4189_v52 = vmul.f32 %v4188_v41, %v4179_v16  ;;  %v8570_v22 = vrot.slane %v4188_v41, %v9378_v47 }
 0x511   : > { %v4190_v5 = vsub.f32 %v4070_v21, %v4189_v52  ;;  %v4199_v11 = vmul.f32 %v8361_v23, %v8570_v22  ;;  %v4200_v49 = vmul.f32 %v8365_v15, %v8570_v22  ;;  %v4197_v48 = vmul.f32 %v8363_v26, %v8570_v22 }
 0x512   : > { %v4198_v17 = vmul.f32 %v8367_v32, %v8570_v22  ;;  %v4201_v55 = vmul.f32 %v8382_v37, %v8570_v22  ;;  %v4202_v29 = vmul.f32 %v8390_v36, %v8570_v22  ;;  %v4203_v36 = vmul.f32 %v8378_v38, %v8570_v22 }
 0x513   : > { %v8573_v14 = vrot.slane %v4190_v5, %v9378_v47  ;;  %v4204_v7 = vmul.f32 %v8385_v28, %v8570_v22  ;;  %v4205_v63 = vmul.f32 %v8402_v45, %v8570_v22  ;;  %v4206_v16 = vmul.f32 %v8410_v18, %v8570_v22 }
 0x514   : > { %v4207_v18 = vmul.f32 %v8398_v0, %v8570_v22  ;;  %v4208_v61 = vmul.f32 %v8405_v8, %v8570_v22  ;;  %v4209_v41 = vmul.f32 %v8422_v24, %v8570_v22  ;;  %v4210_v21 = vmul.f32 %v8432_v46, %v8570_v22 }
 0x515   : > { %v4237_v34 = vadd.f32 %v8573_v14, %v4199_v11  ;;  %v4238_v4 = vadd.f32 %v8573_v14, %v4200_v49  ;;  %v4235_v23 = vadd.f32 %v8573_v14, %v4197_v48  ;;  %v4236_v15 = vadd.f32 %v8573_v14, %v4198_v17 }
 0x516   : > { %v4239_v19 = vadd.f32 %v8573_v14, %v4201_v55  ;;  %v4240_v26 = vadd.f32 %v8573_v14, %v4202_v29  ;;  %v4241_v6 = vadd.f32 %v8573_v14, %v4203_v36  ;;  %v4242_v39 = vadd.f32 %v8573_v14, %v4204_v7 }
 0x517   : > { %v4269_v20 = vmax.f32 %v4237_v34, 0.0  ;;  %v4270_v32 = vmax.f32 %v4238_v4, 0.0  ;;  %v4267_v35 = vmax.f32 %v4235_v23, 0.0  ;;  %v4268_v60 = vmax.f32 %v4236_v15, 0.0 }
 0x518   : > { %v4271_v37 = vmax.f32 %v4239_v19, 0.0  ;;  %v4272_v12 = vmax.f32 %v4240_v26, 0.0  ;;  %v4243_v62 = vadd.f32 %v8573_v14, %v4205_v63  ;;  %v4244_v38 = vadd.f32 %v8573_v14, %v4206_v16 }
 0x519   : > { %v4300_v25 = vpack.c.bf16 %v4270_v32, %v4269_v20  ;;  %v4299_v13 = vpack.c.bf16 %v4268_v60, %v4267_v35  ;;  %v4273_v28 = vmax.f32 %v4241_v6, 0.0  ;;  %v4274_v53 = vmax.f32 %v4242_v39, 0.0 }
 0x51a   : > { %v4301_v9 = vpack.c.bf16 %v4272_v12, %v4271_v37  ;;  %v4275_v59 = vmax.f32 %v4243_v62, 0.0  ;;  %v4276_v45 = vmax.f32 %v4244_v38, 0.0  ;;  %v4245_v5 = vadd.f32 %v8573_v14, %v4207_v18 }
 0x51b   : > { %6279 = vmatprep.mubr.bf16.mxu0 %v4299_v13  ;;  %v4302_v52 = vpack.c.bf16 %v4274_v53, %v4273_v28  ;;  %v4246_v11 = vadd.f32 %v8573_v14, %v4208_v61  ;;  %v4247_v48 = vadd.f32 %v8573_v14, %v4209_v41  ;;  %v4248_v17 = vadd.f32 %v8573_v14, %v4210_v21 }
 0x51c   : > { %6280 = vmatmul.mubr.bf16.vlgmr.msra.gmra.mrb[64].mxu0 %v4300_v25  ;;  %v4303_v49 = vpack.c.bf16 %v4276_v45, %v4275_v59  ;;  %v4277_v0 = vmax.f32 %v4245_v5, 0.0  ;;  %v4211_v24 = vmul.f32 %v8418_v43, %v8570_v22  ;;  %v4212_v46 = vmul.f32 %v8426_v54, %v8570_v22 }
 0x51d   : > { %6283 = vmatprep.mubr.bf16.mxu0 %v4301_v9  ;;  %v4278_v8 = vmax.f32 %v4246_v11, 0.0  ;;  %v4279_v55 = vmax.f32 %v4247_v48, 0.0  ;;  %v4280_v29 = vmax.f32 %v4248_v17, 0.0  ;;  %v4213_v34 = vmul.f32 %v8446_v10, %v8570_v22 }
 0x51e   : > { %v4214_v4 = vmul.f32 %v8456_v57, %v8570_v22  ;;  %v4249_v15 = vadd.f32 %v8573_v14, %v4211_v24  ;;  %v4250_v19 = vadd.f32 %v8573_v14, %v4212_v46  ;;  %v4215_v10 = vmul.f32 %v8441_v58, %v8570_v22 }
 0x51f   : > { %v4304_v23 = vpack.c.bf16 %v4278_v8, %v4277_v0  ;;  %v4305_v26 = vpack.c.bf16 %v4280_v29, %v4279_v55  ;;  %v4251_v20 = vadd.f32 %v8573_v14, %v4213_v34  ;;  %v4216_v57 = vmul.f32 %v8450_v50, %v8570_v22 }
 0x520   : > { %v4252_v32 = vadd.f32 %v8573_v14, %v4214_v4  ;;  %v4281_v43 = vmax.f32 %v4249_v15, 0.0  ;;  %v4282_v54 = vmax.f32 %v4250_v19, 0.0  ;;  %v4217_v37 = vmul.f32 %v8470_v30, %v8570_v22 }
 0x521   : > { %v4283_v35 = vmax.f32 %v4251_v20, 0.0  ;;  %v4218_v12 = vmul.f32 %v8480_v40, %v8570_v22  ;;  %v4253_v7 = vadd.f32 %v8573_v14, %v4215_v10  ;;  %v4254_v25 = vadd.f32 %v8573_v14, %v4216_v57 }
 0x522   : > { %v4284_v60 = vmax.f32 %v4252_v32, 0.0  ;;  %v4306_v36 = vpack.c.bf16 %v4282_v54, %v4281_v43  ;;  %v4255_v16 = vadd.f32 %v8573_v14, %v4217_v37  ;;  %v4219_v30 = vmul.f32 %v8465_v31, %v8570_v22 }
 0x523   : > { %v4256_v13 = vadd.f32 %v8573_v14, %v4218_v12  ;;  %v4285_v58 = vmax.f32 %v4253_v7, 0.0  ;;  %v4286_v50 = vmax.f32 %v4254_v25, 0.0  ;;  %v4220_v40 = vmul.f32 %v8474_v3, %v8570_v22 }
 0x524   : > { %6284 = vmatmul.mubr.bf16.gmra.mrb[68].mxu0 %v4302_v52  ;;  %v4307_v63 = vpack.c.bf16 %v4284_v60, %v4283_v35  ;;  %v4287_v6 = vmax.f32 %v4255_v16, 0.0  ;;  %v4221_v9 = vmul.f32 %v8494_v51, %v8570_v22  ;;  %v4222_v62 = vmul.f32 %v8504_v56, %v8570_v22 }
 0x525   : > { %6287 = vmatprep.mubr.bf16.mxu0 %v4303_v49  ;;  %v4288_v39 = vmax.f32 %v4256_v13, 0.0  ;;  %v4308_v38 = vpack.c.bf16 %v4286_v50, %v4285_v58  ;;  %v4257_v28 = vadd.f32 %v8573_v14, %v4219_v30  ;;  %v4258_v53 = vadd.f32 %v8573_v14, %v4220_v40 }
 0x526   : > { %v4259_v45 = vadd.f32 %v8573_v14, %v4221_v9  ;;  %v4260_v18 = vadd.f32 %v8573_v14, %v4222_v62  ;;  %v4223_v51 = vmul.f32 %v8489_v2, %v8570_v22  ;;  %v4224_v56 = vmul.f32 %v8498_v33, %v8570_v22 }
 0x527   : > { %v4309_v59 = vpack.c.bf16 %v4288_v39, %v4287_v6  ;;  %v4289_v31 = vmax.f32 %v4257_v28, 0.0  ;;  %v4290_v3 = vmax.f32 %v4258_v53, 0.0  ;;  %v4225_v21 = vmul.f32 %v8518_v44, %v8570_v22 }
 0x528   : > { %v4291_v61 = vmax.f32 %v4259_v45, 0.0  ;;  %v4292_v41 = vmax.f32 %v4260_v18, 0.0  ;;  %v4226_v52 = vmul.f32 %v8528_v1, %v8570_v22  ;;  %v4261_v11 = vadd.f32 %v8573_v14, %v4223_v51 }
 0x529   : > { %v4310_v5 = vpack.c.bf16 %v4290_v3, %v4289_v31  ;;  %v4262_v49 = vadd.f32 %v8573_v14, %v4224_v56  ;;  %v4263_v17 = vadd.f32 %v8573_v14, %v4225_v21  ;;  %v4227_v44 = vmul.f32 %v8513_v42, %v8570_v22 }
 0x52a   : > { %v4311_v48 = vpack.c.bf16 %v4292_v41, %v4291_v61  ;;  %v4264_v0 = vadd.f32 %v8573_v14, %v4226_v52  ;;  %v4293_v2 = vmax.f32 %v4261_v11, 0.0  ;;  %v4228_v1 = vmul.f32 %v8522_v27, %v8570_v22 }
 0x52b   : > { %v4294_v33 = vmax.f32 %v4262_v49, 0.0  ;;  %v4295_v8 = vmax.f32 %v4263_v17, 0.0  ;;  %v4265_v24 = vadd.f32 %v8573_v14, %v4227_v44 }
 0x52c   : > { %6288 = vmatmul.mubr.bf16.gmra.mrb[72].mxu0 %v4304_v23  ;;  %v4296_v55 = vmax.f32 %v4264_v0, 0.0  ;;  %v4266_v46 = vadd.f32 %v8573_v14, %v4228_v1 }
 0x52d   : > { %6291 = vmatprep.mubr.bf16.mxu0 %v4305_v26  ;;  %v4312_v29 = vpack.c.bf16 %v4294_v33, %v4293_v2  ;;  %v4297_v4 = vmax.f32 %v4265_v24, 0.0 }
 0x52e   : > { %v4313_v34 = vpack.c.bf16 %v4296_v55, %v4295_v8  ;;  %v4298_v23 = vmax.f32 %v4266_v46, 0.0 }
 0x530   : > { %v4314_v15 = vpack.c.bf16 %v4298_v23, %v4297_v4 }
 0x534   : > { %6292 = vmatmul.mubr.bf16.gmra.mrb[76].mxu0 %v4306_v36 }
 0x535   : > { %6295 = vmatprep.mubr.bf16.mxu0 %v4307_v63 }
 0x53c   : > { %6296 = vmatmul.mubr.bf16.gmra.mrb[80].mxu0 %v4308_v38 }
 0x53d   : > { %6299 = vmatprep.mubr.bf16.mxu0 %v4309_v59 }
 0x544   : > { %6300 = vmatmul.mubr.bf16.gmra.mrb[84].mxu0 %v4310_v5 }
 0x545   : > { %6303 = vmatprep.mubr.bf16.mxu0 %v4311_v48 }
 0x54c   : > { %6304 = vmatmul.mubr.bf16.gmra.mrb[88].mxu0 %v4312_v29 }
 0x54d   : > { %6307 = vmatprep.mubr.bf16.mxu0 %v4313_v34 }
 0x554   : > { %6308 = vmatmul.mubr.bf16.gmra.mrb[92].mxu0 %v4314_v15 }
 0x5ef   : > { %v8671_v19 = vpop.f32.mrb[64].mxu0 }
 0x5f0   : > { %v8673_v26 = vpop.f32.mrb[65].mxu0  ;;  %v4581_v32 = vmul.f32 %v8671_v19, %v8671_v19 }
 0x5f1   : > { %v8675_v42 = vpop.f32.mrb[66].mxu0  ;;  %v4579_v27 = vmul.f32 %v8673_v26, %v8673_v26 }
 0x5f2   : > { %v8677_v20 = vpop.f32.mrb[67].mxu0  ;;  %v4582_v35 = vmul.f32 %v8675_v42, %v8675_v42 }
 0x5f3   : > { %v4542_v22 = vadd.f32 %v8677_v20, %v8673_v26  ;;  %v4580_v14 = vmul.f32 %v8677_v20, %v8677_v20 }
 0x5f5   : > { %v4543_v43 = vadd.f32 %v8671_v19, %v4542_v22  ;;  %v4611_v54 = vadd.f32 %v4580_v14, %v4579_v27 }
 0x5f7   : > { %v4612_v60 = vadd.f32 %v4611_v54, %v4581_v32  ;;  %v8690_v10 = vpop.f32.mrb[68].mxu0  ;;  %v4544_v57 = vadd.f32 %v8675_v42, %v4543_v43 }
 0x5f8   : > { %v8693_v37 = vpop.f32.mrb[69].mxu0  ;;  %v4585_v50 = vmul.f32 %v8690_v10, %v8690_v10 }
 0x5f9   : > { %v4545_v12 = vadd.f32 %v4544_v57, %v8693_v37  ;;  %v4583_v36 = vmul.f32 %v8693_v37, %v8693_v37  ;;  %v4613_v7 = vadd.f32 %v4612_v60, %v4582_v35  ;;  %v8698_v25 = vpop.f32.mrb[70].mxu0 }
 0x5fa   : > { %v8700_v63 = vpop.f32.mrb[71].mxu0  ;;  %v4586_v30 = vmul.f32 %v8698_v25, %v8698_v25 }
 0x5fb   : > { %v4614_v16 = vadd.f32 %v4613_v7, %v4583_v36  ;;  %v4546_v13 = vadd.f32 %v4545_v12, %v8700_v63  ;;  %v4584_v58 = vmul.f32 %v8700_v63, %v8700_v63 }
 0x5fd   : > { %v4547_v6 = vadd.f32 %v8690_v10, %v4546_v13  ;;  %v4615_v39 = vadd.f32 %v4614_v16, %v4584_v58 }
 0x5ff   : > { %v4616_v40 = vadd.f32 %v4615_v39, %v4585_v50  ;;  %v8710_v9 = vpop.f32.mrb[72].mxu0  ;;  %v4548_v62 = vadd.f32 %v8698_v25, %v4547_v6 }
 0x600   : > { %v8713_v38 = vpop.f32.mrb[73].mxu0  ;;  %v4589_v41 = vmul.f32 %v8710_v9, %v8710_v9 }
 0x601   : > { %v4549_v28 = vadd.f32 %v4548_v62, %v8713_v38  ;;  %v4587_v53 = vmul.f32 %v8713_v38, %v8713_v38  ;;  %v4617_v59 = vadd.f32 %v4616_v40, %v4586_v30  ;;  %v8718_v45 = vpop.f32.mrb[74].mxu0 }
 0x602   : > { %v8720_v18 = vpop.f32.mrb[75].mxu0  ;;  %v4590_v21 = vmul.f32 %v8718_v45, %v8718_v45 }
 0x603   : > { %v4618_v31 = vadd.f32 %v4617_v59, %v4587_v53  ;;  %v4550_v3 = vadd.f32 %v4549_v28, %v8720_v18  ;;  %v4588_v61 = vmul.f32 %v8720_v18, %v8720_v18 }
 0x605   : > { %v4551_v51 = vadd.f32 %v8710_v9, %v4550_v3  ;;  %v4619_v56 = vadd.f32 %v4618_v31, %v4588_v61 }
 0x607   : > { %v4620_v52 = vadd.f32 %v4619_v56, %v4589_v41  ;;  %v8730_v5 = vpop.f32.mrb[76].mxu0  ;;  %v4552_v11 = vadd.f32 %v8718_v45, %v4551_v51 }
 0x608   : > { %v8733_v49 = vpop.f32.mrb[77].mxu0  ;;  %v4593_v1 = vmul.f32 %v8730_v5, %v8730_v5 }
 0x609   : > { %v4553_v48 = vadd.f32 %v4552_v11, %v8733_v49  ;;  %v4591_v17 = vmul.f32 %v8733_v49, %v8733_v49  ;;  %v4621_v0 = vadd.f32 %v4620_v52, %v4590_v21  ;;  %v8738_v2 = vpop.f32.mrb[78].mxu0 }
 0x60a   : > { %v8740_v33 = vpop.f32.mrb[79].mxu0  ;;  %v4594_v46 = vmul.f32 %v8738_v2, %v8738_v2 }
 0x60b   : > { %v4622_v8 = vadd.f32 %v4621_v0, %v4591_v17  ;;  %v4554_v55 = vadd.f32 %v4553_v48, %v8740_v33  ;;  %v4592_v44 = vmul.f32 %v8740_v33, %v8740_v33 }
 0x60d   : > { %v4555_v29 = vadd.f32 %v8730_v5, %v4554_v55  ;;  %v4623_v24 = vadd.f32 %v4622_v8, %v4592_v44 }
 0x60f   : > { %v4624_v34 = vadd.f32 %v4623_v24, %v4593_v1  ;;  %v8750_v4 = vpop.f32.mrb[80].mxu0  ;;  %v4556_v23 = vadd.f32 %v8738_v2, %v4555_v29 }
 0x610   : > { %v8753_v15 = vpop.f32.mrb[81].mxu0  ;;  %v4597_v57 = vmul.f32 %v8750_v4, %v8750_v4 }
 0x611   : > { %v4557_v27 = vadd.f32 %v4556_v23, %v8753_v15  ;;  %v4595_v22 = vmul.f32 %v8753_v15, %v8753_v15  ;;  %v4625_v14 = vadd.f32 %v4624_v34, %v4594_v46  ;;  %v8758_v32 = vpop.f32.mrb[82].mxu0 }
 0x612   : > { %v8760_v43 = vpop.f32.mrb[83].mxu0  ;;  %v4598_v7 = vmul.f32 %v8758_v32, %v8758_v32 }
 0x613   : > { %v4626_v54 = vadd.f32 %v4625_v14, %v4595_v22  ;;  %v4558_v35 = vadd.f32 %v4557_v27, %v8760_v43  ;;  %v4596_v60 = vmul.f32 %v8760_v43, %v8760_v43 }
 0x615   : > { %v4559_v12 = vadd.f32 %v8750_v4, %v4558_v35  ;;  %v4627_v36 = vadd.f32 %v4626_v54, %v4596_v60 }
 0x617   : > { %v4628_v16 = vadd.f32 %v4627_v36, %v4597_v57  ;;  %v8770_v13 = vpop.f32.mrb[84].mxu0  ;;  %v4560_v58 = vadd.f32 %v8758_v32, %v4559_v12 }
 0x618   : > { %v8773_v50 = vpop.f32.mrb[85].mxu0  ;;  %v4601_v31 = vmul.f32 %v8770_v13, %v8770_v13 }
 0x619   : > { %v4561_v6 = vadd.f32 %v4560_v58, %v8773_v50  ;;  %v4599_v39 = vmul.f32 %v8773_v50, %v8773_v50  ;;  %v4629_v30 = vadd.f32 %v4628_v16, %v4598_v7  ;;  %v8778_v40 = vpop.f32.mrb[86].mxu0 }
 0x61a   : > { %v8780_v62 = vpop.f32.mrb[87].mxu0  ;;  %v4602_v41 = vmul.f32 %v8778_v40, %v8778_v40 }
 0x61b   : > { %v4630_v28 = vadd.f32 %v4629_v30, %v4599_v39  ;;  %v4562_v53 = vadd.f32 %v4561_v6, %v8780_v62  ;;  %v4600_v59 = vmul.f32 %v8780_v62, %v8780_v62 }
 0x61d   : > { %v4563_v3 = vadd.f32 %v8770_v13, %v4562_v53  ;;  %v4631_v61 = vadd.f32 %v4630_v28, %v4600_v59 }
 0x61f   : > { %v4632_v51 = vadd.f32 %v4631_v61, %v4601_v31  ;;  %v8790_v56 = vpop.f32.mrb[88].mxu0  ;;  %v4564_v21 = vadd.f32 %v8778_v40, %v4563_v3 }
 0x620   : > { %v8793_v52 = vpop.f32.mrb[89].mxu0  ;;  %v4605_v29 = vmul.f32 %v8790_v56, %v8790_v56 }
 0x621   : > { %v4565_v11 = vadd.f32 %v4564_v21, %v8793_v52  ;;  %v4603_v48 = vmul.f32 %v8793_v52, %v8793_v52  ;;  %v4633_v17 = vadd.f32 %v4632_v51, %v4602_v41  ;;  %v8798_v0 = vpop.f32.mrb[90].mxu0 }
 0x622   : > { %v8800_v8 = vpop.f32.mrb[91].mxu0  ;;  %v4606_v34 = vmul.f32 %v8798_v0, %v8798_v0 }
 0x623   : > { %v4634_v55 = vadd.f32 %v4633_v17, %v4603_v48  ;;  %v4566_v44 = vadd.f32 %v4565_v11, %v8800_v8  ;;  %v4604_v1 = vmul.f32 %v8800_v8, %v8800_v8 }
 0x625   : > { %v4567_v24 = vadd.f32 %v8790_v56, %v4566_v44  ;;  %v4635_v46 = vadd.f32 %v4634_v55, %v4604_v1 }
 0x627   : > { %v4636_v23 = vadd.f32 %v4635_v46, %v4605_v29  ;;  %v8810_v27 = vpop.f32.mrb[92].mxu0  ;;  %v4568_v22 = vadd.f32 %v8798_v0, %v4567_v24 }
 0x628   : > { %v8813_v14 = vpop.f32.mrb[93].mxu0  ;;  %v4609_v58 = vmul.f32 %v8810_v27, %v8810_v27 }
 0x629   : > { %v4569_v54 = vadd.f32 %v4568_v22, %v8813_v14  ;;  %v4607_v35 = vmul.f32 %v8813_v14, %v8813_v14  ;;  %v4637_v60 = vadd.f32 %v4636_v23, %v4606_v34  ;;  %v8818_v57 = vpop.f32.mrb[94].mxu0 }
 0x62a   : > { %v8820_v12 = vpop.f32.mrb[95].mxu0  ;;  %v4610_v30 = vmul.f32 %v8818_v57, %v8818_v57 }
 0x62b   : > { %v4638_v36 = vadd.f32 %v4637_v60, %v4607_v35  ;;  %v4570_v7 = vadd.f32 %v4569_v54, %v8820_v12  ;;  %v4608_v16 = vmul.f32 %v8820_v12, %v8820_v12  ;;  %v4540_v60 = vld [vmem:[%s9058_s8] sm:$0x1] }
 0x62d   : > { %v4571_v6 = vadd.f32 %v8810_v27, %v4570_v7  ;;  %v4639_v39 = vadd.f32 %v4638_v36, %v4608_v16  ;;  %v4541_v16 = vld [vmem:[%s9059_s9] sm:$0x1] }
 0x62f   : > { %v4572_v28 = vadd.f32 %v8818_v57, %v4571_v6  ;;  %v4640_v53 = vadd.f32 %v4639_v39, %v4609_v58 }
 0x631   : > { %v4573_v59 = vrot.slane %v4572_v28, 4  ;;  %v4641_v31 = vadd.f32 %v4640_v53, %v4610_v30 }
 0x633   : > { %v4574_v3 = vadd.f32 %v4573_v59, %v4572_v28  ;;  %v4642_v61 = vrot.slane %v4641_v31, 4 }
 0x635   : > { %v4575_v41 = vrot.slane %v4574_v3, 2  ;;  %v4643_v51 = vadd.f32 %v4642_v61, %v4641_v31 }
 0x637   : > { %v4576_v21 = vadd.f32 %v4575_v41, %v4574_v3  ;;  %v4644_v11 = vrot.slane %v4643_v51, 2 }
 0x639   : > { %v4577_v48 = vrot.slane %v4576_v21, 1  ;;  %v4645_v17 = vadd.f32 %v4644_v11, %v4643_v51 }
 0x63b   : > { %v4578_v55 = vadd.f32 %v4577_v48, %v4576_v21  ;;  %v4646_v44 = vrot.slane %v4645_v17, 1 }
 0x63d   : > { %4648 = vadd.xlane.f32.xlu0 %v4578_v55  ;;  %v4647_v1 = vadd.f32 %v4646_v44, %v4645_v17 }
 0x63f   : > { %4652 = vadd.xlane.f32.xlu1 %v4647_v1 }
 0x6ca   : > { %v4649_v29 = vpop.xlane.xlu0 %4648 }
 0x6cb   : > { %v4651_v24 = vmul.f32 0.00012207031, %v4649_v29 }
 0x6cc   : > { %v4653_v46 = vpop.xlane.xlu1 %4652 }
 0x6cd   : > { %v4655_v34 = vmul.f32 %v4651_v24, %v4651_v24  ;;  %v4654_v23 = vmul.f32 0.00012207031, %v4653_v46 }
 0x6cf   : > { %v4656_v22 = vsub.f32 %v4654_v23, %v4655_v34 }
 0x6d1   : > { %v4657_v54 = vmax.f32 %v4656_v22, 0.0 }
 0x6d3   : > { %v4658_v35 = vadd.f32 1e-05, %v4657_v54 }
 0x6d5   : > { %6685 = vrsqrt.f32 %v4658_v35 }
 0x6df   : > { %v6686_v36 = vpop.eup %6685 }
 0x6e0   : > { %v4660_v7 = vmul.f32 %v6686_v36, %v4540_v60 }
 0x6e2   : > { %v4661_v58 = vmul.f32 %v4660_v7, %v4651_v24  ;;  %v4667_v6 = vrot.slane %v4660_v7, %v9378_v47 }
 0x6e4   : > { %v4662_v39 = vsub.f32 %v4541_v16, %v4661_v58  ;;  %v4669_v30 = vmul.f32 %v4667_v6, %v8673_v26  ;;  %v4670_v28 = vmul.f32 %v4667_v6, %v8677_v20  ;;  %v4671_v53 = vmul.f32 %v8671_v19, %v4667_v6 }
 0x6e5   : > { %v4672_v59 = vmul.f32 %v8675_v42, %v4667_v6  ;;  %v4673_v31 = vmul.f32 %v4667_v6, %v8693_v37  ;;  %v4674_v3 = vmul.f32 %v4667_v6, %v8700_v63  ;;  %v4675_v61 = vmul.f32 %v8690_v10, %v4667_v6 }
 0x6e6   : > { %v4676_v41 = vmul.f32 %v8698_v25, %v4667_v6  ;;  %v4677_v51 = vmul.f32 %v4667_v6, %v8713_v38  ;;  %v4678_v21 = vmul.f32 %v4667_v6, %v8720_v18  ;;  %v4679_v26 = vmul.f32 %v8710_v9, %v4667_v6 }
 0x6e7   : > { %v4680_v20 = vmul.f32 %v8718_v45, %v4667_v6  ;;  %v4681_v19 = vmul.f32 %v4667_v6, %v8733_v49  ;;  %v4682_v42 = vmul.f32 %v4667_v6, %v8740_v33  ;;  %v4683_v37 = vmul.f32 %v8730_v5, %v4667_v6 }
 0x6e8   : > { %v4684_v63 = vmul.f32 %v8738_v2, %v4667_v6  ;;  %v4685_v10 = vmul.f32 %v4667_v6, %v8753_v15  ;;  %v4686_v25 = vmul.f32 %v4667_v6, %v8760_v43  ;;  %v4687_v38 = vmul.f32 %v8750_v4, %v4667_v6 }
 0x6e9   : > { %v4688_v18 = vmul.f32 %v8758_v32, %v4667_v6  ;;  %v4689_v9 = vmul.f32 %v4667_v6, %v8773_v50  ;;  %v4690_v45 = vmul.f32 %v4667_v6, %v8780_v62  ;;  %v4691_v49 = vmul.f32 %v8770_v13, %v4667_v6 }
 0x6ea   : > { %v4692_v33 = vmul.f32 %v8778_v40, %v4667_v6  ;;  %v4693_v5 = vmul.f32 %v4667_v6, %v8793_v52  ;;  %v4694_v2 = vmul.f32 %v4667_v6, %v8800_v8  ;;  %v4695_v15 = vmul.f32 %v8790_v56, %v4667_v6 }
 0x6eb   : > { %v4696_v43 = vmul.f32 %v8798_v0, %v4667_v6  ;;  %v4705_v4 = vrot.slane %v4662_v39, %v9378_v47  ;;  %v4697_v32 = vmul.f32 %v4667_v6, %v8813_v14  ;;  %v4698_v50 = vmul.f32 %v4667_v6, %v8820_v12 }
 0x6ec   : > { %v4699_v62 = vmul.f32 %v8810_v27, %v4667_v6  ;;  %v4700_v13 = vmul.f32 %v8818_v57, %v4667_v6 }
 0x6ed   : > { %v4707_v11 = vadd.f32 %v4705_v4, %v4669_v30  ;;  %v4708_v40 = vadd.f32 %v4705_v4, %v4670_v28  ;;  %v4709_v48 = vadd.f32 %v4705_v4, %v4671_v53  ;;  %v4710_v52 = vadd.f32 %v4705_v4, %v4672_v59  ;;  %v6695_v28 = vld [vmem:[%s6817_s24] sm:$0xff]  ;;  %v6696_v59 = vld [vmem:[%s6817_s24 + $0x8] sm:$0xff] }
 0x6ee   : > { %v4711_v17 = vadd.f32 %v4705_v4, %v4673_v31  ;;  %v4712_v8 = vadd.f32 %v4705_v4, %v4674_v3  ;;  %v4713_v55 = vadd.f32 %v4705_v4, %v4675_v61  ;;  %v4714_v56 = vadd.f32 %v4705_v4, %v4676_v41  ;;  %v6697_v3 = vld [vmem:[%s6817_s24 + $0x10] sm:$0xff]  ;;  %v6698_v41 = vld [vmem:[%s6817_s24 + $0x18] sm:$0xff] }
 0x6ef   : > { %v4715_v44 = vadd.f32 %v4705_v4, %v4677_v51  ;;  %v4716_v0 = vadd.f32 %v4705_v4, %v4678_v21  ;;  %v4717_v1 = vadd.f32 %v4705_v4, %v4679_v26  ;;  %v4718_v47 = vadd.f32 %v4705_v4, %v4680_v20  ;;  %v6699_v21 = vld [vmem:[%s6817_s24 + $0x20] sm:$0xff]  ;;  %v6700_v20 = vld [vmem:[%s6817_s24 + $0x28] sm:$0xff] }
 0x6f0   : > { %v4719_v29 = vadd.f32 %v4705_v4, %v4681_v19  ;;  %v4720_v14 = vadd.f32 %v4705_v4, %v4682_v42  ;;  %v4721_v24 = vadd.f32 %v4705_v4, %v4683_v37  ;;  %v4722_v12 = vadd.f32 %v4705_v4, %v4684_v63  ;;  %v6701_v42 = vld [vmem:[%s6817_s24 + $0x30] sm:$0xff]  ;;  %v6702_v63 = vld [vmem:[%s6817_s24 + $0x38] sm:$0xff] }
 0x6f1   : > { %v4723_v46 = vadd.f32 %v4705_v4, %v4685_v10  ;;  %v4724_v27 = vadd.f32 %v4705_v4, %v4686_v25  ;;  %v4725_v57 = vadd.f32 %v4705_v4, %v4687_v38  ;;  %v4726_v34 = vadd.f32 %v4705_v4, %v4688_v18  ;;  %v6703_v25 = vld [vmem:[%s6817_s24 + $0x40] sm:$0xff]  ;;  %v6704_v18 = vld [vmem:[%s6817_s24 + $0x48] sm:$0xff] }
 0x6f2   : > { %v4727_v23 = vadd.f32 %v4705_v4, %v4689_v9  ;;  %v4728_v22 = vadd.f32 %v4705_v4, %v4690_v45  ;;  %v4729_v54 = vadd.f32 %v4705_v4, %v4691_v49  ;;  %v4730_v35 = vadd.f32 %v4705_v4, %v4692_v33  ;;  %v6705_v45 = vld [vmem:[%s6817_s24 + $0x50] sm:$0xff]  ;;  %v6706_v33 = vld [vmem:[%s6817_s24 + $0x58] sm:$0xff] }
 0x6f3   : > { %v4731_v60 = vadd.f32 %v4705_v4, %v4693_v5  ;;  %v4732_v36 = vadd.f32 %v4705_v4, %v4694_v2  ;;  %v4733_v7 = vadd.f32 %v4705_v4, %v4695_v15  ;;  %v4734_v16 = vadd.f32 %v4705_v4, %v4696_v43  ;;  %v6707_v2 = vld [vmem:[%s6817_s24 + $0x60] sm:$0xff]  ;;  %v6708_v43 = vld [vmem:[%s6817_s24 + $0x68] sm:$0xff] }
 0x6f4   : > { %v4735_v58 = vadd.f32 %v4705_v4, %v4697_v32  ;;  %v8871_v6 = vadd.f32 %v4705_v4, %v4698_v50  ;;  %v8873_v39 = vadd.f32 %v4705_v4, %v4699_v62  ;;  %v8875_v30 = vadd.f32 %v4705_v4, %v4700_v13  ;;  %v6709_v32 = vld [vmem:[%s6817_s24 + $0x70] sm:$0xff]  ;;  %v6710_v62 = vld [vmem:[%s6817_s24 + $0x78] sm:$0xff] }
 0x6f5   : > { %v8878_v53 = vadd.f32 %v6695_v28, %v4707_v11  ;;  %v8881_v31 = vadd.f32 %v6696_v59, %v4708_v40  ;;  %v8884_v61 = vadd.f32 %v6697_v3, %v4709_v48  ;;  %v8887_v51 = vadd.f32 %v6698_v41, %v4710_v52  ;;  %v6711_v11 = vld [vmem:[%s6817_s24 + $0x80] sm:$0xff]  ;;  %v6712_v48 = vld [vmem:[%s6817_s24 + $0x88] sm:$0xff] }
 0x6f6   : > { %v8890_v26 = vadd.f32 %v6699_v21, %v4711_v17  ;;  %v8893_v19 = vadd.f32 %v6700_v20, %v4712_v8  ;;  %v8896_v37 = vadd.f32 %v6701_v42, %v4713_v55  ;;  %v8899_v10 = vadd.f32 %v6702_v63, %v4714_v56  ;;  %v6713_v17 = vld [vmem:[%s6817_s24 + $0x90] sm:$0xff]  ;;  %v6714_v55 = vld [vmem:[%s6817_s24 + $0x98] sm:$0xff] }
 0x6f7   : > { %v8902_v38 = vadd.f32 %v6703_v25, %v4715_v44  ;;  %v8905_v9 = vadd.f32 %v6704_v18, %v4716_v0  ;;  %v8908_v49 = vadd.f32 %v6705_v45, %v4717_v1  ;;  %v8911_v5 = vadd.f32 %v6706_v33, %v4718_v47  ;;  %v6715_v44 = vld [vmem:[%s6817_s24 + $0xa0] sm:$0xff]  ;;  %v6716_v1 = vld [vmem:[%s6817_s24 + $0xa8] sm:$0xff] }
 0x6f8   : > { %v8914_v15 = vadd.f32 %v6707_v2, %v4719_v29  ;;  %v8917_v4 = vadd.f32 %v6708_v43, %v4720_v14  ;;  %v8920_v50 = vadd.f32 %v6709_v32, %v4721_v24  ;;  %v8923_v13 = vadd.f32 %v6710_v62, %v4722_v12  ;;  %v6717_v29 = vld [vmem:[%s6817_s24 + $0xb0] sm:$0xff]  ;;  %v6718_v24 = vld [vmem:[%s6817_s24 + $0xb8] sm:$0xff] }
 0x6f9   : > { %v8926_v40 = vadd.f32 %v6711_v11, %v4723_v46  ;;  %v8929_v52 = vadd.f32 %v6712_v48, %v4724_v27  ;;  %v8932_v8 = vadd.f32 %v6713_v17, %v4725_v57  ;;  %v8935_v56 = vadd.f32 %v6714_v55, %v4726_v34  ;;  %v6719_v46 = vld [vmem:[%s6817_s24 + $0xc0] sm:$0xff]  ;;  %v6720_v57 = vld [vmem:[%s6817_s24 + $0xc8] sm:$0xff] }
 0x6fa   : > { %v8938_v0 = vadd.f32 %v6715_v44, %v4727_v23  ;;  %v8941_v47 = vadd.f32 %v6716_v1, %v4728_v22  ;;  %v8944_v14 = vadd.f32 %v6717_v29, %v4729_v54  ;;  %v8947_v12 = vadd.f32 %v6718_v24, %v4730_v35  ;;  %v6721_v23 = vld [vmem:[%s6817_s24 + $0xd0] sm:$0xff]  ;;  %v6722_v22 = vld [vmem:[%s6817_s24 + $0xd8] sm:$0xff]  ;;  %v6723_v54 = vld [vmem:[%s6817_s24 + $0xe0] sm:$0xff] }
 0x6fb   : > { %v8950_v27 = vadd.f32 %v6719_v46, %v4731_v60  ;;  %v8953_v34 = vadd.f32 %v6720_v57, %v4732_v36  ;;  %v8956_v28 = vadd.f32 %v6721_v23, %v4733_v7  ;;  %v8959_v59 = vadd.f32 %v6722_v22, %v4734_v16  ;;  %v6724_v60 = vld [vmem:[%s6817_s24 + $0xe8] sm:$0xff]  ;;  %v6725_v36 = vld [vmem:[%s6817_s24 + $0xf0] sm:$0xff]  ;;  %v6726_v16 = vld [vmem:[%s6817_s24 + $0xf8] sm:$0xff] }
 0x6fc   : > { %v8969_v35 = vadd.f32 %v6723_v54, %v4735_v58  ;;  %v8973_v3 = vadd.f32 %v6724_v60, %v8871_v6  ;;  %v8977_v7 = vadd.f32 %v6725_v36, %v8873_v39  ;;  %v8981_v41 = vadd.f32 %v6726_v16, %v8875_v30 }
 0x6fd   : > { %v4771_v21 = vmax.f32 %v8878_v53, 0.0  ;;  %v4772_v58 = vmax.f32 %v8881_v31, 0.0  ;;  %v4773_v20 = vmax.f32 %v8884_v61, 0.0  ;;  %v4774_v6 = vmax.f32 %v8887_v51, 0.0 }
 0x6fe   : > { %v4775_v42 = vmax.f32 %v8890_v26, 0.0  ;;  %v4776_v39 = vmax.f32 %v8893_v19, 0.0  ;;  %v4777_v63 = vmax.f32 %v8896_v37, 0.0  ;;  %v4778_v30 = vmax.f32 %v8899_v10, 0.0 }
 0x6ff   : > { %v4779_v53 = vmax.f32 %v8902_v38, 0.0  ;;  %v4780_v31 = vmax.f32 %v8905_v9, 0.0  ;;  %v4781_v61 = vmax.f32 %v8908_v49, 0.0  ;;  %v4782_v51 = vmax.f32 %v8911_v5, 0.0  ;;  %4803 = vst [vmem:[%s8966_s15] sm:$0xff] %v4771_v21  ;;  %4804 = vst [vmem:[%s8966_s15 + $0x8] sm:$0xff] %v4772_v58 }
 0x700   : > { %4805 = vst [vmem:[%s8966_s15 + $0x10] sm:$0xff] %v4773_v20  ;;  %4806 = vst [vmem:[%s8966_s15 + $0x18] sm:$0xff] %v4774_v6  ;;  %v4783_v26 = vmax.f32 %v8914_v15, 0.0  ;;  %v4784_v19 = vmax.f32 %v8917_v4, 0.0  ;;  %v4785_v37 = vmax.f32 %v8920_v50, 0.0  ;;  %v4786_v10 = vmax.f32 %v8923_v13, 0.0 }
 0x701   : > { %4807 = vst [vmem:[%s8966_s15 + $0x20] sm:$0xff] %v4775_v42  ;;  %4808 = vst [vmem:[%s8966_s15 + $0x28] sm:$0xff] %v4776_v39  ;;  %v4787_v25 = vmax.f32 %v8926_v40, 0.0  ;;  %v4788_v38 = vmax.f32 %v8929_v52, 0.0  ;;  %v4789_v18 = vmax.f32 %v8932_v8, 0.0  ;;  %v4790_v9 = vmax.f32 %v8935_v56, 0.0 }
 0x702   : > { %4809 = vst [vmem:[%s8966_s15 + $0x30] sm:$0xff] %v4777_v63  ;;  %4810 = vst [vmem:[%s8966_s15 + $0x38] sm:$0xff] %v4778_v30  ;;  %v4791_v45 = vmax.f32 %v8938_v0, 0.0  ;;  %v4792_v49 = vmax.f32 %v8941_v47, 0.0  ;;  %v4793_v33 = vmax.f32 %v8944_v14, 0.0  ;;  %v4794_v5 = vmax.f32 %v8947_v12, 0.0 }
 0x703   : > { %4811 = vst [vmem:[%s8966_s15 + $0x40] sm:$0xff] %v4779_v53  ;;  %4812 = vst [vmem:[%s8966_s15 + $0x48] sm:$0xff] %v4780_v31  ;;  %v4795_v2 = vmax.f32 %v8950_v27, 0.0  ;;  %v4796_v15 = vmax.f32 %v8953_v34, 0.0  ;;  %v4797_v43 = vmax.f32 %v8956_v28, 0.0  ;;  %v4798_v4 = vmax.f32 %v8959_v59, 0.0 }
 0x704   : > { %4813 = vst [vmem:[%s8966_s15 + $0x50] sm:$0xff] %v4781_v61  ;;  %4814 = vst [vmem:[%s8966_s15 + $0x58] sm:$0xff] %v4782_v51  ;;  %v4799_v32 = vmax.f32 %v8969_v35, 0.0  ;;  %v4800_v50 = vmax.f32 %v8973_v3, 0.0  ;;  %v4801_v62 = vmax.f32 %v8977_v7, 0.0  ;;  %v4802_v13 = vmax.f32 %v8981_v41, 0.0 }
 0x705   : > { %4815 = vst [vmem:[%s8966_s15 + $0x60] sm:$0xff] %v4783_v26  ;;  %4816 = vst [vmem:[%s8966_s15 + $0x68] sm:$0xff] %v4784_v19 }
 0x706   : > { %4817 = vst [vmem:[%s8966_s15 + $0x70] sm:$0xff] %v4785_v37  ;;  %4818 = vst [vmem:[%s8966_s15 + $0x78] sm:$0xff] %v4786_v10 }
 0x707   : > { %4819 = vst [vmem:[%s8966_s15 + $0x80] sm:$0xff] %v4787_v25  ;;  %4820 = vst [vmem:[%s8966_s15 + $0x88] sm:$0xff] %v4788_v38 }
 0x708   : > { %4821 = vst [vmem:[%s8966_s15 + $0x90] sm:$0xff] %v4789_v18  ;;  %4822 = vst [vmem:[%s8966_s15 + $0x98] sm:$0xff] %v4790_v9 }
 0x709   : > { %4823 = vst [vmem:[%s8966_s15 + $0xa0] sm:$0xff] %v4791_v45  ;;  %4824 = vst [vmem:[%s8966_s15 + $0xa8] sm:$0xff] %v4792_v49 }
 0x70a   : > { %4825 = vst [vmem:[%s8966_s15 + $0xb0] sm:$0xff] %v4793_v33  ;;  %4826 = vst [vmem:[%s8966_s15 + $0xb8] sm:$0xff] %v4794_v5 }
 0x70b   : > { %4827 = vst [vmem:[%s8966_s15 + $0xc0] sm:$0xff] %v4795_v2  ;;  %4828 = vst [vmem:[%s8966_s15 + $0xc8] sm:$0xff] %v4796_v15 }
 0x70c   : > { %4829 = vst [vmem:[%s8966_s15 + $0xd0] sm:$0xff] %v4797_v43  ;;  %4830 = vst [vmem:[%s8966_s15 + $0xd8] sm:$0xff] %v4798_v4 }
 0x70d   : > { %4831 = vst [vmem:[%s8966_s15 + $0xe0] sm:$0xff] %v4799_v32  ;;  %4832 = vst [vmem:[%s8966_s15 + $0xe8] sm:$0xff] %v4800_v50 }
 0x70e   : > { %4833 = vst [vmem:[%s8966_s15 + $0xf0] sm:$0xff] %v4801_v62  ;;  %4834 = vst [vmem:[%s8966_s15 + $0xf8] sm:$0xff] %v4802_v13 }
 0x70f PF: > { %s20_s13 = sadd.s32 1, %s6733_s13  }
 0x710   : > { %p17_p4 = scmp.ge.s32.totalorder %s20_s13, 4  }
 0x712   :  { %19 = sbr.rel (!%p17_p4) target bundleno = 1 (0x1), region = 98 }

</bundles_post_ra>
